<compile_context>
chip_gen: v7x
topology: tpu7x:2x2x1
jax: 0.10.0
libtpu: 0.0.40
codegen_flags: <defaults>
</compile_context>

<pallas_src>
import math
import numpy as np

import jax
import jax.numpy as jnp
from jax.experimental import pallas as pl
from jax.experimental.pallas import tpu as pltpu

# Match f32 matmul numerics between the in-kernel MXU dots and the pure-JAX reference.
jax.config.update("jax_default_matmul_precision", "highest")

# ---------------------------------------------------------------------------
# Problem shapes (small, consistent with the PyTorch module defaults).
B, S, D_MODEL = 2, 8, 32
NUM_HEADS, D_K = 4, 8
R_Q, R_K, R_V = 6, 2, 2
N_ROWS = B * S                        # 16
HD = NUM_HEADS * D_K                  # 32  (one head-block of lanes)
QK_BLK = NUM_HEADS * HD               # 128 (q_rep / k_rep lane-block width)
SCALE = 1.0 / math.sqrt(D_K)

# Expanded-projection ("p") lane layout: (r, h, d) blocks for Q, K, V.
QOFF = 0
KOFF = R_Q * HD                       # 192
VOFF = KOFF + R_K * HD                # 256
PROJ_W = VOFF + R_V * HD              # 320 real columns
PAD_W = 384                           # lane-padded width of the expanded projections

# "rep" output layout of the R matmul: [ q_rep (128) | k_rep (128) | v (32) ].
REP_W = 2 * QK_BLK + HD               # 288

# Row layout of the packed weight slab `wr` (width PAD_W).
WA_R0 = 0                             # expanded A-weights        (32, 320)
WB_R0 = 32                            # expanded B-weights        (32, 320)
BA_R0 = 64                            # expanded A-bias (1 row)
BB_R0 = 72                            # expanded B-bias (1 row)
R_R0 = 80                             # rank-reduce/replicate R   (384, 288)
WR_ROWS = R_R0 + PAD_W                # 464

# Row layout of the packed constants slab `misc` (width 64).
SREP_R0 = 0                                   # 4 x (128, 32) score reduce+broadcast
P_R0 = SREP_R0 + NUM_HEADS * QK_BLK           # 512: 4 x (16, 64) one-hot row gathers
GW_R0 = P_R0 + NUM_HEADS * N_ROWS             # 576: 4 x (32, 32) folded out_proj
BOUT_R0 = GW_R0 + NUM_HEADS * HD              # 704: out_proj bias (1 row)
MISC_ROWS = BOUT_R0 + 8                       # 712
MISC_W = NUM_HEADS * N_ROWS                   # 64


# ---------------------------------------------------------------------------
# Kernel
def tpa_fused_kernel(x_ref, wr_ref, misc_ref, out_ref):
    """x_ref: (N_ROWS, D_MODEL) -> out_ref: (N_ROWS, D_MODEL); whole problem VMEM-resident."""
    x = x_ref[...]                                                    # (16, 32)

    # ---- expanded low-rank projections: two lane-dense MXU matmuls ----------
    # pa lanes (r,h,d) hold A[r,h] (broadcast over d), pb lanes hold B[r,d]
    # (broadcast over h), so pa*pb gives every A*B product with zero lane shuffles.
    wa = wr_ref[WA_R0:WA_R0 + D_MODEL, :]                             # (32, 384)
    wb = wr_ref[WB_R0:WB_R0 + D_MODEL, :]
    ba = wr_ref[BA_R0:BA_R0 + 1, :]                                   # (1, 384)
    bb = wr_ref[BB_R0:BB_R0 + 1, :]
    pa = jnp.dot(x, wa, preferred_element_type=jnp.float32) + ba      # (16, 384)
    pb = jnp.dot(x, wb, preferred_element_type=jnp.float32) + bb
    p = pa * pb                                                       # (16, 384)

    # ---- rank reduction + head replication as one constant MXU matmul -------
    rmat = wr_ref[R_R0:R_R0 + PAD_W, 0:REP_W]                         # (384, 288)
    rep = jnp.dot(p, rmat, preferred_element_type=jnp.float32)        # (16, 288)
    q_rep = rep[:, 0:QK_BLK]                   # lane (h,g,d): scale*Q[n,h,d]
    k_rep = rep[:, QK_BLK:2 * QK_BLK]          # lane (h,g,d): K[n,g,d]
    v_all = rep[:, 2 * QK_BLK:REP_W]           # lane (g,d):   V[n,g,d]
    sp = q_rep * k_rep                         # lane (h,g,d): scale*Q[h,d]*K[g,d]

    # ---- per-head softmax over key heads; reductions/broadcasts on the MXU --
    t_list = []
    for h in range(NUM_HEADS):
        srep_h = misc_ref[SREP_R0 + h * QK_BLK:SREP_R0 + (h + 1) * QK_BLK, 0:HD]
        # (16, 32): scores[n, h, g] broadcast across the d lanes of key-head g.
        s_rep = jnp.dot(sp, srep_h, preferred_element_type=jnp.float32)
        m_h = jnp.max(s_rep, axis=-1, keepdims=True)                  # (16, 1)
        e_rep = jnp.exp(s_rep - m_h)                                  # (16, 32)
        denom = jnp.sum(e_rep, axis=-1, keepdims=True) * (1.0 / D_K)  # (16, 1)
        # Exact divide kept: approx reciprocal flagged as a 1e-4-tolerance risk.
        t_list.append((e_rep / denom) * v_all)     # (16, 32): attn[n,h,g]*V[n,g,d]
    t_stacked = jnp.concatenate(t_list, axis=0)                       # (64, 32)

    # ---- transpose(1,2).contiguous().view(B,S,-1) + out_proj, all on the MXU --
    # out = b_out + sum_k (P_k @ T_stacked) @ GW_k, where GW_k pre-folds the
    # key-head reduction into the k-th out_proj row block.
    contrib = []
    for k in range(NUM_HEADS):
        p_k = misc_ref[P_R0 + k * N_ROWS:P_R0 + (k + 1) * N_ROWS, :]          # (16, 64)
        gw_k = misc_ref[GW_R0 + k * HD:GW_R0 + (k + 1) * HD, 0:D_MODEL]       # (32, 32)
        y_k = jnp.dot(p_k, t_stacked, preferred_element_type=jnp.float32)     # (16, 32)
        contrib.append(jnp.dot(y_k, gw_k, preferred_element_type=jnp.float32))
    b_out = misc_ref[BOUT_R0:BOUT_R0 + 1, 0:D_MODEL]                          # (1, 32)
    out_ref[...] = (contrib[0] + contrib[1]) + (contrib[2] + contrib[3]) + b_out


# ---------------------------------------------------------------------------
# One-time host-side packing (outside the jitted per-call path).
def _build_constant_matrices():
    """One-hot / replication constants, built once with numpy on the host."""
    # R: p lanes (r,h,d)/(r,g,d) -> [q_rep | k_rep | v]; rank-sum + head-replicate,
    # with the 1/sqrt(d_k) score scale folded into the Q block.
    r_mat = np.zeros((PAD_W, REP_W), np.float32)
    for r in range(R_Q):
        for h in range(NUM_HEADS):
            for d in range(D_K):
                for g in range(NUM_HEADS):
                    r_mat[QOFF + r * HD + h * D_K + d, h * HD + g * D_K + d] = SCALE
    for r in range(R_K):
        for g in range(NUM_HEADS):
            for d in range(D_K):
                for h in range(NUM_HEADS):
                    r_mat[KOFF + r * HD + g * D_K + d, QK_BLK + h * HD + g * D_K + d] = 1.0
    for r in range(R_V):
        for g in range(NUM_HEADS):
            for d in range(D_K):
                r_mat[VOFF + r * HD + g * D_K + d, 2 * QK_BLK + g * D_K + d] = 1.0

    # SREP_h: sp lanes (h',g,d') -> lanes (g,d): sum over d' for head h', broadcast over d.
    srep = np.zeros((NUM_HEADS, QK_BLK, HD), np.float32)
    for h in range(NUM_HEADS):
        for g in range(NUM_HEADS):
            for d1 in range(D_K):
                for d2 in range(D_K):
                    srep[h, h * HD + g * D_K + d1, g * D_K + d2] = 1.0

    # P_k: one-hot row gather realizing transpose(1,2).contiguous().view(B,S,-1):
    # output row (b, s_out), block k pulls stacked row h*N + b*S + s_in with
    # h*S + s_in == s_out*H + k.
    p_gather = np.zeros((NUM_HEADS, N_ROWS, NUM_HEADS * N_ROWS), np.float32)
    for k in range(NUM_HEADS):
        for b in range(B):
            for s_out in range(S):
                h, s_in = divmod(s_out * NUM_HEADS + k, S)
                p_gather[k, b * S + s_out, h * N_ROWS + b * S + s_in] = 1.0
    return r_mat, srep, p_gather


def _expand_a(w, r):
    """Khatri-Rao expand 'A' columns (r, h) -> (r, h, d) by replicating over d."""
    shp = w.shape[:-1]
    w = w.reshape(shp + (r, NUM_HEADS, 1))
    w = jnp.broadcast_to(w, shp + (r, NUM_HEADS, D_K))
    return w.reshape(shp + (r * HD,))


def _expand_b(w, r):
    """Khatri-Rao expand 'B' columns (r, d) -> (r, h, d) by replicating over h."""
    shp = w.shape[:-1]
    w = w.reshape(shp + (r, 1, D_K))
    w = jnp.broadcast_to(w, shp + (r, NUM_HEADS, D_K))
    return w.reshape(shp + (r * HD,))


def pack_params(params):
    """Pack all module parameters + constants into two VMEM slabs. Call once at init."""
    (waq, wbq, wak, wbk, wav, wbv, wout,
     baq, bbq, bak, bbk, bav, bbv, bout) = params
    r_mat, srep, p_gather = _build_constant_matrices()

    wa_exp = jnp.concatenate(
        [_expand_a(waq, R_Q), _expand_a(wak, R_K), _expand_a(wav, R_V)], axis=-1)
    wb_exp = jnp.concatenate(
        [_expand_b(wbq, R_Q), _expand_b(wbk, R_K), _expand_b(wbv, R_V)], axis=-1)
    ba_exp = jnp.concatenate(
        [_expand_a(baq, R_Q), _expand_a(bak, R_K), _expand_a(bav, R_V)], axis=-1)
    bb_exp = jnp.concatenate(
        [_expand_b(bbq, R_Q), _expand_b(bbk, R_K), _expand_b(bbv, R_V)], axis=-1)

    wr = jnp.zeros((WR_ROWS, PAD_W), jnp.float32)
    wr = wr.at[WA_R0:WA_R0 + D_MODEL, :PROJ_W].set(wa_exp)
    wr = wr.at[WB_R0:WB_R0 + D_MODEL, :PROJ_W].set(wb_exp)
    wr = wr.at[BA_R0, :PROJ_W].set(ba_exp)
    wr = wr.at[BB_R0, :PROJ_W].set(bb_exp)
    wr = wr.at[R_R0:R_R0 + PAD_W, :REP_W].set(jnp.asarray(r_mat))

    # GW_k[g*D_K+d, :] = W_out[k*D_K+d, :]  (key-head reduction folded into out_proj).
    gw = jnp.tile(wout.reshape(NUM_HEADS, 1, D_K, D_MODEL), (1, NUM_HEADS, 1, 1))
    gw = gw.reshape(NUM_HEADS * HD, D_MODEL)                           # (128, 32)

    misc = jnp.zeros((MISC_ROWS, MISC_W), jnp.float32)
    misc = misc.at[SREP_R0:SREP_R0 + NUM_HEADS * QK_BLK, :HD].set(
        jnp.asarray(srep).reshape(-1, HD))
    misc = misc.at[P_R0:P_R0 + NUM_HEADS * N_ROWS, :].set(
        jnp.asarray(p_gather).reshape(-1, NUM_HEADS * N_ROWS))
    misc = misc.at[GW_R0:GW_R0 + NUM_HEADS * HD, :D_MODEL].set(gw)
    misc = misc.at[BOUT_R0, :D_MODEL].set(bout)
    return wr, misc


@jax.jit
def tensor_product_attention(x, wr, misc):
    """Fused forward. `wr` / `misc` are the pre-packed slabs from pack_params()."""
    B_, S_, D_ = x.shape
    assert (B_, S_, D_) == (B, S, D_MODEL)
    x2d = x.reshape(B_ * S_, D_)
    out2d = pl.pallas_call(
        tpa_fused_kernel,
        out_shape=jax.ShapeDtypeStruct((B_ * S_, D_), jnp.float32),
        in_specs=[pl.BlockSpec(memory_space=pltpu.MemorySpace.VMEM)] * 3,
        out_specs=pl.BlockSpec(memory_space=pltpu.MemorySpace.VMEM),
    )(x2d, wr, misc)
    return out2d.reshape(B_, S_, D_)


# ---------------------------------------------------------------------------
# Pure-JAX reference (replica of the PyTorch forward with rope_pos=None).
def reference(x, params):
    (waq, wbq, wak, wbk, wav, wbv, wout,
     baq, bbq, bak, bbk, bav, bbv, bout) = params
    B_, S_, _ = x.shape
    A_Q = (x @ waq + baq).reshape(B_, S_, R_Q, NUM_HEADS)
    B_Q = (x @ wbq + bbq).reshape(B_, S_, R_Q, D_K)
    A_K = (x @ wak + bak).reshape(B_, S_, R_K, NUM_HEADS)
    B_K = (x @ wbk + bbk).reshape(B_, S_, R_K, D_K)
    A_V = (x @ wav + bav).reshape(B_, S_, R_V, NUM_HEADS)
    B_V = (x @ wbv + bbv).reshape(B_, S_, R_V, D_K)
    Q = jnp.einsum('bsrh,bsrd->bshd', A_Q, B_Q)
    K = jnp.einsum('bsrh,bsrd->bshd', A_K, B_K)
    V = jnp.einsum('bsrh,bsrd->bshd', A_V, B_V)
    scores = jnp.einsum('bshd,bsgd->bshg', Q, K) / jnp.sqrt(jnp.float32(D_K))
    attn = jax.nn.softmax(scores, axis=-1)
    ctx = jnp.einsum('bshg,bsgd->bshd', attn, V)
    ctx = jnp.transpose(ctx, (0, 2, 1, 3)).reshape(B_, S_, NUM_HEADS * D_K)
    return ctx @ wout + bout


def init_params(key):
    ks = jax.random.split(key, 14)
    scale = 0.1
    waq = scale * jax.random.normal(ks[0], (D_MODEL, NUM_HEADS * R_Q), jnp.float32)
    wbq = scale * jax.random.normal(ks[1], (D_MODEL, D_K * R_Q), jnp.float32)
    wak = scale * jax.random.normal(ks[2], (D_MODEL, NUM_HEADS * R_K), jnp.float32)
    wbk = scale * jax.random.normal(ks[3], (D_MODEL, D_K * R_K), jnp.float32)
    wav = scale * jax.random.normal(ks[4], (D_MODEL, NUM_HEADS * R_V), jnp.float32)
    wbv = scale * jax.random.normal(ks[5], (D_MODEL, D_K * R_V), jnp.float32)
    wout = scale * jax.random.normal(ks[6], (NUM_HEADS * D_K, D_MODEL), jnp.float32)
    baq = scale * jax.random.normal(ks[7], (NUM_HEADS * R_Q,), jnp.float32)
    bbq = scale * jax.random.normal(ks[8], (D_K * R_Q,), jnp.float32)
    bak = scale * jax.random.normal(ks[9], (NUM_HEADS * R_K,), jnp.float32)
    bbk = scale * jax.random.normal(ks[10], (D_K * R_K,), jnp.float32)
    bav = scale * jax.random.normal(ks[11], (NUM_HEADS * R_V,), jnp.float32)
    bbv = scale * jax.random.normal(ks[12], (D_K * R_V,), jnp.float32)
    bout = scale * jax.random.normal(ks[13], (D_MODEL,), jnp.float32)
    return (waq, wbq, wak, wbk, wav, wbv, wout,
            baq, bbq, bak, bbk, bav, bbv, bout)


if __name__ == "__main__":
    key = jax.random.PRNGKey(0)
    k_x, k_p = jax.random.split(key)
    x = jax.random.normal(k_x, (B, S, D_MODEL), jnp.float32)
    params = init_params(k_p)

    # Packing is hoisted: runs once here, never inside the jitted per-call path.
    wr, misc = pack_params(params)

    out = tensor_product_attention(x, wr, misc)
    out = jax.block_until_ready(out)

    ref = reference(x, params)
    assert out.shape == (B, S, D_MODEL)
    err = float(jnp.max(jnp.abs(out - ref)))
    assert jnp.allclose(out, ref, rtol=1e-4, atol=2e-4), f"max abs err = {err}"
    print("KERNEL_OK")
</pallas_src>

<mosaic_0001>
module attributes {stable_mosaic.version = 11 : i64} {
  func.func @tpa_fused_kernel(%arg0: memref<16x32xf32, #tpu.memory_space<vmem>>, %arg1: memref<464x384xf32, #tpu.memory_space<vmem>>, %arg2: memref<712x64xf32, #tpu.memory_space<vmem>>, %arg3: memref<16x32xf32, #tpu.memory_space<vmem>>) attributes {dimension_semantics = [], scalar_prefetch = 0 : i64, scratch_operands = 0 : i64, tpu.core_type = #tpu.core_type<tc>} {
    %c0 = arith.constant 0 : index
    %c0_0 = arith.constant 0 : index
    %0 = vector.load %arg0[%c0, %c0_0] : memref<16x32xf32, #tpu.memory_space<vmem>>, vector<16x32xf32>
    %c0_1 = arith.constant 0 : index
    %c0_2 = arith.constant 0 : index
    %1 = vector.load %arg1[%c0_1, %c0_2] : memref<464x384xf32, #tpu.memory_space<vmem>>, vector<32x384xf32>
    %c32 = arith.constant 32 : index
    %c0_3 = arith.constant 0 : index
    %2 = vector.load %arg1[%c32, %c0_3] : memref<464x384xf32, #tpu.memory_space<vmem>>, vector<32x384xf32>
    %c64 = arith.constant 64 : index
    %c0_4 = arith.constant 0 : index
    %3 = vector.load %arg1[%c64, %c0_4] : memref<464x384xf32, #tpu.memory_space<vmem>>, vector<1x384xf32>
    %c72 = arith.constant 72 : index
    %c0_5 = arith.constant 0 : index
    %4 = vector.load %arg1[%c72, %c0_5] : memref<464x384xf32, #tpu.memory_space<vmem>>, vector<1x384xf32>
    %cst = arith.constant dense<0.000000e+00> : vector<16x384xf32>
    %5 = tpu.matmul %0, %1, %cst {dimension_numbers = #tpu.dot_dimension_numbers<[1], [0], [0], [1], [0, 0, 1, 1], [], []>, precision = #tpu.contract_precision<fp32>} : vector<16x32xf32>, vector<32x384xf32>, vector<16x384xf32> -> vector<16x384xf32>
    %6 = vector.broadcast %3 : vector<1x384xf32> to vector<16x384xf32>
    %7 = arith.addf %5, %6 : vector<16x384xf32>
    %cst_6 = arith.constant dense<0.000000e+00> : vector<16x384xf32>
    %8 = tpu.matmul %0, %2, %cst_6 {dimension_numbers = #tpu.dot_dimension_numbers<[1], [0], [0], [1], [0, 0, 1, 1], [], []>, precision = #tpu.contract_precision<fp32>} : vector<16x32xf32>, vector<32x384xf32>, vector<16x384xf32> -> vector<16x384xf32>
    %9 = vector.broadcast %4 : vector<1x384xf32> to vector<16x384xf32>
    %10 = arith.addf %8, %9 : vector<16x384xf32>
    %11 = arith.mulf %7, %10 : vector<16x384xf32>
    %c80 = arith.constant 80 : index
    %c0_7 = arith.constant 0 : index
    %12 = vector.load %arg1[%c80, %c0_7] : memref<464x384xf32, #tpu.memory_space<vmem>>, vector<384x288xf32>
    %cst_8 = arith.constant dense<0.000000e+00> : vector<16x288xf32>
    %13 = tpu.matmul %11, %12, %cst_8 {dimension_numbers = #tpu.dot_dimension_numbers<[1], [0], [0], [1], [0, 0, 1, 1], [], []>, precision = #tpu.contract_precision<fp32>} : vector<16x384xf32>, vector<384x288xf32>, vector<16x288xf32> -> vector<16x288xf32>
    %14 = vector.extract_strided_slice %13 {offsets = [0, 0], sizes = [16, 128], strides = [1, 1]} : vector<16x288xf32> to vector<16x128xf32>
    %15 = vector.extract_strided_slice %13 {offsets = [0, 128], sizes = [16, 128], strides = [1, 1]} : vector<16x288xf32> to vector<16x128xf32>
    %16 = vector.extract_strided_slice %13 {offsets = [0, 256], sizes = [16, 32], strides = [1, 1]} : vector<16x288xf32> to vector<16x32xf32>
    %17 = arith.mulf %14, %15 : vector<16x128xf32>
    %c0_9 = arith.constant 0 : index
    %c0_10 = arith.constant 0 : index
    %18 = vector.load %arg2[%c0_9, %c0_10] : memref<712x64xf32, #tpu.memory_space<vmem>>, vector<128x32xf32>
    %cst_11 = arith.constant dense<0.000000e+00> : vector<16x32xf32>
    %19 = tpu.matmul %17, %18, %cst_11 {dimension_numbers = #tpu.dot_dimension_numbers<[1], [0], [0], [1], [0, 0, 1, 1], [], []>, precision = #tpu.contract_precision<fp32>} : vector<16x128xf32>, vector<128x32xf32>, vector<16x32xf32> -> vector<16x32xf32>
    %cst_12 = arith.constant dense<0xFF800000> : vector<16xf32>
    %20 = vector.multi_reduction <maximumf>, %19, %cst_12 [1] : vector<16x32xf32> to vector<16xf32>
    %21 = vector.shape_cast %20 : vector<16xf32> to vector<16x1xf32>
    %22 = vector.broadcast %21 : vector<16x1xf32> to vector<16x32xf32>
    %23 = arith.subf %19, %22 : vector<16x32xf32>
    %24 = math.exp %23 : vector<16x32xf32>
    %cst_13 = arith.constant dense<0.000000e+00> : vector<16xf32>
    %25 = vector.multi_reduction <add>, %24, %cst_13 [1] : vector<16x32xf32> to vector<16xf32>
    %26 = vector.shape_cast %25 : vector<16xf32> to vector<16x1xf32>
    %cst_14 = arith.constant 1.250000e-01 : f32
    %27 = vector.broadcast %cst_14 : f32 to vector<16x1xf32>
    %28 = arith.mulf %26, %27 : vector<16x1xf32>
    %29 = vector.broadcast %28 : vector<16x1xf32> to vector<16x32xf32>
    %30 = arith.divf %24, %29 : vector<16x32xf32>
    %31 = arith.mulf %30, %16 : vector<16x32xf32>
    %c128 = arith.constant 128 : index
    %c0_15 = arith.constant 0 : index
    %32 = vector.load %arg2[%c128, %c0_15] : memref<712x64xf32, #tpu.memory_space<vmem>>, vector<128x32xf32>
    %cst_16 = arith.constant dense<0.000000e+00> : vector<16x32xf32>
    %33 = tpu.matmul %17, %32, %cst_16 {dimension_numbers = #tpu.dot_dimension_numbers<[1], [0], [0], [1], [0, 0, 1, 1], [], []>, precision = #tpu.contract_precision<fp32>} : vector<16x128xf32>, vector<128x32xf32>, vector<16x32xf32> -> vector<16x32xf32>
    %cst_17 = arith.constant dense<0xFF800000> : vector<16xf32>
    %34 = vector.multi_reduction <maximumf>, %33, %cst_17 [1] : vector<16x32xf32> to vector<16xf32>
    %35 = vector.shape_cast %34 : vector<16xf32> to vector<16x1xf32>
    %36 = vector.broadcast %35 : vector<16x1xf32> to vector<16x32xf32>
    %37 = arith.subf %33, %36 : vector<16x32xf32>
    %38 = math.exp %37 : vector<16x32xf32>
    %cst_18 = arith.constant dense<0.000000e+00> : vector<16xf32>
    %39 = vector.multi_reduction <add>, %38, %cst_18 [1] : vector<16x32xf32> to vector<16xf32>
    %40 = vector.shape_cast %39 : vector<16xf32> to vector<16x1xf32>
    %cst_19 = arith.constant 1.250000e-01 : f32
    %41 = vector.broadcast %cst_19 : f32 to vector<16x1xf32>
    %42 = arith.mulf %40, %41 : vector<16x1xf32>
    %43 = vector.broadcast %42 : vector<16x1xf32> to vector<16x32xf32>
    %44 = arith.divf %38, %43 : vector<16x32xf32>
    %45 = arith.mulf %44, %16 : vector<16x32xf32>
    %c256 = arith.constant 256 : index
    %c0_20 = arith.constant 0 : index
    %46 = vector.load %arg2[%c256, %c0_20] : memref<712x64xf32, #tpu.memory_space<vmem>>, vector<128x32xf32>
    %cst_21 = arith.constant dense<0.000000e+00> : vector<16x32xf32>
    %47 = tpu.matmul %17, %46, %cst_21 {dimension_numbers = #tpu.dot_dimension_numbers<[1], [0], [0], [1], [0, 0, 1, 1], [], []>, precision = #tpu.contract_precision<fp32>} : vector<16x128xf32>, vector<128x32xf32>, vector<16x32xf32> -> vector<16x32xf32>
    %cst_22 = arith.constant dense<0xFF800000> : vector<16xf32>
    %48 = vector.multi_reduction <maximumf>, %47, %cst_22 [1] : vector<16x32xf32> to vector<16xf32>
    %49 = vector.shape_cast %48 : vector<16xf32> to vector<16x1xf32>
    %50 = vector.broadcast %49 : vector<16x1xf32> to vector<16x32xf32>
    %51 = arith.subf %47, %50 : vector<16x32xf32>
    %52 = math.exp %51 : vector<16x32xf32>
    %cst_23 = arith.constant dense<0.000000e+00> : vector<16xf32>
    %53 = vector.multi_reduction <add>, %52, %cst_23 [1] : vector<16x32xf32> to vector<16xf32>
    %54 = vector.shape_cast %53 : vector<16xf32> to vector<16x1xf32>
    %cst_24 = arith.constant 1.250000e-01 : f32
    %55 = vector.broadcast %cst_24 : f32 to vector<16x1xf32>
    %56 = arith.mulf %54, %55 : vector<16x1xf32>
    %57 = vector.broadcast %56 : vector<16x1xf32> to vector<16x32xf32>
    %58 = arith.divf %52, %57 : vector<16x32xf32>
    %59 = arith.mulf %58, %16 : vector<16x32xf32>
    %c384 = arith.constant 384 : index
    %c0_25 = arith.constant 0 : index
    %60 = vector.load %arg2[%c384, %c0_25] : memref<712x64xf32, #tpu.memory_space<vmem>>, vector<128x32xf32>
    %cst_26 = arith.constant dense<0.000000e+00> : vector<16x32xf32>
    %61 = tpu.matmul %17, %60, %cst_26 {dimension_numbers = #tpu.dot_dimension_numbers<[1], [0], [0], [1], [0, 0, 1, 1], [], []>, precision = #tpu.contract_precision<fp32>} : vector<16x128xf32>, vector<128x32xf32>, vector<16x32xf32> -> vector<16x32xf32>
    %cst_27 = arith.constant dense<0xFF800000> : vector<16xf32>
    %62 = vector.multi_reduction <maximumf>, %61, %cst_27 [1] : vector<16x32xf32> to vector<16xf32>
    %63 = vector.shape_cast %62 : vector<16xf32> to vector<16x1xf32>
    %64 = vector.broadcast %63 : vector<16x1xf32> to vector<16x32xf32>
    %65 = arith.subf %61, %64 : vector<16x32xf32>
    %66 = math.exp %65 : vector<16x32xf32>
    %cst_28 = arith.constant dense<0.000000e+00> : vector<16xf32>
    %67 = vector.multi_reduction <add>, %66, %cst_28 [1] : vector<16x32xf32> to vector<16xf32>
    %68 = vector.shape_cast %67 : vector<16xf32> to vector<16x1xf32>
    %cst_29 = arith.constant 1.250000e-01 : f32
    %69 = vector.broadcast %cst_29 : f32 to vector<16x1xf32>
    %70 = arith.mulf %68, %69 : vector<16x1xf32>
    %71 = vector.broadcast %70 : vector<16x1xf32> to vector<16x32xf32>
    %72 = arith.divf %66, %71 : vector<16x32xf32>
    %73 = arith.mulf %72, %16 : vector<16x32xf32>
    %74 = tpu.concatenate %31, %45, %59, %73 in 0 : vector<16x32xf32>, vector<16x32xf32>, vector<16x32xf32>, vector<16x32xf32> -> vector<64x32xf32>
    %c512 = arith.constant 512 : index
    %c0_30 = arith.constant 0 : index
    %75 = vector.load %arg2[%c512, %c0_30] : memref<712x64xf32, #tpu.memory_space<vmem>>, vector<16x64xf32>
    %c576 = arith.constant 576 : index
    %c0_31 = arith.constant 0 : index
    %76 = vector.load %arg2[%c576, %c0_31] : memref<712x64xf32, #tpu.memory_space<vmem>>, vector<32x32xf32>
    %cst_32 = arith.constant dense<0.000000e+00> : vector<16x32xf32>
    %77 = tpu.matmul %75, %74, %cst_32 {dimension_numbers = #tpu.dot_dimension_numbers<[1], [0], [0], [1], [0, 0, 1, 1], [], []>, precision = #tpu.contract_precision<fp32>} : vector<16x64xf32>, vector<64x32xf32>, vector<16x32xf32> -> vector<16x32xf32>
    %cst_33 = arith.constant dense<0.000000e+00> : vector<16x32xf32>
    %78 = tpu.matmul %77, %76, %cst_33 {dimension_numbers = #tpu.dot_dimension_numbers<[1], [0], [0], [1], [0, 0, 1, 1], [], []>, precision = #tpu.contract_precision<fp32>} : vector<16x32xf32>, vector<32x32xf32>, vector<16x32xf32> -> vector<16x32xf32>
    %c528 = arith.constant 528 : index
    %c0_34 = arith.constant 0 : index
    %79 = vector.load %arg2[%c528, %c0_34] : memref<712x64xf32, #tpu.memory_space<vmem>>, vector<16x64xf32>
    %c608 = arith.constant 608 : index
    %c0_35 = arith.constant 0 : index
    %80 = vector.load %arg2[%c608, %c0_35] : memref<712x64xf32, #tpu.memory_space<vmem>>, vector<32x32xf32>
    %cst_36 = arith.constant dense<0.000000e+00> : vector<16x32xf32>
    %81 = tpu.matmul %79, %74, %cst_36 {dimension_numbers = #tpu.dot_dimension_numbers<[1], [0], [0], [1], [0, 0, 1, 1], [], []>, precision = #tpu.contract_precision<fp32>} : vector<16x64xf32>, vector<64x32xf32>, vector<16x32xf32> -> vector<16x32xf32>
    %cst_37 = arith.constant dense<0.000000e+00> : vector<16x32xf32>
    %82 = tpu.matmul %81, %80, %cst_37 {dimension_numbers = #tpu.dot_dimension_numbers<[1], [0], [0], [1], [0, 0, 1, 1], [], []>, precision = #tpu.contract_precision<fp32>} : vector<16x32xf32>, vector<32x32xf32>, vector<16x32xf32> -> vector<16x32xf32>
    %c544 = arith.constant 544 : index
    %c0_38 = arith.constant 0 : index
    %83 = vector.load %arg2[%c544, %c0_38] : memref<712x64xf32, #tpu.memory_space<vmem>>, vector<16x64xf32>
    %c640 = arith.constant 640 : index
    %c0_39 = arith.constant 0 : index
    %84 = vector.load %arg2[%c640, %c0_39] : memref<712x64xf32, #tpu.memory_space<vmem>>, vector<32x32xf32>
    %cst_40 = arith.constant dense<0.000000e+00> : vector<16x32xf32>
    %85 = tpu.matmul %83, %74, %cst_40 {dimension_numbers = #tpu.dot_dimension_numbers<[1], [0], [0], [1], [0, 0, 1, 1], [], []>, precision = #tpu.contract_precision<fp32>} : vector<16x64xf32>, vector<64x32xf32>, vector<16x32xf32> -> vector<16x32xf32>
    %cst_41 = arith.constant dense<0.000000e+00> : vector<16x32xf32>
    %86 = tpu.matmul %85, %84, %cst_41 {dimension_numbers = #tpu.dot_dimension_numbers<[1], [0], [0], [1], [0, 0, 1, 1], [], []>, precision = #tpu.contract_precision<fp32>} : vector<16x32xf32>, vector<32x32xf32>, vector<16x32xf32> -> vector<16x32xf32>
    %c560 = arith.constant 560 : index
    %c0_42 = arith.constant 0 : index
    %87 = vector.load %arg2[%c560, %c0_42] : memref<712x64xf32, #tpu.memory_space<vmem>>, vector<16x64xf32>
    %c672 = arith.constant 672 : index
    %c0_43 = arith.constant 0 : index
    %88 = vector.load %arg2[%c672, %c0_43] : memref<712x64xf32, #tpu.memory_space<vmem>>, vector<32x32xf32>
    %cst_44 = arith.constant dense<0.000000e+00> : vector<16x32xf32>
    %89 = tpu.matmul %87, %74, %cst_44 {dimension_numbers = #tpu.dot_dimension_numbers<[1], [0], [0], [1], [0, 0, 1, 1], [], []>, precision = #tpu.contract_precision<fp32>} : vector<16x64xf32>, vector<64x32xf32>, vector<16x32xf32> -> vector<16x32xf32>
    %cst_45 = arith.constant dense<0.000000e+00> : vector<16x32xf32>
    %90 = tpu.matmul %89, %88, %cst_45 {dimension_numbers = #tpu.dot_dimension_numbers<[1], [0], [0], [1], [0, 0, 1, 1], [], []>, precision = #tpu.contract_precision<fp32>} : vector<16x32xf32>, vector<32x32xf32>, vector<16x32xf32> -> vector<16x32xf32>
    %c704 = arith.constant 704 : index
    %c0_46 = arith.constant 0 : index
    %91 = vector.load %arg2[%c704, %c0_46] : memref<712x64xf32, #tpu.memory_space<vmem>>, vector<1x32xf32>
    %92 = arith.addf %78, %82 : vector<16x32xf32>
    %93 = arith.addf %86, %90 : vector<16x32xf32>
    %94 = arith.addf %92, %93 : vector<16x32xf32>
    %95 = vector.broadcast %91 : vector<1x32xf32> to vector<16x32xf32>
    %96 = arith.addf %94, %95 : vector<16x32xf32>
    %c0_47 = arith.constant 0 : index
    %c0_48 = arith.constant 0 : index
    %97 = vector.load %arg3[%c0_47, %c0_48] : memref<16x32xf32, #tpu.memory_space<vmem>>, vector<16x32xf32>
    tpu.vector_store %arg3[%c0_47, %c0_48], %96 {strides = array<i32>} : memref<16x32xf32, #tpu.memory_space<vmem>>, vector<16x32xf32>,
    return
  }
}

</mosaic_0001>

<bundles_post_ra>
// kernel: tensor_product_attention.1
= control target key start
LH: loop header
LB: loop body
LE: loop exit
PB: predicated region body
PF: predicated region fallthrough
CT: control target
= control target key end

     0   :  { %8 = vsyncpa [#allocation3], 0  ;;  %s25284_s0 = inlined_call_operand.vmem [shape: f32[16,32], index: 0, kind: input, shape index: {}]   ;;  %s25285_s1 = inlined_call_operand.hbm [shape: f32[464,384], index: 1, kind: input, shape index: {}]   ;;  %s25286_s2 = inlined_call_operand.vmem [shape: f32[712,64], index: 2, kind: input, shape index: {}]   ;;  %s25287_s3 = inlined_call_operand.hbm [shape: f32[16,32], index: 3, kind: output, shape index: {}]  }
   0x1   :  { %9 = vsyncpa [#allocation4], 0  ;;  %s19743_s12 = smov [#allocation2]   ;;  %s19695_s16 = scalar_lea.hbm %s25285_s1, 22272 }
   0x2   :  { %s17_s13 = sshll.u32 %s19743_s12, 4  ;;  %p19696_p0 = scmp.ne.s32.totalorder %s25285_s1, %s19695_s16  ;;  %s18_s13 = int_to_ptr.vmem [resolvable:$true] %s17_s13 }
   0x3   :  { %p19699_p1 = scmp.lt.u32.totalorder %s19695_s16, %s25285_s1 }
   0x5   :  { %p19701_p2 = pnand %p19699_p1, %p19696_p0 }
   0x7   :  { %19704 = shalt.err (!%p19701_p2)
}
   0x8   :  { %s19705_s21 = scalar_lea.vmem %s18_s13, 22272  ;;  %p19710_p4 = scmp.lt.s32.totalorder %s18_s13, %s18_s13 }
   0x9   :  { %p19706_p3 = scmp.ne.s32.totalorder %s18_s13, %s19705_s21  ;;  %p19711_p5 = scmp.lt.s32.totalorder %s19705_s21, %s19705_s21 }
   0xb   :  { %p19712_p6 = por %p19711_p5, %p19710_p4 }
   0xd   :  { %p19713_p7 = pnand %p19712_p6, %p19706_p3 }
   0xf   :  { %19716 = shalt.err (!%p19713_p7)
}
  0x10   :  { %s19744_s22 = smov 384   ;;  %s19745_s23 = smov 24  }
  0x11   :  { %23 = dma.hbm_to_vmem [thread:$0]  %s25285_s1, 22272, %s18_s13, [#allocation3], %s19744_s22, %s19744_s22, %s19745_s23  }
  0x12   :  { %19739 = dma.done.wait [#allocation3], 22272  }
  0x13   :  { %19740 = vsyncadd [#allocation3], 4294945024  ;;  %v25314_v0 = vmov 0.0   ;;  %v32_v1 = vld [vmem:[#allocation2 + $0x8] sm:$0xff]  ;;  %v35_v2 = vld [vmem:[#allocation2 + $0x20] sm:$0xff]  ;;  %vm75_vm0 = vcmask 261120  }
  0x14   :  { %154 = vmatprep.mubr.f32.mxu0 %v25314_v0  ;;  %v31_v3 = vld [vmem:[#allocation2] sm:$0xff]  ;;  %v82_v4 = vand.u32 4294901760, %v32_v1  ;;  %v86_v5 = vand.u32 4294901760, %v35_v2  ;;  %v34_v6 = vld [vmem:[#allocation2 + $0x18] sm:$0xff]  ;;  %v41_v9 = vld [vmem:[#allocation2 + $0x50] sm:$0xff]  ;;  %vm9252_vm1 = vcmask 523264  }
  0x15   :  { %v84_v7 = vand.u32 4294901760, %v31_v3  ;;  %v38_v8 = vld [vmem:[#allocation2 + $0x38] sm:$0xff]  ;;  %v88_v10 = vand.u32 4294901760, %v34_v6  ;;  %v94_v12 = vand.u32 4294901760, %v41_v9  ;;  %v37_v13 = vld [vmem:[#allocation2 + $0x30] sm:$0xff]  ;;  %v40_v14 = vld [vmem:[#allocation2 + $0x48] sm:$0xff] }
  0x16   :  { %v90_v11 = vand.u32 4294901760, %v38_v8  ;;  %v29_v15 = vld [vmem:[%s25284_s0] sm:$0xff]  ;;  %v19786_v16 = vpack.c.bf16 %v86_v5, %v82_v4  ;;  %v19788_v17 = vsub.f32 %v32_v1, %v82_v4  ;;  %v19790_v18 = vsub.f32 %v35_v2, %v86_v5  ;;  %v30_v32 = vld [vmem:[%s25284_s0 + $0x8] sm:$0xff]  ;;  %v33_v1 = vld [vmem:[#allocation2 + $0x10] sm:$0xff]  ;;  %s19747_s5 = smov [#allocation5]  }
  0x17   :  { %v19792_v19 = vsub.f32 %v31_v3, %v84_v7  ;;  %v19794_v20 = vpack.c.bf16 %v88_v10, %v84_v7  ;;  %v19796_v21 = vsub.f32 %v34_v6, %v88_v10  ;;  %v19803_v24 = vsub.f32 %v41_v9, %v94_v12  ;;  %v36_v2 = vld [vmem:[#allocation2 + $0x28] sm:$0xff]  ;;  %v39_v5 = vld [vmem:[#allocation2 + $0x40] sm:$0xff]  ;;  %v42_v6 = vld [vmem:[#allocation2 + $0x58] sm:$0xff]  ;;  %s13767_s6 = sshll.u32 %s19747_s5, 4  ;;  %s13768_s6 = int_to_ptr.vmem [resolvable:$true] %s13767_s6 }
  0x18   :  { %v19798_v22 = vpack.c.bf16 %v94_v12, %v90_v11  ;;  %v19800_v23 = vsub.f32 %v38_v8, %v90_v11  ;;  %16907 = vmatprep.subr.bf16.mxu0 %v19786_v16  ;;  %v92_v25 = vand.u32 4294901760, %v37_v13  ;;  %v96_v26 = vand.u32 4294901760, %v40_v14  ;;  %s19717_s7 = scalar_lea.vmem %s13768_s6, 256  ;;  %p19722_p9 = scmp.lt.s32.totalorder %s13768_s6, %s13768_s6 }
  0x19   :  { %v77_v27 = vsel %vm75_vm0, %v29_v15, 0  ;;  %16909 = vmatpush1.bf16.msra.mxu0 %v19794_v20  ;;  %v179_v29 = vand.u32 4294901760, %v19788_v17  ;;  %v191_v30 = vand.u32 4294901760, %v19790_v18  ;;  %v185_v31 = vand.u32 4294901760, %v19792_v19  ;;  %p19718_p8 = scmp.ne.s32.totalorder %s13768_s6, %s19717_s7  ;;  %p19723_p10 = scmp.lt.s32.totalorder %s19717_s7, %s19717_s7 }
  0x1a   :  { %v19807_v28 = vand.u32 4294901760, %v77_v27  ;;  %16911 = vmatprep.subr.bf16.mxu0 %v19798_v22  ;;  %v19816_v33 = vpack.c.bf16 %v96_v26, %v92_v25  ;;  %v19818_v34 = vsub.f32 %v37_v13, %v92_v25  ;;  %v19820_v35 = vsub.f32 %v40_v14, %v96_v26 }
  0x1b   :  { %v197_v36 = vand.u32 4294901760, %v19796_v21  ;;  %v180_v38 = vsub.f32 %v19788_v17, %v179_v29  ;;  %v192_v39 = vsub.f32 %v19790_v18, %v191_v30  ;;  %v186_v40 = vsub.f32 %v19792_v19, %v185_v31  ;;  %p19724_p11 = por %p19723_p10, %p19722_p9 }
  0x1c   :  { %v19824_v37 = vsub.f32 %v77_v27, %v19807_v28  ;;  %v80_v42 = vsel %vm75_vm0, %v30_v32, 0  ;;  %v203_v43 = vand.u32 4294901760, %v19800_v23  ;;  %v215_v44 = vand.u32 4294901760, %v19803_v24 }
  0x1d   :  { %v198_v41 = vsub.f32 %v19796_v21, %v197_v36  ;;  %16913 = vmatpush1.bf16.msra.mxu0 %v19816_v33  ;;  %v181_v46 = vand.u32 4294901760, %v180_v38  ;;  %v193_v47 = vand.u32 4294901760, %v192_v39  ;;  %v187_v48 = vand.u32 4294901760, %v186_v40  ;;  %p19725_p12 = pnand %p19724_p11, %p19718_p8 }
  0x1e   :  { %v19843_v45 = vand.u32 4294901760, %v19824_v37  ;;  %v19845_v50 = vand.u32 4294901760, %v80_v42  ;;  %v204_v51 = vsub.f32 %v19800_v23, %v203_v43  ;;  %v216_v52 = vsub.f32 %v19803_v24, %v215_v44 }
  0x1f   :  { %v199_v49 = vand.u32 4294901760, %v198_v41  ;;  %v16914_v54 = vpack.c.bf16 %v193_v47, %v181_v46  ;;  %v209_v55 = vand.u32 4294901760, %v19818_v34  ;;  %v221_v56 = vand.u32 4294901760, %v19820_v35 }
  0x20   :  { %v158_v53 = vsub.f32 %v19824_v37, %v19843_v45  ;;  %v19858_v58 = vsub.f32 %v80_v42, %v19845_v50  ;;  %v205_v59 = vand.u32 4294901760, %v204_v51  ;;  %v217_v60 = vand.u32 4294901760, %v216_v52 }
  0x21   :  { %v16916_v57 = vpack.c.bf16 %v199_v49, %v187_v48  ;;  %16915 = vmatprep.subr.bf16.mxu0 %v16914_v54  ;;  %v210_v62 = vsub.f32 %v19818_v34, %v209_v55  ;;  %v222_v63 = vsub.f32 %v19820_v35, %v221_v56  ;;  %v675_v10 = vand.u32 4294901760, %v33_v1 }
  0x22   :  { %v19860_v61 = vand.u32 4294901760, %v158_v53  ;;  %v19869_v3 = vand.u32 4294901760, %v19858_v58  ;;  %v16918_v4 = vpack.c.bf16 %v217_v60, %v205_v59  ;;  %v678_v11 = vand.u32 4294901760, %v36_v2 }
  0x23   :  { %v211_v7 = vand.u32 4294901760, %v210_v62  ;;  %v223_v8 = vand.u32 4294901760, %v222_v63  ;;  %v681_v13 = vand.u32 4294901760, %v39_v5  ;;  %v684_v14 = vand.u32 4294901760, %v42_v6 }
  0x24   :  { %160 = vmatmul.mubr.f32.vlgmr.msra.gmra.mrb[0].mxu0 %v19860_v61  ;;  %15012 = vmatprep.mubr.f32.mxu1 %v19860_v61  ;;  %v169_v9 = vsub.f32 %v19858_v58, %v19869_v3  ;;  %v16922_v25 = vpack.c.bf16 %v19790_v18, %v19788_v17  ;;  %v19880_v26 = vpack.c.bf16 %v678_v11, %v675_v10 }
  0x25   :  { %16917 = vmatpush1.bf16.msra.mxu0 %v16916_v57  ;;  %165 = vmatprep.mubr.f32.mxu0 %v25314_v0  ;;  %v16920_v12 = vpack.c.bf16 %v223_v8, %v211_v7  ;;  %v19882_v27 = vsub.f32 %v33_v1, %v675_v10  ;;  %v19884_v32 = vpack.c.bf16 %v684_v14, %v681_v13  ;;  %v19938_v7 = vld [vmem:[#allocation2 + $0x80] sm:$0xff] }
  0x26   :  { %16919 = vmatprep.subr.bf16.mxu0 %v16918_v4  ;;  %v19876_v15 = vand.u32 4294901760, %v169_v9  ;;  %v19886_v38 = vsub.f32 %v36_v2, %v678_v11  ;;  %v19888_v39 = vsub.f32 %v39_v5, %v681_v13  ;;  %v19890_v40 = vsub.f32 %v42_v6, %v684_v14  ;;  %16955 = vmatprep.subr.bf16.mxu1 %v19880_v26  ;;  %v19929_v4 = vld [vmem:[#allocation2 + $0x68] sm:$0xff]  ;;  %v46_v9 = vld [vmem:[#allocation2 + $0x78] sm:$0xff] }
  0x27   :  { %v766_v41 = vand.u32 4294901760, %v19882_v27  ;;  %v16924_v42 = vpack.c.bf16 %v19796_v21, %v19792_v19  ;;  %v16926_v49 = vpack.c.bf16 %v19803_v24, %v19800_v23  ;;  %16957 = vmatpush3.bf16.msra.mxu1 %v19880_v26  ;;  %v16928_v59 = vpack.c.bf16 %v19820_v35, %v19818_v34  ;;  %v19956_v11 = vld [vmem:[#allocation2 + $0x98] sm:$0xff]  ;;  %v19958_v19 = vld [vmem:[#allocation2 + $0xb0] sm:$0xff]  ;;  %v52_v35 = vld [vmem:[#allocation2 + $0xa8] sm:$0xff] }
  0x28   :  { %171 = vmatmul.mubr.f32.gmra.mrb[2].mxu0 %v19876_v15  ;;  %v773_v46 = vand.u32 4294901760, %v19886_v38  ;;  %v780_v47 = vand.u32 4294901760, %v19888_v39  ;;  %v787_v48 = vand.u32 4294901760, %v19890_v40  ;;  %16959 = vmatprep.subr.bf16.mxu1 %v19884_v32  ;;  %v16938_v5 = vpack.c.bf16 %v191_v30, %v179_v29  ;;  %v43_v29 = vld [vmem:[#allocation2 + $0x60] sm:$0xff]  ;;  %v19975_v34 = vld [vmem:[#allocation2 + $0x90] sm:$0xff] }
  0x29   :  { %16921 = vmatpush1.bf16.msra.mxu0 %v16920_v12  ;;  %281 = vmatprep.mubr.f32.mxu0 %v25314_v0  ;;  %v767_v51 = vsub.f32 %v19882_v27, %v766_v41  ;;  %v16970_v6 = vpack.c.bf16 %v19886_v38, %v19882_v27  ;;  %v1218_v8 = vand.u32 4294901760, %v19929_v4  ;;  %v16940_v17 = vpack.c.bf16 %v197_v36, %v185_v31 }
  0x2a   :  { %16923 = vmatprep.subr.bf16.mxu0 %v16922_v25  ;;  %v774_v52 = vsub.f32 %v19886_v38, %v773_v46  ;;  %v781_v53 = vsub.f32 %v19888_v39, %v780_v47  ;;  %v788_v54 = vsub.f32 %v19890_v40, %v787_v48  ;;  %v1222_v18 = vand.u32 4294901760, %v19938_v7 }
  0x2b   :  { %v768_v57 = vand.u32 4294901760, %v767_v51  ;;  %16961 = vmatpush3.bf16.msra.mxu1 %v19884_v32  ;;  %v16942_v30 = vpack.c.bf16 %v215_v44, %v203_v43  ;;  %v16974_v10 = vpack.c.bf16 %v19890_v40, %v19888_v39  ;;  %v16944_v21 = vpack.c.bf16 %v221_v56, %v209_v55 }
  0x2c   :  { %283 = vmatmul.mubr.f32.vlgmr.msra.gmra.mrb[0].mxu0 %v19807_v28  ;;  %v775_v60 = vand.u32 4294901760, %v774_v52  ;;  %v782_v62 = vand.u32 4294901760, %v781_v53  ;;  %v789_v63 = vand.u32 4294901760, %v788_v54  ;;  %v19967_v23 = vsub.f32 %v19929_v4, %v1218_v8 }
  0x2d   :  { %16925 = vmatpush1.bf16.msra.mxu0 %v16924_v42  ;;  %288 = vmatprep.mubr.f32.mxu0 %v25314_v0  ;;  %v1220_v24 = vand.u32 4294901760, %v43_v29  ;;  %v19971_v31 = vsub.f32 %v19938_v7, %v1222_v18  ;;  %v1224_v36 = vand.u32 4294901760, %v46_v9  ;;  %v1226_v43 = vand.u32 4294901760, %v19956_v11 }
  0x2e   :  { %16927 = vmatprep.subr.bf16.mxu0 %v16926_v49  ;;  %v16962_v1 = vpack.c.bf16 %v775_v60, %v768_v57  ;;  %v16966_v2 = vpack.c.bf16 %v789_v63, %v782_v62  ;;  %15013 = vmatmul.mubr.f32.vlgmr.msra.gmra.mrb[0].mxu1 %v19876_v15  ;;  %v1230_v44 = vand.u32 4294901760, %v19958_v19  ;;  %v1228_v56 = vand.u32 4294901760, %v19975_v34 }
  0x2f   :  { %15023 = vmatprep.mubr.f32.mxu1 %v19807_v28  ;;  %v19979_v55 = vsub.f32 %v43_v29, %v1220_v24  ;;  %v1232_v12 = vand.u32 4294901760, %v52_v35  ;;  %v1315_v13 = vand.u32 4294901760, %v19967_v23  ;;  %v19984_v14 = vsub.f32 %v46_v9, %v1224_v36  ;;  %v54_v29 = vld [vmem:[#allocation2 + $0xb8] sm:$0xff] }
  0x30   :  { %290 = vmatmul.mubr.f32.gmra.mrb[2].mxu0 %v19845_v50  ;;  %16963 = vmatprep.subr.bf16.mxu1 %v16962_v1  ;;  %v19987_v25 = vsub.f32 %v19956_v11, %v1226_v43  ;;  %v19990_v42 = vsub.f32 %v19958_v19, %v1230_v44  ;;  %v1327_v49 = vand.u32 4294901760, %v19971_v31  ;;  %v19998_v51 = vsub.f32 %v19975_v34, %v1228_v56 }
  0x31   :  { %16929 = vmatpush1.bf16.msra.mxu0 %v16928_v59  ;;  %376 = vmatprep.mubr.f32.mxu0 %v25314_v0  ;;  %v20000_v52 = vsub.f32 %v52_v35, %v1232_v12  ;;  %v1316_v53 = vsub.f32 %v19967_v23, %v1315_v13  ;;  %v1321_v54 = vand.u32 4294901760, %v19979_v55  ;;  %v1333_v57 = vand.u32 4294901760, %v19984_v14 }
  0x32   :  { %16931 = vmatprep.subr.bf16.mxu0 %v19786_v16  ;;  %16965 = vmatpush3.bf16.msra.mxu1 %v16962_v1  ;;  %v1339_v59 = vand.u32 4294901760, %v19987_v25  ;;  %v1351_v60 = vand.u32 4294901760, %v19990_v42  ;;  %v20016_v62 = vpack.c.bf16 %v1222_v18, %v1218_v8  ;;  %v20023_v63 = vpack.c.bf16 %v1224_v36, %v1220_v24  ;;  %v20026_v1 = vld [vmem:[#allocation2 + $0x70] sm:$0xff]  ;;  %v51_v18 = vld [vmem:[#allocation2 + $0xa0] sm:$0xff] }
  0x33   :  { %16967 = vmatprep.subr.bf16.mxu1 %v16966_v2  ;;  %v1322_v4 = vsub.f32 %v19979_v55, %v1321_v54  ;;  %v1345_v27 = vand.u32 4294901760, %v19998_v51  ;;  %v1357_v38 = vand.u32 4294901760, %v20000_v52  ;;  %v20049_v7 = vpack.c.bf16 %v1230_v44, %v1226_v43 }
  0x34   :  { %379 = vmatmul.mubr.f32.vlgmr.msra.gmra.mrb[0].mxu0 %v19824_v37  ;;  %v1811_v8 = vand.u32 4294901760, %v20026_v1  ;;  %v1817_v19 = vand.u32 4294901760, %v51_v18 }
  0x35   :  { %16933 = vmatpush1.bf16.msra.mxu0 %v19794_v20  ;;  %384 = vmatprep.mubr.f32.mxu0 %v25314_v0  ;;  %v1323_v9 = vand.u32 4294901760, %v1322_v4  ;;  %v1346_v39 = vsub.f32 %v19998_v51, %v1345_v27  ;;  %v1358_v40 = vsub.f32 %v20000_v52, %v1357_v38 }
  0x36   :  { %16935 = vmatprep.subr.bf16.mxu0 %v19798_v22  ;;  %16969 = vmatpush3.bf16.msra.mxu1 %v16966_v2  ;;  %v20028_v2 = vld [vmem:[#allocation2 + $0x88] sm:$0xff]  ;;  %v20071_v24 = vsub.f32 %v20026_v1, %v1811_v8  ;;  %v17018_v1 = vpack.c.bf16 %v19971_v31, %v19967_v23  ;;  %v20175_v23 = vld [vmem:[#allocation2 + $0x138] sm:$0xff] }
  0x37   :  { %16971 = vmatprep.subr.bf16.mxu1 %v16970_v6  ;;  %v1347_v34 = vand.u32 4294901760, %v1346_v39  ;;  %v1359_v35 = vand.u32 4294901760, %v1358_v40  ;;  %v20128_v40 = vld [vmem:[#allocation2 + $0xf8] sm:$0xff] }
  0x38   :  { %387 = vmatmul.mubr.f32.gmra.mrb[2].mxu0 %v19858_v58 }
  0x39   :  { %16937 = vmatpush1.bf16.msra.mxu0 %v19816_v33  ;;  %465 = vmatprep.mubr.f32.mxu0 %v25314_v0 }
  0x3a   :  { %16939 = vmatprep.subr.bf16.mxu0 %v16938_v5  ;;  %15024 = vmatmul.mubr.f32.vlgmr.msra.gmra.mrb[0].mxu1 %v19845_v50  ;;  %v1340_v5 = vsub.f32 %v19987_v25, %v1339_v59 }
  0x3b   :  { %16973 = vmatpush3.bf16.msra.mxu1 %v16970_v6  ;;  %15034 = vmatprep.mubr.f32.mxu1 %v19824_v37  ;;  %v1352_v6 = vsub.f32 %v19990_v42, %v1351_v60 }
  0x3c   :  { %469 = vmatmul.mubr.f32.vlgmr.msra.gmra.mrb[0].mxu0 %v19843_v45  ;;  %16975 = vmatprep.subr.bf16.mxu1 %v16974_v10 }
  0x3d   :  { %16941 = vmatpush1.bf16.msra.mxu0 %v16940_v17  ;;  %474 = vmatprep.mubr.f32.mxu0 %v25314_v0  ;;  %v1814_v17 = vand.u32 4294901760, %v20028_v2  ;;  %v1353_v11 = vand.u32 4294901760, %v1352_v6 }
  0x3e   :  { %16943 = vmatprep.subr.bf16.mxu0 %v16942_v30  ;;  %v20059_v30 = vpack.c.bf16 %v1232_v12, %v1228_v56  ;;  %v1902_v56 = vand.u32 4294901760, %v20071_v24 }
  0x3f   :  { %16977 = vmatpush3.bf16.msra.mxu1 %v16974_v10  ;;  %v1341_v10 = vand.u32 4294901760, %v1340_v5  ;;  %v20074_v36 = vsub.f32 %v20028_v2, %v1814_v17  ;;  %v20093_v2 = vpack.c.bf16 %v1814_v17, %v1811_v8  ;;  %v17022_v5 = vpack.c.bf16 %v19990_v42, %v19987_v25 }
  0x40   :  { %478 = vmatmul.mubr.f32.gmra.mrb[2].mxu0 %v19869_v3  ;;  %16979 = vmatprep.subr.bf16.mxu1 %v19880_v26 }
  0x41   :  { %16945 = vmatpush1.bf16.msra.mxu0 %v16944_v21  ;;  %572 = vmatprep.mubr.f32.mxu0 %v25314_v0  ;;  %v1820_v21 = vand.u32 4294901760, %v54_v29  ;;  %v17014_v44 = vpack.c.bf16 %v1353_v11, %v1341_v10  ;;  %v1909_v12 = vand.u32 4294901760, %v20074_v36 }
  0x42   :  { %16947 = vmatprep.subr.bf16.mxu0 %v19786_v16  ;;  %15035 = vmatmul.mubr.f32.vlgmr.msra.gmra.mrb[0].mxu1 %v19858_v58  ;;  %v1328_v16 = vsub.f32 %v19971_v31, %v1327_v49  ;;  %v17036_v31 = vpack.c.bf16 %v1333_v57, %v1321_v54  ;;  %v2502_v54 = vand.u32 4294901760, %v20175_v23 }
  0x43   :  { %16981 = vmatpush3.bf16.msra.mxu1 %v19880_v26  ;;  %15045 = vmatprep.mubr.f32.mxu1 %v19843_v45  ;;  %v20112_v6 = vpack.c.bf16 %v1820_v21, %v1817_v19 }
  0x44   :  { %574 = vmatmul.mubr.f32.vlgmr.msra.gmra.mrb[0].mxu0 %v19807_v28  ;;  %16983 = vmatprep.subr.bf16.mxu1 %v19884_v32 }
  0x45   :  { %16949 = vmatpush1.bf16.msra.mxu0 %v19794_v20  ;;  %579 = vmatprep.mubr.f32.mxu0 %v25314_v0  ;;  %v16986_v20 = vpack.c.bf16 %v773_v46, %v766_v41  ;;  %v1329_v41 = vand.u32 4294901760, %v1328_v16  ;;  %v1334_v46 = vsub.f32 %v19984_v14, %v1333_v57  ;;  %v20085_v16 = vsub.f32 %v54_v29, %v1820_v21  ;;  %v20145_v21 = vld [vmem:[#allocation2 + $0x128] sm:$0xff] }
  0x46   :  { %16951 = vmatprep.subr.bf16.mxu0 %v19798_v22  ;;  %v1317_v22 = vand.u32 4294901760, %v1316_v53  ;;  %v20083_v53 = vsub.f32 %v51_v18, %v1817_v19  ;;  %v17024_v18 = vpack.c.bf16 %v20000_v52, %v19998_v51  ;;  %v20140_v19 = vld [vmem:[#allocation2 + $0xf0] sm:$0xff]  ;;  %v20237_v52 = vsub.f32 %v20175_v23, %v2502_v54 }
  0x47   :  { %16985 = vmatpush3.bf16.msra.mxu1 %v19884_v32 }
  0x48   :  { %581 = vmatmul.mubr.f32.gmra.mrb[2].mxu0 %v19845_v50  ;;  %16987 = vmatprep.subr.bf16.mxu1 %v16986_v20  ;;  %v1916_v4 = vand.u32 4294901760, %v20083_v53  ;;  %25928 = vst [vmem:[#allocation15_spill] sm:$0xff] %v20237_v52 }
  0x49   :  { %16953 = vmatpush1.bf16.msra.mxu0 %v19816_v33  ;;  %659 = vmatprep.mubr.f32.mxu0 %v25314_v0  ;;  %v16990_v33 = vpack.c.bf16 %v787_v48, %v780_v47  ;;  %v17010_v47 = vpack.c.bf16 %v1329_v41, %v1317_v22  ;;  %v1335_v48 = vand.u32 4294901760, %v1334_v46  ;;  %v1903_v22 = vsub.f32 %v20071_v24, %v1902_v56 }
  0x4a   :  { %17003 = vmatprep.subr.bf16.mxu0 %v20016_v62  ;;  %15046 = vmatmul.mubr.f32.vlgmr.msra.gmra.mrb[0].mxu1 %v19869_v3  ;;  %v1923_v41 = vand.u32 4294901760, %v20085_v16  ;;  %v17020_v46 = vpack.c.bf16 %v19984_v14, %v19979_v55 }
  0x4b   :  { %16989 = vmatpush3.bf16.msra.mxu1 %v16986_v20  ;;  %15056 = vmatprep.mubr.f32.mxu1 %v19807_v28  ;;  %v17012_v43 = vpack.c.bf16 %v1335_v48, %v1323_v9  ;;  %v17016_v20 = vpack.c.bf16 %v1359_v35, %v1347_v34  ;;  %v2488_v48 = vand.u32 4294901760, %v20128_v40  ;;  %v17034_v34 = vpack.c.bf16 %v1327_v49, %v1315_v13 }
  0x4c   :  { %661 = vmatmul.mubr.f32.vlgmr.msra.gmra.mrb[0].mxu0 %v19807_v28  ;;  %16991 = vmatprep.subr.bf16.mxu1 %v16990_v33  ;;  %v1924_v17 = vsub.f32 %v20085_v16, %v1923_v41  ;;  %v17066_v35 = vpack.c.bf16 %v20074_v36, %v20071_v24  ;;  %v17038_v13 = vpack.c.bf16 %v1351_v60, %v1339_v59 }
  0x4d   :  { %17005 = vmatpush1.bf16.msra.mxu0 %v20023_v63  ;;  %666 = vmatprep.mubr.f32.mxu0 %v25314_v0  ;;  %v17070_v49 = vpack.c.bf16 %v20085_v16, %v20083_v53  ;;  %v17040_v60 = vpack.c.bf16 %v1357_v38, %v1345_v27 }
  0x4e   :  { %17007 = vmatprep.subr.bf16.mxu0 %v20049_v7  ;;  %v1925_v39 = vand.u32 4294901760, %v1924_v17 }
  0x4f   :  { %16993 = vmatpush3.bf16.msra.mxu1 %v16990_v33  ;;  %v1904_v33 = vand.u32 4294901760, %v1903_v22  ;;  %v2496_v22 = vand.u32 4294901760, %v20145_v21 }
  0x50   :  { %668 = vmatmul.mubr.f32.gmra.mrb[2].mxu0 %v19845_v50  ;;  %16995 = vmatprep.subr.bf16.mxu1 %v19880_v26 }
  0x51   :  { %17009 = vmatpush1.bf16.msra.mxu0 %v20059_v30  ;;  %1290 = vmatprep.mubr.f32.mxu0 %v25314_v0  ;;  %v20208_v57 = vsub.f32 %v20145_v21, %v2496_v22 }
  0x52   :  { %17011 = vmatprep.subr.bf16.mxu0 %v17010_v47  ;;  %15057 = vmatmul.mubr.f32.vlgmr.msra.gmra.mrb[0].mxu1 %v19845_v50  ;;  %v20130_v47 = vld [vmem:[#allocation2 + $0x110] sm:$0xff] }
  0x53   :  { %16997 = vmatpush3.bf16.msra.mxu1 %v19880_v26  ;;  %v1910_v26 = vsub.f32 %v20074_v36, %v1909_v12  ;;  %15067 = vmatprep.mubr.f32.mxu1 %v19807_v28  ;;  %v2492_v10 = vand.u32 4294901760, %v20130_v47  ;;  %25925 = vst [vmem:[#allocation12_spill] sm:$0xff] %v20208_v57  ;;  %v25294_v27 = vand.u32 4294901760, %v20208_v57 }
  0x54   :  { %1296 = vmatmul.mubr.f32.vlgmr.msra.gmra.mrb[4].mxu0 %v19860_v61  ;;  %16999 = vmatprep.subr.bf16.mxu1 %v19884_v32 }
  0x55   :  { %17013 = vmatpush1.bf16.msra.mxu0 %v17012_v43  ;;  %1301 = vmatprep.mubr.f32.mxu0 %v25314_v0  ;;  %v1911_v8 = vand.u32 4294901760, %v1910_v26  ;;  %v20147_v43 = vld [vmem:[#allocation2 + $0x140] sm:$0xff] }
  0x56   :  { %17015 = vmatprep.subr.bf16.mxu0 %v17014_v44  ;;  %v20154_v44 = vsub.f32 %v20128_v40, %v2488_v48  ;;  %v2500_v26 = vand.u32 4294901760, %v20147_v43 }
  0x57   :  { %17001 = vmatpush3.bf16.msra.mxu1 %v19884_v32  ;;  %v1917_v32 = vsub.f32 %v20083_v53, %v1916_v4  ;;  %v17058_v29 = vpack.c.bf16 %v1911_v8, %v1904_v33  ;;  %v20300_v53 = vld [vmem:[#allocation2 + $0x170] sm:$0xff] }
  0x58   :  { %1307 = vmatmul.mubr.f32.gmra.mrb[6].mxu0 %v19876_v15  ;;  %17051 = vmatprep.subr.bf16.mxu1 %v20093_v2  ;;  %25921 = vst [vmem:[#allocation8_spill] sm:$0xff] %v20154_v44  ;;  %v20213_v59 = vsub.f32 %v20147_v43, %v2500_v26 }
  0x59   :  { %17017 = vmatpush1.bf16.msra.mxu0 %v17016_v20  ;;  %1417 = vmatprep.mubr.f32.mxu0 %v25314_v0  ;;  %v1918_v9 = vand.u32 4294901760, %v1917_v32  ;;  %v2490_v20 = vand.u32 4294901760, %v20140_v19 }
  0x5a   :  { %17019 = vmatprep.subr.bf16.mxu0 %v17018_v1  ;;  %15068 = vmatmul.mubr.f32.vlgmr.msra.gmra.mrb[0].mxu1 %v19845_v50  ;;  %25926 = vst [vmem:[#allocation13_spill] sm:$0xff] %v20213_v59  ;;  %v25293_v38 = vand.u32 4294901760, %v20213_v59 }
  0x5b   :  { %17053 = vmatpush3.bf16.msra.mxu1 %v20093_v2  ;;  %15078 = vmatprep.mubr.f32.mxu1 %v19860_v61  ;;  %v17062_v11 = vpack.c.bf16 %v1925_v39, %v1918_v9  ;;  %v20142_v61 = vld [vmem:[#allocation2 + $0x108] sm:$0xff]  ;;  %v20195_v14 = vsub.f32 %v20140_v19, %v2490_v20 }
  0x5c   :  { %1419 = vmatmul.mubr.f32.vlgmr.msra.gmra.mrb[4].mxu0 %v19807_v28  ;;  %17055 = vmatprep.subr.bf16.mxu1 %v20112_v6  ;;  %v2494_v1 = vand.u32 4294901760, %v20142_v61 }
  0x5d   :  { %17021 = vmatpush1.bf16.msra.mxu0 %v17020_v46  ;;  %1424 = vmatprep.mubr.f32.mxu0 %v25314_v0  ;;  %v20173_v46 = vld [vmem:[#allocation2 + $0x120] sm:$0xff]  ;;  %25923 = vst [vmem:[#allocation10_spill] sm:$0xff] %v20195_v14  ;;  %v25297_v32 = vand.u32 4294901760, %v20195_v14 }
  0x5e   :  { %17023 = vmatprep.subr.bf16.mxu0 %v17022_v5  ;;  %v25299_v5 = vand.u32 4294901760, %v20154_v44  ;;  %v20200_v25 = vsub.f32 %v20142_v61, %v2494_v1  ;;  %v2498_v42 = vand.u32 4294901760, %v20173_v46 }
  0x5f   :  { %17057 = vmatpush3.bf16.msra.mxu1 %v20112_v6 }
  0x60   :  { %1426 = vmatmul.mubr.f32.gmra.mrb[6].mxu0 %v19845_v50  ;;  %17059 = vmatprep.subr.bf16.mxu1 %v17058_v29  ;;  %25924 = vst [vmem:[#allocation11_spill] sm:$0xff] %v20200_v25  ;;  %v2652_v33 = vsub.f32 %v20154_v44, %v25299_v5  ;;  %v25296_v17 = vand.u32 4294901760, %v20200_v25  ;;  %v20232_v51 = vsub.f32 %v20173_v46, %v2498_v42  ;;  %v20393_v5 = vld [vmem:[#allocation2 + $0x1d0] sm:$0xff] }
  0x61   :  { %17025 = vmatpush1.bf16.msra.mxu0 %v17024_v18  ;;  %1512 = vmatprep.mubr.f32.mxu0 %v25314_v0  ;;  %v20439_v21 = vpack.c.bf16 %v2502_v54, %v2498_v42 }
  0x62   :  { %17027 = vmatprep.subr.bf16.mxu0 %v20016_v62  ;;  %15079 = vmatmul.mubr.f32.vlgmr.msra.gmra.mrb[2].mxu1 %v19876_v15  ;;  %v20159_v15 = vsub.f32 %v20130_v47, %v2492_v10  ;;  %25927 = vst [vmem:[#allocation14_spill] sm:$0xff] %v20232_v51  ;;  %v2653_v18 = vand.u32 4294901760, %v2652_v33  ;;  %v2670_v9 = vsub.f32 %v20200_v25, %v25296_v17  ;;  %v25291_v39 = vand.u32 4294901760, %v20232_v51  ;;  %v20306_v33 = vld [vmem:[#allocation2 + $0x168] sm:$0xff] }
  0x63   :  { %17061 = vmatpush3.bf16.msra.mxu1 %v17058_v29  ;;  %15089 = vmatprep.mubr.f32.mxu1 %v19807_v28  ;;  %25941 = vst [vmem:[#allocation28_spill] sm:$0xff] %v20439_v21 }
  0x64   :  { %1515 = vmatmul.mubr.f32.vlgmr.msra.gmra.mrb[4].mxu0 %v19824_v37  ;;  %25922 = vst [vmem:[#allocation9_spill] sm:$0xff] %v20159_v15  ;;  %17063 = vmatprep.subr.bf16.mxu1 %v17062_v11  ;;  %v25298_v55 = vand.u32 4294901760, %v20159_v15 }
  0x65   :  { %17029 = vmatpush1.bf16.msra.mxu0 %v20023_v63  ;;  %1520 = vmatprep.mubr.f32.mxu0 %v25314_v0 }
  0x66   :  { %17031 = vmatprep.subr.bf16.mxu0 %v20049_v7  ;;  %v2664_v8 = vsub.f32 %v20159_v15, %v25298_v55  ;;  %v20388_v55 = vpack.c.bf16 %v2492_v10, %v2488_v48  ;;  %v20409_v10 = vld [vmem:[#allocation2 + $0x1c8] sm:$0xff] }
  0x67   :  { %17065 = vmatpush3.bf16.msra.mxu1 %v17062_v11  ;;  %v25290_v11 = vand.u32 4294901760, %v20237_v52 }
  0x68   :  { %1523 = vmatmul.mubr.f32.gmra.mrb[6].mxu0 %v19858_v58  ;;  %17067 = vmatprep.subr.bf16.mxu1 %v17066_v35  ;;  %v2665_v29 = vand.u32 4294901760, %v2664_v8  ;;  %25937 = vst [vmem:[#allocation24_spill] sm:$0xff] %v20388_v55 }
  0x69   :  { %17033 = vmatpush1.bf16.msra.mxu0 %v20059_v30  ;;  %1601 = vmatprep.mubr.f32.mxu0 %v25314_v0 }
  0x6a   :  { %17035 = vmatprep.subr.bf16.mxu0 %v17034_v34  ;;  %15090 = vmatmul.mubr.f32.vlgmr.msra.gmra.mrb[2].mxu1 %v19845_v50  ;;  %v2688_v34 = vsub.f32 %v20213_v59, %v25293_v38 }
  0x6b   :  { %17069 = vmatpush3.bf16.msra.mxu1 %v17066_v35  ;;  %15100 = vmatprep.mubr.f32.mxu1 %v19824_v37  ;;  %v2658_v37 = vsub.f32 %v20195_v14, %v25297_v32  ;;  %v17162_v35 = vpack.c.bf16 %v2665_v29, %v2653_v18  ;;  %v20330_v29 = vld [vmem:[#allocation2 + $0x188] sm:$0xff]  ;;  %v20382_v32 = vld [vmem:[#allocation2 + $0x1b8] sm:$0xff] }
  0x6c   :  { %1605 = vmatmul.mubr.f32.vlgmr.msra.gmra.mrb[4].mxu0 %v19843_v45  ;;  %17071 = vmatprep.subr.bf16.mxu1 %v17070_v49  ;;  %v2689_v36 = vand.u32 4294901760, %v2688_v34  ;;  %v2512_v34 = vand.u32 4294901760, %v20330_v29  ;;  %v2520_v61 = vand.u32 4294901760, %v20382_v32 }
  0x6d   :  { %17037 = vmatpush1.bf16.msra.mxu0 %v17036_v31  ;;  %1610 = vmatprep.mubr.f32.mxu0 %v25314_v0  ;;  %v2659_v31 = vand.u32 4294901760, %v2658_v37  ;;  %v20332_v37 = vld [vmem:[#allocation2 + $0x1a0] sm:$0xff] }
  0x6e   :  { %17039 = vmatprep.subr.bf16.mxu0 %v17038_v13  ;;  %v2671_v13 = vand.u32 4294901760, %v2670_v9 }
  0x6f   :  { %17073 = vmatpush3.bf16.msra.mxu1 %v17070_v49  ;;  %v2682_v49 = vsub.f32 %v20232_v51, %v25291_v39 }
  0x70   :  { %1614 = vmatmul.mubr.f32.gmra.mrb[6].mxu0 %v19869_v3  ;;  %17075 = vmatprep.subr.bf16.mxu1 %v20093_v2 }
  0x71   :  { %17041 = vmatpush1.bf16.msra.mxu0 %v17040_v60  ;;  %1708 = vmatprep.mubr.f32.mxu0 %v25314_v0 }
  0x72   :  { %17043 = vmatprep.subr.bf16.mxu0 %v20016_v62  ;;  %15101 = vmatmul.mubr.f32.vlgmr.msra.gmra.mrb[2].mxu1 %v19858_v58  ;;  %v2676_v62 = vsub.f32 %v20208_v57, %v25294_v27  ;;  %v17082_v58 = vpack.c.bf16 %v1909_v12, %v1902_v56  ;;  %v17164_v56 = vpack.c.bf16 %v2671_v13, %v2659_v31  ;;  %v2683_v12 = vand.u32 4294901760, %v2682_v49  ;;  %v20340_v31 = vld [vmem:[#allocation2 + $0x198] sm:$0xff] }
  0x73   :  { %17077 = vmatpush3.bf16.msra.mxu1 %v20093_v2  ;;  %15111 = vmatprep.mubr.f32.mxu1 %v19843_v45 }
  0x74   :  { %1710 = vmatmul.mubr.f32.vlgmr.msra.gmra.mrb[4].mxu0 %v19807_v28  ;;  %17079 = vmatprep.subr.bf16.mxu1 %v20112_v6  ;;  %v2677_v24 = vand.u32 4294901760, %v2676_v62 }
  0x75   :  { %17045 = vmatpush1.bf16.msra.mxu0 %v20023_v63  ;;  %1715 = vmatprep.mubr.f32.mxu0 %v25314_v0  ;;  %v2694_v63 = vsub.f32 %v20237_v52, %v25290_v11 }
  0x76   :  { %17047 = vmatprep.subr.bf16.mxu0 %v20049_v7  ;;  %v17086_v7 = vpack.c.bf16 %v1923_v41, %v1916_v4  ;;  %v17166_v60 = vpack.c.bf16 %v2689_v36, %v2677_v24  ;;  %v2508_v4 = vand.u32 4294901760, %v20300_v53  ;;  %v20304_v41 = vld [vmem:[#allocation2 + $0x150] sm:$0xff]  ;;  %v2518_v24 = vand.u32 4294901760, %v20340_v31 }
  0x77   :  { %17081 = vmatpush3.bf16.msra.mxu1 %v20112_v6  ;;  %v2695_v45 = vand.u32 4294901760, %v2694_v63 }
  0x78   :  { %1717 = vmatmul.mubr.f32.gmra.mrb[6].mxu0 %v19845_v50  ;;  %17083 = vmatprep.subr.bf16.mxu1 %v17082_v58 }
  0x79   :  { %17049 = vmatpush1.bf16.msra.mxu0 %v20059_v30  ;;  %1795 = vmatprep.mubr.f32.mxu0 %v25314_v0  ;;  %v17168_v30 = vpack.c.bf16 %v2695_v45, %v2683_v12 }
  0x7a   :  { %17163 = vmatprep.subr.bf16.mxu0 %v17162_v35  ;;  %15112 = vmatmul.mubr.f32.vlgmr.msra.gmra.mrb[2].mxu1 %v19869_v3  ;;  %v20298_v3 = vld [vmem:[#allocation2 + $0x158] sm:$0xff]  ;;  %v20338_v35 = vld [vmem:[#allocation2 + $0x180] sm:$0xff] }
  0x7b   :  { %17085 = vmatpush3.bf16.msra.mxu1 %v17082_v58  ;;  %15122 = vmatprep.mubr.f32.mxu1 %v19807_v28  ;;  %v2504_v16 = vand.u32 4294901760, %v20298_v3  ;;  %v2516_v58 = vand.u32 4294901760, %v20332_v37  ;;  %v2514_v63 = vand.u32 4294901760, %v20338_v35 }
  0x7c   :  { %1797 = vmatmul.mubr.f32.vlgmr.msra.gmra.mrb[4].mxu0 %v19807_v28  ;;  %17087 = vmatprep.subr.bf16.mxu1 %v17086_v7 }
  0x7d   :  { %1802 = vmatprep.mubr.f32.mxu0 %v25314_v0  ;;  %17165 = vmatpush1.bf16.msra.mxu0 %v17164_v56  ;;  %v20355_v56 = vsub.f32 %v20330_v29, %v2512_v34  ;;  %v20360_v12 = vsub.f32 %v20332_v37, %v2516_v58  ;;  %v20506_v29 = vld [vmem:[#allocation2 + $0x218] sm:$0xff] }
  0x7e   :  { %17167 = vmatprep.subr.bf16.mxu0 %v17166_v60 }
  0x7f   :  { %17089 = vmatpush3.bf16.msra.mxu1 %v17086_v7  ;;  %25933 = vst [vmem:[#allocation20_spill] sm:$0xff] %v20355_v56  ;;  %25934 = vst [vmem:[#allocation21_spill] sm:$0xff] %v20360_v12  ;;  %v25312_v39 = vand.u32 4294901760, %v20355_v56 }
  0x80   :  { %1804 = vmatmul.mubr.f32.gmra.mrb[6].mxu0 %v19845_v50  ;;  %17091 = vmatprep.subr.bf16.mxu1 %v20093_v2 }
  0x81   :  { %17169 = vmatpush1.bf16.msra.mxu0 %v17168_v30  ;;  %v20371_v30 = vsub.f32 %v20338_v35, %v2514_v63 }
  0x82   :  { %15123 = vmatmul.mubr.f32.vlgmr.msra.gmra.mrb[2].mxu1 %v19845_v50 }
  0x83   :  { %17093 = vmatpush3.bf16.msra.mxu1 %v20093_v2  ;;  %15133 = vmatprep.mubr.f32.mxu1 %v19807_v28  ;;  %v2506_v28 = vand.u32 4294901760, %v20304_v41  ;;  %v2510_v2 = vand.u32 4294901760, %v20306_v33  ;;  %25935 = vst [vmem:[#allocation22_spill] sm:$0xff] %v20371_v30 }
  0x84   :  { %17095 = vmatprep.subr.bf16.mxu1 %v20112_v6 }
  0x85   :  { %v20323_v8 = vsub.f32 %v20304_v41, %v2506_v28  ;;  %v20328_v18 = vsub.f32 %v20306_v33, %v2510_v2 }
  0x87   :  { %17097 = vmatpush3.bf16.msra.mxu1 %v20112_v6  ;;  %v20318_v6 = vsub.f32 %v20300_v53, %v2508_v4  ;;  %25931 = vst [vmem:[#allocation18_spill] sm:$0xff] %v20323_v8  ;;  %25932 = vst [vmem:[#allocation19_spill] sm:$0xff] %v20328_v18  ;;  %v25292_v13 = vand.u32 4294901760, %v20323_v8  ;;  %v25295_v49 = vand.u32 4294901760, %v20328_v18 }
  0x88   :  { %17099 = vmatprep.subr.bf16.mxu1 %v20388_v55 }
  0x89   :  { %25930 = vst [vmem:[#allocation17_spill] sm:$0xff] %v20318_v6  ;;  %v25288_v62 = vand.u32 4294901760, %v20318_v6  ;;  %v2706_v45 = vsub.f32 %v20323_v8, %v25292_v13  ;;  %v2718_v60 = vsub.f32 %v20328_v18, %v25295_v49  ;;  %v25310_v13 = vand.u32 4294901760, %v20360_v12 }
  0x8a   :  { %15134 = vmatmul.mubr.f32.vlgmr.msra.gmra.mrb[2].mxu1 %v19845_v50  ;;  %v20313_v50 = vsub.f32 %v20298_v3, %v2504_v16  ;;  %v25301_v49 = vand.u32 4294901760, %v20371_v30 }
  0x8b   :  { %v2712_v7 = vsub.f32 %v20318_v6, %v25288_v62  ;;  %v20376_v62 = vsub.f32 %v20340_v31, %v2518_v24  ;;  %v2707_v38 = vand.u32 4294901760, %v2706_v45  ;;  %v2719_v27 = vand.u32 4294901760, %v2718_v60  ;;  %v20395_v45 = vld [vmem:[#allocation2 + $0x1b0] sm:$0xff] }
  0x8c   :  { %25929 = vst [vmem:[#allocation16_spill] sm:$0xff] %v20313_v50  ;;  %v25289_v9 = vand.u32 4294901760, %v20313_v50  ;;  %v20401_v60 = vpack.c.bf16 %v2494_v1, %v2490_v20  ;;  %v2736_v47 = vsub.f32 %v20360_v12, %v25310_v13  ;;  %v2730_v48 = vsub.f32 %v20371_v30, %v25301_v49 }
  0x8d   :  { %25936 = vst [vmem:[#allocation23_spill] sm:$0xff] %v20376_v62  ;;  %v2713_v11 = vand.u32 4294901760, %v2712_v7  ;;  %v25300_v17 = vand.u32 4294901760, %v20376_v62  ;;  %v2724_v7 = vsub.f32 %v20355_v56, %v25312_v39  ;;  %v17172_v40 = vpack.c.bf16 %v2719_v27, %v2707_v38 }
  0x8e   :  { %v2700_v36 = vsub.f32 %v20313_v50, %v25289_v9  ;;  %25938 = vst [vmem:[#allocation25_spill] sm:$0xff] %v20401_v60  ;;  %17101 = vmatpush1.bf16.msra.mxu1 %v20401_v60  ;;  %v2737_v20 = vand.u32 4294901760, %v2736_v47  ;;  %v2731_v1 = vand.u32 4294901760, %v2730_v48  ;;  %v2524_v27 = vand.u32 4294901760, %v20393_v5  ;;  %v20431_v47 = vld [vmem:[#allocation2 + $0x200] sm:$0xff] }
  0x8f   :  { %v2742_v19 = vsub.f32 %v20376_v62, %v25300_v17  ;;  %v2522_v38 = vand.u32 4294901760, %v20395_v45  ;;  %v20428_v17 = vsub.f32 %v20382_v32, %v2520_v61  ;;  %v20433_v48 = vld [vmem:[#allocation2 + $0x1e0] sm:$0xff]  ;;  %v2532_v42 = vand.u32 4294901760, %v20431_v47 }
  0x90   :  { %v2701_v9 = vand.u32 4294901760, %v2700_v36  ;;  %v20442_v43 = vsub.f32 %v20393_v5, %v2524_v27  ;;  %v2530_v54 = vand.u32 4294901760, %v20433_v48 }
  0x91   :  { %25940 = vst [vmem:[#allocation27_spill] sm:$0xff] %v20428_v17  ;;  %v25308_v32 = vand.u32 4294901760, %v20428_v17 }
  0x92   :  { %v17170_v36 = vpack.c.bf16 %v2713_v11, %v2701_v9  ;;  %v2725_v11 = vand.u32 4294901760, %v2724_v7  ;;  %v20419_v9 = vld [vmem:[#allocation2 + $0x1e8] sm:$0xff]  ;;  %v2743_v7 = vand.u32 4294901760, %v2742_v19  ;;  %25942 = vst [vmem:[#allocation29_spill] sm:$0xff] %v20442_v43  ;;  %v25307_v23 = vand.u32 4294901760, %v20442_v43 }
  0x93   :  { %v2528_v46 = vand.u32 4294901760, %v20419_v9  ;;  %v20473_v19 = vpack.c.bf16 %v2510_v2, %v2506_v28  ;;  %v20498_v28 = vsub.f32 %v20431_v47, %v2532_v42  ;;  %v20504_v2 = vpack.c.bf16 %v2518_v24, %v2514_v63 }
  0x94   :  { %17171 = vmatprep.subr.bf16.mxu0 %v17170_v36  ;;  %v20425_v36 = vpack.c.bf16 %v2500_v26, %v2496_v22  ;;  %v17174_v49 = vpack.c.bf16 %v2737_v20, %v2725_v11  ;;  %v20447_v22 = vsub.f32 %v20395_v45, %v2522_v38  ;;  %v17176_v26 = vpack.c.bf16 %v2743_v7, %v2731_v1  ;;  %v20476_v1 = vld [vmem:[#allocation2 + $0x1f8] sm:$0xff]  ;;  %v20511_v7 = vld [vmem:[#allocation2 + $0x230] sm:$0xff] }
  0x95   :  { %17173 = vmatpush1.bf16.msra.mxu0 %v17172_v40  ;;  %v2526_v40 = vand.u32 4294901760, %v20409_v10  ;;  %25946 = vst [vmem:[#allocation33_spill] sm:$0xff] %v20473_v19  ;;  %v2760_v3 = vsub.f32 %v20442_v43, %v25307_v23  ;;  %25949 = vst [vmem:[#allocation36_spill] sm:$0xff] %v20498_v28  ;;  %v25304_v35 = vand.u32 4294901760, %v20498_v28  ;;  %v20518_v31 = vsub.f32 %v20433_v48, %v2530_v54 }
  0x96   :  { %25939 = vst [vmem:[#allocation26_spill] sm:$0xff] %v20425_v36  ;;  %25943 = vst [vmem:[#allocation30_spill] sm:$0xff] %v20447_v22  ;;  %17103 = vmatprep.subr.bf16.mxu1 %v20425_v36  ;;  %17175 = vmatprep.subr.bf16.mxu0 %v17174_v49  ;;  %v25305_v5 = vand.u32 4294901760, %v20447_v22  ;;  %v2748_v49 = vsub.f32 %v20428_v17, %v25308_v32  ;;  %v20520_v63 = vpack.c.bf16 %v2524_v27, %v2520_v61 }
  0x97   :  { %v20452_v11 = vsub.f32 %v20409_v10, %v2526_v40  ;;  %17105 = vmatpush1.bf16.msra.mxu1 %v20439_v21  ;;  %v20464_v10 = vpack.c.bf16 %v2508_v4, %v2504_v16  ;;  %v20488_v16 = vpack.c.bf16 %v2516_v58, %v2512_v34  ;;  %v20491_v4 = vsub.f32 %v20419_v9, %v2528_v46 }
  0x98   :  { %v2754_v53 = vsub.f32 %v20447_v22, %v25305_v5  ;;  %v2749_v41 = vand.u32 4294901760, %v2748_v49  ;;  %25950 = vst [vmem:[#allocation37_spill] sm:$0xff] %v20504_v2  ;;  %v2761_v37 = vand.u32 4294901760, %v2760_v3  ;;  %v2534_v9 = vand.u32 4294901760, %v20476_v1  ;;  %25951 = vst [vmem:[#allocation38_spill] sm:$0xff] %v20518_v31  ;;  %v20555_v5 = vld [vmem:[#allocation2 + $0x248] sm:$0xff] }
  0x99   :  { %25944 = vst [vmem:[#allocation31_spill] sm:$0xff] %v20452_v11  ;;  %17177 = vmatpush1.bf16.msra.mxu0 %v17176_v26  ;;  %25945 = vst [vmem:[#allocation32_spill] sm:$0xff] %v20464_v10  ;;  %v25302_v20 = vand.u32 4294901760, %v20452_v11  ;;  %17107 = vmatprep.subr.bf16.mxu1 %v20464_v10  ;;  %v25303_v58 = vand.u32 4294901760, %v20491_v4  ;;  %v2536_v3 = vand.u32 4294901760, %v20506_v29  ;;  %v25306_v61 = vand.u32 4294901760, %v20518_v31 }
  0x9a   :  { %25947 = vst [vmem:[#allocation34_spill] sm:$0xff] %v20488_v16  ;;  %25948 = vst [vmem:[#allocation35_spill] sm:$0xff] %v20491_v4  ;;  %v2755_v34 = vand.u32 4294901760, %v2754_v53  ;;  %v17178_v24 = vpack.c.bf16 %v2761_v37, %v2749_v41  ;;  %v20526_v49 = vsub.f32 %v20476_v1, %v2534_v9  ;;  %v20529_v53 = vld [vmem:[#allocation2 + $0x210] sm:$0xff]  ;;  %v2540_v27 = vand.u32 4294901760, %v20511_v7  ;;  %v20536_v41 = vld [vmem:[#allocation2 + $0x228] sm:$0xff] }
  0x9b   :  { %v2766_v33 = vsub.f32 %v20452_v11, %v25302_v20  ;;  %17109 = vmatpush1.bf16.msra.mxu1 %v20473_v19  ;;  %25952 = vst [vmem:[#allocation39_spill] sm:$0xff] %v20520_v63  ;;  %v2772_v26 = vsub.f32 %v20491_v4, %v25303_v58  ;;  %v2784_v20 = vsub.f32 %v20498_v28, %v25304_v35  ;;  %v2438_v4 = vld [vmem:[#allocation2 + $0x3e0] sm:$0xff] }
  0x9c   :  { %17111 = vmatprep.subr.bf16.mxu1 %v20488_v16  ;;  %25953 = vst [vmem:[#allocation40_spill] sm:$0xff] %v20526_v49  ;;  %17179 = vmatprep.subr.bf16.mxu0 %v17178_v24  ;;  %v25309_v1 = vand.u32 4294901760, %v20526_v49  ;;  %v20541_v58 = vsub.f32 %v20506_v29, %v2536_v3  ;;  %v2778_v35 = vsub.f32 %v20518_v31, %v25306_v61  ;;  %v20564_v29 = vld [vmem:[#allocation2 + $0x260] sm:$0xff]  ;;  %v20911_v31 = vld [vmem:[#allocation2 + $0x3a8] sm:$0xff] }
  0x9d   :  { %v2767_v47 = vand.u32 4294901760, %v2766_v33  ;;  %v2773_v37 = vand.u32 4294901760, %v2772_v26  ;;  %v20552_v24 = vsub.f32 %v20511_v7, %v2540_v27  ;;  %v2538_v26 = vand.u32 4294901760, %v20529_v53 }
  0x9e   :  { %25954 = vst [vmem:[#allocation41_spill] sm:$0xff] %v20541_v58  ;;  %v2790_v45 = vsub.f32 %v20526_v49, %v25309_v1  ;;  %v2779_v61 = vand.u32 4294901760, %v2778_v35 }
  0x9f   :  { %v17180_v33 = vpack.c.bf16 %v2767_v47, %v2755_v34  ;;  %17113 = vmatpush1.bf16.msra.mxu1 %v20504_v2  ;;  %v20545_v34 = vpack.c.bf16 %v2526_v40, %v2522_v38  ;;  %v2785_v47 = vand.u32 4294901760, %v2784_v20  ;;  %25956 = vst [vmem:[#allocation43_spill] sm:$0xff] %v20552_v24  ;;  %v25311_v38 = vand.u32 4294901760, %v20541_v58 }
  0xa0   :  { %17115 = vmatprep.subr.bf16.mxu1 %v20520_v63  ;;  %v2542_v40 = vand.u32 4294901760, %v20536_v41  ;;  %v20562_v20 = vpack.c.bf16 %v2532_v42, %v2528_v46  ;;  %v25313_v7 = vand.u32 4294901760, %v20552_v24  ;;  %v20568_v23 = vsub.f32 %v20529_v53, %v2538_v26  ;;  %v20578_v42 = vld [vmem:[#allocation2 + $0x240] sm:$0xff] }
  0xa1   :  { %25955 = vst [vmem:[#allocation42_spill] sm:$0xff] %v20545_v34  ;;  %17181 = vmatpush1.bf16.msra.mxu0 %v17180_v33  ;;  %v17182_v33 = vpack.c.bf16 %v2785_v47, %v2773_v37  ;;  %v2791_v32 = vand.u32 4294901760, %v2790_v45  ;;  %v2796_v1 = vsub.f32 %v20541_v58, %v25311_v38  ;;  %v2544_v46 = vand.u32 4294901760, %v20555_v5 }
  0xa2   :  { %25957 = vst [vmem:[#allocation44_spill] sm:$0xff] %v20562_v20  ;;  %25958 = vst [vmem:[#allocation45_spill] sm:$0xff] %v20568_v23  ;;  %v20575_v13 = vsub.f32 %v20536_v41, %v2542_v40  ;;  %v2808_v35 = vsub.f32 %v20552_v24, %v25313_v7  ;;  %v25318_v53 = vand.u32 4294901760, %v20568_v23  ;;  %v2548_v37 = vand.u32 4294901760, %v20564_v29  ;;  %v20590_v41 = vld [vmem:[#allocation2 + $0x258] sm:$0xff] }
  0xa3   :  { %17117 = vmatpush1.bf16.msra.mxu1 %v20545_v34  ;;  %17183 = vmatprep.subr.bf16.mxu0 %v17182_v33  ;;  %v20588_v47 = vpack.c.bf16 %v2534_v9, %v2530_v54  ;;  %v17184_v45 = vpack.c.bf16 %v2791_v32, %v2779_v61  ;;  %v2797_v38 = vand.u32 4294901760, %v2796_v1  ;;  %v20594_v39 = vsub.f32 %v20555_v5, %v2544_v46  ;;  %v20603_v54 = vld [vmem:[#allocation2 + $0x278] sm:$0xff]  ;;  %v20613_v1 = vld [vmem:[#allocation2 + $0x290] sm:$0xff] }
  0xa4   :  { %25959 = vst [vmem:[#allocation46_spill] sm:$0xff] %v20575_v13  ;;  %17119 = vmatprep.subr.bf16.mxu1 %v20562_v20  ;;  %v25321_v33 = vand.u32 4294901760, %v20575_v13  ;;  %v2809_v7 = vand.u32 4294901760, %v2808_v35  ;;  %v2802_v0 = vsub.f32 %v20568_v23, %v25318_v53  ;;  %v20600_v20 = vsub.f32 %v20564_v29, %v2548_v37 }
  0xa5   :  { %25960 = vst [vmem:[#allocation47_spill] sm:$0xff] %v20588_v47  ;;  %25961 = vst [vmem:[#allocation48_spill] sm:$0xff] %v20594_v39  ;;  %v2546_v48 = vand.u32 4294901760, %v20578_v42  ;;  %17185 = vmatpush1.bf16.msra.mxu0 %v17184_v45  ;;  %v25324_v5 = vand.u32 4294901760, %v20594_v39  ;;  %v2550_v9 = vand.u32 4294901760, %v20590_v41  ;;  %v20611_v61 = vpack.c.bf16 %v2540_v27, %v2536_v3  ;;  %v20627_v27 = vld [vmem:[#allocation2 + $0x270] sm:$0xff] }
  0xa6   :  { %25962 = vst [vmem:[#allocation49_spill] sm:$0xff] %v20600_v20  ;;  %v2814_v32 = vsub.f32 %v20575_v13, %v25321_v33  ;;  %v17186_v29 = vpack.c.bf16 %v2809_v7, %v2797_v38  ;;  %v2803_v35 = vand.u32 4294901760, %v2802_v0  ;;  %v25329_v53 = vand.u32 4294901760, %v20600_v20 }
  0xa7   :  { %17121 = vmatpush1.bf16.msra.mxu1 %v20588_v47  ;;  %25963 = vst [vmem:[#allocation50_spill] sm:$0xff] %v20611_v61  ;;  %v20617_v45 = vsub.f32 %v20578_v42, %v2546_v48  ;;  %v2820_v33 = vsub.f32 %v20594_v39, %v25324_v5  ;;  %v20623_v47 = vsub.f32 %v20590_v41, %v2550_v9  ;;  %v2552_v3 = vand.u32 4294901760, %v20603_v54 }
  0xa8   :  { %v2815_v34 = vand.u32 4294901760, %v2814_v32  ;;  %17123 = vmatprep.subr.bf16.mxu1 %v20611_v61  ;;  %17187 = vmatprep.subr.bf16.mxu0 %v17186_v29  ;;  %v2832_v0 = vsub.f32 %v20600_v20, %v25329_v53  ;;  %v2556_v7 = vand.u32 4294901760, %v20613_v1  ;;  %v20634_v42 = vpack.c.bf16 %v2542_v40, %v2538_v26  ;;  %v20636_v32 = vld [vmem:[#allocation2 + $0x288] sm:$0xff] }
  0xa9   :  { %25964 = vst [vmem:[#allocation51_spill] sm:$0xff] %v20617_v45  ;;  %25965 = vst [vmem:[#allocation52_spill] sm:$0xff] %v20623_v47  ;;  %v25332_v38 = vand.u32 4294901760, %v20617_v45  ;;  %v2821_v5 = vand.u32 4294901760, %v2820_v33  ;;  %v25337_v61 = vand.u32 4294901760, %v20623_v47  ;;  %v20640_v63 = vsub.f32 %v20603_v54, %v2552_v3  ;;  %v20650_v40 = vld [vmem:[#allocation2 + $0x2a8] sm:$0xff] }
  0xaa   :  { %25966 = vst [vmem:[#allocation53_spill] sm:$0xff] %v20634_v42  ;;  %v17188_v41 = vpack.c.bf16 %v2815_v34, %v2803_v35  ;;  %v2833_v29 = vand.u32 4294901760, %v2832_v0  ;;  %v20646_v2 = vsub.f32 %v20613_v1, %v2556_v7  ;;  %v2554_v26 = vand.u32 4294901760, %v20627_v27  ;;  %v20659_v0 = vld [vmem:[#allocation2 + $0x2c0] sm:$0xff] }
  0xab   :  { %25967 = vst [vmem:[#allocation54_spill] sm:$0xff] %v20640_v63  ;;  %v2826_v53 = vsub.f32 %v20617_v45, %v25332_v38  ;;  %17125 = vmatpush1.bf16.msra.mxu1 %v20634_v42  ;;  %v2838_v34 = vsub.f32 %v20623_v47, %v25337_v61  ;;  %v25340_v33 = vand.u32 4294901760, %v20640_v63  ;;  %v2558_v54 = vand.u32 4294901760, %v20636_v32 }
  0xac   :  { %25968 = vst [vmem:[#allocation55_spill] sm:$0xff] %v20646_v2  ;;  %17189 = vmatpush1.bf16.msra.mxu0 %v17188_v41  ;;  %v20657_v35 = vpack.c.bf16 %v2548_v37, %v2544_v46  ;;  %v17190_v1 = vpack.c.bf16 %v2833_v29, %v2821_v5  ;;  %v25345_v42 = vand.u32 4294901760, %v20646_v2  ;;  %v20663_v16 = vsub.f32 %v20627_v27, %v2554_v26  ;;  %v20673_v37 = vld [vmem:[#allocation2 + $0x2a0] sm:$0xff] }
  0xad   :  { %v2827_v38 = vand.u32 4294901760, %v2826_v53  ;;  %v2839_v41 = vand.u32 4294901760, %v2838_v34  ;;  %v2844_v61 = vsub.f32 %v20640_v63, %v25340_v33  ;;  %v20669_v19 = vsub.f32 %v20636_v32, %v2558_v54  ;;  %v20682_v34 = vld [vmem:[#allocation2 + $0x2b8] sm:$0xff] }
  0xae   :  { %25969 = vst [vmem:[#allocation56_spill] sm:$0xff] %v20657_v35  ;;  %25970 = vst [vmem:[#allocation57_spill] sm:$0xff] %v20663_v16  ;;  %17127 = vmatprep.subr.bf16.mxu1 %v20657_v35  ;;  %v2560_v46 = vand.u32 4294901760, %v20650_v40  ;;  %17191 = vmatprep.subr.bf16.mxu0 %v17190_v1  ;;  %v2856_v53 = vsub.f32 %v20646_v2, %v25345_v42  ;;  %v25348_v5 = vand.u32 4294901760, %v20663_v16  ;;  %v2564_v27 = vand.u32 4294901760, %v20659_v0 }
  0xaf   :  { %25971 = vst [vmem:[#allocation58_spill] sm:$0xff] %v20669_v19  ;;  %v20680_v29 = vpack.c.bf16 %v2550_v9, %v2546_v48  ;;  %v17192_v32 = vpack.c.bf16 %v2839_v41, %v2827_v38  ;;  %v2845_v33 = vand.u32 4294901760, %v2844_v61  ;;  %v25353_v35 = vand.u32 4294901760, %v20669_v19  ;;  %v20696_v9 = vld [vmem:[#allocation2 + $0x2d8] sm:$0xff] }
  0xb0   :  { %v20686_v10 = vsub.f32 %v20650_v40, %v2560_v46  ;;  %v2857_v1 = vand.u32 4294901760, %v2856_v53  ;;  %v2850_v42 = vsub.f32 %v20663_v16, %v25348_v5  ;;  %v20692_v21 = vsub.f32 %v20659_v0, %v2564_v27  ;;  %v20705_v53 = vld [vmem:[#allocation2 + $0x2f0] sm:$0xff] }
  0xb1   :  { %25972 = vst [vmem:[#allocation59_spill] sm:$0xff] %v20680_v29  ;;  %17129 = vmatpush1.bf16.msra.mxu1 %v20680_v29  ;;  %v2562_v48 = vand.u32 4294901760, %v20673_v37  ;;  %17193 = vmatpush1.bf16.msra.mxu0 %v17192_v32  ;;  %v2862_v61 = vsub.f32 %v20669_v19, %v25353_v35  ;;  %v2566_v40 = vand.u32 4294901760, %v20682_v34  ;;  %v20703_v41 = vpack.c.bf16 %v2556_v7, %v2552_v3  ;;  %v20719_v7 = vld [vmem:[#allocation2 + $0x2d0] sm:$0xff] }
  0xb2   :  { %25973 = vst [vmem:[#allocation60_spill] sm:$0xff] %v20686_v10  ;;  %25974 = vst [vmem:[#allocation61_spill] sm:$0xff] %v20692_v21  ;;  %v25356_v38 = vand.u32 4294901760, %v20686_v10  ;;  %v17194_v0 = vpack.c.bf16 %v2857_v1, %v2845_v33  ;;  %v2851_v5 = vand.u32 4294901760, %v2850_v42  ;;  %v25361_v29 = vand.u32 4294901760, %v20692_v21 }
  0xb3   :  { %25975 = vst [vmem:[#allocation62_spill] sm:$0xff] %v20703_v41  ;;  %v20709_v36 = vsub.f32 %v20673_v37, %v2562_v48  ;;  %v2863_v32 = vand.u32 4294901760, %v2862_v61  ;;  %v20715_v60 = vsub.f32 %v20682_v34, %v2566_v40  ;;  %17131 = vmatprep.subr.bf16.mxu1 %v20703_v41  ;;  %v2568_v3 = vand.u32 4294901760, %v20696_v9  ;;  %v20728_v61 = vld [vmem:[#allocation2 + $0x2e8] sm:$0xff] }
  0xb4   :  { %v2868_v35 = vsub.f32 %v20686_v10, %v25356_v38  ;;  %17195 = vmatprep.subr.bf16.mxu0 %v17194_v0  ;;  %v2880_v42 = vsub.f32 %v20692_v21, %v25361_v29  ;;  %v2572_v37 = vand.u32 4294901760, %v20705_v53  ;;  %v20726_v1 = vpack.c.bf16 %v2558_v54, %v2554_v26  ;;  %v20742_v54 = vld [vmem:[#allocation2 + $0x308] sm:$0xff] }
  0xb5   :  { %25976 = vst [vmem:[#allocation63_spill] sm:$0xff] %v20709_v36  ;;  %25977 = vst [vmem:[#allocation64_spill] sm:$0xff] %v20715_v60  ;;  %v25364_v33 = vand.u32 4294901760, %v20709_v36  ;;  %v17196_v34 = vpack.c.bf16 %v2863_v32, %v2851_v5  ;;  %v25369_v41 = vand.u32 4294901760, %v20715_v60  ;;  %v20732_v55 = vsub.f32 %v20696_v9, %v2568_v3 }
  0xb6   :  { %25978 = vst [vmem:[#allocation65_spill] sm:$0xff] %v20726_v1  ;;  %v2869_v38 = vand.u32 4294901760, %v2868_v35  ;;  %v2881_v0 = vand.u32 4294901760, %v2880_v42  ;;  %v20738_v21 = vsub.f32 %v20705_v53, %v2572_v37  ;;  %17133 = vmatpush1.bf16.msra.mxu1 %v20726_v1  ;;  %v2570_v26 = vand.u32 4294901760, %v20719_v7  ;;  %v20751_v42 = vld [vmem:[#allocation2 + $0x320] sm:$0xff] }
  0xb7   :  { %25979 = vst [vmem:[#allocation66_spill] sm:$0xff] %v20732_v55  ;;  %v2874_v29 = vsub.f32 %v20709_v36, %v25364_v33  ;;  %17197 = vmatpush1.bf16.msra.mxu0 %v17196_v34  ;;  %v2886_v35 = vsub.f32 %v20715_v60, %v25369_v41  ;;  %v25372_v5 = vand.u32 4294901760, %v20732_v55  ;;  %v2574_v9 = vand.u32 4294901760, %v20728_v61 }
  0xb8   :  { %25980 = vst [vmem:[#allocation67_spill] sm:$0xff] %v20738_v21  ;;  %v20749_v32 = vpack.c.bf16 %v2564_v27, %v2560_v46  ;;  %v17198_v53 = vpack.c.bf16 %v2881_v0, %v2869_v38  ;;  %v25377_v1 = vand.u32 4294901760, %v20738_v21  ;;  %v20755_v10 = vsub.f32 %v20719_v7, %v2570_v26  ;;  %v20765_v27 = vld [vmem:[#allocation2 + $0x300] sm:$0xff] }
  0xb9   :  { %v2875_v33 = vand.u32 4294901760, %v2874_v29  ;;  %v2887_v34 = vand.u32 4294901760, %v2886_v35  ;;  %v2892_v41 = vsub.f32 %v20732_v55, %v25372_v5  ;;  %v20761_v19 = vsub.f32 %v20728_v61, %v2574_v9  ;;  %v20774_v35 = vld [vmem:[#allocation2 + $0x318] sm:$0xff] }
  0xba   :  { %25981 = vst [vmem:[#allocation68_spill] sm:$0xff] %v20749_v32  ;;  %25982 = vst [vmem:[#allocation69_spill] sm:$0xff] %v20755_v10  ;;  %17135 = vmatprep.subr.bf16.mxu1 %v20749_v32  ;;  %v2576_v46 = vand.u32 4294901760, %v20742_v54  ;;  %17199 = vmatprep.subr.bf16.mxu0 %v17198_v53  ;;  %v2904_v29 = vsub.f32 %v20738_v21, %v25377_v1  ;;  %v25380_v38 = vand.u32 4294901760, %v20755_v10  ;;  %v2580_v7 = vand.u32 4294901760, %v20751_v42 }
  0xbb   :  { %25983 = vst [vmem:[#allocation70_spill] sm:$0xff] %v20761_v19  ;;  %v20772_v0 = vpack.c.bf16 %v2566_v40, %v2562_v48  ;;  %v17200_v61 = vpack.c.bf16 %v2887_v34, %v2875_v33  ;;  %v2893_v5 = vand.u32 4294901760, %v2892_v41  ;;  %v25385_v32 = vand.u32 4294901760, %v20761_v19  ;;  %v20788_v40 = vld [vmem:[#allocation2 + $0x338] sm:$0xff] }
  0xbc   :  { %v20778_v16 = vsub.f32 %v20742_v54, %v2576_v46  ;;  %v2905_v53 = vand.u32 4294901760, %v2904_v29  ;;  %v2898_v1 = vsub.f32 %v20755_v10, %v25380_v38  ;;  %v20784_v2 = vsub.f32 %v20751_v42, %v2580_v7  ;;  %v20797_v29 = vld [vmem:[#allocation2 + $0x350] sm:$0xff] }
  0xbd   :  { %25984 = vst [vmem:[#allocation71_spill] sm:$0xff] %v20772_v0  ;;  %17137 = vmatpush1.bf16.msra.mxu1 %v20772_v0  ;;  %v2578_v48 = vand.u32 4294901760, %v20765_v27  ;;  %17201 = vmatpush1.bf16.msra.mxu0 %v17200_v61  ;;  %v2910_v41 = vsub.f32 %v20761_v19, %v25385_v32  ;;  %v2582_v54 = vand.u32 4294901760, %v20774_v35  ;;  %v20795_v34 = vpack.c.bf16 %v2572_v37, %v2568_v3  ;;  %v20811_v37 = vld [vmem:[#allocation2 + $0x330] sm:$0xff] }
  0xbe   :  { %25985 = vst [vmem:[#allocation72_spill] sm:$0xff] %v20778_v16  ;;  %25986 = vst [vmem:[#allocation73_spill] sm:$0xff] %v20784_v2  ;;  %v25388_v33 = vand.u32 4294901760, %v20778_v16  ;;  %v17202_v42 = vpack.c.bf16 %v2905_v53, %v2893_v5  ;;  %v2899_v38 = vand.u32 4294901760, %v2898_v1  ;;  %v25393_v0 = vand.u32 4294901760, %v20784_v2 }
  0xbf   :  { %25987 = vst [vmem:[#allocation74_spill] sm:$0xff] %v20795_v34  ;;  %v20801_v63 = vsub.f32 %v20765_v27, %v2578_v48  ;;  %v2911_v61 = vand.u32 4294901760, %v2910_v41  ;;  %v20807_v47 = vsub.f32 %v20774_v35, %v2582_v54  ;;  %17139 = vmatprep.subr.bf16.mxu1 %v20795_v34  ;;  %v2584_v3 = vand.u32 4294901760, %v20788_v40  ;;  %v20820_v41 = vld [vmem:[#allocation2 + $0x348] sm:$0xff] }
  0xc0   :  { %v2916_v32 = vsub.f32 %v20778_v16, %v25388_v33  ;;  %17203 = vmatprep.subr.bf16.mxu0 %v17202_v42  ;;  %v2928_v1 = vsub.f32 %v20784_v2, %v25393_v0  ;;  %v2588_v27 = vand.u32 4294901760, %v20797_v29  ;;  %v20818_v53 = vpack.c.bf16 %v2574_v9, %v2570_v26  ;;  %v20834_v9 = vld [vmem:[#allocation2 + $0x368] sm:$0xff] }
  0xc1   :  { %25988 = vst [vmem:[#allocation75_spill] sm:$0xff] %v20801_v63  ;;  %25989 = vst [vmem:[#allocation76_spill] sm:$0xff] %v20807_v47  ;;  %v25396_v5 = vand.u32 4294901760, %v20801_v63  ;;  %v17204_v35 = vpack.c.bf16 %v2911_v61, %v2899_v38  ;;  %v25401_v34 = vand.u32 4294901760, %v20807_v47  ;;  %v20824_v45 = vsub.f32 %v20788_v40, %v2584_v3 }
  0xc2   :  { %25990 = vst [vmem:[#allocation77_spill] sm:$0xff] %v20818_v53  ;;  %v2917_v33 = vand.u32 4294901760, %v2916_v32  ;;  %v2929_v42 = vand.u32 4294901760, %v2928_v1  ;;  %v20830_v20 = vsub.f32 %v20797_v29, %v2588_v27  ;;  %17141 = vmatpush1.bf16.msra.mxu1 %v20818_v53  ;;  %v25405_v26 = vand.u32 4294901760, %v20811_v37  ;;  %v20843_v1 = vld [vmem:[#allocation2 + $0x380] sm:$0xff] }
  0xc3   :  { %25991 = vst [vmem:[#allocation78_spill] sm:$0xff] %v20824_v45  ;;  %v2922_v0 = vsub.f32 %v20801_v63, %v25396_v5  ;;  %17205 = vmatpush1.bf16.msra.mxu0 %v17204_v35  ;;  %v2934_v32 = vsub.f32 %v20807_v47, %v25401_v34  ;;  %v25404_v38 = vand.u32 4294901760, %v20824_v45  ;;  %v2590_v40 = vand.u32 4294901760, %v20820_v41 }
  0xc4   :  { %25992 = vst [vmem:[#allocation79_spill] sm:$0xff] %v20830_v20  ;;  %v20841_v61 = vpack.c.bf16 %v2580_v7, %v2576_v46  ;;  %v17206_v29 = vpack.c.bf16 %v2929_v42, %v2917_v33  ;;  %v25410_v53 = vand.u32 4294901760, %v20830_v20  ;;  %v20849_v35 = vsub.f32 %v20811_v37, %v25405_v26  ;;  %v20859_v7 = vld [vmem:[#allocation2 + $0x360] sm:$0xff] }
  0xc5   :  { %v2923_v5 = vand.u32 4294901760, %v2922_v0  ;;  %v2935_v39 = vand.u32 4294901760, %v2934_v32  ;;  %v2940_v34 = vsub.f32 %v20824_v45, %v25404_v38  ;;  %v20855_v13 = vsub.f32 %v20820_v41, %v2590_v40  ;;  %v20868_v38 = vld [vmem:[#allocation2 + $0x378] sm:$0xff] }
  0xc6   :  { %25993 = vst [vmem:[#allocation80_spill] sm:$0xff] %v20841_v61  ;;  %25994 = vst [vmem:[#allocation81_spill] sm:$0xff] %v20849_v35  ;;  %17143 = vmatprep.subr.bf16.mxu1 %v20841_v61  ;;  %v2592_v46 = vand.u32 4294901760, %v20834_v9  ;;  %17207 = vmatprep.subr.bf16.mxu0 %v17206_v29  ;;  %v2952_v0 = vsub.f32 %v20830_v20, %v25410_v53  ;;  %v25413_v33 = vand.u32 4294901760, %v20849_v35  ;;  %v2596_v42 = vand.u32 4294901760, %v20843_v1 }
  0xc7   :  { %25995 = vst [vmem:[#allocation82_spill] sm:$0xff] %v20855_v13  ;;  %v20866_v32 = vpack.c.bf16 %v2582_v54, %v2578_v48  ;;  %v17208_v41 = vpack.c.bf16 %v2935_v39, %v2923_v5  ;;  %v2941_v26 = vand.u32 4294901760, %v2940_v34  ;;  %v25416_v61 = vand.u32 4294901760, %v20855_v13  ;;  %v20887_v5 = vld [vmem:[#allocation2 + $0x398] sm:$0xff] }
  0xc8   :  { %v20872_v23 = vsub.f32 %v20834_v9, %v2592_v46  ;;  %v2953_v29 = vand.u32 4294901760, %v2952_v0  ;;  %v2946_v53 = vsub.f32 %v20849_v35, %v25413_v33  ;;  %v20878_v24 = vsub.f32 %v20843_v1, %v2596_v42  ;;  %v20889_v9 = vld [vmem:[#allocation2 + $0x3b0] sm:$0xff] }
  0xc9   :  { %25996 = vst [vmem:[#allocation83_spill] sm:$0xff] %v20866_v32  ;;  %17145 = vmatpush1.bf16.msra.mxu1 %v20866_v32  ;;  %v2594_v48 = vand.u32 4294901760, %v20859_v7  ;;  %17209 = vmatpush1.bf16.msra.mxu0 %v17208_v41  ;;  %v2958_v39 = vsub.f32 %v20855_v13, %v25416_v61  ;;  %v2598_v34 = vand.u32 4294901760, %v20868_v38  ;;  %v20901_v49 = vpack.c.bf16 %v2588_v27, %v2584_v3 }
  0xca   :  { %25997 = vst [vmem:[#allocation84_spill] sm:$0xff] %v20872_v23  ;;  %25998 = vst [vmem:[#allocation85_spill] sm:$0xff] %v20878_v24  ;;  %v25423_v54 = vand.u32 4294901760, %v20872_v23  ;;  %v17210_v0 = vpack.c.bf16 %v2953_v29, %v2941_v26  ;;  %v2947_v1 = vand.u32 4294901760, %v2946_v53  ;;  %v25424_v33 = vand.u32 4294901760, %v20878_v24 }
  0xcb   :  { %v20893_v32 = vsub.f32 %v20859_v7, %v2594_v48  ;;  %v2959_v41 = vand.u32 4294901760, %v2958_v39  ;;  %v20899_v58 = vsub.f32 %v20868_v38, %v2598_v34  ;;  %26001 = vst [vmem:[#allocation88_spill] sm:$0xff] %v20901_v49  ;;  %v2600_v7 = vand.u32 4294901760, %v20887_v5  ;;  %v20909_v39 = vld [vmem:[#allocation2 + $0x390] sm:$0xff]  ;;  %17147 = vmatprep.subr.bf16.mxu1 %v20901_v49 }
  0xcc   :  { %v2964_v61 = vsub.f32 %v20872_v23, %v25423_v54  ;;  %17211 = vmatprep.subr.bf16.mxu0 %v17210_v0  ;;  %v2976_v53 = vsub.f32 %v20878_v24, %v25424_v33  ;;  %v2604_v29 = vand.u32 4294901760, %v20889_v9  ;;  %v2606_v49 = vand.u32 4294901760, %v20911_v31 }
  0xcd   :  { %25999 = vst [vmem:[#allocation86_spill] sm:$0xff] %v20893_v32  ;;  %26000 = vst [vmem:[#allocation87_spill] sm:$0xff] %v20899_v58  ;;  %v25429_v26 = vand.u32 4294901760, %v20893_v32  ;;  %v17212_v54 = vpack.c.bf16 %v2959_v41, %v2947_v1  ;;  %v25436_v3 = vand.u32 4294901760, %v20899_v58  ;;  %v20919_v33 = vsub.f32 %v20887_v5, %v2600_v7 }
  0xce   :  { %v2965_v38 = vand.u32 4294901760, %v2964_v61  ;;  %v2977_v27 = vand.u32 4294901760, %v2976_v53  ;;  %v20922_v28 = vsub.f32 %v20889_v9, %v2604_v29  ;;  %v26004_v1 = vand.u32 4294901760, %v20811_v37 }
  0xcf   :  { %v2970_v0 = vsub.f32 %v20893_v32, %v25429_v26  ;;  %26002 = vst [vmem:[#allocation89_spill] sm:$0xff] %v20919_v33  ;;  %17213 = vmatpush1.bf16.msra.mxu0 %v17212_v54  ;;  %v2982_v61 = vsub.f32 %v20899_v58, %v25436_v3  ;;  %v2602_v53 = vand.u32 4294901760, %v20909_v39  ;;  %v2435_v26 = vld [vmem:[#allocation2 + $0x3c8] sm:$0xff]  ;;  %v25441_v9 = vand.u32 4294901760, %v20919_v33 }
  0xd0   :  { %26003 = vst [vmem:[#allocation90_spill] sm:$0xff] %v20922_v28  ;;  %v20929_v41 = vpack.c.bf16 %v2590_v40, %v26004_v1  ;;  %v17214_v5 = vpack.c.bf16 %v2977_v27, %v2965_v38  ;;  %v25444_v54 = vand.u32 4294901760, %v20922_v28  ;;  %v20940_v37 = vsub.f32 %v20911_v31, %v2606_v49  ;;  %v2434_v1 = vld [vmem:[#allocation2 + $0x3c0] sm:$0xff] }
  0xd1   :  { %v2971_v11 = vand.u32 4294901760, %v2970_v0  ;;  %v2983_v22 = vand.u32 4294901760, %v2982_v61  ;;  %v20937_v3 = vsub.f32 %v20909_v39, %v2602_v53  ;;  %v20942_v40 = vpack.c.bf16 %v2596_v42, %v2592_v46  ;;  %v56_v58 = vld [vmem:[#allocation2 + $0xc0] ss:$8 sm:$0x7] }
  0xd2   :  { %26005 = vst [vmem:[#allocation91_spill] sm:$0xff] %v20929_v41  ;;  %17149 = vmatpush1.bf16.msra.mxu1 %v20929_v41  ;;  %26007 = vst [vmem:[#allocation93_spill] sm:$0xff] %v20940_v37  ;;  %17215 = vmatprep.subr.bf16.mxu0 %v17214_v5  ;;  %v2988_v38 = vsub.f32 %v20919_v33, %v25441_v9  ;;  %v3000_v27 = vsub.f32 %v20922_v28, %v25444_v54  ;;  %v2608_v0 = vand.u32 4294901760, %v2435_v26  ;;  %v2437_v41 = vld [vmem:[#allocation2 + $0x3d8] sm:$0xff] }
  0xd3   :  { %26006 = vst [vmem:[#allocation92_spill] sm:$0xff] %v20937_v3  ;;  %26008 = vst [vmem:[#allocation94_spill] sm:$0xff] %v20942_v40  ;;  %v2612_v61 = vand.u32 4294901760, %v2438_v4  ;;  %v17216_v39 = vpack.c.bf16 %v2983_v22, %v2971_v11  ;;  %v25449_v43 = vand.u32 4294901760, %v20937_v3  ;;  %v25450_v31 = vand.u32 4294901760, %v20940_v37  ;;  %17151 = vmatprep.subr.bf16.mxu1 %v20942_v40 }
  0xd4   :  { %v20953_v46 = vpack.c.bf16 %v2598_v34, %v2594_v48  ;;  %v2989_v42 = vand.u32 4294901760, %v2988_v38  ;;  %v3001_v5 = vand.u32 4294901760, %v3000_v27  ;;  %v20955_v9 = vsub.f32 %v2435_v26, %v2608_v0  ;;  %v2441_v34 = vld [vmem:[#allocation2 + $0x3f8] sm:$0xff] }
  0xd5   :  { %v20957_v17 = vsub.f32 %v2438_v4, %v2612_v61  ;;  %17217 = vmatpush1.bf16.msra.mxu0 %v17216_v39  ;;  %v2994_v54 = vsub.f32 %v20937_v3, %v25449_v43  ;;  %v3006_v22 = vsub.f32 %v20940_v37, %v25450_v31  ;;  %v2610_v11 = vand.u32 4294901760, %v2434_v1  ;;  %v58_v28 = vld [vmem:[#allocation2 + $0xd8] ss:$8 sm:$0x7] }
  0xd6   :  { %26009 = vst [vmem:[#allocation95_spill] sm:$0xff] %v20953_v46  ;;  %26010 = vst [vmem:[#allocation96_spill] sm:$0xff] %v20955_v9  ;;  %17153 = vmatpush1.bf16.msra.mxu1 %v20953_v46  ;;  %v2614_v48 = vand.u32 4294901760, %v2437_v41  ;;  %v17218_v38 = vpack.c.bf16 %v3001_v5, %v2989_v42  ;;  %v25454_v26 = vand.u32 4294901760, %v20955_v9  ;;  %v20968_v27 = vpack.c.bf16 %v2604_v29, %v2600_v7  ;;  %v2444_v5 = vld [vmem:[#allocation2 + $0x410] sm:$0xff] }
  0xd7   :  { %26011 = vst [vmem:[#allocation97_spill] sm:$0xff] %v20957_v17  ;;  %v25453_v4 = vand.u32 4294901760, %v20957_v17  ;;  %v2995_v39 = vand.u32 4294901760, %v2994_v54  ;;  %v3007_v40 = vand.u32 4294901760, %v3006_v22  ;;  %v20970_v62 = vsub.f32 %v2434_v1, %v2610_v11 }
  0xd8   :  { %26012 = vst [vmem:[#allocation98_spill] sm:$0xff] %v20968_v27  ;;  %v20972_v43 = vsub.f32 %v2437_v41, %v2614_v48  ;;  %17219 = vmatprep.subr.bf16.mxu0 %v17218_v38  ;;  %v3012_v31 = vsub.f32 %v20955_v9, %v25454_v26  ;;  %17155 = vmatprep.subr.bf16.mxu1 %v20968_v27  ;;  %v3834_v7 = vand.u32 4294901760, %v2441_v34 }
  0xd9   :  { %26013 = vst [vmem:[#allocation99_spill] sm:$0xff] %v20970_v62  ;;  %v3024_v42 = vsub.f32 %v20957_v17, %v25453_v4  ;;  %v17220_v29 = vpack.c.bf16 %v3007_v40, %v2995_v39  ;;  %v25455_v54 = vand.u32 4294901760, %v20970_v62  ;;  %v20983_v41 = vpack.c.bf16 %v2606_v49, %v2602_v53  ;;  %v20994_v39 = vld [vmem:[#allocation2 + $0x3f0] sm:$0xff]  ;;  %v20996_v49 = vld [vmem:[#allocation2 + $0x408] sm:$0xff] }
  0xda   :  { %26014 = vst [vmem:[#allocation100_spill] sm:$0xff] %v20972_v43  ;;  %v25456_v1 = vand.u32 4294901760, %v20972_v43  ;;  %v3013_v22 = vand.u32 4294901760, %v3012_v31  ;;  %v20985_v46 = vpack.c.bf16 %v2612_v61, %v2608_v0  ;;  %v3838_v40 = vand.u32 4294901760, %v2444_v5  ;;  %v21001_v61 = vld [vmem:[#allocation2 + $0x428] sm:$0xff]  ;;  %v21003_v31 = vld [vmem:[#allocation2 + $0x440] sm:$0xff] }
  0xdb   :  { %26015 = vst [vmem:[#allocation101_spill] sm:$0xff] %v20983_v41  ;;  %v3025_v38 = vand.u32 4294901760, %v3024_v42  ;;  %17221 = vmatpush1.bf16.msra.mxu0 %v17220_v29  ;;  %v3018_v4 = vsub.f32 %v20970_v62, %v25455_v54  ;;  %17157 = vmatpush1.bf16.msra.mxu1 %v20983_v41  ;;  %v20999_v0 = vpack.c.bf16 %v2614_v48, %v2610_v11  ;;  %v25464_v11 = vand.u32 4294901760, %v20996_v49  ;;  %v21015_v48 = vld [vmem:[#allocation2 + $0x420] sm:$0xff] }
  0xdc   :  { %26016 = vst [vmem:[#allocation102_spill] sm:$0xff] %v20985_v46  ;;  %v3030_v26 = vsub.f32 %v20972_v43, %v25456_v1  ;;  %17159 = vmatprep.subr.bf16.mxu1 %v20985_v46  ;;  %v21005_v54 = vpack.c.bf16 %v3838_v40, %v3834_v7  ;;  %v21007_v1 = vsub.f32 %v2441_v34, %v3834_v7  ;;  %v21022_v7 = vld [vmem:[#allocation2 + $0x458] sm:$0xff] }
  0xdd   :  { %v17222_v53 = vpack.c.bf16 %v3025_v38, %v3013_v22  ;;  %26017 = vst [vmem:[#allocation103_spill] sm:$0xff] %v20999_v0  ;;  %v3019_v42 = vand.u32 4294901760, %v3018_v4  ;;  %v17226_v41 = vpack.c.bf16 %v20159_v15, %v20154_v44  ;;  %v21011_v27 = vsub.f32 %v2444_v5, %v3838_v40  ;;  %v21020_v4 = vld [vmem:[#allocation2 + $0x438] sm:$0xff] }
  0xde   :  { %v3031_v29 = vand.u32 4294901760, %v3030_v26  ;;  %26018 = vst [vmem:[#allocation104_spill] sm:$0xff] %v21005_v54  ;;  %26019 = vst [vmem:[#allocation105_spill] sm:$0xff] %v21007_v1  ;;  %v25461_v22 = vand.u32 4294901760, %v20994_v39  ;;  %v25468_v26 = vand.u32 4294901760, %v21001_v61  ;;  %v21033_v40 = vsub.f32 %v20996_v49, %v25464_v11  ;;  %v21116_v1 = vld [vmem:[#allocation2 + $0x4c8] sm:$0xff] }
  0xdf   :  { %17223 = vmatprep.subr.bf16.mxu0 %v17222_v53  ;;  %26020 = vst [vmem:[#allocation106_spill] sm:$0xff] %v21011_v27  ;;  %17161 = vmatpush1.bf16.msra.mxu1 %v20999_v0  ;;  %v21035_v53 = vld [vmem:[#allocation2 + $0x470] sm:$0xff]  ;;  %v25472_v11 = vand.u32 4294901760, %v21015_v48  ;;  %v25476_v0 = vand.u32 4294901760, %v21020_v4  ;;  %26047 = vst [vmem:[#allocation129_spill] sm:$0xff] %v21116_v1  ;;  %v21118_v27 = vld [vmem:[#allocation2 + $0x4e8] sm:$0xff] }
  0xe0   :  { %v17224_v38 = vpack.c.bf16 %v3031_v29, %v3019_v42  ;;  %17483 = vmatprep.subr.bf16.mxu1 %v21005_v54  ;;  %v21028_v5 = vsub.f32 %v20994_v39, %v25461_v22  ;;  %26022 = vst [vmem:[#allocation108_spill] sm:$0xff] %v21033_v40  ;;  %26023 = vst [vmem:[#allocation109_spill] sm:$0xff] %v21035_v53  ;;  %v21037_v42 = vld [vmem:[#allocation2 + $0x450] sm:$0xff]  ;;  %v21039_v29 = vld [vmem:[#allocation2 + $0x468] sm:$0xff]  ;;  %v21044_v34 = vsub.f32 %v21001_v61, %v25468_v26 }
  0xe1   :  { %26024 = vst [vmem:[#allocation110_spill] sm:$0xff] %v21037_v42  ;;  %26025 = vst [vmem:[#allocation111_spill] sm:$0xff] %v21039_v29  ;;  %v26027_v22 = vand.u32 4294901760, %v21003_v31  ;;  %v25478_v40 = vand.u32 4294901760, %v21022_v7  ;;  %v21078_v26 = vld [vmem:[#allocation2 + $0x498] sm:$0xff]  ;;  %v26038_v15 = vand.u32 4294901760, %v21037_v42 }
  0xe2   :  { %26021 = vst [vmem:[#allocation107_spill] sm:$0xff] %v21028_v5  ;;  %17225 = vmatpush1.bf16.msra.mxu0 %v17224_v38  ;;  %26026 = vst [vmem:[#allocation112_spill] sm:$0xff] %v21044_v34  ;;  %v21057_v38 = vsub.f32 %v21015_v48, %v25472_v11  ;;  %v26036_v5 = vand.u32 4294901760, %v21035_v53 }
  0xe3   :  { %v21049_v54 = vsub.f32 %v21003_v31, %v26027_v22  ;;  %17227 = vmatprep.subr.bf16.mxu0 %v17226_v41  ;;  %v21062_v22 = vld [vmem:[#allocation2 + $0x488] sm:$0xff]  ;;  %v21069_v41 = vsub.f32 %v21020_v4, %v25476_v0  ;;  %v21074_v11 = vsub.f32 %v21022_v7, %v25478_v40  ;;  %26035 = vst [vmem:[#allocation120_spill] sm:$0xff] %v21078_v26  ;;  %v26040_v0 = vand.u32 4294901760, %v21039_v29  ;;  %v21095_v40 = vld [vmem:[#allocation2 + $0x4b8] sm:$0xff] }
  0xe4   :  { %26029 = vst [vmem:[#allocation114_spill] sm:$0xff] %v21057_v38  ;;  %26030 = vst [vmem:[#allocation115_spill] sm:$0xff] %v21062_v22  ;;  %v21076_v38 = vld [vmem:[#allocation2 + $0x480] sm:$0xff]  ;;  %v21083_v34 = vsub.f32 %v21035_v53, %v26036_v5  ;;  %v21088_v44 = vsub.f32 %v21037_v42, %v26038_v15 }
  0xe5   :  { %26028 = vst [vmem:[#allocation113_spill] sm:$0xff] %v21049_v54  ;;  %v21064_v54 = vld [vmem:[#allocation2 + $0x4a0] sm:$0xff]  ;;  %26032 = vst [vmem:[#allocation117_spill] sm:$0xff] %v21069_v41  ;;  %v21093_v41 = vsub.f32 %v21039_v29, %v26040_v0  ;;  %v26049_v5 = vand.u32 4294901760, %v21076_v38 }
  0xe6   :  { %26031 = vst [vmem:[#allocation116_spill] sm:$0xff] %v21064_v54  ;;  %26033 = vst [vmem:[#allocation118_spill] sm:$0xff] %v21074_v11  ;;  %v25488_v11 = vand.u32 4294901760, %v21062_v22  ;;  %v25490_v46 = vand.u32 4294901760, %v21064_v54 }
  0xe7   :  { %26034 = vst [vmem:[#allocation119_spill] sm:$0xff] %v21076_v38  ;;  %26037 = vst [vmem:[#allocation121_spill] sm:$0xff] %v21083_v34  ;;  %v21101_v34 = vld [vmem:[#allocation2 + $0x4d0] sm:$0xff]  ;;  %v21123_v29 = vsub.f32 %v21076_v38, %v26049_v5  ;;  %v21143_v38 = vld [vmem:[#allocation2 + $0x4f8] sm:$0xff]  ;;  %v26059_v5 = vand.u32 4294901760, %v21116_v1 }
  0xe8   :  { %26039 = vst [vmem:[#allocation122_spill] sm:$0xff] %v21088_v44  ;;  %26041 = vst [vmem:[#allocation123_spill] sm:$0xff] %v21093_v41  ;;  %v21106_v15 = vsub.f32 %v21062_v22, %v25488_v11  ;;  %v21111_v0 = vsub.f32 %v21064_v54, %v25490_v46  ;;  %v21114_v44 = vld [vmem:[#allocation2 + $0x4b0] sm:$0xff]  ;;  %v26051_v11 = vand.u32 4294901760, %v21078_v26  ;;  %v21130_v46 = vld [vmem:[#allocation2 + $0x500] sm:$0xff]  ;;  %v25501_v41 = vand.u32 4294901760, %v21101_v34 }
  0xe9   :  { %26042 = vst [vmem:[#allocation124_spill] sm:$0xff] %v21095_v40  ;;  %26043 = vst [vmem:[#allocation125_spill] sm:$0xff] %v21101_v34  ;;  %v25504_v22 = vand.u32 4294901760, %v21114_v44 }
  0xea   :  { %26044 = vst [vmem:[#allocation126_spill] sm:$0xff] %v21106_v15  ;;  %26045 = vst [vmem:[#allocation127_spill] sm:$0xff] %v21111_v0  ;;  %v21128_v15 = vsub.f32 %v21078_v26, %v26051_v11  ;;  %v26054_v0 = vand.u32 4294901760, %v21095_v40  ;;  %v21148_v11 = vsub.f32 %v21101_v34, %v25501_v41  ;;  %v21151_v26 = vld [vmem:[#allocation2 + $0x518] sm:$0xff] }
  0xeb   :  { %26046 = vst [vmem:[#allocation128_spill] sm:$0xff] %v21114_v44  ;;  %26048 = vst [vmem:[#allocation130_spill] sm:$0xff] %v21118_v27  ;;  %v21158_v42 = vsub.f32 %v21114_v44, %v25504_v22  ;;  %v21179_v44 = vld [vmem:[#allocation2 + $0x528] sm:$0xff] }
  0xec   :  { %26050 = vst [vmem:[#allocation131_spill] sm:$0xff] %v21123_v29  ;;  %26052 = vst [vmem:[#allocation132_spill] sm:$0xff] %v21128_v15  ;;  %v21136_v54 = vsub.f32 %v21095_v40, %v26054_v0  ;;  %v21141_v29 = vld [vmem:[#allocation2 + $0x4e0] sm:$0xff]  ;;  %v21153_v0 = vld [vmem:[#allocation2 + $0x530] sm:$0xff]  ;;  %v26061_v40 = vand.u32 4294901760, %v21118_v27 }
  0xed   :  { %26053 = vst [vmem:[#allocation133_spill] sm:$0xff] %v21130_v46  ;;  %26056 = vst [vmem:[#allocation135_spill] sm:$0xff] %v21143_v38  ;;  %v21170_v15 = vld [vmem:[#allocation2 + $0x510] sm:$0xff]  ;;  %v25514_v22 = vand.u32 4294901760, %v21141_v29 }
  0xee   :  { %26055 = vst [vmem:[#allocation134_spill] sm:$0xff] %v21136_v54  ;;  %26057 = vst [vmem:[#allocation136_spill] sm:$0xff] %v21148_v11  ;;  %v21163_v54 = vsub.f32 %v21116_v1, %v26059_v5  ;;  %v21168_v41 = vsub.f32 %v21118_v27, %v26061_v40  ;;  %v26063_v11 = vand.u32 4294901760, %v21130_v46  ;;  %v25519_v5 = vand.u32 4294901760, %v21151_v26  ;;  %v21183_v1 = vld [vmem:[#allocation2 + $0x548] sm:$0xff]  ;;  %v21185_v40 = vld [vmem:[#allocation2 + $0x560] sm:$0xff] }
  0xef   :  { %26058 = vst [vmem:[#allocation137_spill] sm:$0xff] %v21158_v42  ;;  %v25516_v42 = vand.u32 4294901760, %v21143_v38  ;;  %v26068_v27 = vand.u32 4294901760, %v21153_v0 }
  0xf0   :  { %26060 = vst [vmem:[#allocation138_spill] sm:$0xff] %v21163_v54  ;;  %26062 = vst [vmem:[#allocation139_spill] sm:$0xff] %v21168_v41  ;;  %v21175_v34 = vsub.f32 %v21130_v46, %v26063_v11  ;;  %v21190_v41 = vsub.f32 %v21141_v29, %v25514_v22  ;;  %v21198_v46 = vld [vmem:[#allocation2 + $0x540] sm:$0xff]  ;;  %v21203_v54 = vsub.f32 %v21151_v26, %v25519_v5  ;;  %v25524_v22 = vand.u32 4294901760, %v21179_v44 }
  0xf1   :  { %v21195_v11 = vsub.f32 %v21143_v38, %v25516_v42  ;;  %v21208_v53 = vsub.f32 %v21153_v0, %v26068_v27  ;;  %v25527_v38 = vand.u32 4294901760, %v21185_v40 }
  0xf2   :  { %26064 = vst [vmem:[#allocation140_spill] sm:$0xff] %v21175_v34  ;;  %26065 = vst [vmem:[#allocation141_spill] sm:$0xff] %v21190_v41  ;;  %v25522_v34 = vand.u32 4294901760, %v21170_v15  ;;  %v21211_v41 = vld [vmem:[#allocation2 + $0x558] sm:$0xff]  ;;  %v21223_v5 = vsub.f32 %v21179_v44, %v25524_v22 }
  0xf3   :  { %26066 = vst [vmem:[#allocation142_spill] sm:$0xff] %v21195_v11  ;;  %26067 = vst [vmem:[#allocation143_spill] sm:$0xff] %v21203_v54  ;;  %v25525_v11 = vand.u32 4294901760, %v21183_v1 }
  0xf4   :  { %26069 = vst [vmem:[#allocation144_spill] sm:$0xff] %v21208_v53  ;;  %v21216_v42 = vsub.f32 %v21170_v15, %v25522_v34  ;;  %26071 = vst [vmem:[#allocation146_spill] sm:$0xff] %v21223_v5  ;;  %v25529_v53 = vand.u32 4294901760, %v21198_v46  ;;  %v21236_v34 = vsub.f32 %v21185_v40, %v25527_v38 }
  0xf5   :  { %v21231_v54 = vsub.f32 %v21183_v1, %v25525_v11 }
  0xf6   :  { %26070 = vst [vmem:[#allocation145_spill] sm:$0xff] %v21216_v42  ;;  %26073 = vst [vmem:[#allocation148_spill] sm:$0xff] %v21236_v34  ;;  %v25531_v42 = vand.u32 4294901760, %v21211_v41  ;;  %v21242_v22 = vsub.f32 %v21198_v46, %v25529_v53 }
  0xf7   :  { %26072 = vst [vmem:[#allocation147_spill] sm:$0xff] %v21231_v54 }
  0xf8   :  { %26074 = vst [vmem:[#allocation149_spill] sm:$0xff] %v21242_v22  ;;  %v21249_v11 = vsub.f32 %v21211_v41, %v25531_v42  ;;  %v60_v42 = vlaneseq }
  0xfa   :  { %26075 = vst [vmem:[#allocation150_spill] sm:$0xff] %v21249_v11  ;;  %v61_v32 = vshrl.u32 %v60_v42, 7 }
  0xfc   :  { %v62_v54 = vsub.s32 0, %v61_v32  ;;  %v66_v33 = vsub.s32 1, %v61_v32 }
  0xfe   :  { %v63_v38 = vrot.slane %v56_v58, %v62_v54  ;;  %v1206_v3 = vrot.slane %v58_v28, %v62_v54  ;;  %v67_v37 = vrot.slane %v56_v58, %v66_v33  ;;  %v1210_v34 = vrot.slane %v58_v28, %v66_v33 }
  0xff   :  { %v17228_v33 = vpack.c.bf16 %v20200_v25, %v20195_v14 }
 0x11f   :  { %v662_v11 = vpop.f32.mrb[0].mxu0 }
 0x120   :  { %v664_v27 = vpop.f32.mrb[1].mxu0  ;;  %v19402_v17 = vadd.f32 %v662_v11, %v63_v38 }
 0x121   :  { %v19403_v43 = vadd.f32 %v664_v27, %v67_v37 }
 0x123   :  { %v669_v5 = vpop.f32.mrb[2].mxu0 }
 0x124   :  { %v671_v35 = vpop.f32.mrb[3].mxu0  ;;  %v19404_v63 = vadd.f32 %v669_v5, %v63_v38  ;;  %v17238_v38 = vpack.c.bf16 %v20360_v12, %v20355_v56  ;;  %v21608_v56 = vld [vmem:[#allocation2 + $0x370] sm:$0xff] }
 0x125   :  { %v19405_v2 = vadd.f32 %v671_v35, %v67_v37 }
 0x12d   :  { %v15069_v22 = vpop.f32.mrb[0].mxu1 }
 0x12e   :  { %v21273_v23 = vpop.f32.mrb[1].mxu1 }
 0x14f   :  { %v1798_v9 = vpop.f32.mrb[4].mxu0 }
 0x150   :  { %v19408_v53 = vadd.f32 %v1798_v9, %v1206_v3  ;;  %v1800_v62 = vpop.f32.mrb[5].mxu0 }
 0x151   :  { %v19409_v24 = vadd.f32 %v1800_v62, %v1210_v34  ;;  %v70_v62 = vsub.s32 2, %v61_v32 }
 0x152   :  { %v2338_v13 = vmul.f32 %v19408_v53, %v19402_v17  ;;  %v17230_v17 = vpack.c.bf16 %v20213_v59, %v20208_v57  ;;  %v17236_v53 = vpack.c.bf16 %v20328_v18, %v20323_v8 }
 0x153   :  { %v2339_v45 = vmul.f32 %v19409_v24, %v19403_v43  ;;  %v1805_v20 = vpop.f32.mrb[6].mxu0 }
 0x154   :  { %v21275_v47 = vand.u32 4294901760, %v2338_v13  ;;  %v19410_v42 = vadd.f32 %v1805_v20, %v1206_v3  ;;  %v1807_v16 = vpop.f32.mrb[7].mxu0  ;;  %v71_v3 = vrot.slane %v56_v58, %v70_v62  ;;  %v1214_v58 = vrot.slane %v58_v28, %v70_v62 }
 0x155   :  { %v21277_v10 = vand.u32 4294901760, %v2339_v45  ;;  %v19411_v54 = vadd.f32 %v1807_v16, %v1210_v34  ;;  %v26088_v28 = vand.u32 4294901760, %v21001_v61  ;;  %v26089_v62 = vand.u32 4294901760, %v21003_v31 }
 0x156   :  { %26076 = vst [vmem:[#allocation151_spill] sm:$0xff] %v21275_v47  ;;  %v21282_v9 = vsub.f32 %v2338_v13, %v21275_v47  ;;  %v2341_v11 = vmul.f32 %v19410_v42, %v19404_v63  ;;  %v17232_v63 = vpack.c.bf16 %v20237_v52, %v20232_v51  ;;  %v26084_v42 = vand.u32 4294901760, %v20994_v39 }
 0x157   :  { %v21287_v43 = vsub.f32 %v2339_v45, %v21277_v10  ;;  %v2342_v24 = vmul.f32 %v19411_v54, %v19405_v2  ;;  %3034 = vmatprep.mubr.f32.mxu0 %v21277_v10  ;;  %v17234_v45 = vpack.c.bf16 %v20318_v6, %v20313_v50  ;;  %v26085_v54 = vand.u32 4294901760, %v20996_v49 }
 0x158   :  { %26077 = vst [vmem:[#allocation152_spill] sm:$0xff] %v21282_v9  ;;  %v21290_v20 = vand.u32 4294901760, %v2341_v11  ;;  %3036 = vmatmul.mubr.f32.vlgmr.msra.gmra.mrb[8].mxu0 %v21275_v47  ;;  %v21294_v16 = vand.u32 4294901760, %v21282_v9  ;;  %v19407_v49 = vadd.f32 %v21273_v23, %v71_v3  ;;  %v26092_v23 = vand.u32 4294901760, %v21015_v48 }
 0x159   :  { %v21296_v13 = vand.u32 4294901760, %v2342_v24  ;;  %17229 = vmatpush1.bf16.msra.mxu0 %v17228_v33  ;;  %v21301_v35 = vand.u32 4294901760, %v21287_v43  ;;  %v21331_v33 = vpack.c.bf16 %v26085_v54, %v26084_v42  ;;  %v26091_v42 = vld [vmem:[#allocation23_spill] sm:$0xff] }
 0x15a   :  { %26078 = vst [vmem:[#allocation153_spill] sm:$0xff] %v21290_v20  ;;  %26079 = vst [vmem:[#allocation154_spill] sm:$0xff] %v21294_v16  ;;  %v21304_v2 = vsub.f32 %v2341_v11, %v21290_v20  ;;  %17231 = vmatprep.subr.bf16.mxu0 %v17230_v17  ;;  %v2625_v32 = vsub.f32 %v21282_v9, %v21294_v16  ;;  %v19406_v17 = vadd.f32 %v15069_v22, %v71_v3  ;;  %v26215_v16 = vld [vmem:[#allocation84_spill] sm:$0xff] }
 0x15b   :  { %26080 = vst [vmem:[#allocation155_spill] sm:$0xff] %v21296_v13  ;;  %v21311_v37 = vsub.f32 %v2342_v24, %v21296_v13  ;;  %3042 = vmatprep.mubr.f32.mxu0 %v21296_v13  ;;  %v2619_v34 = vsub.f32 %v21287_v43, %v21301_v35  ;;  %26086 = vst [vmem:[#allocation159_spill] sm:$0xff] %v21331_v33  ;;  %v17240_v54 = vpack.c.bf16 %v26091_v42, %v20371_v30 }
 0x15c   :  { %26081 = vst [vmem:[#allocation156_spill] sm:$0xff] %v21304_v2  ;;  %3044 = vmatmul.mubr.f32.gmra.mrb[10].mxu0 %v21290_v20  ;;  %v21322_v5 = vand.u32 4294901760, %v21304_v2  ;;  %v21336_v24 = vand.u32 4294901760, %v2625_v32  ;;  %v26093_v3 = vand.u32 4294901760, %v21020_v4  ;;  %v26101_v4 = vld [vmem:[#allocation30_spill] sm:$0xff] }
 0x15d   :  { %26082 = vst [vmem:[#allocation157_spill] sm:$0xff] %v21311_v37  ;;  %17233 = vmatpush1.bf16.msra.mxu0 %v17232_v63  ;;  %3244 = vmatprep.mubr.f32.mxu0 %v21287_v43  ;;  %v21325_v27 = vand.u32 4294901760, %v2619_v34  ;;  %v21334_v11 = vand.u32 4294901760, %v21311_v37  ;;  %v21342_v63 = vpack.c.bf16 %v26089_v62, %v26088_v28  ;;  %v15135_v34 = vpop.f32.mrb[2].mxu1 }
 0x15e   :  { %26083 = vst [vmem:[#allocation158_spill] sm:$0xff] %v21322_v5  ;;  %17235 = vmatprep.subr.bf16.mxu0 %v17234_v45  ;;  %v2641_v39 = vsub.f32 %v21304_v2, %v21322_v5  ;;  %v19412_v45 = vadd.f32 %v15135_v34, %v1214_v58  ;;  %v2328_v32 = vpop.f32.mrb[3].mxu1  ;;  %v21360_v28 = vpack.c.bf16 %v26093_v3, %v26092_v23  ;;  %v26105_v23 = vld [vmem:[#allocation111_spill] sm:$0xff] }
 0x15f   :  { %26087 = vst [vmem:[#allocation160_spill] sm:$0xff] %v21334_v11  ;;  %26090 = vst [vmem:[#allocation161_spill] sm:$0xff] %v21342_v63  ;;  %2621 = vmatprep.mubr.f32.mxu1 %v21325_v27  ;;  %v2635_v22 = vsub.f32 %v21311_v37, %v21334_v11  ;;  %v19413_v61 = vadd.f32 %v2328_v32, %v1214_v58  ;;  %v26096_v58 = vld [vmem:[#allocation29_spill] sm:$0xff]  ;;  %v26106_v3 = vand.u32 4294901760, %v26105_v23 }
 0x160   :  { %2627 = vmatmul.mubr.f32.vlgmr.msra.gmra.mrb[4].mxu1 %v21336_v24  ;;  %26094 = vst [vmem:[#allocation162_spill] sm:$0xff] %v21360_v28  ;;  %v2343_v62 = vmul.f32 %v19412_v45, %v19406_v17  ;;  %v21363_v34 = vand.u32 4294901760, %v2641_v39  ;;  %v26103_v39 = vld [vmem:[#allocation110_spill] sm:$0xff] }
 0x161   :  { %17237 = vmatpush1.bf16.msra.mxu0 %v17236_v53  ;;  %17485 = vmatpush1.bf16.msra.mxu1 %v21331_v33  ;;  %v21352_v31 = vand.u32 4294901760, %v2635_v22  ;;  %v26095_v53 = vld [vmem:[#allocation27_spill] sm:$0xff]  ;;  %v26097_v22 = vand.u32 4294901760, %v21022_v7  ;;  %v26098_v33 = vld [vmem:[#allocation109_spill] sm:$0xff]  ;;  %v2340_v48 = vmul.f32 %v19413_v61, %v19407_v49  ;;  %v26104_v45 = vand.u32 4294901760, %v26103_v39  ;;  %v26116_v39 = vld [vmem:[#allocation38_spill] sm:$0xff] }
 0x162   :  { %17239 = vmatprep.subr.bf16.mxu0 %v17238_v38  ;;  %17487 = vmatprep.subr.bf16.mxu1 %v21342_v63  ;;  %v17242_v32 = vpack.c.bf16 %v26096_v58, %v26095_v53  ;;  %v26099_v12 = vand.u32 4294901760, %v26098_v33  ;;  %v26102_v38 = vld [vmem:[#allocation31_spill] sm:$0xff]  ;;  %v26109_v33 = vld [vmem:[#allocation36_spill] sm:$0xff]  ;;  %v26115_v58 = vmov 0.0   ;;  %v21432_v30 = vand.u32 4294901760, %v2343_v62 }
 0x163   :  { %2637 = vmatprep.mubr.f32.mxu1 %v21352_v31  ;;  %v17244_v17 = vpack.c.bf16 %v26102_v38, %v26101_v4  ;;  %v21382_v7 = vpack.c.bf16 %v26106_v3, %v26104_v45  ;;  %v26110_v61 = vld [vmem:[#allocation115_spill] sm:$0xff]  ;;  %v26117_v45 = vld [vmem:[#allocation40_spill] sm:$0xff]  ;;  %v21412_v53 = vand.u32 4294901760, %v2340_v48 }
 0x164   :  { %v21371_v42 = vpack.c.bf16 %v26099_v12, %v26097_v22  ;;  %2643 = vmatmul.mubr.f32.gmra.mrb[6].mxu1 %v21363_v34  ;;  %v26108_v12 = vld [vmem:[#allocation35_spill] sm:$0xff]  ;;  %v26111_v22 = vand.u32 4294901760, %v26110_v61  ;;  %v17248_v23 = vpack.c.bf16 %v26117_v45, %v26116_v39  ;;  %v26123_v61 = vld [vmem:[#allocation41_spill] sm:$0xff] }
 0x165   :  { %17241 = vmatpush1.bf16.msra.mxu0 %v17240_v54  ;;  %17489 = vmatpush1.bf16.msra.mxu1 %v21360_v28  ;;  %26107 = vst [vmem:[#allocation110_spill] sm:$0xff] %v21382_v7  ;;  %v17246_v49 = vpack.c.bf16 %v26109_v33, %v26108_v12  ;;  %v26112_v54 = vld [vmem:[#allocation116_spill] sm:$0xff] }
 0x166   :  { %26100 = vst [vmem:[#allocation109_spill] sm:$0xff] %v21371_v42  ;;  %17243 = vmatprep.subr.bf16.mxu0 %v17242_v32  ;;  %17491 = vmatprep.subr.bf16.mxu1 %v21371_v42  ;;  %v26113_v63 = vand.u32 4294901760, %v26112_v54  ;;  %v26118_v32 = vld [vmem:[#allocation119_spill] sm:$0xff]  ;;  %v26120_v42 = vld [vmem:[#allocation120_spill] sm:$0xff] }
 0x167   :  { %3930 = vmatprep.mubr.f32.mxu1 %v26115_v58  ;;  %v26119_v3 = vand.u32 4294901760, %v26118_v32  ;;  %v26121_v38 = vand.u32 4294901760, %v26120_v42  ;;  %v26125_v54 = vld [vmem:[#allocation124_spill] sm:$0xff]  ;;  %26130 = vst [vmem:[#allocation119_spill] sm:$0xff] %v21412_v53  ;;  %v26131_v42 = vld [vmem:[#allocation45_spill] sm:$0xff] }
 0x168   :  { %v21391_v28 = vpack.c.bf16 %v26113_v63, %v26111_v22  ;;  %v26124_v63 = vld [vmem:[#allocation43_spill] sm:$0xff]  ;;  %v26126_v33 = vand.u32 4294901760, %v26125_v54  ;;  %v26138_v54 = vld [vmem:[#allocation48_spill] sm:$0xff] }
 0x169   :  { %17245 = vmatpush1.bf16.msra.mxu0 %v17244_v17  ;;  %17493 = vmatpush1.bf16.msra.mxu1 %v21382_v7  ;;  %v21401_v4 = vpack.c.bf16 %v26121_v38, %v26119_v3  ;;  %v17250_v22 = vpack.c.bf16 %v26124_v63, %v26123_v61  ;;  %v26127_v17 = vld [vmem:[#allocation125_spill] sm:$0xff]  ;;  %v26132_v38 = vld [vmem:[#allocation46_spill] sm:$0xff] }
 0x16a   :  { %26114 = vst [vmem:[#allocation111_spill] sm:$0xff] %v21391_v28  ;;  %17247 = vmatprep.subr.bf16.mxu0 %v17246_v49  ;;  %17495 = vmatprep.subr.bf16.mxu1 %v21391_v28  ;;  %v26128_v12 = vand.u32 4294901760, %v26127_v17  ;;  %v17252_v32 = vpack.c.bf16 %v26132_v38, %v26131_v42  ;;  %v26133_v49 = vld [vmem:[#allocation128_spill] sm:$0xff]  ;;  %v26135_v28 = vld [vmem:[#allocation129_spill] sm:$0xff]  ;;  %v26140_v17 = vld [vmem:[#allocation130_spill] sm:$0xff] }
 0x16b   :  { %26122 = vst [vmem:[#allocation115_spill] sm:$0xff] %v21401_v4  ;;  %v26134_v3 = vand.u32 4294901760, %v26133_v49  ;;  %v26136_v45 = vand.u32 4294901760, %v26135_v28  ;;  %v26141_v63 = vand.u32 4294901760, %v26140_v17  ;;  %26145 = vst [vmem:[#allocation125_spill] sm:$0xff] %v21432_v30  ;;  %v21435_v49 = vsub.f32 %v2340_v48, %v21412_v53  ;;  %v26147_v28 = vld [vmem:[#allocation51_spill] sm:$0xff] }
 0x16c   :  { %v21410_v7 = vpack.c.bf16 %v26128_v12, %v26126_v33  ;;  %v26139_v12 = vld [vmem:[#allocation49_spill] sm:$0xff]  ;;  %v26155_v48 = vand.u32 4294901760, %v21151_v26  ;;  %v21455_v53 = vld [vmem:[#allocation2 + $0x280] sm:$0xff]  ;;  %v21597_v42 = vld [vmem:[#allocation2 + $0x1d8] sm:$0xff] }
 0x16d   :  { %17249 = vmatpush1.bf16.msra.mxu0 %v17248_v23  ;;  %17497 = vmatpush1.bf16.msra.mxu1 %v21401_v4  ;;  %v21421_v39 = vpack.c.bf16 %v26136_v45, %v26134_v3  ;;  %v17254_v33 = vpack.c.bf16 %v26139_v12, %v26138_v54  ;;  %v26142_v23 = vld [vmem:[#allocation133_spill] sm:$0xff]  ;;  %26146 = vst [vmem:[#allocation128_spill] sm:$0xff] %v21435_v49  ;;  %v26148_v45 = vld [vmem:[#allocation52_spill] sm:$0xff]  ;;  %v26149_v3 = vand.u32 4294901760, %v21141_v29  ;;  %v26197_v54 = vld [vmem:[#allocation75_spill] sm:$0xff]  ;;  %v26205_v18 = vand.u32 4294901760, %v21455_v53 }
 0x16e   :  { %26129 = vst [vmem:[#allocation116_spill] sm:$0xff] %v21410_v7  ;;  %17251 = vmatprep.subr.bf16.mxu0 %v17250_v22  ;;  %17499 = vmatprep.subr.bf16.mxu1 %v21410_v7  ;;  %v26143_v61 = vand.u32 4294901760, %v26142_v23  ;;  %v17256_v22 = vpack.c.bf16 %v26148_v45, %v26147_v28  ;;  %v26150_v7 = vld [vmem:[#allocation135_spill] sm:$0xff]  ;;  %v21460_v29 = vsub.f32 %v2343_v62, %v21432_v30  ;;  %v26165_v62 = vld [vmem:[#allocation60_spill] sm:$0xff]  ;;  %v26167_v30 = vand.u32 4294901760, %v21183_v1  ;;  %v21496_v1 = vld [vmem:[#allocation2 + $0x2c8] sm:$0xff] }
 0x16f   :  { %26137 = vst [vmem:[#allocation120_spill] sm:$0xff] %v21421_v39  ;;  %v26151_v12 = vand.u32 4294901760, %v26150_v7  ;;  %v21457_v45 = vld [vmem:[#allocation2 + $0x298] sm:$0xff]  ;;  %v21463_v7 = vand.u32 4294901760, %v21435_v49  ;;  %v2370_v38 = vld [vmem:[#allocation2 + $0x1c0] sm:$0xff] }
 0x170   :  { %v21430_v4 = vpack.c.bf16 %v26143_v61, %v26141_v63  ;;  %v26153_v61 = vld [vmem:[#allocation54_spill] sm:$0xff]  ;;  %v26154_v63 = vld [vmem:[#allocation55_spill] sm:$0xff]  ;;  %26158 = vst [vmem:[#allocation133_spill] sm:$0xff] %v21460_v29 }
 0x171   :  { %17253 = vmatpush1.bf16.msra.mxu0 %v17252_v32  ;;  %17501 = vmatpush1.bf16.msra.mxu1 %v21421_v39  ;;  %v21444_v17 = vpack.c.bf16 %v26151_v12, %v26149_v3  ;;  %v17258_v23 = vpack.c.bf16 %v26154_v63, %v26153_v61  ;;  %v26156_v32 = vand.u32 4294901760, %v21153_v0  ;;  %26159 = vst [vmem:[#allocation135_spill] sm:$0xff] %v21463_v7  ;;  %v26160_v12 = vld [vmem:[#allocation57_spill] sm:$0xff]  ;;  %v26162_v0 = vand.u32 4294901760, %v21170_v15  ;;  %v21526_v15 = vld [vmem:[#allocation2 + $0x2f8] sm:$0xff] }
 0x172   :  { %26144 = vst [vmem:[#allocation124_spill] sm:$0xff] %v21430_v4  ;;  %17255 = vmatprep.subr.bf16.mxu0 %v17254_v33  ;;  %17503 = vmatprep.subr.bf16.mxu1 %v21430_v4  ;;  %v26161_v33 = vld [vmem:[#allocation58_spill] sm:$0xff]  ;;  %v26163_v3 = vand.u32 4294901760, %v21179_v44  ;;  %v21487_v44 = vld [vmem:[#allocation2 + $0x118] sm:$0xff]  ;;  %v21583_v61 = vld [vmem:[#allocation2 + $0x1a8] sm:$0xff] }
 0x173   :  { %26152 = vst [vmem:[#allocation129_spill] sm:$0xff] %v21444_v17  ;;  %v21453_v39 = vpack.c.bf16 %v26156_v32, %v26155_v48  ;;  %v17260_v26 = vpack.c.bf16 %v26161_v33, %v26160_v12  ;;  %v26166_v32 = vld [vmem:[#allocation61_spill] sm:$0xff]  ;;  %v21485_v12 = vld [vmem:[#allocation2 + $0x100] sm:$0xff]  ;;  %v2421_v28 = vld [vmem:[#allocation2 + $0x358] sm:$0xff]  ;;  %v26208_v5 = vand.u32 4294901760, %v21487_v44 }
 0x174   :  { %v21472_v48 = vpack.c.bf16 %v26163_v3, %v26162_v0  ;;  %v17262_v4 = vpack.c.bf16 %v26166_v32, %v26165_v62  ;;  %v21492_v0 = vand.u32 4294901760, %v21460_v29  ;;  %v21494_v3 = vld [vmem:[#allocation2 + $0x2b0] sm:$0xff]  ;;  %v21524_v33 = vld [vmem:[#allocation2 + $0x2e0] sm:$0xff]  ;;  %v26207_v8 = vand.u32 4294901760, %v21485_v12 }
 0x175   :  { %26157 = vst [vmem:[#allocation130_spill] sm:$0xff] %v21453_v39  ;;  %17257 = vmatpush1.bf16.msra.mxu0 %v17256_v22  ;;  %17505 = vmatpush1.bf16.msra.mxu1 %v21444_v17  ;;  %v26168_v22 = vand.u32 4294901760, %v21185_v40  ;;  %v26172_v40 = vand.u32 4294901760, %v21211_v41  ;;  %v26180_v41 = vand.u32 4294901760, %v21487_v44  ;;  %v21631_v6 = vsub.f32 %v21487_v44, %v26208_v5 }
 0x176   :  { %26164 = vst [vmem:[#allocation163_spill] sm:$0xff] %v21472_v48  ;;  %17259 = vmatprep.subr.bf16.mxu0 %v17258_v23  ;;  %17507 = vmatprep.subr.bf16.mxu1 %v21453_v39  ;;  %v3934_v23 = vsub.f32 %v21435_v49, %v21463_v7  ;;  %26170 = vst [vmem:[#allocation165_spill] sm:$0xff] %v21492_v0  ;;  %v26174_v39 = vand.u32 4294901760, %v21455_v53  ;;  %v26175_v7 = vand.u32 4294901760, %v21457_v45  ;;  %v26184_v49 = vand.u32 4294901760, %v21496_v1 }
 0x177   :  { %v21481_v17 = vpack.c.bf16 %v26168_v22, %v26167_v30  ;;  %v26171_v30 = vand.u32 4294901760, %v21198_v46  ;;  %v21516_v46 = vld [vmem:[#allocation2 + $0x148] sm:$0xff]  ;;  %v26213_v11 = vand.u32 4294901760, %v21494_v3 }
 0x179   :  { %26169 = vst [vmem:[#allocation164_spill] sm:$0xff] %v21481_v17  ;;  %17261 = vmatpush1.bf16.msra.mxu0 %v17260_v26  ;;  %17509 = vmatpush1.bf16.msra.mxu1 %v21472_v48  ;;  %v21503_v22 = vpack.c.bf16 %v26172_v40, %v26171_v30  ;;  %v21512_v26 = vpack.c.bf16 %v26175_v7, %v26174_v39  ;;  %v21514_v48 = vld [vmem:[#allocation2 + $0x130] sm:$0xff]  ;;  %v21520_v40 = vand.u32 4294901760, %v3934_v23  ;;  %v26179_v7 = vand.u32 4294901760, %v21485_v12 }
 0x17a   :  { %17263 = vmatprep.subr.bf16.mxu0 %v17262_v4  ;;  %17511 = vmatprep.subr.bf16.mxu1 %v21481_v17  ;;  %v3945_v4 = vsub.f32 %v21460_v29, %v21492_v0  ;;  %v26178_v39 = vpack.c.bf16 %v20715_v60, %v20709_v36  ;;  %v26182_v17 = vpack.c.bf16 %v20738_v21, %v20732_v55  ;;  %v21544_v29 = vld [vmem:[#allocation2 + $0x160] sm:$0xff]  ;;  %v4802_v0 = vand.u32 4294901760, %v21526_v15  ;;  %v21556_v23 = vld [vmem:[#allocation2 + $0x310] sm:$0xff]  ;;  %v21558_v21 = vld [vmem:[#allocation2 + $0x328] sm:$0xff] }
 0x17b   :  { %26173 = vst [vmem:[#allocation166_spill] sm:$0xff] %v21503_v22  ;;  %26176 = vst [vmem:[#allocation167_spill] sm:$0xff] %v21512_v26  ;;  %v21536_v30 = vpack.c.bf16 %v26180_v41, %v26179_v7  ;;  %v4799_v7 = vand.u32 4294901760, %v21524_v33  ;;  %v26187_v55 = vld [vmem:[#allocation69_spill] sm:$0xff]  ;;  %v4751_v32 = vand.u32 4294901760, %v21544_v29 }
 0x17c   :  { %26177 = vst [vmem:[#allocation168_spill] sm:$0xff] %v21520_v40  ;;  %v26188_v60 = vpack.c.bf16 %v20761_v19, %v26187_v55  ;;  %v21581_v55 = vld [vmem:[#allocation2 + $0x190] sm:$0xff]  ;;  %v21679_v59 = vsub.f32 %v21526_v15, %v4802_v0 }
 0x17d   :  { %17265 = vmatpush1.bf16.msra.mxu0 %v26178_v39  ;;  %17513 = vmatpush1.bf16.msra.mxu1 %v21503_v22  ;;  %26181 = vst [vmem:[#allocation169_spill] sm:$0xff] %v21536_v30  ;;  %v21546_v39 = vld [vmem:[#allocation2 + $0x178] sm:$0xff]  ;;  %v26183_v22 = vand.u32 4294901760, %v21494_v3  ;;  %v4757_v19 = vand.u32 4294901760, %v21581_v55  ;;  %v21676_v51 = vsub.f32 %v21524_v33, %v4799_v7  ;;  %v21682_v57 = vsub.f32 %v21544_v29, %v4751_v32 }
 0x17e   :  { %17267 = vmatprep.subr.bf16.mxu0 %v26182_v17  ;;  %17675 = vmatprep.subr.bf16.mxu1 %v21512_v26  ;;  %v21561_v17 = vand.u32 4294901760, %v3945_v4  ;;  %v4754_v62 = vand.u32 4294901760, %v21546_v39  ;;  %v26192_v4 = vld [vmem:[#allocation73_spill] sm:$0xff]  ;;  %v26229_v29 = vand.u32 4294901760, %v21558_v21 }
 0x17f   :  { %v21552_v41 = vpack.c.bf16 %v26184_v49, %v26183_v22  ;;  %v26189_v49 = vand.u32 4294901760, %v21514_v48  ;;  %v26190_v22 = vand.u32 4294901760, %v21516_v46  ;;  %v21610_v26 = vld [vmem:[#allocation2 + $0x388] sm:$0xff] }
 0x180   :  { %3936 = vmatmul.mubr.f32.vlgmr.msra.gmra.mrb[8].mxu1 %v21520_v40  ;;  %26186 = vst [vmem:[#allocation171_spill] sm:$0xff] %v21561_v17  ;;  %v26193_v40 = vld [vmem:[#allocation72_spill] sm:$0xff]  ;;  %v4820_v44 = vand.u32 4294901760, %v21610_v26 }
 0x181   :  { %26185 = vst [vmem:[#allocation170_spill] sm:$0xff] %v21552_v41  ;;  %17269 = vmatpush1.bf16.msra.mxu0 %v26188_v60  ;;  %17677 = vmatpush3.bf16.msra.mxu1 %v21536_v30  ;;  %v21571_v36 = vpack.c.bf16 %v26190_v22, %v26189_v49  ;;  %v26194_v63 = vpack.c.bf16 %v26192_v4, %v26193_v40  ;;  %v4805_v60 = vand.u32 4294901760, %v21556_v23  ;;  %v2418_v22 = vld [vmem:[#allocation2 + $0x340] sm:$0xff]  ;;  %v4760_v40 = vand.u32 4294901760, %v21583_v61  ;;  %v26201_v30 = vld [vmem:[#allocation78_spill] sm:$0xff] }
 0x182   :  { %3941 = vmatprep.mubr.f32.mxu1 %v26115_v58  ;;  %17679 = vmatprep.subr.bf16.mxu1 %v21552_v41  ;;  %v21586_v49 = vpack.c.bf16 %v4802_v0, %v4799_v7  ;;  %v26196_v58 = vld [vmem:[#allocation76_spill] sm:$0xff]  ;;  %v26200_v41 = vld [vmem:[#allocation79_spill] sm:$0xff] }
 0x183   :  { %26191 = vst [vmem:[#allocation172_spill] sm:$0xff] %v21571_v36  ;;  %17271 = vmatprep.subr.bf16.mxu0 %v26194_v63  ;;  %v26198_v4 = vpack.c.bf16 %v26196_v58, %v26197_v54  ;;  %v21593_v63 = vpack.c.bf16 %v4754_v62, %v4751_v32  ;;  %v26203_v58 = vand.u32 4294901760, %v21558_v21  ;;  %v4811_v54 = vand.u32 4294901760, %v2418_v22  ;;  %v21697_v32 = vld [vmem:[#allocation2 + $0x220] sm:$0xff] }
 0x184   :  { %26195 = vst [vmem:[#allocation173_spill] sm:$0xff] %v21586_v49  ;;  %3947 = vmatmul.mubr.f32.gmra.mrb[10].mxu1 %v21561_v17  ;;  %v26202_v17 = vpack.c.bf16 %v26200_v41, %v26201_v30  ;;  %v26206_v41 = vand.u32 4294901760, %v21457_v45  ;;  %v4766_v30 = vand.u32 4294901760, %v21597_v42  ;;  %v21702_v0 = vsub.f32 %v21556_v23, %v4805_v60 }
 0x185   :  { %17273 = vmatpush1.bf16.msra.mxu0 %v26198_v4  ;;  %17681 = vmatpush3.bf16.msra.mxu1 %v21571_v36  ;;  %26199 = vst [vmem:[#allocation174_spill] sm:$0xff] %v21593_v63  ;;  %v21605_v4 = vpack.c.bf16 %v26203_v58, %v4805_v60  ;;  %v4814_v36 = vand.u32 4294901760, %v2421_v28  ;;  %v4763_v58 = vand.u32 4294901760, %v2370_v38  ;;  %v21718_v23 = vsub.f32 %v21581_v55, %v4757_v19  ;;  %v26235_v55 = vld [vmem:[#allocation92_spill] sm:$0xff] }
 0x186   :  { %4839 = vmatprep.mubr.f32.mxu1 %v21325_v27  ;;  %17275 = vmatprep.subr.bf16.mxu0 %v26202_v17  ;;  %v21615_v27 = vsub.f32 %v21455_v53, %v26205_v18  ;;  %v21620_v17 = vsub.f32 %v21457_v45, %v26206_v41  ;;  %v26209_v18 = vld [vmem:[#allocation82_spill] sm:$0xff]  ;;  %v26210_v53 = vld [vmem:[#allocation81_spill] sm:$0xff]  ;;  %v21637_v45 = vpack.c.bf16 %v4760_v40, %v4757_v19 }
 0x187   :  { %26204 = vst [vmem:[#allocation175_spill] sm:$0xff] %v21605_v4  ;;  %17683 = vmatprep.subr.bf16.mxu1 %v21586_v49  ;;  %v21626_v49 = vsub.f32 %v21485_v12, %v26207_v8  ;;  %v26211_v50 = vpack.c.bf16 %v26209_v18, %v26210_v53  ;;  %v21639_v41 = vld [vmem:[#allocation2 + $0x1f0] sm:$0xff]  ;;  %v21644_v8 = vsub.f32 %v21494_v3, %v26213_v11  ;;  %v26214_v12 = vld [vmem:[#allocation85_spill] sm:$0xff]  ;;  %v21656_v53 = vld [vmem:[#allocation2 + $0x3a0] sm:$0xff]  ;;  %v26218_v11 = vand.u32 4294901760, %v21496_v1 }
 0x188   :  { %26212 = vst [vmem:[#allocation176_spill] sm:$0xff] %v21637_v45  ;;  %v26216_v52 = vpack.c.bf16 %v26214_v12, %v26215_v16  ;;  %v21650_v5 = vpack.c.bf16 %v4814_v36, %v4811_v54  ;;  %v21654_v18 = vld [vmem:[#allocation2 + $0x208] sm:$0xff]  ;;  %v26220_v16 = vand.u32 4294901760, %v21516_v46  ;;  %v4823_v15 = vand.u32 4294901760, %v21656_v53 }
 0x189   :  { %17277 = vmatpush1.bf16.msra.mxu0 %v26211_v50  ;;  %17685 = vmatpush3.bf16.msra.mxu1 %v21593_v63  ;;  %v4817_v50 = vand.u32 4294901760, %v21608_v56  ;;  %v21658_v63 = vld [vmem:[#allocation2 + $0x3b8] sm:$0xff]  ;;  %v21663_v3 = vsub.f32 %v21496_v1, %v26218_v11  ;;  %v21685_v1 = vsub.f32 %v21546_v39, %v4754_v62  ;;  %v21687_v11 = vpack.c.bf16 %v4766_v30, %v4763_v58  ;;  %v26226_v39 = vld [vmem:[#allocation89_spill] sm:$0xff] }
 0x18a   :  { %17279 = vmatprep.subr.bf16.mxu0 %v26216_v52  ;;  %17687 = vmatprep.subr.bf16.mxu1 %v21605_v4  ;;  %26217 = vst [vmem:[#allocation177_spill] sm:$0xff] %v21650_v5  ;;  %v26219_v52 = vand.u32 4294901760, %v21514_v48  ;;  %v21673_v4 = vsub.f32 %v21516_v46, %v26220_v16  ;;  %v4769_v16 = vand.u32 4294901760, %v21639_v41  ;;  %v4772_v33 = vand.u32 4294901760, %v21654_v18  ;;  %v21699_v62 = vld [vmem:[#allocation2 + $0x238] sm:$0xff]  ;;  %v26225_v46 = vld [vmem:[#allocation90_spill] sm:$0xff] }
 0x18b   :  { %26221 = vst [vmem:[#allocation178_spill] sm:$0xff] %v21687_v11  ;;  %v21708_v7 = vpack.c.bf16 %v4820_v44, %v4817_v50  ;;  %v21721_v60 = vsub.f32 %v21583_v61, %v4760_v40  ;;  %v21747_v61 = vld [vmem:[#allocation2 + $0x268] sm:$0xff]  ;;  %v26256_v40 = vld [vmem:[#allocation24_spill] sm:$0xff] }
 0x18c   :  { %v21668_v12 = vsub.f32 %v21514_v48, %v26219_v52  ;;  %v26222_v48 = vld [vmem:[#allocation87_spill] sm:$0xff]  ;;  %v26223_v52 = vld [vmem:[#allocation86_spill] sm:$0xff] }
 0x18d   :  { %v26224_v25 = vpack.c.bf16 %v26222_v48, %v26223_v52  ;;  %17689 = vmatpush3.bf16.msra.mxu1 %v21637_v45  ;;  %26228 = vst [vmem:[#allocation179_spill] sm:$0xff] %v21708_v7  ;;  %v21715_v45 = vsub.f32 %v21558_v21, %v26229_v29  ;;  %26230 = vst [vmem:[#allocation180_spill] sm:$0xff] %v21721_v60  ;;  %v21733_v21 = vld [vmem:[#allocation2 + $0x3e8] sm:$0xff]  ;;  %v26241_v52 = vld [vmem:[#allocation96_spill] sm:$0xff] }
 0x18e   :  { %17691 = vmatprep.subr.bf16.mxu1 %v21650_v5  ;;  %v21731_v5 = vld [vmem:[#allocation2 + $0x3d0] sm:$0xff]  ;;  %v26234_v29 = vld [vmem:[#allocation93_spill] sm:$0xff] }
 0x18f   :  { %17281 = vmatpush1.bf16.msra.mxu0 %v26224_v25  ;;  %v26227_v25 = vpack.c.bf16 %v26225_v46, %v26226_v39  ;;  %v21725_v46 = vsub.f32 %v2421_v28, %v4814_v36  ;;  %v21727_v39 = vsub.f32 %v2370_v38, %v4763_v58  ;;  %v26236_v19 = vpack.c.bf16 %v26234_v29, %v26235_v55  ;;  %v21745_v28 = vld [vmem:[#allocation2 + $0x250] sm:$0xff]  ;;  %v26240_v58 = vld [vmem:[#allocation97_spill] sm:$0xff] }
 0x190   :  { %v26238_v36 = vand.u32 4294901760, %v21658_v63  ;;  %v26242_v48 = vpack.c.bf16 %v26240_v58, %v26241_v52  ;;  %v21767_v58 = vsub.f32 %v21608_v56, %v4817_v50  ;;  %v26252_v56 = vld [vmem:[#allocation99_spill] sm:$0xff]  ;;  %v26254_v52 = vand.u32 4294901760, %v21626_v49 }
 0x191   :  { %17283 = vmatprep.subr.bf16.mxu0 %v26227_v25  ;;  %v21723_v25 = vsub.f32 %v2418_v22, %v4811_v54  ;;  %26232 = vst [vmem:[#allocation182_spill] sm:$0xff] %v21725_v46  ;;  %26233 = vst [vmem:[#allocation183_spill] sm:$0xff] %v21727_v39  ;;  %17693 = vmatpush3.bf16.msra.mxu1 %v21687_v11  ;;  %v21739_v54 = vpack.c.bf16 %v4772_v33, %v4769_v16 }
 0x192   :  { %v21743_v38 = vpack.c.bf16 %v26238_v36, %v4823_v15  ;;  %17695 = vmatprep.subr.bf16.mxu1 %v21708_v7  ;;  %v26244_v36 = vand.u32 4294901760, %v21620_v17  ;;  %v21764_v22 = vsub.f32 %v21597_v42, %v4766_v30  ;;  %26246 = vst [vmem:[#allocation187_spill] sm:$0xff] %v21767_v58  ;;  %v26248_v7 = vand.u32 4294901760, %v21697_v32  ;;  %v26251_v30 = vld [vmem:[#allocation100_spill] sm:$0xff] }
 0x193   :  { %26231 = vst [vmem:[#allocation181_spill] sm:$0xff] %v21723_v25  ;;  %17285 = vmatpush1.bf16.msra.mxu0 %v26236_v19  ;;  %26237 = vst [vmem:[#allocation184_spill] sm:$0xff] %v21739_v54  ;;  %v26243_v19 = vand.u32 4294901760, %v21615_v27  ;;  %v26253_v50 = vpack.c.bf16 %v26251_v30, %v26252_v56  ;;  %v26257_v30 = vand.u32 4294901760, %v21644_v8 }
 0x194   :  { %26239 = vst [vmem:[#allocation185_spill] sm:$0xff] %v21743_v38  ;;  %17287 = vmatprep.subr.bf16.mxu0 %v26242_v48  ;;  %v4988_v55 = vsub.f32 %v21620_v17, %v26244_v36  ;;  %26245 = vst [vmem:[#allocation186_spill] sm:$0xff] %v21764_v22  ;;  %v26249_v36 = vand.u32 4294901760, %v21699_v62 }
 0x195   :  { %v4981_v29 = vsub.f32 %v21615_v27, %v26243_v19  ;;  %v21772_v19 = vsub.f32 %v21610_v26, %v4820_v44  ;;  %17697 = vmatpush3.bf16.msra.mxu1 %v21739_v54  ;;  %v4869_v26 = vsub.f32 %v21626_v49, %v26254_v52  ;;  %v26255_v44 = vand.u32 4294901760, %v21631_v6 }
 0x196   :  { %v21778_v11 = vpack.c.bf16 %v26249_v36, %v26248_v7  ;;  %17699 = vmatprep.subr.bf16.mxu1 %v21743_v38  ;;  %v4995_v56 = vsub.f32 %v21644_v8, %v26257_v30  ;;  %v26258_v52 = vand.u32 4294901760, %v21663_v3  ;;  %v26260_v7 = vand.u32 4294901760, %v21731_v5 }
 0x197   :  { %26247 = vst [vmem:[#allocation188_spill] sm:$0xff] %v21772_v19  ;;  %17289 = vmatpush1.bf16.msra.mxu0 %v26253_v50  ;;  %v4876_v48 = vsub.f32 %v21631_v6, %v26255_v44  ;;  %v4982_v42 = vand.u32 4294901760, %v4981_v29  ;;  %v4989_v50 = vand.u32 4294901760, %v4988_v55  ;;  %v21803_v44 = vsub.f32 %v21639_v41, %v4769_v16 }
 0x198   :  { %26250 = vst [vmem:[#allocation189_spill] sm:$0xff] %v21778_v11  ;;  %17291 = vmatprep.subr.bf16.mxu0 %v26256_v40  ;;  %v5002_v54 = vsub.f32 %v21663_v3, %v26258_v52  ;;  %v26261_v36 = vand.u32 4294901760, %v21733_v21  ;;  %v21814_v38 = vsub.f32 %v21654_v18, %v4772_v33  ;;  %v21818_v30 = vsub.f32 %v21656_v53, %v4823_v15  ;;  %v26268_v53 = vld [vmem:[#allocation26_spill] sm:$0xff] }
 0x199   :  { %26259 = vst [vmem:[#allocation190_spill] sm:$0xff] %v21803_v44  ;;  %v4877_v52 = vand.u32 4294901760, %v4876_v48  ;;  %v26266_v55 = vand.u32 4294901760, %v21668_v12  ;;  %v26267_v33 = vand.u32 4294901760, %v21673_v4  ;;  %17701 = vmatpush3.bf16.msra.mxu1 %v21778_v11  ;;  %v26269_v15 = vand.u32 4294901760, %v21745_v28 }
 0x19a   :  { %v21809_v40 = vpack.c.bf16 %v26261_v36, %v26260_v7  ;;  %26263 = vst [vmem:[#allocation192_spill] sm:$0xff] %v21814_v38  ;;  %3247 = vmatmul.mubr.f32.vlgmr.msra.gmra.mrb[8].mxu0 %v21282_v9  ;;  %26264 = vst [vmem:[#allocation193_spill] sm:$0xff] %v21818_v30  ;;  %v26265_v7 = vld [vmem:[#allocation25_spill] sm:$0xff]  ;;  %v4870_v36 = vand.u32 4294901760, %v4869_v26  ;;  %v26270_v16 = vand.u32 4294901760, %v21747_v61  ;;  %v17706_v26 = vpack.c.bf16 %v4989_v50, %v4982_v42  ;;  %v26279_v9 = vld [vmem:[#allocation28_spill] sm:$0xff] }
 0x19b   :  { %3254 = vmatprep.mubr.f32.mxu0 %v21311_v37  ;;  %17293 = vmatpush1.bf16.msra.mxu0 %v26265_v7  ;;  %v4883_v18 = vsub.f32 %v21668_v12, %v26266_v55  ;;  %v4890_v29 = vsub.f32 %v21673_v4, %v26267_v33  ;;  %v4996_v48 = vand.u32 4294901760, %v4995_v56  ;;  %v5003_v7 = vand.u32 4294901760, %v5002_v54 }
 0x19c   :  { %26262 = vst [vmem:[#allocation191_spill] sm:$0xff] %v21809_v40  ;;  %17295 = vmatprep.subr.bf16.mxu0 %v26268_v53  ;;  %v21836_v41 = vpack.c.bf16 %v26270_v16, %v26269_v15  ;;  %17703 = vmatprep.subr.bf16.mxu1 %v21809_v40  ;;  %v26271_v55 = vand.u32 4294901760, %v21676_v51  ;;  %v26272_v33 = vand.u32 4294901760, %v21679_v59  ;;  %v26273_v16 = vand.u32 4294901760, %v21658_v63 }
 0x19d   :  { %v26275_v54 = vand.u32 4294901760, %v21697_v32  ;;  %v26277_v50 = vand.u32 4294901760, %v21682_v57  ;;  %v4891_v53 = vand.u32 4294901760, %v4890_v29  ;;  %v17710_v40 = vpack.c.bf16 %v5003_v7, %v4996_v48 }
 0x19e   :  { %v5009_v37 = vsub.f32 %v21676_v51, %v26271_v55  ;;  %v5016_v11 = vsub.f32 %v21679_v59, %v26272_v33  ;;  %v21850_v42 = vsub.f32 %v21658_v63, %v26273_v16  ;;  %3257 = vmatmul.mubr.f32.gmra.mrb[10].mxu0 %v21304_v2  ;;  %v26278_v55 = vand.u32 4294901760, %v21685_v1  ;;  %17705 = vmatpush3.bf16.msra.mxu1 %v21836_v41  ;;  %v26289_v2 = vld [vmem:[#allocation34_spill] sm:$0xff] }
 0x19f   :  { %v21855_v56 = vsub.f32 %v21697_v32, %v26275_v54  ;;  %v4897_v15 = vsub.f32 %v21682_v57, %v26277_v50  ;;  %17297 = vmatpush1.bf16.msra.mxu0 %v26279_v9  ;;  %3394 = vmatprep.mubr.f32.mxu0 %v21301_v35  ;;  %v17708_v63 = vpack.c.bf16 %v4877_v52, %v4870_v36  ;;  %v4884_v16 = vand.u32 4294901760, %v4883_v18  ;;  %v26280_v54 = vld [vmem:[#allocation32_spill] sm:$0xff] }
 0x1a0   :  { %26274 = vst [vmem:[#allocation194_spill] sm:$0xff] %v21850_v42  ;;  %v4904_v33 = vsub.f32 %v21685_v1, %v26278_v55  ;;  %17299 = vmatprep.subr.bf16.mxu0 %v26280_v54  ;;  %v25678_v50 = vand.u32 4294901760, %v21721_v60  ;;  %17707 = vmatprep.subr.bf16.mxu1 %v17706_v26  ;;  %v5010_v9 = vand.u32 4294901760, %v5009_v37  ;;  %v5017_v14 = vand.u32 4294901760, %v5016_v11  ;;  %v26283_v55 = vld [vmem:[#allocation33_spill] sm:$0xff] }
 0x1a1   :  { %26276 = vst [vmem:[#allocation195_spill] sm:$0xff] %v21855_v56  ;;  %v26281_v36 = vand.u32 4294901760, %v21702_v0  ;;  %v26282_v52 = vand.u32 4294901760, %v21715_v45  ;;  %v4898_v32 = vand.u32 4294901760, %v4897_v15  ;;  %v25679_v7 = vand.u32 4294901760, %v21727_v39  ;;  %4845 = vmatmul.mubr.f32.vlgmr.msra.gmra.mrb[12].mxu1 %v21336_v24 }
 0x1a2   :  { %v4905_v54 = vand.u32 4294901760, %v4904_v33  ;;  %v17712_v37 = vpack.c.bf16 %v4891_v53, %v4884_v16  ;;  %v26284_v11 = vand.u32 4294901760, %v21718_v23  ;;  %4854 = vmatprep.mubr.f32.mxu1 %v21352_v31  ;;  %17709 = vmatpush3.bf16.msra.mxu1 %v17708_v63  ;;  %v4918_v15 = vsub.f32 %v21721_v60, %v25678_v50 }
 0x1a3   :  { %v5023_v29 = vsub.f32 %v21702_v0, %v26281_v36  ;;  %v5030_v18 = vsub.f32 %v21715_v45, %v26282_v52  ;;  %17301 = vmatpush1.bf16.msra.mxu0 %v26283_v55  ;;  %v26285_v24 = vand.u32 4294901760, %v21723_v25  ;;  %v26286_v53 = vand.u32 4294901760, %v21725_v46  ;;  %17711 = vmatprep.subr.bf16.mxu1 %v17710_v40  ;;  %v26293_v40 = vld [vmem:[#allocation37_spill] sm:$0xff] }
 0x1a4   :  { %v4911_v26 = vsub.f32 %v21718_v23, %v26284_v11  ;;  %v26287_v52 = vand.u32 4294901760, %v21699_v62  ;;  %17303 = vmatprep.subr.bf16.mxu0 %v26289_v2  ;;  %v17714_v31 = vpack.c.bf16 %v5017_v14, %v5010_v9  ;;  %v26290_v50 = vand.u32 4294901760, %v21731_v5  ;;  %v26353_v2 = vld [vmem:[#allocation112_spill] sm:$0xff] }
 0x1a5   :  { %v5037_v33 = vsub.f32 %v21723_v25, %v26285_v24  ;;  %v5044_v16 = vsub.f32 %v21725_v46, %v26286_v53  ;;  %v5024_v63 = vand.u32 4294901760, %v5023_v29  ;;  %v5031_v36 = vand.u32 4294901760, %v5030_v18  ;;  %4860 = vmatmul.mubr.f32.gmra.mrb[14].mxu1 %v21363_v34  ;;  %v26303_v34 = vld [vmem:[#allocation42_spill] sm:$0xff] }
 0x1a6   :  { %v21900_v11 = vsub.f32 %v21699_v62, %v26287_v52  ;;  %v21906_v48 = vsub.f32 %v21731_v5, %v26290_v50  ;;  %v17716_v24 = vpack.c.bf16 %v4905_v54, %v4898_v32  ;;  %v4925_v53 = vsub.f32 %v21727_v39, %v25679_v7  ;;  %17713 = vmatpush3.bf16.msra.mxu1 %v17712_v37 }
 0x1a7   :  { %v26292_v55 = vand.u32 4294901760, %v21764_v22  ;;  %17305 = vmatpush1.bf16.msra.mxu0 %v26293_v40  ;;  %v4912_v14 = vand.u32 4294901760, %v4911_v26  ;;  %v26294_v9 = vand.u32 4294901760, %v21767_v58  ;;  %v26295_v5 = vand.u32 4294901760, %v21772_v19  ;;  %5090 = vmatprep.mubr.f32.mxu1 %v21277_v10 }
 0x1a8   :  { %26288 = vst [vmem:[#allocation196_spill] sm:$0xff] %v21900_v11  ;;  %26291 = vst [vmem:[#allocation197_spill] sm:$0xff] %v21906_v48  ;;  %v4919_v50 = vand.u32 4294901760, %v4918_v15  ;;  %v5045_v18 = vand.u32 4294901760, %v5044_v16  ;;  %v26296_v26 = vand.u32 4294901760, %v21733_v21  ;;  %17715 = vmatprep.subr.bf16.mxu1 %v17714_v31  ;;  %v17718_v7 = vpack.c.bf16 %v5031_v36, %v5024_v63 }
 0x1a9   :  { %v4932_v62 = vsub.f32 %v21764_v22, %v26292_v55  ;;  %v5051_v29 = vsub.f32 %v21767_v58, %v26294_v9  ;;  %v5058_v32 = vsub.f32 %v21772_v19, %v26295_v5  ;;  %v5038_v55 = vand.u32 4294901760, %v5037_v33  ;;  %v26298_v9 = vld [vmem:[#allocation39_spill] sm:$0xff] }
 0x1aa   :  { %v21928_v52 = vsub.f32 %v21733_v21, %v26296_v26  ;;  %17307 = vmatprep.subr.bf16.mxu0 %v26298_v9  ;;  %v26299_v54 = vand.u32 4294901760, %v21745_v28  ;;  %v26301_v33 = vand.u32 4294901760, %v21747_v61  ;;  %v4926_v21 = vand.u32 4294901760, %v4925_v53  ;;  %17717 = vmatpush3.bf16.msra.mxu1 %v17716_v24 }
 0x1ab   :  { %v4933_v26 = vand.u32 4294901760, %v4932_v62  ;;  %17309 = vmatpush1.bf16.msra.mxu0 %v26303_v34  ;;  %v5052_v31 = vand.u32 4294901760, %v5051_v29  ;;  %v5059_v36 = vand.u32 4294901760, %v5058_v32  ;;  %v26304_v63 = vand.u32 4294901760, %v21803_v44  ;;  %17719 = vmatprep.subr.bf16.mxu1 %v17718_v7  ;;  %v26310_v62 = vld [vmem:[#allocation50_spill] sm:$0xff]  ;;  %v26317_v34 = vld [vmem:[#allocation59_spill] sm:$0xff] }
 0x1ac   :  { %26297 = vst [vmem:[#allocation198_spill] sm:$0xff] %v21928_v52  ;;  %v21936_v15 = vsub.f32 %v21745_v28, %v26299_v54  ;;  %v21941_v16 = vsub.f32 %v21747_v61, %v26301_v33  ;;  %v25680_v5 = vand.u32 4294901760, %v21855_v56  ;;  %v26305_v28 = vld [vmem:[#allocation44_spill] sm:$0xff]  ;;  %v17720_v54 = vpack.c.bf16 %v4919_v50, %v4912_v14  ;;  %v26309_v50 = vld [vmem:[#allocation47_spill] sm:$0xff] }
 0x1ad   :  { %v4939_v37 = vsub.f32 %v21803_v44, %v26304_v63  ;;  %17311 = vmatprep.subr.bf16.mxu0 %v26305_v28  ;;  %v17722_v9 = vpack.c.bf16 %v5045_v18, %v5038_v55  ;;  %v26306_v61 = vand.u32 4294901760, %v21814_v38  ;;  %v26307_v29 = vand.u32 4294901760, %v21818_v30 }
 0x1ae   :  { %26300 = vst [vmem:[#allocation199_spill] sm:$0xff] %v21936_v15  ;;  %26302 = vst [vmem:[#allocation200_spill] sm:$0xff] %v21941_v16  ;;  %v26308_v33 = vand.u32 4294901760, %v21850_v42  ;;  %v17724_v55 = vpack.c.bf16 %v4933_v26, %v4926_v21  ;;  %v17726_v18 = vpack.c.bf16 %v5059_v36, %v5052_v31  ;;  %v4953_v7 = vsub.f32 %v21855_v56, %v25680_v5 }
 0x1af   :  { %v4946_v53 = vsub.f32 %v21814_v38, %v26306_v61  ;;  %v5065_v32 = vsub.f32 %v21818_v30, %v26307_v29  ;;  %17313 = vmatpush1.bf16.msra.mxu0 %v26309_v50  ;;  %v4940_v61 = vand.u32 4294901760, %v4939_v37  ;;  %17721 = vmatpush3.bf16.msra.mxu1 %v17720_v54  ;;  %v26311_v28 = vand.u32 4294901760, %v21900_v11 }
 0x1b0   :  { %v5072_v63 = vsub.f32 %v21850_v42, %v26308_v33  ;;  %17315 = vmatprep.subr.bf16.mxu0 %v26310_v62  ;;  %v25681_v14 = vand.u32 4294901760, %v21941_v16  ;;  %17723 = vmatprep.subr.bf16.mxu1 %v17722_v9  ;;  %v26312_v37 = vand.u32 4294901760, %v21906_v48  ;;  %v26313_v36 = vand.u32 4294901760, %v21928_v52 }
 0x1b1   :  { %v4947_v29 = vand.u32 4294901760, %v4946_v53  ;;  %v4960_v33 = vsub.f32 %v21900_v11, %v26311_v28  ;;  %v5066_v21 = vand.u32 4294901760, %v5065_v32  ;;  %v26314_v53 = vld [vmem:[#allocation53_spill] sm:$0xff]  ;;  %v4954_v5 = vand.u32 4294901760, %v4953_v7  ;;  %v26315_v28 = vld [vmem:[#allocation56_spill] sm:$0xff] }
 0x1b2   :  { %v5073_v26 = vand.u32 4294901760, %v5072_v63  ;;  %v5079_v31 = vsub.f32 %v21906_v48, %v26312_v37  ;;  %v5086_v54 = vsub.f32 %v21928_v52, %v26313_v36  ;;  %v26316_v9 = vand.u32 4294901760, %v21936_v15 }
 0x1b3   :  { %17317 = vmatpush1.bf16.msra.mxu0 %v26314_v53  ;;  %17725 = vmatpush3.bf16.msra.mxu1 %v17724_v55  ;;  %v17728_v24 = vpack.c.bf16 %v4947_v29, %v4940_v61  ;;  %v4961_v62 = vand.u32 4294901760, %v4960_v33  ;;  %v4974_v63 = vsub.f32 %v21941_v16, %v25681_v14  ;;  %v26318_v55 = vld [vmem:[#allocation62_spill] sm:$0xff] }
 0x1b4   :  { %17319 = vmatprep.subr.bf16.mxu0 %v26315_v28  ;;  %v4967_v32 = vsub.f32 %v21936_v15, %v26316_v9  ;;  %17727 = vmatprep.subr.bf16.mxu1 %v17726_v18  ;;  %v17730_v37 = vpack.c.bf16 %v5073_v26, %v5066_v21  ;;  %v5080_v50 = vand.u32 4294901760, %v5079_v31  ;;  %v5087_v36 = vand.u32 4294901760, %v5086_v54  ;;  %v26319_v28 = vld [vmem:[#allocation65_spill] sm:$0xff]  ;;  %v26320_v9 = vld [vmem:[#allocation68_spill] sm:$0xff]  ;;  %v26321_v21 = vld [vmem:[#allocation71_spill] sm:$0xff] }
 0x1b5   :  { %v17732_v7 = vpack.c.bf16 %v4961_v62, %v4954_v5  ;;  %v4975_v29 = vand.u32 4294901760, %v4974_v63  ;;  %v17738_v18 = vpack.c.bf16 %v21620_v17, %v21615_v27  ;;  %v17740_v5 = vpack.c.bf16 %v21631_v6, %v21626_v49  ;;  %v26325_v54 = vld [vmem:[#allocation83_spill] sm:$0xff]  ;;  %v26326_v63 = vld [vmem:[#allocation88_spill] sm:$0xff] }
 0x1b6   :  { %v4968_v61 = vand.u32 4294901760, %v4967_v32  ;;  %v17734_v33 = vpack.c.bf16 %v5087_v36, %v5080_v50  ;;  %v17742_v62 = vpack.c.bf16 %v21663_v3, %v21644_v8  ;;  %v26323_v50 = vld [vmem:[#allocation77_spill] sm:$0xff]  ;;  %v17744_v26 = vpack.c.bf16 %v21673_v4, %v21668_v12  ;;  %v26327_v36 = vld [vmem:[#allocation91_spill] sm:$0xff] }
 0x1b7   :  { %17321 = vmatpush1.bf16.msra.mxu0 %v26317_v34  ;;  %17729 = vmatpush3.bf16.msra.mxu1 %v17728_v24  ;;  %v26322_v24 = vld [vmem:[#allocation74_spill] sm:$0xff]  ;;  %v17746_v31 = vpack.c.bf16 %v21679_v59, %v21676_v51  ;;  %v17748_v32 = vpack.c.bf16 %v21685_v1, %v21682_v57  ;;  %v26351_v34 = vld [vmem:[#allocation13_spill] sm:$0xff] }
 0x1b8   :  { %17323 = vmatprep.subr.bf16.mxu0 %v26318_v55  ;;  %17731 = vmatprep.subr.bf16.mxu1 %v17730_v37  ;;  %v17736_v14 = vpack.c.bf16 %v4975_v29, %v4968_v61  ;;  %v17750_v37 = vpack.c.bf16 %v21715_v45, %v21702_v0  ;;  %v17752_v61 = vpack.c.bf16 %v21721_v60, %v21718_v23  ;;  %v26329_v29 = vld [vmem:[#allocation95_spill] sm:$0xff]  ;;  %v26349_v55 = vld [vmem:[#allocation12_spill] sm:$0xff] }
 0x1bb   :  { %17325 = vmatpush1.bf16.msra.mxu0 %v26319_v28  ;;  %17733 = vmatpush3.bf16.msra.mxu1 %v17732_v7  ;;  %v26328_v7 = vld [vmem:[#allocation94_spill] sm:$0xff]  ;;  %v26348_v28 = vld [vmem:[#allocation103_spill] sm:$0xff] }
 0x1bc   :  { %17327 = vmatprep.subr.bf16.mxu0 %v26320_v9  ;;  %17735 = vmatprep.subr.bf16.mxu1 %v17734_v33  ;;  %v26330_v33 = vld [vmem:[#allocation98_spill] sm:$0xff] }
 0x1bf   :  { %17329 = vmatpush1.bf16.msra.mxu0 %v26321_v21  ;;  %17737 = vmatpush3.bf16.msra.mxu1 %v17736_v14  ;;  %v26324_v14 = vld [vmem:[#allocation80_spill] sm:$0xff] }
 0x1c0   :  { %17331 = vmatprep.subr.bf16.mxu0 %v26322_v24  ;;  %17739 = vmatprep.subr.bf16.mxu1 %v17738_v18  ;;  %v17756_v18 = vpack.c.bf16 %v21764_v22, %v21727_v39  ;;  %v17764_v24 = vpack.c.bf16 %v21900_v11, %v21855_v56  ;;  %v26382_v56 = vld [vmem:[#allocation20_spill] sm:$0xff] }
 0x1c2   :  { %5092 = vmatmul.mubr.f32.vlgmr.msra.gmra.mrb[16].mxu1 %v21275_v47 }
 0x1c3   :  { %17333 = vmatpush1.bf16.msra.mxu0 %v26323_v50  ;;  %5097 = vmatprep.mubr.f32.mxu1 %v21296_v13  ;;  %v26340_v50 = vld [vmem:[#allocation108_spill] sm:$0xff]  ;;  %v26354_v13 = vld [vmem:[#allocation113_spill] sm:$0xff] }
 0x1c4   :  { %17741 = vmatpush3.bf16.msra.mxu1 %v17740_v5  ;;  %17335 = vmatprep.subr.bf16.mxu0 %v26324_v14  ;;  %v17758_v5 = vpack.c.bf16 %v21772_v19, %v21767_v58  ;;  %v26347_v9 = vand.u32 4294901760, %v26340_v50 }
 0x1c5   :  { %17743 = vmatprep.subr.bf16.mxu1 %v17742_v62  ;;  %v26331_v62 = vld [vmem:[#allocation101_spill] sm:$0xff] }
 0x1c6   :  { %5099 = vmatmul.mubr.f32.gmra.mrb[18].mxu1 %v21290_v20  ;;  %v25691_v20 = vand.u32 4294901760, %v26353_v2 }
 0x1c7   :  { %17337 = vmatpush1.bf16.msra.mxu0 %v26325_v54  ;;  %5234 = vmatprep.mubr.f32.mxu1 %v21287_v43  ;;  %v17754_v43 = vpack.c.bf16 %v21725_v46, %v21723_v25  ;;  %v26339_v54 = vld [vmem:[#allocation107_spill] sm:$0xff]  ;;  %v26440_v25 = vld [vmem:[#allocation49_spill] sm:$0xff] }
 0x1c8   :  { %17745 = vmatpush3.bf16.msra.mxu1 %v17744_v26  ;;  %17339 = vmatprep.subr.bf16.mxu0 %v26326_v63  ;;  %v26332_v26 = vld [vmem:[#allocation105_spill] sm:$0xff]  ;;  %v25682_v14 = vand.u32 4294901760, %v26339_v54 }
 0x1c9   :  { %17747 = vmatprep.subr.bf16.mxu1 %v17746_v31  ;;  %v17762_v31 = vpack.c.bf16 %v21850_v42, %v21818_v30  ;;  %v26383_v42 = vand.u32 4294901760, %v26382_v56  ;;  %v26388_v56 = vld [vmem:[#allocation152_spill] sm:$0xff] }
 0x1cb   :  { %17341 = vmatpush1.bf16.msra.mxu0 %v26327_v36  ;;  %v26337_v36 = vld [vmem:[#allocation9_spill] sm:$0xff] }
 0x1cc   :  { %17749 = vmatpush3.bf16.msra.mxu1 %v17748_v32  ;;  %17343 = vmatprep.subr.bf16.mxu0 %v26328_v7  ;;  %v26333_v32 = vld [vmem:[#allocation106_spill] sm:$0xff]  ;;  %v26338_v63 = vand.u32 4294901760, %v26337_v36  ;;  %v26345_v36 = vld [vmem:[#allocation11_spill] sm:$0xff] }
 0x1cd   :  { %17751 = vmatprep.subr.bf16.mxu1 %v17750_v37  ;;  %v26334_v7 = vld [vmem:[#allocation102_spill] sm:$0xff] }
 0x1cf   :  { %17345 = vmatpush1.bf16.msra.mxu0 %v26329_v29 }
 0x1d0   :  { %17753 = vmatpush3.bf16.msra.mxu1 %v17752_v61  ;;  %17347 = vmatprep.subr.bf16.mxu0 %v26330_v33  ;;  %v17760_v61 = vpack.c.bf16 %v21814_v38, %v21803_v44  ;;  %v26335_v33 = vld [vmem:[#allocation8_spill] sm:$0xff] }
 0x1d1   :  { %17755 = vmatprep.subr.bf16.mxu1 %v17754_v43  ;;  %v26336_v29 = vand.u32 4294901760, %v26335_v33  ;;  %v26343_v33 = vld [vmem:[#allocation10_spill] sm:$0xff]  ;;  %v26402_v38 = vld [vmem:[#allocation132_spill] sm:$0xff] }
 0x1d2   :  { %v26344_v21 = vand.u32 4294901760, %v26343_v33  ;;  %v26352_v33 = vand.u32 4294901760, %v26351_v34  ;;  %v26404_v44 = vld [vmem:[#allocation156_spill] sm:$0xff] }
 0x1d3   :  { %17349 = vmatpush1.bf16.msra.mxu0 %v26331_v62  ;;  %v17354_v43 = vpack.c.bf16 %v26338_v63, %v26336_v29  ;;  %v26346_v63 = vand.u32 4294901760, %v26345_v36 }
 0x1d4   :  { %17757 = vmatpush3.bf16.msra.mxu1 %v17756_v18  ;;  %17351 = vmatprep.subr.bf16.mxu0 %v26334_v7  ;;  %v26341_v18 = vand.u32 4294901760, %v26332_v26  ;;  %v26342_v7 = vand.u32 4294901760, %v26333_v32 }
 0x1d5   :  { %17759 = vmatprep.subr.bf16.mxu1 %v17758_v5  ;;  %v17356_v29 = vpack.c.bf16 %v26346_v63, %v26344_v21  ;;  %v3962_v5 = vsub.f32 %v26339_v54, %v25682_v14  ;;  %v17766_v21 = vpack.c.bf16 %v21928_v52, %v21906_v48  ;;  %v26380_v48 = vld [vmem:[#allocation126_spill] sm:$0xff] }
 0x1d6   :  { %v3956_v37 = vsub.f32 %v26332_v26, %v26341_v18  ;;  %v3968_v62 = vsub.f32 %v26333_v32, %v26342_v7  ;;  %v3974_v18 = vsub.f32 %v26340_v50, %v26347_v9  ;;  %v26350_v7 = vand.u32 4294901760, %v26349_v55  ;;  %v26357_v55 = vld [vmem:[#allocation15_spill] sm:$0xff] }
 0x1d7   :  { %17353 = vmatpush1.bf16.msra.mxu0 %v26348_v28  ;;  %v3963_v40 = vand.u32 4294901760, %v3962_v5  ;;  %v25692_v9 = vand.u32 4294901760, %v26354_v13  ;;  %v26355_v28 = vld [vmem:[#allocation14_spill] sm:$0xff]  ;;  %v26358_v11 = vand.u32 4294901760, %v26357_v55 }
 0x1d8   :  { %v17358_v53 = vpack.c.bf16 %v26352_v33, %v26350_v7  ;;  %v3957_v36 = vand.u32 4294901760, %v3956_v37  ;;  %v3969_v63 = vand.u32 4294901760, %v3968_v62  ;;  %17761 = vmatpush3.bf16.msra.mxu1 %v17760_v61  ;;  %17355 = vmatprep.subr.bf16.mxu0 %v17354_v43  ;;  %v3975_v14 = vand.u32 4294901760, %v3974_v18  ;;  %v26360_v33 = vld [vmem:[#allocation114_spill] sm:$0xff]  ;;  %v26361_v37 = vld [vmem:[#allocation117_spill] sm:$0xff] }
 0x1d9   :  { %17763 = vmatprep.subr.bf16.mxu1 %v17762_v31  ;;  %v26356_v47 = vand.u32 4294901760, %v26355_v28  ;;  %v25694_v52 = vand.u32 4294901760, %v26360_v33  ;;  %v25695_v62 = vand.u32 4294901760, %v26361_v37  ;;  %v26362_v61 = vld [vmem:[#allocation154_spill] sm:$0xff]  ;;  %v17768_v43 = vpack.c.bf16 %v21941_v16, %v21936_v15  ;;  %v26365_v31 = vld [vmem:[#allocation16_spill] sm:$0xff] }
 0x1da   :  { %v22070_v7 = vpack.c.bf16 %v3969_v63, %v3957_v36  ;;  %3398 = vmatmul.mubr.f32.vlgmr.msra.gmra.mrb[8].mxu0 %v26362_v61  ;;  %v22077_v5 = vpack.c.bf16 %v3975_v14, %v3963_v40  ;;  %v3980_v28 = vsub.f32 %v26353_v2, %v25691_v20  ;;  %v26366_v18 = vand.u32 4294901760, %v26365_v31  ;;  %v26367_v36 = vld [vmem:[#allocation17_spill] sm:$0xff] }
 0x1db   :  { %v17360_v34 = vpack.c.bf16 %v26358_v11, %v26356_v47  ;;  %v3992_v47 = vsub.f32 %v26354_v13, %v25692_v9  ;;  %v26364_v11 = vld [vmem:[#allocation160_spill] sm:$0xff]  ;;  %17357 = vmatpush1.bf16.msra.mxu0 %v17356_v29  ;;  %v26368_v63 = vand.u32 4294901760, %v26367_v36  ;;  %v3986_v40 = vsub.f32 %v26360_v33, %v25694_v52  ;;  %v26370_v29 = vld [vmem:[#allocation121_spill] sm:$0xff] }
 0x1dc   :  { %26359 = vst [vmem:[#allocation105_spill] sm:$0xff] %v22070_v7  ;;  %26363 = vst [vmem:[#allocation106_spill] sm:$0xff] %v22077_v5  ;;  %3406 = vmatprep.mubr.f32.mxu0 %v26364_v11  ;;  %v3998_v14 = vsub.f32 %v26361_v37, %v25695_v62  ;;  %17765 = vmatpush3.bf16.msra.mxu1 %v17764_v24  ;;  %v3981_v20 = vand.u32 4294901760, %v3980_v28  ;;  %v26369_v5 = vld [vmem:[#allocation118_spill] sm:$0xff]  ;;  %v25699_v16 = vand.u32 4294901760, %v26370_v29  ;;  %v26379_v62 = vld [vmem:[#allocation123_spill] sm:$0xff] }
 0x1dd   :  { %v17362_v55 = vpack.c.bf16 %v26368_v63, %v26366_v18  ;;  %17359 = vmatprep.subr.bf16.mxu0 %v17358_v53  ;;  %v3993_v9 = vand.u32 4294901760, %v3992_v47  ;;  %v25696_v7 = vand.u32 4294901760, %v26369_v5  ;;  %17767 = vmatprep.subr.bf16.mxu1 %v17766_v21  ;;  %v3987_v31 = vand.u32 4294901760, %v3986_v40  ;;  %v26371_v18 = vld [vmem:[#allocation158_spill] sm:$0xff]  ;;  %v26375_v21 = vld [vmem:[#allocation19_spill] sm:$0xff] }
 0x1de   :  { %v3999_v36 = vand.u32 4294901760, %v3998_v14  ;;  %3410 = vmatmul.mubr.f32.gmra.mrb[10].mxu0 %v26371_v18  ;;  %v4016_v53 = vsub.f32 %v26370_v29, %v25699_v16  ;;  %v26373_v24 = vld [vmem:[#allocation18_spill] sm:$0xff]  ;;  %v26376_v47 = vand.u32 4294901760, %v26375_v21  ;;  %v25705_v16 = vand.u32 4294901760, %v26380_v48 }
 0x1df   :  { %v22099_v63 = vpack.c.bf16 %v3993_v9, %v3981_v20  ;;  %v4004_v52 = vsub.f32 %v26369_v5, %v25696_v7  ;;  %17361 = vmatpush1.bf16.msra.mxu0 %v17360_v34  ;;  %3673 = vmatprep.mubr.f32.mxu0 %v21277_v10  ;;  %v26374_v28 = vand.u32 4294901760, %v26373_v24  ;;  %v26378_v20 = vld [vmem:[#allocation122_spill] sm:$0xff]  ;;  %v26381_v34 = vld [vmem:[#allocation167_spill] sm:$0xff]  ;;  %v26384_v24 = vld [vmem:[#allocation21_spill] sm:$0xff] }
 0x1e0   :  { %v22112_v14 = vpack.c.bf16 %v3999_v36, %v3987_v31  ;;  %v25703_v9 = vand.u32 4294901760, %v26378_v20  ;;  %17769 = vmatpush3.bf16.msra.mxu1 %v17768_v43  ;;  %17363 = vmatprep.subr.bf16.mxu0 %v17362_v55  ;;  %v4017_v15 = vand.u32 4294901760, %v4016_v53  ;;  %v26385_v30 = vand.u32 4294901760, %v26384_v24  ;;  %v26386_v55 = vld [vmem:[#allocation127_spill] sm:$0xff] }
 0x1e1   :  { %26372 = vst [vmem:[#allocation8_spill] sm:$0xff] %v22099_v63  ;;  %v17364_v40 = vpack.c.bf16 %v26376_v47, %v26374_v28  ;;  %v25704_v63 = vand.u32 4294901760, %v26379_v62  ;;  %v4005_v7 = vand.u32 4294901760, %v4004_v52  ;;  %17771 = vmatprep.subr.bf16.mxu1 %v26381_v34  ;;  %v25707_v52 = vand.u32 4294901760, %v26386_v55  ;;  %v26391_v28 = vld [vmem:[#allocation23_spill] sm:$0xff] }
 0x1e2   :  { %26377 = vst [vmem:[#allocation9_spill] sm:$0xff] %v22112_v14  ;;  %v17366_v21 = vpack.c.bf16 %v26385_v30, %v26383_v42  ;;  %v4010_v31 = vsub.f32 %v26378_v20, %v25703_v9  ;;  %v4028_v53 = vsub.f32 %v26380_v48, %v25705_v16  ;;  %v26389_v30 = vld [vmem:[#allocation22_spill] sm:$0xff]  ;;  %v26392_v47 = vand.u32 4294901760, %v26391_v28  ;;  %v26395_v16 = vld [vmem:[#allocation131_spill] sm:$0xff]  ;;  %v26399_v28 = vld [vmem:[#allocation29_spill] sm:$0xff] }
 0x1e3   :  { %v4022_v43 = vsub.f32 %v26379_v62, %v25704_v63  ;;  %v22129_v36 = vpack.c.bf16 %v4017_v15, %v4005_v7  ;;  %5237 = vmatmul.mubr.f32.vlgmr.msra.gmra.mrb[20].mxu1 %v26388_v56  ;;  %17365 = vmatpush1.bf16.msra.mxu0 %v17364_v40  ;;  %v26390_v42 = vand.u32 4294901760, %v26389_v30  ;;  %v4040_v63 = vsub.f32 %v26386_v55, %v25707_v52  ;;  %v26393_v15 = vld [vmem:[#allocation157_spill] sm:$0xff]  ;;  %v26396_v40 = vld [vmem:[#allocation170_spill] sm:$0xff]  ;;  %v26397_v56 = vld [vmem:[#allocation27_spill] sm:$0xff] }
 0x1e4   :  { %v4011_v9 = vand.u32 4294901760, %v4010_v31  ;;  %5243 = vmatprep.mubr.f32.mxu1 %v26393_v15  ;;  %v26394_v7 = vld [vmem:[#allocation169_spill] sm:$0xff]  ;;  %v25710_v34 = vand.u32 4294901760, %v26395_v16  ;;  %17367 = vmatprep.subr.bf16.mxu0 %v17366_v21  ;;  %v26398_v30 = vand.u32 4294901760, %v26397_v56  ;;  %v25711_v52 = vand.u32 4294901760, %v26402_v38  ;;  %v26405_v21 = vld [vmem:[#allocation30_spill] sm:$0xff] }
 0x1e5   :  { %26387 = vst [vmem:[#allocation107_spill] sm:$0xff] %v22129_v36  ;;  %v17368_v24 = vpack.c.bf16 %v26392_v47, %v26390_v42  ;;  %v4023_v14 = vand.u32 4294901760, %v4022_v43  ;;  %17773 = vmatpush3.bf16.msra.mxu1 %v26394_v7  ;;  %v4029_v36 = vand.u32 4294901760, %v4028_v53  ;;  %v26400_v42 = vand.u32 4294901760, %v26399_v28  ;;  %v26403_v53 = vld [vmem:[#allocation134_spill] sm:$0xff]  ;;  %v26407_v56 = vld [vmem:[#allocation31_spill] sm:$0xff] }
 0x1e6   :  { %17775 = vmatprep.subr.bf16.mxu1 %v26396_v40  ;;  %v4041_v47 = vand.u32 4294901760, %v4040_v63  ;;  %v4034_v15 = vsub.f32 %v26395_v16, %v25710_v34  ;;  %v26406_v40 = vand.u32 4294901760, %v26405_v21  ;;  %v26408_v19 = vand.u32 4294901760, %v26407_v56  ;;  %v26412_v34 = vld [vmem:[#allocation35_spill] sm:$0xff] }
 0x1e7   :  { %v17370_v31 = vpack.c.bf16 %v26400_v42, %v26398_v30  ;;  %v22150_v43 = vpack.c.bf16 %v4023_v14, %v4011_v9  ;;  %5246 = vmatmul.mubr.f32.gmra.mrb[22].mxu1 %v26404_v44  ;;  %17369 = vmatpush1.bf16.msra.mxu0 %v17368_v24  ;;  %v4046_v63 = vsub.f32 %v26402_v38, %v25711_v52  ;;  %v26410_v14 = vld [vmem:[#allocation136_spill] sm:$0xff]  ;;  %v26413_v44 = vand.u32 4294901760, %v26412_v34  ;;  %v26419_v34 = vld [vmem:[#allocation138_spill] sm:$0xff] }
 0x1e8   :  { %v17372_v28 = vpack.c.bf16 %v26408_v19, %v26406_v40  ;;  %v22162_v30 = vpack.c.bf16 %v4041_v47, %v4029_v36  ;;  %v25714_v9 = vand.u32 4294901760, %v26410_v14  ;;  %v26411_v42 = vld [vmem:[#allocation172_spill] sm:$0xff]  ;;  %5350 = vmatprep.mubr.f32.mxu1 %v21301_v35  ;;  %v26416_v19 = vand.u32 4294901760, %v26403_v53  ;;  %v26417_v40 = vld [vmem:[#allocation173_spill] sm:$0xff] }
 0x1e9   :  { %26401 = vst [vmem:[#allocation108_spill] sm:$0xff] %v22150_v43  ;;  %17777 = vmatpush3.bf16.msra.mxu1 %v26411_v42  ;;  %v26414_v24 = vld [vmem:[#allocation36_spill] sm:$0xff]  ;;  %v4035_v43 = vand.u32 4294901760, %v4034_v15  ;;  %17371 = vmatprep.subr.bf16.mxu0 %v17370_v31  ;;  %v4047_v47 = vand.u32 4294901760, %v4046_v63  ;;  %v26418_v35 = vld [vmem:[#allocation137_spill] sm:$0xff]  ;;  %v25717_v42 = vand.u32 4294901760, %v26419_v34 }
 0x1ea   :  { %26409 = vst [vmem:[#allocation10_spill] sm:$0xff] %v22162_v30  ;;  %v26415_v7 = vand.u32 4294901760, %v26414_v24  ;;  %v4052_v36 = vsub.f32 %v26403_v53, %v26416_v19  ;;  %17779 = vmatprep.subr.bf16.mxu1 %v26417_v40  ;;  %v4064_v56 = vsub.f32 %v26410_v14, %v25714_v9  ;;  %v25716_v30 = vand.u32 4294901760, %v26418_v35  ;;  %v26425_v40 = vld [vmem:[#allocation174_spill] sm:$0xff]  ;;  %v26426_v63 = vld [vmem:[#allocation41_spill] sm:$0xff]  ;;  %v26428_v9 = vld [vmem:[#allocation43_spill] sm:$0xff] }
 0x1eb   :  { %17373 = vmatpush1.bf16.msra.mxu0 %v17372_v28  ;;  %v22187_v19 = vpack.c.bf16 %v4047_v47, %v4035_v43  ;;  %v26427_v22 = vand.u32 4294901760, %v26426_v63  ;;  %v26431_v47 = vld [vmem:[#allocation175_spill] sm:$0xff] }
 0x1ec   :  { %v17374_v21 = vpack.c.bf16 %v26415_v7, %v26413_v44  ;;  %v4053_v52 = vand.u32 4294901760, %v4052_v36  ;;  %v26420_v7 = vld [vmem:[#allocation38_spill] sm:$0xff]  ;;  %v26422_v44 = vld [vmem:[#allocation40_spill] sm:$0xff]  ;;  %v4065_v31 = vand.u32 4294901760, %v4064_v56  ;;  %v26429_v36 = vand.u32 4294901760, %v26428_v9  ;;  %v26434_v9 = vld [vmem:[#allocation45_spill] sm:$0xff] }
 0x1ed   :  { %v26421_v15 = vand.u32 4294901760, %v26420_v7  ;;  %v26423_v24 = vand.u32 4294901760, %v26422_v44  ;;  %26424 = vst [vmem:[#allocation11_spill] sm:$0xff] %v22187_v19  ;;  %17781 = vmatpush3.bf16.msra.mxu1 %v26425_v40  ;;  %v4058_v28 = vsub.f32 %v26418_v35, %v25716_v30  ;;  %v4070_v7 = vsub.f32 %v26419_v34, %v25717_v42  ;;  %v26436_v30 = vld [vmem:[#allocation46_spill] sm:$0xff]  ;;  %v26438_v40 = vld [vmem:[#allocation48_spill] sm:$0xff] }
 0x1ee   :  { %17375 = vmatprep.subr.bf16.mxu0 %v17374_v21  ;;  %v17378_v39 = vpack.c.bf16 %v26429_v36, %v26427_v22  ;;  %17783 = vmatprep.subr.bf16.mxu1 %v26431_v47  ;;  %v22202_v56 = vpack.c.bf16 %v4065_v31, %v4053_v52  ;;  %v26433_v21 = vld [vmem:[#allocation140_spill] sm:$0xff]  ;;  %v26435_v36 = vand.u32 4294901760, %v26434_v9  ;;  %v26437_v19 = vand.u32 4294901760, %v26436_v30 }
 0x1ef   :  { %v17376_v58 = vpack.c.bf16 %v26423_v24, %v26421_v15  ;;  %v26430_v15 = vld [vmem:[#allocation139_spill] sm:$0xff]  ;;  %v25721_v44 = vand.u32 4294901760, %v26433_v21  ;;  %v4059_v24 = vand.u32 4294901760, %v4058_v28  ;;  %v4071_v63 = vand.u32 4294901760, %v4070_v7  ;;  %v26442_v28 = vld [vmem:[#allocation176_spill] sm:$0xff] }
 0x1f0   :  { %v25720_v43 = vand.u32 4294901760, %v26430_v15  ;;  %26432 = vst [vmem:[#allocation12_spill] sm:$0xff] %v22202_v56  ;;  %v17380_v42 = vpack.c.bf16 %v26437_v19, %v26435_v36  ;;  %v26439_v46 = vand.u32 4294901760, %v26438_v40  ;;  %v26441_v47 = vand.u32 4294901760, %v26440_v25  ;;  %v26445_v56 = vld [vmem:[#allocation142_spill] sm:$0xff]  ;;  %v26446_v19 = vld [vmem:[#allocation177_spill] sm:$0xff] }
 0x1f1   :  { %17377 = vmatpush1.bf16.msra.mxu0 %v17376_v58  ;;  %v4088_v31 = vsub.f32 %v26433_v21, %v25721_v44  ;;  %17785 = vmatpush3.bf16.msra.mxu1 %v26442_v28  ;;  %v22220_v7 = vpack.c.bf16 %v4071_v63, %v4059_v24  ;;  %v25727_v30 = vand.u32 4294901760, %v26445_v56  ;;  %v26448_v24 = vld [vmem:[#allocation144_spill] sm:$0xff]  ;;  %v26455_v21 = vld [vmem:[#allocation55_spill] sm:$0xff] }
 0x1f2   :  { %v4076_v22 = vsub.f32 %v26430_v15, %v25720_v43  ;;  %v17382_v52 = vpack.c.bf16 %v26441_v47, %v26439_v46  ;;  %17379 = vmatprep.subr.bf16.mxu0 %v17378_v39  ;;  %v26444_v43 = vld [vmem:[#allocation141_spill] sm:$0xff]  ;;  %17787 = vmatprep.subr.bf16.mxu1 %v26446_v19  ;;  %v26447_v47 = vld [vmem:[#allocation143_spill] sm:$0xff]  ;;  %v26451_v44 = vld [vmem:[#allocation52_spill] sm:$0xff]  ;;  %v26456_v15 = vand.u32 4294901760, %v26455_v21 }
 0x1f3   :  { %26443 = vst [vmem:[#allocation13_spill] sm:$0xff] %v22220_v7  ;;  %v25725_v9 = vand.u32 4294901760, %v26444_v43  ;;  %v4089_v40 = vand.u32 4294901760, %v4088_v31  ;;  %v4094_v25 = vsub.f32 %v26445_v56, %v25727_v30  ;;  %v26452_v7 = vand.u32 4294901760, %v26451_v44  ;;  %v26453_v19 = vld [vmem:[#allocation54_spill] sm:$0xff]  ;;  %v26471_v56 = vld [vmem:[#allocation61_spill] sm:$0xff] }
 0x1f4   :  { %v4077_v58 = vand.u32 4294901760, %v4076_v22  ;;  %v26449_v22 = vld [vmem:[#allocation51_spill] sm:$0xff]  ;;  %v26454_v31 = vand.u32 4294901760, %v26453_v19  ;;  %v26459_v63 = vand.u32 4294901760, %v26447_v47  ;;  %v26462_v19 = vld [vmem:[#allocation145_spill] sm:$0xff] }
 0x1f5   :  { %v4082_v46 = vsub.f32 %v26444_v43, %v25725_v9  ;;  %17381 = vmatpush1.bf16.msra.mxu0 %v17380_v42  ;;  %v26450_v36 = vand.u32 4294901760, %v26449_v22  ;;  %v26458_v43 = vld [vmem:[#allocation178_spill] sm:$0xff]  ;;  %v4095_v39 = vand.u32 4294901760, %v4094_v25  ;;  %v26460_v22 = vand.u32 4294901760, %v26448_v24 }
 0x1f6   :  { %v17386_v60 = vpack.c.bf16 %v26456_v15, %v26454_v31  ;;  %v22241_v9 = vpack.c.bf16 %v4089_v40, %v4077_v58  ;;  %17789 = vmatpush3.bf16.msra.mxu1 %v26458_v43  ;;  %17383 = vmatprep.subr.bf16.mxu0 %v17382_v52  ;;  %v4100_v42 = vsub.f32 %v26447_v47, %v26459_v63  ;;  %v25732_v21 = vand.u32 4294901760, %v26462_v19  ;;  %v26467_v31 = vld [vmem:[#allocation58_spill] sm:$0xff]  ;;  %v26469_v43 = vld [vmem:[#allocation60_spill] sm:$0xff] }
 0x1f7   :  { %v17384_v28 = vpack.c.bf16 %v26452_v7, %v26450_v36  ;;  %v4083_v30 = vand.u32 4294901760, %v4082_v46  ;;  %v4112_v44 = vsub.f32 %v26448_v24, %v26460_v22  ;;  %v26461_v7 = vld [vmem:[#allocation179_spill] sm:$0xff]  ;;  %v26464_v36 = vld [vmem:[#allocation146_spill] sm:$0xff]  ;;  %v26465_v46 = vld [vmem:[#allocation57_spill] sm:$0xff]  ;;  %v26470_v47 = vand.u32 4294901760, %v26469_v43 }
 0x1f8   :  { %26457 = vst [vmem:[#allocation112_spill] sm:$0xff] %v22241_v9  ;;  %17791 = vmatprep.subr.bf16.mxu1 %v26461_v7  ;;  %v4101_v58 = vand.u32 4294901760, %v4100_v42  ;;  %v25731_v52 = vand.u32 4294901760, %v26464_v36  ;;  %v26466_v25 = vand.u32 4294901760, %v26465_v46  ;;  %v26468_v9 = vand.u32 4294901760, %v26467_v31  ;;  %v26476_v46 = vld [vmem:[#allocation148_spill] sm:$0xff] }
 0x1f9   :  { %v22252_v15 = vpack.c.bf16 %v4095_v39, %v4083_v30  ;;  %v4113_v40 = vand.u32 4294901760, %v4112_v44  ;;  %17385 = vmatpush1.bf16.msra.mxu0 %v17384_v28  ;;  %v26472_v22 = vand.u32 4294901760, %v26471_v56  ;;  %v4106_v30 = vsub.f32 %v26462_v19, %v25732_v21  ;;  %v26473_v39 = vld [vmem:[#allocation184_spill] sm:$0xff]  ;;  %v26475_v44 = vld [vmem:[#allocation147_spill] sm:$0xff] }
 0x1fa   :  { %v17388_v63 = vpack.c.bf16 %v26468_v9, %v26466_v25  ;;  %17793 = vmatpush3.bf16.msra.mxu1 %v26473_v39  ;;  %17387 = vmatprep.subr.bf16.mxu0 %v17386_v60  ;;  %v4118_v28 = vsub.f32 %v26464_v36, %v25731_v52  ;;  %v25733_v9 = vand.u32 4294901760, %v26475_v44  ;;  %v25737_v43 = vand.u32 4294901760, %v26476_v46  ;;  %v26477_v25 = vld [vmem:[#allocation185_spill] sm:$0xff]  ;;  %v26483_v39 = vld [vmem:[#allocation150_spill] sm:$0xff] }
 0x1fb   :  { %26463 = vst [vmem:[#allocation113_spill] sm:$0xff] %v22252_v15  ;;  %v17390_v24 = vpack.c.bf16 %v26472_v22, %v26470_v47  ;;  %v22267_v42 = vpack.c.bf16 %v4113_v40, %v4101_v58  ;;  %17795 = vmatprep.subr.bf16.mxu1 %v26477_v25  ;;  %v4107_v56 = vand.u32 4294901760, %v4106_v30  ;;  %v26478_v58 = vld [vmem:[#allocation63_spill] sm:$0xff]  ;;  %v26480_v22 = vld [vmem:[#allocation64_spill] sm:$0xff]  ;;  %v25738_v25 = vand.u32 4294901760, %v26483_v39  ;;  %v26484_v30 = vld [vmem:[#allocation189_spill] sm:$0xff] }
 0x1fc   :  { %v4119_v47 = vand.u32 4294901760, %v4118_v28  ;;  %v4124_v31 = vsub.f32 %v26475_v44, %v25733_v9  ;;  %v4136_v60 = vsub.f32 %v26476_v46, %v25737_v43  ;;  %v26479_v40 = vand.u32 4294901760, %v26478_v58  ;;  %v26485_v28 = vld [vmem:[#allocation66_spill] sm:$0xff]  ;;  %v26487_v9 = vld [vmem:[#allocation67_spill] sm:$0xff] }
 0x1fd   :  { %26474 = vst [vmem:[#allocation14_spill] sm:$0xff] %v22267_v42  ;;  %17389 = vmatpush1.bf16.msra.mxu0 %v17388_v63  ;;  %v26481_v52 = vand.u32 4294901760, %v26480_v22  ;;  %v26482_v42 = vld [vmem:[#allocation149_spill] sm:$0xff]  ;;  %v26486_v7 = vand.u32 4294901760, %v26485_v28  ;;  %v26488_v44 = vand.u32 4294901760, %v26487_v9  ;;  %v26489_v58 = vld [vmem:[#allocation191_spill] sm:$0xff]  ;;  %v4142_v9 = vsub.f32 %v26483_v39, %v25738_v25 }
 0x1fe   :  { %v25739_v15 = vand.u32 4294901760, %v26482_v42  ;;  %17797 = vmatpush3.bf16.msra.mxu1 %v26484_v30  ;;  %17391 = vmatprep.subr.bf16.mxu0 %v17390_v24  ;;  %v22292_v19 = vpack.c.bf16 %v4119_v47, %v4107_v56  ;;  %v4125_v63 = vand.u32 4294901760, %v4124_v31  ;;  %v4137_v43 = vand.u32 4294901760, %v4136_v60  ;;  %v26492_v56 = vld [vmem:[#allocation69_spill] sm:$0xff] }
 0x1ff   :  { %v17392_v21 = vpack.c.bf16 %v26481_v52, %v26479_v40  ;;  %v17394_v36 = vpack.c.bf16 %v26488_v44, %v26486_v7  ;;  %17799 = vmatprep.subr.bf16.mxu1 %v26489_v58  ;;  %v26490_v52 = vand.u32 4294901760, %v21615_v27  ;;  %v26491_v40 = vand.u32 4294901760, %v21620_v17  ;;  %v26494_v27 = vld [vmem:[#allocation70_spill] sm:$0xff]  ;;  %v22534_v44 = vld [vmem:[#allocation2 + $0x4c0] sm:$0xff]  ;;  %v22550_v39 = vld [vmem:[#allocation2 + $0x508] sm:$0xff] }
 0x200   :  { %v4130_v24 = vsub.f32 %v26482_v42, %v25739_v15  ;;  %v22305_v7 = vpack.c.bf16 %v4137_v43, %v4125_v63  ;;  %v26493_v47 = vand.u32 4294901760, %v26492_v56  ;;  %v26495_v31 = vand.u32 4294901760, %v26494_v27  ;;  %v26498_v56 = vld [vmem:[#allocation72_spill] sm:$0xff]  ;;  %v22548_v42 = vld [vmem:[#allocation2 + $0x4f0] sm:$0xff] }
 0x201   :  { %v17802_v22 = vpack.c.bf16 %v26491_v40, %v26490_v52  ;;  %17393 = vmatpush1.bf16.msra.mxu0 %v17392_v21  ;;  %v4143_v28 = vand.u32 4294901760, %v4142_v9  ;;  %v26496_v52 = vand.u32 4294901760, %v21626_v49  ;;  %v26497_v40 = vand.u32 4294901760, %v21631_v6  ;;  %v22522_v6 = vld [vmem:[#allocation2 + $0x4a8] sm:$0xff] }
 0x202   :  { %v17396_v17 = vpack.c.bf16 %v26495_v31, %v26493_v47  ;;  %v4131_v60 = vand.u32 4294901760, %v4130_v24  ;;  %17801 = vmatpush3.bf16.msra.mxu1 %v21836_v41  ;;  %17395 = vmatprep.subr.bf16.mxu0 %v17394_v36  ;;  %v26499_v27 = vand.u32 4294901760, %v26498_v56  ;;  %v26500_v47 = vld [vmem:[#allocation73_spill] sm:$0xff]  ;;  %v26502_v31 = vand.u32 4294901760, %v21644_v8  ;;  %v26506_v56 = vld [vmem:[#allocation76_spill] sm:$0xff] }
 0x203   :  { %v17804_v43 = vpack.c.bf16 %v26497_v40, %v26496_v52  ;;  %17803 = vmatprep.subr.bf16.mxu1 %v17802_v22  ;;  %v26501_v24 = vand.u32 4294901760, %v26500_v47  ;;  %v26503_v36 = vand.u32 4294901760, %v21663_v3  ;;  %v26504_v22 = vld [vmem:[#allocation75_spill] sm:$0xff]  ;;  %v26508_v8 = vand.u32 4294901760, %v21668_v12  ;;  %v22520_v52 = vld [vmem:[#allocation2 + $0x490] sm:$0xff]  ;;  %v26635_v21 = vld [vmem:[#allocation77_spill] sm:$0xff] }
 0x204   :  { %v22330_v25 = vpack.c.bf16 %v4143_v28, %v4131_v60  ;;  %v26505_v40 = vand.u32 4294901760, %v26504_v22  ;;  %v26509_v3 = vand.u32 4294901760, %v21673_v4  ;;  %v26515_v12 = vand.u32 4294901760, %v21679_v59  ;;  %v26632_v28 = vld [vmem:[#allocation71_spill] sm:$0xff] }
 0x205   :  { %v17398_v9 = vpack.c.bf16 %v26501_v24, %v26499_v27  ;;  %v17806_v49 = vpack.c.bf16 %v26503_v36, %v26502_v31  ;;  %5354 = vmatmul.mubr.f32.vlgmr.msra.gmra.mrb[24].mxu1 %v26362_v61  ;;  %17397 = vmatpush1.bf16.msra.mxu0 %v17396_v17  ;;  %v26507_v27 = vand.u32 4294901760, %v26506_v56  ;;  %v26510_v17 = vld [vmem:[#allocation78_spill] sm:$0xff]  ;;  %v26512_v31 = vld [vmem:[#allocation79_spill] sm:$0xff]  ;;  %v5678_v63 = vand.u32 4294901760, %v22522_v6 }
 0x206   :  { %5361 = vmatprep.mubr.f32.mxu1 %v26364_v11  ;;  %17805 = vmatpush3.bf16.msra.mxu1 %v17804_v43  ;;  %v17808_v60 = vpack.c.bf16 %v26509_v3, %v26508_v8  ;;  %v26511_v24 = vand.u32 4294901760, %v26510_v17  ;;  %v26513_v36 = vand.u32 4294901760, %v26512_v31  ;;  %v26514_v11 = vand.u32 4294901760, %v21676_v51  ;;  %v26522_v3 = vld [vmem:[#allocation84_spill] sm:$0xff] }
 0x207   :  { %v17400_v47 = vpack.c.bf16 %v26507_v27, %v26505_v40  ;;  %17399 = vmatprep.subr.bf16.mxu0 %v17398_v9  ;;  %17807 = vmatprep.subr.bf16.mxu1 %v17806_v49  ;;  %v26516_v40 = vld [vmem:[#allocation81_spill] sm:$0xff]  ;;  %v26518_v9 = vld [vmem:[#allocation82_spill] sm:$0xff]  ;;  %v26520_v8 = vand.u32 4294901760, %v21682_v57  ;;  %v26521_v51 = vand.u32 4294901760, %v21685_v1  ;;  %v26523_v17 = vand.u32 4294901760, %v26522_v3 }
 0x208   :  { %v17402_v22 = vpack.c.bf16 %v26513_v36, %v26511_v24  ;;  %v17810_v43 = vpack.c.bf16 %v26515_v12, %v26514_v11  ;;  %v26517_v56 = vand.u32 4294901760, %v26516_v40  ;;  %v26519_v49 = vand.u32 4294901760, %v26518_v9  ;;  %v26524_v24 = vld [vmem:[#allocation85_spill] sm:$0xff]  ;;  %v26528_v1 = vld [vmem:[#allocation86_spill] sm:$0xff]  ;;  %v26530_v40 = vld [vmem:[#allocation87_spill] sm:$0xff] }
 0x209   :  { %5365 = vmatmul.mubr.f32.gmra.mrb[26].mxu1 %v26371_v18  ;;  %17401 = vmatpush1.bf16.msra.mxu0 %v17400_v47  ;;  %v17812_v59 = vpack.c.bf16 %v26521_v51, %v26520_v8  ;;  %v26525_v31 = vand.u32 4294901760, %v26524_v24  ;;  %v26526_v47 = vand.u32 4294901760, %v21702_v0  ;;  %v26529_v12 = vand.u32 4294901760, %v26528_v1  ;;  %v26535_v0 = vld [vmem:[#allocation89_spill] sm:$0xff]  ;;  %v26539_v24 = vld [vmem:[#allocation139_spill] sm:$0xff]  ;;  %v26543_v1 = vld [vmem:[#allocation182_spill] sm:$0xff] }
 0x20a   :  { %v17404_v27 = vpack.c.bf16 %v26519_v49, %v26517_v56  ;;  %17809 = vmatpush3.bf16.msra.mxu1 %v17808_v60  ;;  %5531 = vmatprep.mubr.f32.mxu1 %v21277_v10  ;;  %v26527_v60 = vand.u32 4294901760, %v21715_v45  ;;  %v26531_v56 = vand.u32 4294901760, %v26530_v40  ;;  %v26532_v49 = vand.u32 4294901760, %v21718_v23  ;;  %v26537_v45 = vld [vmem:[#allocation90_spill] sm:$0xff]  ;;  %v26560_v23 = vld [vmem:[#allocation144_spill] sm:$0xff] }
 0x20b   :  { %v17406_v36 = vpack.c.bf16 %v26525_v31, %v26523_v17  ;;  %17403 = vmatprep.subr.bf16.mxu0 %v17402_v22  ;;  %17811 = vmatprep.subr.bf16.mxu1 %v17810_v43  ;;  %v26533_v22 = vld [vmem:[#allocation180_spill] sm:$0xff]  ;;  %v26536_v51 = vand.u32 4294901760, %v26535_v0  ;;  %v26538_v3 = vand.u32 4294901760, %v26537_v45  ;;  %v26546_v40 = vld [vmem:[#allocation142_spill] sm:$0xff]  ;;  %v22631_v57 = vsub.f32 %v22522_v6, %v5678_v63 }
 0x20c   :  { %v17814_v11 = vpack.c.bf16 %v26527_v60, %v26526_v47  ;;  %v17408_v9 = vpack.c.bf16 %v26531_v56, %v26529_v12  ;;  %v26534_v43 = vand.u32 4294901760, %v26533_v22  ;;  %v26540_v31 = vld [vmem:[#allocation140_spill] sm:$0xff]  ;;  %v26541_v47 = vld [vmem:[#allocation181_spill] sm:$0xff]  ;;  %v26544_v12 = vand.u32 4294901760, %v26543_v1 }
 0x20d   :  { %17405 = vmatpush1.bf16.msra.mxu0 %v17404_v27  ;;  %v17410_v17 = vpack.c.bf16 %v26538_v3, %v26536_v51  ;;  %v26542_v60 = vand.u32 4294901760, %v26541_v47  ;;  %v26547_v56 = vld [vmem:[#allocation92_spill] sm:$0xff]  ;;  %v26549_v22 = vld [vmem:[#allocation93_spill] sm:$0xff]  ;;  %v26551_v51 = vld [vmem:[#allocation183_spill] sm:$0xff] }
 0x20e   :  { %17813 = vmatpush3.bf16.msra.mxu1 %v17812_v59  ;;  %17407 = vmatprep.subr.bf16.mxu0 %v17406_v36  ;;  %v17816_v8 = vpack.c.bf16 %v26534_v43, %v26532_v49  ;;  %v26545_v36 = vld [vmem:[#allocation141_spill] sm:$0xff]  ;;  %v26548_v49 = vand.u32 4294901760, %v26547_v56  ;;  %v26550_v43 = vand.u32 4294901760, %v26549_v22  ;;  %v26552_v45 = vand.u32 4294901760, %v26551_v51  ;;  %v26553_v3 = vld [vmem:[#allocation186_spill] sm:$0xff]  ;;  %v26555_v47 = vld [vmem:[#allocation96_spill] sm:$0xff] }
 0x20f   :  { %17815 = vmatprep.subr.bf16.mxu1 %v17814_v11  ;;  %v17818_v59 = vpack.c.bf16 %v26544_v12, %v26542_v60  ;;  %v26554_v11 = vand.u32 4294901760, %v26553_v3  ;;  %v26556_v27 = vand.u32 4294901760, %v26555_v47  ;;  %v26557_v1 = vld [vmem:[#allocation97_spill] sm:$0xff]  ;;  %v26561_v56 = vld [vmem:[#allocation187_spill] sm:$0xff]  ;;  %v26563_v22 = vld [vmem:[#allocation188_spill] sm:$0xff] }
 0x210   :  { %v17412_v0 = vpack.c.bf16 %v26550_v43, %v26548_v49  ;;  %v26558_v60 = vand.u32 4294901760, %v26557_v1  ;;  %v26562_v18 = vand.u32 4294901760, %v26561_v56  ;;  %v26564_v49 = vand.u32 4294901760, %v26563_v22  ;;  %v26567_v3 = vld [vmem:[#allocation99_spill] sm:$0xff]  ;;  %v26575_v56 = vld [vmem:[#allocation193_spill] sm:$0xff] }
 0x211   :  { %17409 = vmatpush1.bf16.msra.mxu0 %v17408_v9  ;;  %v17820_v15 = vpack.c.bf16 %v26554_v11, %v26552_v45  ;;  %v26568_v45 = vand.u32 4294901760, %v26567_v3  ;;  %v26569_v11 = vld [vmem:[#allocation100_spill] sm:$0xff]  ;;  %v26576_v22 = vand.u32 4294901760, %v26575_v56  ;;  %v26642_v51 = vld [vmem:[#allocation91_spill] sm:$0xff] }
 0x212   :  { %17817 = vmatpush3.bf16.msra.mxu1 %v17816_v8  ;;  %17411 = vmatprep.subr.bf16.mxu0 %v17410_v17  ;;  %v17414_v12 = vpack.c.bf16 %v26558_v60, %v26556_v27  ;;  %v17822_v8 = vpack.c.bf16 %v26564_v49, %v26562_v18  ;;  %v26570_v47 = vand.u32 4294901760, %v26569_v11  ;;  %v26571_v27 = vld [vmem:[#allocation190_spill] sm:$0xff]  ;;  %v26573_v60 = vld [vmem:[#allocation192_spill] sm:$0xff] }
 0x213   :  { %17819 = vmatprep.subr.bf16.mxu1 %v17818_v59  ;;  %v26572_v1 = vand.u32 4294901760, %v26571_v27  ;;  %v26574_v59 = vand.u32 4294901760, %v26573_v60  ;;  %v26577_v18 = vld [vmem:[#allocation194_spill] sm:$0xff]  ;;  %v26583_v11 = vld [vmem:[#allocation196_spill] sm:$0xff]  ;;  %v26585_v27 = vld [vmem:[#allocation197_spill] sm:$0xff] }
 0x214   :  { %v17416_v4 = vpack.c.bf16 %v26570_v47, %v26568_v45  ;;  %v26578_v49 = vand.u32 4294901760, %v26577_v18  ;;  %v26584_v47 = vand.u32 4294901760, %v26583_v11  ;;  %v26587_v60 = vld [vmem:[#allocation198_spill] sm:$0xff]  ;;  %v26590_v18 = vld [vmem:[#allocation155_spill] sm:$0xff]  ;;  %v22508_v3 = vld [vmem:[#allocation2 + $0x460] sm:$0xff] }
 0x215   :  { %17413 = vmatpush1.bf16.msra.mxu0 %v17412_v0  ;;  %v17824_v9 = vpack.c.bf16 %v26574_v59, %v26572_v1  ;;  %v26586_v1 = vand.u32 4294901760, %v26585_v27  ;;  %v26588_v59 = vand.u32 4294901760, %v26587_v60  ;;  %v26599_v27 = vld [vmem:[#allocation32_spill] sm:$0xff]  ;;  %v26602_v60 = vld [vmem:[#allocation169_spill] sm:$0xff]  ;;  %v22510_v0 = vld [vmem:[#allocation2 + $0x478] sm:$0xff] }
 0x216   :  { %17821 = vmatpush3.bf16.msra.mxu1 %v17820_v15  ;;  %17415 = vmatprep.subr.bf16.mxu0 %v17414_v12  ;;  %v17826_v61 = vpack.c.bf16 %v26578_v49, %v26576_v22  ;;  %v26580_v15 = vld [vmem:[#allocation24_spill] sm:$0xff]  ;;  %v26581_v12 = vld [vmem:[#allocation195_spill] sm:$0xff]  ;;  %v26591_v49 = vld [vmem:[#allocation25_spill] sm:$0xff] }
 0x217   :  { %17823 = vmatprep.subr.bf16.mxu1 %v17822_v8  ;;  %v26582_v45 = vand.u32 4294901760, %v26581_v12  ;;  %v17830_v56 = vpack.c.bf16 %v26588_v59, %v26586_v1  ;;  %v26589_v22 = vld [vmem:[#allocation151_spill] sm:$0xff]  ;;  %v26595_v12 = vld [vmem:[#allocation200_spill] sm:$0xff]  ;;  %v26603_v59 = vld [vmem:[#allocation34_spill] sm:$0xff] }
 0x218   :  { %v26596_v11 = vand.u32 4294901760, %v26595_v12  ;;  %v26600_v1 = vld [vmem:[#allocation167_spill] sm:$0xff]  ;;  %v26609_v12 = vld [vmem:[#allocation42_spill] sm:$0xff] }
 0x219   :  { %17417 = vmatpush1.bf16.msra.mxu0 %v17416_v4  ;;  %v17828_v8 = vpack.c.bf16 %v26584_v47, %v26582_v45  ;;  %v26592_v4 = vld [vmem:[#allocation26_spill] sm:$0xff]  ;;  %v26598_v47 = vld [vmem:[#allocation28_spill] sm:$0xff] }
 0x21a   :  { %17825 = vmatpush3.bf16.msra.mxu1 %v17824_v9  ;;  %17419 = vmatprep.subr.bf16.mxu0 %v26580_v15  ;;  %v26593_v9 = vld [vmem:[#allocation199_spill] sm:$0xff] }
 0x21b   :  { %17827 = vmatprep.subr.bf16.mxu1 %v17826_v61  ;;  %v26594_v15 = vand.u32 4294901760, %v26593_v9  ;;  %v26597_v61 = vld [vmem:[#allocation153_spill] sm:$0xff]  ;;  %v26607_v9 = vld [vmem:[#allocation39_spill] sm:$0xff] }
 0x21c   :  { %3675 = vmatmul.mubr.f32.vlgmr.msra.gmra.mrb[8].mxu0 %v26589_v22 }
 0x21d   :  { %3681 = vmatprep.mubr.f32.mxu0 %v26590_v18  ;;  %17421 = vmatpush1.bf16.msra.mxu0 %v26591_v49  ;;  %v17832_v45 = vpack.c.bf16 %v26596_v11, %v26594_v15  ;;  %v26605_v49 = vld [vmem:[#allocation37_spill] sm:$0xff]  ;;  %v26610_v11 = vld [vmem:[#allocation174_spill] sm:$0xff] }
 0x21e   :  { %17829 = vmatpush3.bf16.msra.mxu1 %v17828_v8  ;;  %17423 = vmatprep.subr.bf16.mxu0 %v26592_v4  ;;  %v26601_v8 = vld [vmem:[#allocation33_spill] sm:$0xff]  ;;  %v26606_v4 = vld [vmem:[#allocation172_spill] sm:$0xff] }
 0x21f   :  { %17831 = vmatprep.subr.bf16.mxu1 %v17830_v56  ;;  %v26604_v56 = vld [vmem:[#allocation170_spill] sm:$0xff]  ;;  %v26608_v15 = vld [vmem:[#allocation173_spill] sm:$0xff] }
 0x220   :  { %3683 = vmatmul.mubr.f32.gmra.mrb[10].mxu0 %v26597_v61 }
 0x221   :  { %17425 = vmatpush1.bf16.msra.mxu0 %v26598_v47  ;;  %3818 = vmatprep.mubr.f32.mxu0 %v21277_v10  ;;  %v26612_v47 = vld [vmem:[#allocation175_spill] sm:$0xff] }
 0x222   :  { %17833 = vmatpush3.bf16.msra.mxu1 %v17832_v45  ;;  %17427 = vmatprep.subr.bf16.mxu0 %v26599_v27  ;;  %v26611_v45 = vld [vmem:[#allocation44_spill] sm:$0xff]  ;;  %v26613_v27 = vld [vmem:[#allocation47_spill] sm:$0xff] }
 0x223   :  { %17835 = vmatprep.subr.bf16.mxu1 %v26600_v1  ;;  %v26614_v1 = vld [vmem:[#allocation176_spill] sm:$0xff] }
 0x225   :  { %5533 = vmatmul.mubr.f32.vlgmr.msra.gmra.mrb[28].mxu1 %v26589_v22  ;;  %17429 = vmatpush1.bf16.msra.mxu0 %v26601_v8  ;;  %v26615_v8 = vld [vmem:[#allocation50_spill] sm:$0xff] }
 0x226   :  { %5538 = vmatprep.mubr.f32.mxu1 %v26590_v18  ;;  %17837 = vmatpush3.bf16.msra.mxu1 %v26602_v60  ;;  %v26616_v60 = vld [vmem:[#allocation177_spill] sm:$0xff] }
 0x227   :  { %17431 = vmatprep.subr.bf16.mxu0 %v26603_v59  ;;  %17839 = vmatprep.subr.bf16.mxu1 %v26604_v56  ;;  %v26618_v59 = vld [vmem:[#allocation178_spill] sm:$0xff]  ;;  %v26619_v56 = vld [vmem:[#allocation56_spill] sm:$0xff] }
 0x229   :  { %5540 = vmatmul.mubr.f32.gmra.mrb[30].mxu1 %v26597_v61  ;;  %17433 = vmatpush1.bf16.msra.mxu0 %v26605_v49 }
 0x22a   :  { %17841 = vmatpush3.bf16.msra.mxu1 %v26606_v4  ;;  %5642 = vmatprep.mubr.f32.mxu1 %v21277_v10  ;;  %v26617_v10 = vld [vmem:[#allocation53_spill] sm:$0xff]  ;;  %v26621_v4 = vld [vmem:[#allocation179_spill] sm:$0xff] }
 0x22b   :  { %17435 = vmatprep.subr.bf16.mxu0 %v26607_v9  ;;  %17843 = vmatprep.subr.bf16.mxu1 %v26608_v15  ;;  %v2442_v15 = vld [vmem:[#allocation2 + $0x400] sm:$0xff] }
 0x22d   :  { %17437 = vmatpush1.bf16.msra.mxu0 %v26609_v12  ;;  %v2445_v12 = vld [vmem:[#allocation2 + $0x418] sm:$0xff] }
 0x22e   :  { %17845 = vmatpush3.bf16.msra.mxu1 %v26610_v11  ;;  %17439 = vmatprep.subr.bf16.mxu0 %v26611_v45  ;;  %v26623_v11 = vld [vmem:[#allocation59_spill] sm:$0xff]  ;;  %v26624_v45 = vld [vmem:[#allocation184_spill] sm:$0xff] }
 0x22f   :  { %17847 = vmatprep.subr.bf16.mxu1 %v26612_v47  ;;  %v26625_v47 = vld [vmem:[#allocation62_spill] sm:$0xff] }
 0x231   :  { %17441 = vmatpush1.bf16.msra.mxu0 %v26613_v27 }
 0x232   :  { %17849 = vmatpush3.bf16.msra.mxu1 %v26614_v1  ;;  %17443 = vmatprep.subr.bf16.mxu0 %v26615_v8  ;;  %v26627_v1 = vld [vmem:[#allocation185_spill] sm:$0xff]  ;;  %v5657_v8 = vand.u32 4294901760, %v2442_v15 }
 0x233   :  { %17851 = vmatprep.subr.bf16.mxu1 %v26616_v60  ;;  %v22483_v49 = vpop.f32.mrb[4].mxu1  ;;  %v5660_v60 = vand.u32 4294901760, %v2445_v12 }
 0x234   :  { %26620 = vst [vmem:[#allocation15_spill] sm:$0xff] %v22483_v49  ;;  %v22486_v9 = vpop.f32.mrb[5].mxu1  ;;  %v25750_v49 = vand.u32 4294901760, %v22534_v44 }
 0x235   :  { %17445 = vmatpush1.bf16.msra.mxu0 %v26617_v10  ;;  %26622 = vst [vmem:[#allocation114_spill] sm:$0xff] %v22486_v9  ;;  %v22561_v46 = vsub.f32 %v2445_v12, %v5660_v60  ;;  %v26646_v12 = vld [vmem:[#allocation98_spill] sm:$0xff] }
 0x236   :  { %17853 = vmatpush3.bf16.msra.mxu1 %v26618_v59  ;;  %17447 = vmatprep.subr.bf16.mxu0 %v26619_v56  ;;  %v22496_v59 = vld [vmem:[#allocation2 + $0x430] sm:$0xff]  ;;  %v22498_v56 = vld [vmem:[#allocation2 + $0x448] sm:$0xff] }
 0x237   :  { %17855 = vmatprep.subr.bf16.mxu1 %v26621_v4  ;;  %v22491_v27 = vpop.f32.mrb[6].mxu1  ;;  %v26629_v4 = vld [vmem:[#allocation65_spill] sm:$0xff] }
 0x238   :  { %26626 = vst [vmem:[#allocation117_spill] sm:$0xff] %v22491_v27  ;;  %v22494_v10 = vpop.f32.mrb[7].mxu1  ;;  %v26639_v27 = vld [vmem:[#allocation168_spill] sm:$0xff] }
 0x239   :  { %17449 = vmatpush1.bf16.msra.mxu0 %v26623_v11  ;;  %26628 = vst [vmem:[#allocation154_spill] sm:$0xff] %v22494_v10  ;;  %v26630_v11 = vld [vmem:[#allocation68_spill] sm:$0xff]  ;;  %v22536_v10 = vld [vmem:[#allocation2 + $0x4d8] sm:$0xff] }
 0x23a   :  { %17857 = vmatpush3.bf16.msra.mxu1 %v26624_v45  ;;  %17451 = vmatprep.subr.bf16.mxu0 %v26625_v47  ;;  %v22504_v45 = vpack.c.bf16 %v5660_v60, %v5657_v8  ;;  %v5663_v47 = vand.u32 4294901760, %v22496_v59 }
 0x23b   :  { %17859 = vmatprep.subr.bf16.mxu1 %v26627_v1  ;;  %v5666_v1 = vand.u32 4294901760, %v22498_v56 }
 0x23c   :  { %26631 = vst [vmem:[#allocation160_spill] sm:$0xff] %v22504_v45 }
 0x23d   :  { %17453 = vmatpush1.bf16.msra.mxu0 %v26629_v4  ;;  %v26633_v4 = vld [vmem:[#allocation74_spill] sm:$0xff] }
 0x23e   :  { %17861 = vmatpush3.bf16.msra.mxu1 %v26484_v30  ;;  %17455 = vmatprep.subr.bf16.mxu0 %v26630_v11  ;;  %v22516_v30 = vpack.c.bf16 %v5666_v1, %v5663_v47  ;;  %v5672_v11 = vand.u32 4294901760, %v22510_v0 }
 0x23f   :  { %17863 = vmatprep.subr.bf16.mxu1 %v26489_v58  ;;  %v5669_v58 = vand.u32 4294901760, %v22508_v3 }
 0x240   :  { %26634 = vst [vmem:[#allocation16_spill] sm:$0xff] %v22516_v30 }
 0x241   :  { %17457 = vmatpush1.bf16.msra.mxu0 %v26632_v28  ;;  %v22530_v28 = vpack.c.bf16 %v5672_v11, %v5669_v58 }
 0x242   :  { %17865 = vmatpush3.bf16.msra.mxu1 %v21836_v41  ;;  %17459 = vmatprep.subr.bf16.mxu0 %v26633_v4  ;;  %v26636_v41 = vld [vmem:[#allocation80_spill] sm:$0xff]  ;;  %v5675_v4 = vand.u32 4294901760, %v22520_v52 }
 0x243   :  { %17867 = vmatprep.subr.bf16.mxu1 %v22504_v45  ;;  %26637 = vst [vmem:[#allocation17_spill] sm:$0xff] %v22530_v28 }
 0x244   :  { %v22544_v9 = vpack.c.bf16 %v5678_v63, %v5675_v4 }
 0x245   :  { %5644 = vmatmul.mubr.f32.vlgmr.msra.gmra.mrb[32].mxu1 %v26589_v22  ;;  %17461 = vmatpush1.bf16.msra.mxu0 %v26635_v21  ;;  %v26638_v21 = vld [vmem:[#allocation83_spill] sm:$0xff] }
 0x246   :  { %5649 = vmatprep.mubr.f32.mxu1 %v26590_v18  ;;  %17869 = vmatpush3.bf16.msra.mxu1 %v22504_v45  ;;  %26641 = vst [vmem:[#allocation118_spill] sm:$0xff] %v22544_v9  ;;  %v25749_v45 = vand.u32 4294901760, %v22536_v10 }
 0x247   :  { %17463 = vmatprep.subr.bf16.mxu0 %v26636_v41  ;;  %17871 = vmatprep.subr.bf16.mxu1 %v22516_v30  ;;  %v26640_v41 = vld [vmem:[#allocation88_spill] sm:$0xff] }
 0x248   :  { %v22568_v17 = vpack.c.bf16 %v25749_v45, %v25750_v49  ;;  %v22588_v49 = vld [vmem:[#allocation2 + $0x568] sm:$0xff] }
 0x249   :  { %5651 = vmatmul.mubr.f32.gmra.mrb[34].mxu1 %v26597_v61  ;;  %17465 = vmatpush1.bf16.msra.mxu0 %v26638_v21  ;;  %v26643_v21 = vld [vmem:[#allocation94_spill] sm:$0xff] }
 0x24a   :  { %17873 = vmatpush3.bf16.msra.mxu1 %v22516_v30  ;;  %15168 = vmatprep.mubr.f32.mxu1 %v26639_v27  ;;  %v22555_v27 = vld [vmem:[#allocation2 + $0x520] sm:$0xff]  ;;  %v22559_v30 = vsub.f32 %v2442_v15, %v5657_v8  ;;  %26644 = vst [vmem:[#allocation121_spill] sm:$0xff] %v22568_v17  ;;  %v22591_v15 = vsub.f32 %v22496_v59, %v5663_v47  ;;  %v26648_v8 = vld [vmem:[#allocation101_spill] sm:$0xff] }
 0x24b   :  { %17467 = vmatprep.subr.bf16.mxu0 %v26640_v41  ;;  %17875 = vmatprep.subr.bf16.mxu1 %v22530_v28  ;;  %v22557_v41 = vld [vmem:[#allocation2 + $0x538] sm:$0xff]  ;;  %v25755_v43 = vand.u32 4294901760, %v22555_v27 }
 0x24c   :  { %v26649_v60 = vand.u32 4294901760, %v22557_v41  ;;  %v26652_v47 = vand.u32 4294901760, %v22559_v30 }
 0x24d   :  { %17469 = vmatpush1.bf16.msra.mxu0 %v26642_v51  ;;  %v25754_v51 = vand.u32 4294901760, %v22548_v42 }
 0x24e   :  { %17877 = vmatpush3.bf16.msra.mxu1 %v22530_v28  ;;  %17471 = vmatprep.subr.bf16.mxu0 %v26643_v21  ;;  %v25753_v21 = vand.u32 4294901760, %v22550_v39  ;;  %v26645_v28 = vld [vmem:[#allocation95_spill] sm:$0xff] }
 0x24f   :  { %17879 = vmatprep.subr.bf16.mxu1 %v22544_v9 }
 0x250   :  { %v22584_v45 = vpack.c.bf16 %v25753_v21, %v25754_v51  ;;  %v26651_v21 = vld [vmem:[#allocation102_spill] sm:$0xff]  ;;  %v22620_v51 = vsub.f32 %v22510_v0, %v5672_v11  ;;  %v26659_v0 = vand.u32 4294901760, %v22588_v49 }
 0x251   :  { %17473 = vmatpush1.bf16.msra.mxu0 %v26645_v28  ;;  %v22586_v28 = vld [vmem:[#allocation2 + $0x550] sm:$0xff] }
 0x252   :  { %17881 = vmatpush3.bf16.msra.mxu1 %v22544_v9  ;;  %17475 = vmatprep.subr.bf16.mxu0 %v26646_v12  ;;  %26647 = vst [vmem:[#allocation158_spill] sm:$0xff] %v22584_v45  ;;  %v22594_v12 = vsub.f32 %v22498_v56, %v5666_v1  ;;  %v22601_v9 = vpack.c.bf16 %v26649_v60, %v25755_v43  ;;  %v26653_v1 = vand.u32 4294901760, %v22561_v46  ;;  %v26657_v43 = vld [vmem:[#allocation105_spill] sm:$0xff] }
 0x253   :  { %17883 = vmatprep.subr.bf16.mxu1 %v22568_v17  ;;  %v5761_v56 = vsub.f32 %v22559_v30, %v26652_v47  ;;  %v22622_v59 = vpop.f32.mrb[8].mxu1  ;;  %v26656_v47 = vld [vmem:[#allocation103_spill] sm:$0xff] }
 0x254   :  { %26650 = vst [vmem:[#allocation18_spill] sm:$0xff] %v22601_v9  ;;  %26654 = vst [vmem:[#allocation19_spill] sm:$0xff] %v22622_v59  ;;  %v26662_v63 = vand.u32 4294901760, %v22594_v12 }
 0x255   :  { %17477 = vmatpush1.bf16.msra.mxu0 %v26648_v8  ;;  %v5768_v8 = vsub.f32 %v22561_v46, %v26653_v1  ;;  %v22628_v1 = vsub.f32 %v22520_v52, %v5675_v4  ;;  %v5762_v11 = vand.u32 4294901760, %v5761_v56  ;;  %v26661_v52 = vand.u32 4294901760, %v22591_v15 }
 0x256   :  { %17885 = vmatpush3.bf16.msra.mxu1 %v22568_v17  ;;  %17479 = vmatprep.subr.bf16.mxu0 %v26651_v21  ;;  %v22617_v21 = vsub.f32 %v22508_v3, %v5669_v58  ;;  %v22624_v17 = vpop.f32.mrb[9].mxu1  ;;  %v26658_v3 = vand.u32 4294901760, %v22586_v28  ;;  %v5782_v6 = vsub.f32 %v22594_v12, %v26662_v63 }
 0x257   :  { %17887 = vmatprep.subr.bf16.mxu1 %v22584_v45  ;;  %26655 = vst [vmem:[#allocation122_spill] sm:$0xff] %v22624_v17  ;;  %v5769_v60 = vand.u32 4294901760, %v5768_v8  ;;  %v5775_v4 = vsub.f32 %v22591_v15, %v26661_v52  ;;  %v22650_v17 = vpop.f32.mrb[10].mxu1  ;;  %v26665_v8 = vld [vmem:[#allocation106_spill] sm:$0xff]  ;;  %v26666_v52 = vld [vmem:[#allocation8_spill] sm:$0xff] }
 0x258   :  { %v22639_v58 = vpack.c.bf16 %v26659_v0, %v26658_v3  ;;  %26663 = vst [vmem:[#allocation126_spill] sm:$0xff] %v22650_v17  ;;  %v22653_v56 = vpop.f32.mrb[11].mxu1  ;;  %v5783_v3 = vand.u32 4294901760, %v5782_v6  ;;  %v26669_v0 = vand.u32 4294901760, %v22617_v21  ;;  %v26674_v6 = vmov 0.0  }
 0x259   :  { %17481 = vmatpush1.bf16.msra.mxu0 %v26656_v47  ;;  %26664 = vst [vmem:[#allocation20_spill] sm:$0xff] %v22653_v56  ;;  %v17898_v63 = vpack.c.bf16 %v5769_v60, %v5762_v11  ;;  %v26667_v47 = vand.u32 4294901760, %v22534_v44  ;;  %v26670_v60 = vand.u32 4294901760, %v22620_v51 }
 0x25a   :  { %17889 = vmatpush3.bf16.msra.mxu1 %v22584_v45  ;;  %17515 = vmatprep.subr.bf16.mxu0 %v26657_v43  ;;  %26660 = vst [vmem:[#allocation123_spill] sm:$0xff] %v22639_v58  ;;  %v5789_v56 = vsub.f32 %v22617_v21, %v26669_v0  ;;  %v26675_v0 = vld [vmem:[#allocation107_spill] sm:$0xff] }
 0x25b   :  { %17891 = vmatprep.subr.bf16.mxu1 %v22601_v9  ;;  %v22664_v43 = vsub.f32 %v22534_v44, %v26667_v47  ;;  %v5796_v11 = vsub.f32 %v22620_v51, %v26670_v60  ;;  %v26671_v44 = vld [vmem:[#allocation9_spill] sm:$0xff]  ;;  %v26672_v47 = vand.u32 4294901760, %v22628_v1  ;;  %v26676_v60 = vand.u32 4294901760, %v22548_v42  ;;  %v26680_v45 = vld [vmem:[#allocation119_spill] sm:$0xff] }
 0x25c   :  { %3820 = vmatmul.mubr.f32.vlgmr.msra.gmra.mrb[8].mxu0 %v26589_v22  ;;  %v26668_v22 = vand.u32 4294901760, %v22536_v10  ;;  %v5790_v59 = vand.u32 4294901760, %v5789_v56 }
 0x25d   :  { %3826 = vmatprep.mubr.f32.mxu0 %v26590_v18  ;;  %17517 = vmatpush1.bf16.msra.mxu0 %v26665_v8  ;;  %v5776_v8 = vand.u32 4294901760, %v5775_v4 }
 0x25e   :  { %17893 = vmatpush3.bf16.msra.mxu1 %v22601_v9  ;;  %17519 = vmatprep.subr.bf16.mxu0 %v26666_v52  ;;  %v22669_v18 = vsub.f32 %v22536_v10, %v26668_v22  ;;  %v5803_v10 = vsub.f32 %v22628_v1, %v26672_v47  ;;  %v26673_v52 = vand.u32 4294901760, %v22631_v57  ;;  %v26677_v47 = vand.u32 4294901760, %v22550_v39  ;;  %v26678_v9 = vld [vmem:[#allocation171_spill] sm:$0xff] }
 0x25f   :  { %17895 = vmatprep.subr.bf16.mxu1 %v22639_v58 }
 0x260   :  { %3828 = vmatmul.mubr.f32.gmra.mrb[10].mxu0 %v26597_v61  ;;  %v5810_v4 = vsub.f32 %v22631_v57, %v26673_v52  ;;  %v22699_v17 = vsub.f32 %v22550_v39, %v26677_v47  ;;  %v17902_v52 = vpack.c.bf16 %v5783_v3, %v5776_v8  ;;  %v5804_v22 = vand.u32 4294901760, %v5803_v10 }
 0x261   :  { %17521 = vmatpush1.bf16.msra.mxu0 %v26671_v44  ;;  %4177 = vmatprep.mubr.f32.mxu0 %v26674_v6  ;;  %v22694_v44 = vsub.f32 %v22548_v42, %v26676_v60  ;;  %v26681_v42 = vand.u32 4294901760, %v22664_v43  ;;  %v26682_v39 = vand.u32 4294901760, %v22669_v18  ;;  %v26686_v10 = vand.u32 4294901760, %v22557_v41 }
 0x262   :  { %17897 = vmatpush3.bf16.msra.mxu1 %v22639_v58  ;;  %17523 = vmatprep.subr.bf16.mxu0 %v26675_v0  ;;  %v5797_v58 = vand.u32 4294901760, %v5796_v11  ;;  %v26679_v0 = vld [vmem:[#allocation108_spill] sm:$0xff]  ;;  %v5811_v61 = vand.u32 4294901760, %v5810_v4 }
 0x263   :  { %17899 = vmatprep.subr.bf16.mxu1 %v17898_v63  ;;  %v5817_v60 = vsub.f32 %v22664_v43, %v26681_v42  ;;  %v5824_v47 = vsub.f32 %v22669_v18, %v26682_v39  ;;  %v25764_v56 = vand.u32 4294901760, %v22694_v44  ;;  %v22721_v4 = vsub.f32 %v22557_v41, %v26686_v10  ;;  %v26689_v39 = vld [vmem:[#allocation12_spill] sm:$0xff] }
 0x264   :  { %v17906_v8 = vpack.c.bf16 %v5797_v58, %v5790_v59  ;;  %v17910_v42 = vpack.c.bf16 %v5811_v61, %v5804_v22  ;;  %v26691_v22 = vand.u32 4294901760, %v22586_v28  ;;  %v26695_v10 = vld [vmem:[#allocation112_spill] sm:$0xff] }
 0x265   :  { %15169 = vmatmul.mubr.f32.vlgmr.msra.gmra.mrb[36].mxu1 %v26678_v9  ;;  %17525 = vmatpush1.bf16.msra.mxu0 %v26679_v0  ;;  %v26683_v9 = vld [vmem:[#allocation10_spill] sm:$0xff]  ;;  %26687 = vst [vmem:[#allocation127_spill] sm:$0xff] %v22721_v4  ;;  %v26688_v0 = vld [vmem:[#allocation11_spill] sm:$0xff]  ;;  %v5818_v3 = vand.u32 4294901760, %v5817_v60  ;;  %v5831_v59 = vsub.f32 %v22694_v44, %v25764_v56 }
 0x266   :  { %17901 = vmatpush3.bf16.msra.mxu1 %v17898_v63  ;;  %15203 = vmatprep.mubr.f32.mxu1 %v26680_v45  ;;  %v26684_v63 = vand.u32 4294901760, %v22555_v27  ;;  %v22736_v61 = vsub.f32 %v22586_v28, %v26691_v22 }
 0x267   :  { %17527 = vmatprep.subr.bf16.mxu0 %v26683_v9  ;;  %17903 = vmatprep.subr.bf16.mxu1 %v17902_v52  ;;  %v5825_v9 = vand.u32 4294901760, %v5824_v47  ;;  %v26694_v47 = vld [vmem:[#allocation13_spill] sm:$0xff] }
 0x268   :  { %v22716_v11 = vsub.f32 %v22555_v27, %v26684_v63  ;;  %v26690_v27 = vand.u32 4294901760, %v22699_v17  ;;  %v25767_v63 = vand.u32 4294901760, %v22721_v4 }
 0x269   :  { %17529 = vmatpush1.bf16.msra.mxu0 %v26688_v0  ;;  %v17914_v0 = vpack.c.bf16 %v5825_v9, %v5818_v3 }
 0x26a   :  { %26685 = vst [vmem:[#allocation21_spill] sm:$0xff] %v22716_v11  ;;  %17905 = vmatpush3.bf16.msra.mxu1 %v17902_v52  ;;  %17531 = vmatprep.subr.bf16.mxu0 %v26689_v39  ;;  %v5838_v58 = vsub.f32 %v22699_v17, %v26690_v27  ;;  %v25768_v41 = vand.u32 4294901760, %v22716_v11  ;;  %v26692_v52 = vand.u32 4294901760, %v22588_v49  ;;  %v5832_v39 = vand.u32 4294901760, %v5831_v59 }
 0x26b   :  { %17907 = vmatprep.subr.bf16.mxu1 %v17906_v8  ;;  %v5852_v28 = vsub.f32 %v22721_v4, %v25767_v63 }
 0x26c   :  { %v22741_v60 = vsub.f32 %v22588_v49, %v26692_v52  ;;  %v5839_v27 = vand.u32 4294901760, %v5838_v58  ;;  %v5845_v56 = vsub.f32 %v22716_v11, %v25768_v41  ;;  %v25766_v49 = vand.u32 4294901760, %v22736_v61  ;;  %v26696_v52 = vld [vmem:[#allocation113_spill] sm:$0xff]  ;;  %v26723_v41 = vld [vmem:[#allocation104_spill] sm:$0xff] }
 0x26d   :  { %17533 = vmatpush1.bf16.msra.mxu0 %v26694_v47  ;;  %v5853_v59 = vand.u32 4294901760, %v5852_v28 }
 0x26e   :  { %26693 = vst [vmem:[#allocation152_spill] sm:$0xff] %v22741_v60  ;;  %17909 = vmatpush3.bf16.msra.mxu1 %v17906_v8  ;;  %17535 = vmatprep.subr.bf16.mxu0 %v26695_v10  ;;  %v25765_v22 = vand.u32 4294901760, %v22741_v60  ;;  %v26697_v8 = vld [vmem:[#allocation14_spill] sm:$0xff]  ;;  %v17918_v3 = vpack.c.bf16 %v5839_v27, %v5832_v39  ;;  %v5846_v9 = vand.u32 4294901760, %v5845_v56  ;;  %v5859_v58 = vsub.f32 %v22736_v61, %v25766_v49 }
 0x26f   :  { %17911 = vmatprep.subr.bf16.mxu1 %v17910_v42 }
 0x270   :  { %v5866_v47 = vsub.f32 %v22741_v60, %v25765_v22  ;;  %v5860_v10 = vand.u32 4294901760, %v5859_v58  ;;  %v26702_v58 = vpack.c.bf16 %v26361_v37, %v26360_v33  ;;  %v26721_v22 = vld [vmem:[#allocation149_spill] sm:$0xff] }
 0x271   :  { %17537 = vmatpush1.bf16.msra.mxu0 %v26696_v52  ;;  %v26698_v52 = vpack.c.bf16 %v26333_v32, %v26332_v26 }
 0x272   :  { %17913 = vmatpush3.bf16.msra.mxu1 %v17910_v42  ;;  %17539 = vmatprep.subr.bf16.mxu0 %v26697_v8  ;;  %v17922_v42 = vpack.c.bf16 %v5853_v59, %v5846_v9  ;;  %v5867_v39 = vand.u32 4294901760, %v5866_v47  ;;  %v26701_v59 = vld [vmem:[#allocation125_spill] sm:$0xff]  ;;  %v26703_v47 = vpack.c.bf16 %v26370_v29, %v26369_v5 }
 0x273   :  { %17915 = vmatprep.subr.bf16.mxu1 %v17914_v0 }
 0x274   :  { %v13884_v27 = vpop.f32.mrb[12].mxu1  ;;  %v17926_v8 = vpack.c.bf16 %v5867_v39, %v5860_v10  ;;  %v26704_v10 = vpack.c.bf16 %v26379_v62, %v26378_v20  ;;  %v26705_v39 = vld [vmem:[#allocation128_spill] sm:$0xff] }
 0x275   :  { %17541 = vmatpush1.bf16.msra.mxu0 %v22292_v19  ;;  %v13885_v56 = vpop.f32.mrb[13].mxu1 }
 0x276   :  { %17917 = vmatpush3.bf16.msra.mxu1 %v17914_v0  ;;  %17543 = vmatprep.subr.bf16.mxu0 %v22305_v7  ;;  %v13886_v28 = vadd.f32 %v13885_v56, %v13884_v27  ;;  %v26699_v0 = vpack.c.bf16 %v26340_v50, %v26339_v54  ;;  %v26706_v27 = vpack.c.bf16 %v26386_v55, %v26380_v48 }
 0x277   :  { %17919 = vmatprep.subr.bf16.mxu1 %v17918_v3  ;;  %v17938_v56 = vpack.c.bf16 %v22620_v51, %v22617_v21 }
 0x278   :  { %v13887_v19 = vpop.f32.mrb[14].mxu1 }
 0x279   :  { %17545 = vmatpush1.bf16.msra.mxu0 %v22330_v25  ;;  %v13888_v7 = vpop.f32.mrb[15].mxu1  ;;  %v26700_v25 = vpack.c.bf16 %v26354_v13, %v26353_v2 }
 0x27a   :  { %17921 = vmatpush3.bf16.msra.mxu1 %v17918_v3  ;;  %17547 = vmatprep.subr.bf16.mxu0 %v26698_v52  ;;  %v13889_v9 = vadd.f32 %v13888_v7, %v13887_v19  ;;  %v17930_v3 = vpack.c.bf16 %v22561_v46, %v22559_v30  ;;  %v26707_v52 = vpack.c.bf16 %v26402_v38, %v26395_v16 }
 0x27b   :  { %17923 = vmatprep.subr.bf16.mxu1 %v17922_v42  ;;  %v17942_v19 = vpack.c.bf16 %v22631_v57, %v22628_v1  ;;  %v26709_v7 = vpack.c.bf16 %v26419_v34, %v26418_v35 }
 0x27c   :  { %4179 = vmatmul.mubr.f32.vlgmr.msra.gmra.mrb[12].mxu0 %v26680_v45 }
 0x27d   :  { %17549 = vmatpush1.bf16.msra.mxu0 %v26699_v0  ;;  %4184 = vmatprep.mubr.f32.mxu0 %v26674_v6  ;;  %v26710_v0 = vpack.c.bf16 %v26540_v31, %v26539_v24 }
 0x27e   :  { %17925 = vmatpush3.bf16.msra.mxu1 %v17922_v42  ;;  %17551 = vmatprep.subr.bf16.mxu0 %v26700_v25  ;;  %v17934_v42 = vpack.c.bf16 %v22594_v12, %v22591_v15  ;;  %v17946_v25 = vpack.c.bf16 %v22669_v18, %v22664_v43 }
 0x27f   :  { %17927 = vmatprep.subr.bf16.mxu1 %v17926_v8 }
 0x280   :  { %4186 = vmatmul.mubr.f32.gmra.mrb[14].mxu0 %v26701_v59 }
 0x281   :  { %17553 = vmatpush1.bf16.msra.mxu0 %v26702_v58  ;;  %4320 = vmatprep.mubr.f32.mxu0 %v26674_v6  ;;  %v26712_v58 = vld [vmem:[#allocation143_spill] sm:$0xff] }
 0x282   :  { %17929 = vmatpush3.bf16.msra.mxu1 %v17926_v8  ;;  %17555 = vmatprep.subr.bf16.mxu0 %v26703_v47  ;;  %v26708_v8 = vpack.c.bf16 %v26410_v14, %v26403_v53  ;;  %v26713_v47 = vpack.c.bf16 %v26560_v23, %v26712_v58 }
 0x283   :  { %17931 = vmatprep.subr.bf16.mxu1 %v17930_v3 }
 0x285   :  { %15204 = vmatmul.mubr.f32.vlgmr.msra.gmra.mrb[36].mxu1 %v26701_v59  ;;  %17557 = vmatpush1.bf16.msra.mxu0 %v26704_v10  ;;  %v26714_v10 = vld [vmem:[#allocation146_spill] sm:$0xff] }
 0x286   :  { %17933 = vmatpush3.bf16.msra.mxu1 %v17930_v3  ;;  %15238 = vmatprep.mubr.f32.mxu1 %v26705_v39  ;;  %v26711_v3 = vpack.c.bf16 %v26546_v40, %v26545_v36 }
 0x287   :  { %17559 = vmatprep.subr.bf16.mxu0 %v26706_v27  ;;  %17935 = vmatprep.subr.bf16.mxu1 %v17934_v42  ;;  %v26715_v27 = vld [vmem:[#allocation145_spill] sm:$0xff] }
 0x289   :  { %17561 = vmatpush1.bf16.msra.mxu0 %v26707_v52  ;;  %v26717_v52 = vld [vmem:[#allocation148_spill] sm:$0xff] }
 0x28a   :  { %17937 = vmatpush3.bf16.msra.mxu1 %v17934_v42  ;;  %17563 = vmatprep.subr.bf16.mxu0 %v26708_v8  ;;  %v17950_v42 = vpack.c.bf16 %v22699_v17, %v22694_v44  ;;  %v26718_v8 = vld [vmem:[#allocation147_spill] sm:$0xff] }
 0x28b   :  { %17939 = vmatprep.subr.bf16.mxu1 %v17938_v56 }
 0x28d   :  { %17565 = vmatpush1.bf16.msra.mxu0 %v26709_v7  ;;  %v26719_v7 = vpack.c.bf16 %v26717_v52, %v26718_v8 }
 0x28e   :  { %17941 = vmatpush3.bf16.msra.mxu1 %v17938_v56  ;;  %17567 = vmatprep.subr.bf16.mxu0 %v26710_v0  ;;  %v26716_v56 = vpack.c.bf16 %v26714_v10, %v26715_v27 }
 0x28f   :  { %17943 = vmatprep.subr.bf16.mxu1 %v17942_v19 }
 0x291   :  { %17569 = vmatpush1.bf16.msra.mxu0 %v26711_v3 }
 0x292   :  { %17945 = vmatpush3.bf16.msra.mxu1 %v17942_v19  ;;  %17571 = vmatprep.subr.bf16.mxu0 %v26713_v47  ;;  %v17954_v19 = vpack.c.bf16 %v22721_v4, %v22716_v11  ;;  %v26720_v47 = vld [vmem:[#allocation150_spill] sm:$0xff]  ;;  %v26724_v4 = vld [vmem:[#allocation159_spill] sm:$0xff] }
 0x293   :  { %17947 = vmatprep.subr.bf16.mxu1 %v17946_v25  ;;  %v26722_v49 = vpack.c.bf16 %v26720_v47, %v26721_v22 }
 0x295   :  { %17573 = vmatpush1.bf16.msra.mxu0 %v26716_v56  ;;  %v13922_v0 = vpop.f32.mrb[16].mxu1 }
 0x296   :  { %17949 = vmatpush3.bf16.msra.mxu1 %v17946_v25  ;;  %17575 = vmatprep.subr.bf16.mxu0 %v26719_v7  ;;  %v13923_v3 = vpop.f32.mrb[17].mxu1  ;;  %v17958_v25 = vpack.c.bf16 %v22741_v60, %v22736_v61 }
 0x297   :  { %17951 = vmatprep.subr.bf16.mxu1 %v17950_v42  ;;  %v13924_v63 = vadd.f32 %v13923_v3, %v13922_v0  ;;  %v26726_v0 = vld [vmem:[#allocation133_spill] sm:$0xff]  ;;  %v26727_v3 = vld [vmem:[#allocation162_spill] sm:$0xff] }
 0x299   :  { %17577 = vmatpush1.bf16.msra.mxu0 %v26722_v49  ;;  %v5094_v56 = vadd.f32 %v13924_v63, %v13886_v28  ;;  %v13925_v7 = vpop.f32.mrb[18].mxu1  ;;  %v26725_v49 = vld [vmem:[#allocation161_spill] sm:$0xff]  ;;  %v26729_v28 = vld [vmem:[#allocation160_spill] sm:$0xff] }
 0x29a   :  { %17953 = vmatpush3.bf16.msra.mxu1 %v17950_v42  ;;  %17579 = vmatprep.subr.bf16.mxu0 %v26723_v41  ;;  %v13926_v59 = vpop.f32.mrb[19].mxu1  ;;  %v26728_v63 = vld [vmem:[#allocation109_spill] sm:$0xff] }
 0x29b   :  { %17955 = vmatprep.subr.bf16.mxu1 %v17954_v19  ;;  %v13927_v11 = vadd.f32 %v13926_v59, %v13925_v7  ;;  %v26731_v59 = vld [vmem:[#allocation135_spill] sm:$0xff]  ;;  %v26736_v7 = vld [vmem:[#allocation17_spill] sm:$0xff] }
 0x29c   :  { %4323 = vmatmul.mubr.f32.vlgmr.msra.gmra.mrb[12].mxu0 %v26705_v39  ;;  %v26730_v39 = vld [vmem:[#allocation110_spill] sm:$0xff] }
 0x29d   :  { %17581 = vmatpush1.bf16.msra.mxu0 %v26724_v4  ;;  %4328 = vmatprep.mubr.f32.mxu0 %v26674_v6  ;;  %v5101_v42 = vadd.f32 %v13927_v11, %v13889_v9  ;;  %v26732_v11 = vld [vmem:[#allocation111_spill] sm:$0xff]  ;;  %v26733_v9 = vld [vmem:[#allocation16_spill] sm:$0xff]  ;;  %v26750_v4 = vand.u32 4294901760, %v26340_v50  ;;  %v26754_v50 = vand.u32 4294901760, %v26360_v33 }
 0x29e   :  { %17957 = vmatpush3.bf16.msra.mxu1 %v17954_v19  ;;  %17583 = vmatprep.subr.bf16.mxu0 %v26725_v49  ;;  %v26734_v19 = vld [vmem:[#allocation115_spill] sm:$0xff] }
 0x29f   :  { %17959 = vmatprep.subr.bf16.mxu1 %v17958_v25 }
 0x2a0   :  { %4331 = vmatmul.mubr.f32.gmra.mrb[14].mxu0 %v26726_v0 }
 0x2a1   :  { %17585 = vmatpush1.bf16.msra.mxu0 %v26727_v3  ;;  %4433 = vmatprep.mubr.f32.mxu0 %v26674_v6  ;;  %v26747_v3 = vld [vmem:[#allocation158_spill] sm:$0xff] }
 0x2a2   :  { %17961 = vmatpush3.bf16.msra.mxu1 %v17958_v25  ;;  %17587 = vmatprep.subr.bf16.mxu0 %v26728_v63  ;;  %v26735_v25 = vld [vmem:[#allocation116_spill] sm:$0xff] }
 0x2a3   :  { %17963 = vmatprep.subr.bf16.mxu1 %v26729_v28  ;;  %v26737_v63 = vld [vmem:[#allocation120_spill] sm:$0xff] }
 0x2a5   :  { %15239 = vmatmul.mubr.f32.vlgmr.msra.gmra.mrb[36].mxu1 %v26726_v0  ;;  %17589 = vmatpush1.bf16.msra.mxu0 %v26730_v39  ;;  %v26738_v0 = vld [vmem:[#allocation124_spill] sm:$0xff]  ;;  %v26739_v39 = vld [vmem:[#allocation118_spill] sm:$0xff] }
 0x2a6   :  { %17965 = vmatpush3.bf16.msra.mxu1 %v26729_v28  ;;  %15273 = vmatprep.mubr.f32.mxu1 %v26731_v59  ;;  %v26740_v28 = vld [vmem:[#allocation129_spill] sm:$0xff] }
 0x2a7   :  { %17591 = vmatprep.subr.bf16.mxu0 %v26732_v11  ;;  %17967 = vmatprep.subr.bf16.mxu1 %v26733_v9  ;;  %v26741_v11 = vld [vmem:[#allocation130_spill] sm:$0xff] }
 0x2a9   :  { %17593 = vmatpush1.bf16.msra.mxu0 %v26734_v19  ;;  %v26742_v19 = vld [vmem:[#allocation121_spill] sm:$0xff] }
 0x2aa   :  { %17969 = vmatpush3.bf16.msra.mxu1 %v26733_v9  ;;  %17595 = vmatprep.subr.bf16.mxu0 %v26735_v25  ;;  %v26743_v9 = vld [vmem:[#allocation163_spill] sm:$0xff]  ;;  %v26744_v25 = vld [vmem:[#allocation164_spill] sm:$0xff] }
 0x2ab   :  { %17971 = vmatprep.subr.bf16.mxu1 %v26736_v7 }
 0x2ad   :  { %17597 = vmatpush1.bf16.msra.mxu0 %v26737_v63  ;;  %v26745_v63 = vand.u32 4294901760, %v26332_v26  ;;  %v26751_v26 = vand.u32 4294901760, %v26353_v2 }
 0x2ae   :  { %17973 = vmatpush3.bf16.msra.mxu1 %v26736_v7  ;;  %17599 = vmatprep.subr.bf16.mxu0 %v26738_v0  ;;  %v26746_v0 = vand.u32 4294901760, %v26333_v32  ;;  %v26752_v32 = vand.u32 4294901760, %v26354_v13  ;;  %v26756_v13 = vand.u32 4294901760, %v26369_v5 }
 0x2af   :  { %17975 = vmatprep.subr.bf16.mxu1 %v26739_v39 }
 0x2b0   :  { %v17610_v7 = vpack.c.bf16 %v26746_v0, %v26745_v63  ;;  %v17614_v63 = vpack.c.bf16 %v26752_v32, %v26751_v26  ;;  %v26753_v0 = vld [vmem:[#allocation18_spill] sm:$0xff]  ;;  %v26767_v26 = vand.u32 4294901760, %v22594_v12  ;;  %v26773_v12 = vand.u32 4294901760, %v22620_v51 }
 0x2b1   :  { %17601 = vmatpush1.bf16.msra.mxu0 %v26740_v28 }
 0x2b2   :  { %17977 = vmatpush3.bf16.msra.mxu1 %v26739_v39  ;;  %17603 = vmatprep.subr.bf16.mxu0 %v26741_v11  ;;  %v26748_v39 = vld [vmem:[#allocation166_spill] sm:$0xff]  ;;  %v26749_v11 = vand.u32 4294901760, %v26339_v54 }
 0x2b3   :  { %17979 = vmatprep.subr.bf16.mxu1 %v26742_v19 }
 0x2b5   :  { %17605 = vmatpush1.bf16.msra.mxu0 %v26743_v9  ;;  %v17612_v9 = vpack.c.bf16 %v26750_v4, %v26749_v11  ;;  %v26755_v4 = vand.u32 4294901760, %v26361_v37  ;;  %v26760_v11 = vand.u32 4294901760, %v22561_v46  ;;  %v26761_v37 = vld [vmem:[#allocation165_spill] sm:$0xff]  ;;  %v26765_v46 = vand.u32 4294901760, %v26386_v55 }
 0x2b6   :  { %17981 = vmatpush3.bf16.msra.mxu1 %v26742_v19  ;;  %17607 = vmatprep.subr.bf16.mxu0 %v26744_v25  ;;  %v13960_v28 = vpop.f32.mrb[20].mxu1  ;;  %v26771_v55 = vand.u32 4294901760, %v26410_v14  ;;  %v26777_v14 = vand.u32 4294901760, %v26540_v31 }
 0x2b7   :  { %17983 = vmatprep.subr.bf16.mxu1 %v26747_v3  ;;  %v13961_v49 = vpop.f32.mrb[21].mxu1 }
 0x2b8   :  { %v13962_v60 = vadd.f32 %v13961_v49, %v13960_v28  ;;  %v17616_v49 = vpack.c.bf16 %v26755_v4, %v26754_v50  ;;  %v26758_v28 = vld [vmem:[#allocation123_spill] sm:$0xff] }
 0x2b9   :  { %17609 = vmatpush1.bf16.msra.mxu0 %v26748_v39 }
 0x2ba   :  { %17985 = vmatpush3.bf16.msra.mxu1 %v26747_v3  ;;  %17611 = vmatprep.subr.bf16.mxu0 %v17610_v7  ;;  %v22881_v25 = vadd.f32 %v13962_v60, %v5094_v56  ;;  %v13963_v19 = vpop.f32.mrb[22].mxu1  ;;  %v26757_v60 = vand.u32 4294901760, %v26370_v29  ;;  %v26763_v7 = vand.u32 4294901760, %v26379_v62  ;;  %v26764_v29 = vand.u32 4294901760, %v26380_v48 }
 0x2bb   :  { %17987 = vmatprep.subr.bf16.mxu1 %v26753_v0  ;;  %v13964_v54 = vpop.f32.mrb[23].mxu1  ;;  %v26768_v62 = vand.u32 4294901760, %v26395_v16  ;;  %v26770_v48 = vand.u32 4294901760, %v26403_v53  ;;  %v26774_v16 = vand.u32 4294901760, %v26418_v35  ;;  %v26776_v53 = vand.u32 4294901760, %v26539_v24 }
 0x2bc   :  { %4437 = vmatmul.mubr.f32.vlgmr.msra.gmra.mrb[12].mxu0 %v26731_v59  ;;  %v13965_v2 = vadd.f32 %v13964_v54, %v13963_v19  ;;  %v17618_v56 = vpack.c.bf16 %v26757_v60, %v26756_v13  ;;  %v26759_v59 = vand.u32 4294901760, %v22559_v30  ;;  %v26762_v19 = vand.u32 4294901760, %v26378_v20 }
 0x2bd   :  { %17613 = vmatpush1.bf16.msra.mxu0 %v17612_v9  ;;  %4442 = vmatprep.mubr.f32.mxu0 %v26674_v6  ;;  %v17622_v30 = vpack.c.bf16 %v26765_v46, %v26764_v29  ;;  %v26769_v20 = vand.u32 4294901760, %v26402_v38  ;;  %v17626_v54 = vpack.c.bf16 %v26771_v55, %v26770_v48  ;;  %v26775_v38 = vand.u32 4294901760, %v26419_v34  ;;  %v26805_v48 = vld [vmem:[#allocation109_spill] sm:$0xff]  ;;  %v26806_v55 = vld [vmem:[#allocation160_spill] sm:$0xff] }
 0x2be   :  { %17989 = vmatpush3.bf16.msra.mxu1 %v26753_v0  ;;  %17615 = vmatprep.subr.bf16.mxu0 %v17614_v63  ;;  %v17994_v9 = vpack.c.bf16 %v26760_v11, %v26759_v59  ;;  %v22899_v33 = vadd.f32 %v13965_v2, %v5101_v42  ;;  %v17620_v5 = vpack.c.bf16 %v26763_v7, %v26762_v19  ;;  %v26766_v42 = vand.u32 4294901760, %v22591_v15  ;;  %v26794_v19 = vld [vmem:[#allocation21_spill] sm:$0xff]  ;;  %v26796_v7 = vld [vmem:[#allocation127_spill] sm:$0xff] }
 0x2bf   :  { %17991 = vmatprep.subr.bf16.mxu1 %v26758_v28  ;;  %v17624_v63 = vpack.c.bf16 %v26769_v20, %v26768_v62  ;;  %v26772_v15 = vand.u32 4294901760, %v22617_v21  ;;  %v17628_v4 = vpack.c.bf16 %v26775_v38, %v26774_v16  ;;  %v26778_v2 = vand.u32 4294901760, %v22628_v1  ;;  %v26801_v62 = vld [vmem:[#allocation159_spill] sm:$0xff]  ;;  %v26812_v16 = vld [vmem:[#allocation17_spill] sm:$0xff]  ;;  %v26813_v38 = vld [vmem:[#allocation120_spill] sm:$0xff] }
 0x2c0   :  { %4446 = vmatmul.mubr.f32.gmra.mrb[14].mxu0 %v26761_v37  ;;  %v17998_v32 = vpack.c.bf16 %v26767_v26, %v26766_v42  ;;  %v26779_v21 = vand.u32 4294901760, %v22631_v57  ;;  %v26780_v13 = vand.u32 4294901760, %v26545_v36  ;;  %v26781_v35 = vand.u32 4294901760, %v26546_v40 }
 0x2c1   :  { %17617 = vmatpush1.bf16.msra.mxu0 %v17616_v49  ;;  %4612 = vmatprep.mubr.f32.mxu0 %v26674_v6  ;;  %v18002_v50 = vpack.c.bf16 %v26773_v12, %v26772_v15  ;;  %v17630_v49 = vpack.c.bf16 %v26777_v14, %v26776_v53  ;;  %v26782_v60 = vand.u32 4294901760, %v26712_v58  ;;  %v26783_v24 = vand.u32 4294901760, %v26560_v23  ;;  %v26809_v15 = vld [vmem:[#allocation16_spill] sm:$0xff]  ;;  %v26810_v12 = vld [vmem:[#allocation115_spill] sm:$0xff]  ;;  %v26815_v53 = vld [vmem:[#allocation118_spill] sm:$0xff] }
 0x2c2   :  { %17993 = vmatpush3.bf16.msra.mxu1 %v26758_v28  ;;  %17619 = vmatprep.subr.bf16.mxu0 %v17618_v56  ;;  %v18006_v51 = vpack.c.bf16 %v26779_v21, %v26778_v2  ;;  %v17632_v34 = vpack.c.bf16 %v26781_v35, %v26780_v13  ;;  %v26784_v56 = vand.u32 4294901760, %v22664_v43  ;;  %v26785_v1 = vand.u32 4294901760, %v22669_v18  ;;  %v23011_v14 = vld [vmem:[%s25286_s2 + $0x80] sm:$0xff]  ;;  %v26816_v2 = vld [vmem:[#allocation129_spill] sm:$0xff]  ;;  %v26817_v21 = vld [vmem:[#allocation130_spill] sm:$0xff] }
 0x2c3   :  { %17995 = vmatprep.subr.bf16.mxu1 %v17994_v9  ;;  %v17634_v31 = vpack.c.bf16 %v26783_v24, %v26782_v60  ;;  %v26786_v59 = vand.u32 4294901760, %v26715_v27  ;;  %v26787_v36 = vand.u32 4294901760, %v26714_v10  ;;  %v26788_v11 = vand.u32 4294901760, %v26718_v8  ;;  %v26818_v35 = vld [vmem:[#allocation121_spill] sm:$0xff]  ;;  %v23032_v60 = vld [vmem:[%s25286_s2 + $0x98] sm:$0xff] }
 0x2c4   :  { %v18010_v57 = vpack.c.bf16 %v26785_v1, %v26784_v56  ;;  %v26789_v58 = vand.u32 4294901760, %v26717_v52  ;;  %v26791_v43 = vand.u32 4294901760, %v22699_v17  ;;  %v26793_v27 = vand.u32 4294901760, %v26720_v47  ;;  %v26819_v24 = vld [vmem:[#allocation163_spill] sm:$0xff] }
 0x2c5   :  { %15274 = vmatmul.mubr.f32.vlgmr.msra.gmra.mrb[36].mxu1 %v26761_v37  ;;  %17621 = vmatpush1.bf16.msra.mxu0 %v17620_v5  ;;  %v17636_v40 = vpack.c.bf16 %v26787_v36, %v26786_v59  ;;  %v26792_v37 = vand.u32 4294901760, %v26721_v22  ;;  %v26795_v8 = vand.u32 4294901760, %v26794_v19  ;;  %v26797_v52 = vand.u32 4294901760, %v26796_v7  ;;  %v26799_v22 = vld [vmem:[#allocation152_spill] sm:$0xff]  ;;  %v23054_v36 = vld [vmem:[%s25286_s2 + $0xa8] sm:$0xff]  ;;  %v23095_v7 = vld [vmem:[%s25286_s2 + $0x10] sm:$0xff] }
 0x2c6   :  { %17997 = vmatpush3.bf16.msra.mxu1 %v17994_v9  ;;  %15308 = vmatprep.mubr.f32.mxu1 %v26680_v45  ;;  %v17638_v23 = vpack.c.bf16 %v26789_v58, %v26788_v11  ;;  %v26790_v9 = vand.u32 4294901760, %v22694_v44  ;;  %v26798_v17 = vand.u32 4294901760, %v22736_v61  ;;  %v26800_v47 = vand.u32 4294901760, %v26799_v22  ;;  %v23049_v59 = vld [vmem:[%s25286_s2 + $0xa0] sm:$0xff]  ;;  %v23064_v58 = vld [vmem:[%s25286_s2 + $0x8] sm:$0xff] }
 0x2c7   :  { %17623 = vmatprep.subr.bf16.mxu0 %v17622_v30  ;;  %17999 = vmatprep.subr.bf16.mxu1 %v17998_v32  ;;  %v17640_v10 = vpack.c.bf16 %v26793_v27, %v26792_v37  ;;  %v18018_v5 = vpack.c.bf16 %v26797_v52, %v26795_v8  ;;  %v23059_v11 = vld [vmem:[%s25286_s2] sm:$0xff]  ;;  %v25782_v37 = vand.u32 4294901760, %v23054_v36  ;;  %v23100_v52 = vld [vmem:[%s25286_s2 + $0x18] sm:$0xff] }
 0x2c8   :  { %v18014_v18 = vpack.c.bf16 %v26791_v43, %v26790_v9  ;;  %v18022_v30 = vpack.c.bf16 %v26800_v47, %v26798_v17  ;;  %v6359_v27 = vand.u32 4294901760, %v23059_v11  ;;  %v25788_v17 = vand.u32 4294901760, %v23100_v52  ;;  %v23128_v47 = vld [vmem:[%s25286_s2 + $0x20] sm:$0xff] }
 0x2c9   :  { %17625 = vmatpush1.bf16.msra.mxu0 %v17624_v63  ;;  %v26803_v63 = vld [vmem:[#allocation125_spill] sm:$0xff] }
 0x2ca   :  { %18001 = vmatpush3.bf16.msra.mxu1 %v17998_v32  ;;  %17627 = vmatprep.subr.bf16.mxu0 %v17626_v54  ;;  %v26807_v54 = vld [vmem:[#allocation110_spill] sm:$0xff] }
 0x2cb   :  { %18003 = vmatprep.subr.bf16.mxu1 %v18002_v50 }
 0x2cd   :  { %17629 = vmatpush1.bf16.msra.mxu0 %v17628_v4  ;;  %v26814_v4 = vld [vmem:[#allocation124_spill] sm:$0xff] }
 0x2ce   :  { %18005 = vmatpush3.bf16.msra.mxu1 %v18002_v50  ;;  %17631 = vmatprep.subr.bf16.mxu0 %v17630_v49  ;;  %v26811_v50 = vld [vmem:[#allocation116_spill] sm:$0xff]  ;;  %v23016_v49 = vld [vmem:[%s25286_s2 + $0x88] sm:$0xff] }
 0x2cf   :  { %18007 = vmatprep.subr.bf16.mxu1 %v18006_v51  ;;  %v7088_v13 = vand.u32 4294901760, %v23016_v49 }
 0x2d1   :  { %17633 = vmatpush1.bf16.msra.mxu0 %v17632_v34  ;;  %v23027_v34 = vld [vmem:[%s25286_s2 + $0x90] sm:$0xff] }
 0x2d2   :  { %18009 = vmatpush3.bf16.msra.mxu1 %v18006_v51  ;;  %17635 = vmatprep.subr.bf16.mxu0 %v17634_v31  ;;  %v7085_v51 = vand.u32 4294901760, %v23011_v14  ;;  %v26820_v31 = vld [vmem:[#allocation164_spill] sm:$0xff]  ;;  %v25787_v1 = vand.u32 4294901760, %v23027_v34 }
 0x2d3   :  { %18011 = vmatprep.subr.bf16.mxu1 %v18010_v57 }
 0x2d4   :  { %v23041_v56 = vpack.c.bf16 %v7088_v13, %v7085_v51 }
 0x2d5   :  { %17637 = vmatpush1.bf16.msra.mxu0 %v17636_v40 }
 0x2d6   :  { %18013 = vmatpush3.bf16.msra.mxu1 %v18010_v57  ;;  %17639 = vmatprep.subr.bf16.mxu0 %v17638_v23  ;;  %v25786_v57 = vand.u32 4294901760, %v23032_v60 }
 0x2d7   :  { %18015 = vmatprep.subr.bf16.mxu1 %v18014_v18 }
 0x2d8   :  { %v13998_v29 = vpop.f32.mrb[24].mxu1  ;;  %v23073_v43 = vpack.c.bf16 %v25786_v57, %v25787_v1 }
 0x2d9   :  { %v13999_v46 = vpop.f32.mrb[25].mxu1  ;;  %17641 = vmatpush1.bf16.msra.mxu0 %v17640_v10  ;;  %v23088_v10 = vld [vmem:[%s25286_s2 + $0xb8] sm:$0xff] }
 0x2da   :  { %v14000_v44 = vadd.f32 %v13999_v46, %v13998_v29  ;;  %18017 = vmatpush3.bf16.msra.mxu1 %v18014_v18  ;;  %17643 = vmatprep.subr.bf16.mxu0 %v26723_v41  ;;  %v26802_v41 = vld [vmem:[#allocation161_spill] sm:$0xff]  ;;  %26821 = vst [vmem:[#allocation22_spill] sm:$0xff] %v23073_v43  ;;  %v25783_v18 = vand.u32 4294901760, %v23049_v59 }
 0x2db   :  { %18019 = vmatprep.subr.bf16.mxu1 %v18018_v5 }
 0x2dc   :  { %v22980_v42 = vadd.f32 %v14000_v44, %v22881_v25  ;;  %v14001_v26 = vpop.f32.mrb[26].mxu1  ;;  %4614 = vmatmul.mubr.f32.vlgmr.msra.gmra.mrb[12].mxu0 %v26680_v45  ;;  %v26804_v25 = vld [vmem:[#allocation162_spill] sm:$0xff]  ;;  %v25778_v44 = vand.u32 4294901760, %v23088_v10 }
 0x2dd   :  { %v14002_v32 = vpop.f32.mrb[27].mxu1  ;;  %17645 = vmatpush1.bf16.msra.mxu0 %v26801_v62  ;;  %4619 = vmatprep.mubr.f32.mxu0 %v26674_v6  ;;  %v23156_v62 = vld [vmem:[%s25286_s2 + $0x30] sm:$0xff] }
 0x2de   :  { %v14003_v20 = vadd.f32 %v14002_v32, %v14001_v26  ;;  %18021 = vmatpush3.bf16.msra.mxu1 %v18018_v5  ;;  %17647 = vmatprep.subr.bf16.mxu0 %v26802_v41  ;;  %v25785_v32 = vand.u32 4294901760, %v23128_v47 }
 0x2df   :  { %18023 = vmatprep.subr.bf16.mxu1 %v18022_v30 }
 0x2e0   :  { %v22987_v61 = vadd.f32 %v14003_v20, %v22899_v33  ;;  %4621 = vmatmul.mubr.f32.gmra.mrb[14].mxu0 %v26803_v63  ;;  %v26808_v33 = vld [vmem:[#allocation111_spill] sm:$0xff] }
 0x2e1   :  { %17649 = vmatpush1.bf16.msra.mxu0 %v26804_v25  ;;  %4723 = vmatprep.mubr.f32.mxu0 %v26674_v6  ;;  %v23161_v20 = vld [vmem:[%s25286_s2 + $0x38] sm:$0xff] }
 0x2e2   :  { %18025 = vmatpush3.bf16.msra.mxu1 %v18022_v30  ;;  %17651 = vmatprep.subr.bf16.mxu0 %v26805_v48  ;;  %v23133_v30 = vld [vmem:[%s25286_s2 + $0x28] sm:$0xff]  ;;  %v25780_v25 = vand.u32 4294901760, %v23161_v20 }
 0x2e3   :  { %18027 = vmatprep.subr.bf16.mxu1 %v26806_v55 }
 0x2e5   :  { %15309 = vmatmul.mubr.f32.vlgmr.msra.gmra.mrb[36].mxu1 %v26803_v63  ;;  %17653 = vmatpush1.bf16.msra.mxu0 %v26807_v54 }
 0x2e6   :  { %18029 = vmatpush3.bf16.msra.mxu1 %v26806_v55  ;;  %15343 = vmatprep.mubr.f32.mxu1 %v26680_v45 }
 0x2e7   :  { %17655 = vmatprep.subr.bf16.mxu0 %v26808_v33  ;;  %18031 = vmatprep.subr.bf16.mxu1 %v26809_v15 }
 0x2e9   :  { %17657 = vmatpush1.bf16.msra.mxu0 %v26810_v12 }
 0x2ea   :  { %18033 = vmatpush3.bf16.msra.mxu1 %v26809_v15  ;;  %17659 = vmatprep.subr.bf16.mxu0 %v26811_v50 }
 0x2eb   :  { %18035 = vmatprep.subr.bf16.mxu1 %v26812_v16 }
 0x2ed   :  { %17661 = vmatpush1.bf16.msra.mxu0 %v26813_v38 }
 0x2ee   :  { %18037 = vmatpush3.bf16.msra.mxu1 %v26812_v16  ;;  %17663 = vmatprep.subr.bf16.mxu0 %v26814_v4  ;;  %v26827_v4 = vld [vmem:[#allocation15_spill] sm:$0xff] }
 0x2ef   :  { %18039 = vmatprep.subr.bf16.mxu1 %v26815_v53 }
 0x2f1   :  { %17665 = vmatpush1.bf16.msra.mxu0 %v26816_v2 }
 0x2f2   :  { %18041 = vmatpush3.bf16.msra.mxu1 %v26815_v53  ;;  %17667 = vmatprep.subr.bf16.mxu0 %v26817_v21  ;;  %v26828_v21 = vld [vmem:[#allocation114_spill] sm:$0xff] }
 0x2f3   :  { %18043 = vmatprep.subr.bf16.mxu1 %v26818_v35 }
 0x2f5   :  { %17669 = vmatpush1.bf16.msra.mxu0 %v26819_v24  ;;  %v26829_v24 = vld [vmem:[#allocation19_spill] sm:$0xff] }
 0x2f6   :  { %18045 = vmatpush3.bf16.msra.mxu1 %v26818_v35  ;;  %17671 = vmatprep.subr.bf16.mxu0 %v26820_v31 }
 0x2f7   :  { %18047 = vmatprep.subr.bf16.mxu1 %v26747_v3 }
 0x2f8   :  { %v14036_v40 = vpop.f32.mrb[28].mxu1 }
 0x2f9   :  { %v14037_v23 = vpop.f32.mrb[29].mxu1  ;;  %17673 = vmatpush1.bf16.msra.mxu0 %v26748_v39  ;;  %v6362_v39 = vand.u32 4294901760, %v23064_v58 }
 0x2fa   :  { %v14038_v9 = vadd.f32 %v14037_v23, %v14036_v40  ;;  %18049 = vmatpush3.bf16.msra.mxu1 %v26747_v3  ;;  %18251 = vmatprep.subr.bf16.mxu0 %v23041_v56  ;;  %v23083_v3 = vld [vmem:[%s25286_s2 + $0xb0] sm:$0xff] }
 0x2fb   :  { %18051 = vmatprep.subr.bf16.mxu1 %v26753_v0  ;;  %v25779_v46 = vand.u32 4294901760, %v23083_v3  ;;  %v26830_v23 = vld [vmem:[#allocation122_spill] sm:$0xff] }
 0x2fc   :  { %v5535_v19 = vadd.f32 %v14038_v9, %v22980_v42  ;;  %v14039_v8 = vpop.f32.mrb[30].mxu1  ;;  %4725 = vmatmul.mubr.f32.vlgmr.msra.gmra.mrb[12].mxu0 %v26680_v45  ;;  %v23110_v45 = vpack.c.bf16 %v25782_v37, %v25783_v18  ;;  %v23297_v37 = vld [vmem:[%s25286_s2 + $0xe0] sm:$0xff] }
 0x2fd   :  { %v14040_v5 = vpop.f32.mrb[31].mxu1  ;;  %4730 = vmatprep.mubr.f32.mxu0 %v26674_v6  ;;  %18253 = vmatpush3.bf16.msra.mxu0 %v23041_v56  ;;  %v23119_v6 = vpack.c.bf16 %v6362_v39, %v6359_v27  ;;  %v23142_v42 = vpack.c.bf16 %v25778_v44, %v25779_v46  ;;  %v25794_v57 = vand.u32 4294901760, %v23297_v37 }
 0x2fe   :  { %v14041_v29 = vadd.f32 %v14040_v5, %v14039_v8  ;;  %18053 = vmatpush3.bf16.msra.mxu1 %v26753_v0  ;;  %18255 = vmatprep.subr.bf16.mxu0 %v23073_v43  ;;  %26822 = vst [vmem:[#allocation23_spill] sm:$0xff] %v23110_v45  ;;  %v25789_v0 = vand.u32 4294901760, %v23095_v7  ;;  %v26831_v8 = vld [vmem:[#allocation117_spill] sm:$0xff] }
 0x2ff   :  { %18055 = vmatprep.subr.bf16.mxu1 %v26758_v28  ;;  %26823 = vst [vmem:[#allocation157_spill] sm:$0xff] %v23142_v42 }
 0x300   :  { %v5542_v22 = vadd.f32 %v14041_v29, %v22987_v61  ;;  %4732 = vmatmul.mubr.f32.gmra.mrb[14].mxu0 %v26803_v63  ;;  %v23149_v26 = vpack.c.bf16 %v25788_v17, %v25789_v0  ;;  %v25781_v61 = vand.u32 4294901760, %v23156_v62  ;;  %v26832_v29 = vld [vmem:[#allocation154_spill] sm:$0xff]  ;;  %v23321_v0 = vsub.f32 %v23059_v11, %v6359_v27 }
 0x301   :  { %18257 = vmatpush3.bf16.msra.mxu0 %v23073_v43  ;;  %v23342_v11 = vld [vmem:[%s25286_s2 + $0x70] sm:$0xff] }
 0x302   :  { %18057 = vmatpush3.bf16.msra.mxu1 %v26758_v28  ;;  %18259 = vmatprep.subr.bf16.mxu0 %v23110_v45  ;;  %26824 = vst [vmem:[#allocation131_spill] sm:$0xff] %v23149_v26  ;;  %v25784_v28 = vand.u32 4294901760, %v23133_v30  ;;  %v25803_v27 = vand.u32 4294901760, %v23342_v11 }
 0x303   :  { %18059 = vmatprep.subr.bf16.mxu1 %v23119_v6 }
 0x304   :  { %v23172_v41 = vpack.c.bf16 %v25784_v28, %v25785_v32  ;;  %v23305_v32 = vld [vmem:[%s25286_s2 + $0xe8] sm:$0xff] }
 0x305   :  { %15344 = vmatmul.mubr.f32.vlgmr.msra.gmra.mrb[36].mxu1 %v26803_v63  ;;  %18261 = vmatpush3.bf16.msra.mxu0 %v23110_v45  ;;  %v23183_v63 = vpack.c.bf16 %v25780_v25, %v25781_v61  ;;  %v23287_v25 = vld [vmem:[%s25286_s2 + $0x60] sm:$0xff]  ;;  %v23292_v61 = vld [vmem:[%s25286_s2 + $0x68] sm:$0xff]  ;;  %v25793_v1 = vand.u32 4294901760, %v23305_v32 }
 0x306   :  { %18061 = vmatpush3.bf16.msra.mxu1 %v23119_v6  ;;  %18263 = vmatprep.subr.bf16.mxu0 %v23142_v42  ;;  %26825 = vst [vmem:[#allocation27_spill] sm:$0xff] %v23172_v41  ;;  %v25795_v18 = vand.u32 4294901760, %v23287_v25  ;;  %v25792_v28 = vand.u32 4294901760, %v23292_v61 }
 0x307   :  { %18063 = vmatprep.subr.bf16.mxu1 %v23149_v26  ;;  %26826 = vst [vmem:[#allocation29_spill] sm:$0xff] %v23183_v63 }
 0x308   :  { %v23316_v17 = vpack.c.bf16 %v25792_v28, %v25795_v18  ;;  %v23337_v28 = vpack.c.bf16 %v25793_v1, %v25794_v57  ;;  %v23365_v1 = vld [vmem:[%s25286_s2 + $0xf8] sm:$0xff]  ;;  %v25804_v18 = vand.u32 4294901760, %v23321_v0 }
 0x309   :  { %18265 = vmatpush3.bf16.msra.mxu0 %v23142_v42 }
 0x30a   :  { %18065 = vmatpush3.bf16.msra.mxu1 %v23149_v26  ;;  %26839 = vst [vmem:[#allocation31_spill] sm:$0xff] %v23316_v17  ;;  %26840 = vst [vmem:[#allocation136_spill] sm:$0xff] %v23337_v28 }
 0x30b   :  { %18067 = vmatprep.subr.bf16.mxu1 %v23172_v41 }
 0x30e   :  { %18069 = vmatpush3.bf16.msra.mxu1 %v23172_v41 }
 0x30f   :  { %18071 = vmatprep.subr.bf16.mxu1 %v23183_v63 }
 0x312   :  { %18073 = vmatpush3.bf16.msra.mxu1 %v23183_v63 }
 0x318   :  { %v14074_v48 = vpop.f32.mrb[32].mxu1 }
 0x319   :  { %v14075_v55 = vpop.f32.mrb[33].mxu1 }
 0x31a   :  { %v14076_v54 = vadd.f32 %v14075_v55, %v14074_v48 }
 0x31c   :  { %v14077_v33 = vpop.f32.mrb[34].mxu1  ;;  %v23188_v15 = vadd.f32 %v14076_v54, %v5535_v19  ;;  %v26834_v54 = vld [vmem:[#allocation20_spill] sm:$0xff] }
 0x31d   :  { %v14078_v12 = vpop.f32.mrb[35].mxu1 }
 0x31e   :  { %v14079_v50 = vadd.f32 %v14078_v12, %v14077_v33  ;;  %v23211_v12 = vld [vmem:[%s25286_s2 + $0x40] sm:$0xff] }
 0x320   :  { %v23190_v16 = vadd.f32 %v14079_v50, %v5542_v22  ;;  %v26833_v22 = vld [vmem:[#allocation126_spill] sm:$0xff]  ;;  %v23216_v50 = vld [vmem:[%s25286_s2 + $0x48] sm:$0xff] }
 0x32f   :  { %v3821_v38 = vpop.f32.mrb[8].mxu0 }
 0x330   :  { %v19414_v53 = vadd.f32 %v3821_v38, %v26827_v4  ;;  %v3823_v2 = vpop.f32.mrb[9].mxu0  ;;  %v23221_v38 = vld [vmem:[%s25286_s2 + $0xc0] sm:$0xff]  ;;  %v25801_v4 = vand.u32 4294901760, %v23211_v12 }
 0x331   :  { %v19417_v35 = vadd.f32 %v3823_v2, %v26828_v21  ;;  %v23228_v2 = vld [vmem:[%s25286_s2 + $0xc8] sm:$0xff]  ;;  %v25799_v21 = vand.u32 4294901760, %v23221_v38 }
 0x332   :  { %v23195_v31 = vadd.f32 %v19414_v53, %v26829_v24  ;;  %v25800_v53 = vand.u32 4294901760, %v23216_v50 }
 0x333   :  { %v3829_v40 = vpop.f32.mrb[10].mxu0  ;;  %v23198_v9 = vadd.f32 %v19417_v35, %v26830_v23  ;;  %v25798_v35 = vand.u32 4294901760, %v23228_v2  ;;  %v23247_v23 = vld [vmem:[%s25286_s2 + $0x50] sm:$0xff] }
 0x334   :  { %v19420_v19 = vadd.f32 %v3829_v40, %v26831_v8  ;;  %v3831_v5 = vpop.f32.mrb[11].mxu0  ;;  %v23236_v24 = vpack.c.bf16 %v25800_v53, %v25801_v4  ;;  %v23252_v8 = vld [vmem:[%s25286_s2 + $0x58] sm:$0xff] }
 0x335   :  { %v19423_v48 = vadd.f32 %v3831_v5, %v26832_v29  ;;  %v23242_v40 = vpack.c.bf16 %v25798_v35, %v25799_v21  ;;  %v25797_v5 = vand.u32 4294901760, %v23247_v23  ;;  %v25796_v29 = vand.u32 4294901760, %v23252_v8 }
 0x336   :  { %v23203_v55 = vadd.f32 %v19420_v19, %v26833_v22  ;;  %26835 = vst [vmem:[#allocation132_spill] sm:$0xff] %v23236_v24  ;;  %v23257_v19 = vld [vmem:[%s25286_s2 + $0xd0] sm:$0xff]  ;;  %18075 = vmatprep.subr.bf16.mxu1 %v23236_v24  ;;  %v6463_v21 = vsub.f32 %v23321_v0, %v25804_v18 }
 0x337   :  { %v23206_v33 = vadd.f32 %v19423_v48, %v26834_v54  ;;  %26836 = vst [vmem:[#allocation134_spill] sm:$0xff] %v23242_v40  ;;  %v23265_v48 = vld [vmem:[%s25286_s2 + $0xd8] sm:$0xff]  ;;  %v25791_v22 = vand.u32 4294901760, %v23257_v19  ;;  %18267 = vmatprep.subr.bf16.mxu0 %v23242_v40  ;;  %18077 = vmatpush3.bf16.msra.mxu1 %v23236_v24  ;;  %v23276_v44 = vpack.c.bf16 %v25796_v29, %v25797_v5 }
 0x338   :  { %v25790_v54 = vand.u32 4294901760, %v23265_v48  ;;  %18269 = vmatpush3.bf16.msra.mxu0 %v23242_v40  ;;  %v6464_v18 = vand.u32 4294901760, %v6463_v21 }
 0x339   :  { %26837 = vst [vmem:[#allocation156_spill] sm:$0xff] %v23276_v44  ;;  %18079 = vmatprep.subr.bf16.mxu1 %v23276_v44 }
 0x33a   :  { %v23282_v46 = vpack.c.bf16 %v25790_v54, %v25791_v22  ;;  %v23326_v54 = vsub.f32 %v23064_v58, %v6362_v39  ;;  %v23331_v22 = vsub.f32 %v23011_v14, %v7085_v51  ;;  %v23347_v58 = vld [vmem:[%s25286_s2 + $0x78] sm:$0xff]  ;;  %v23352_v14 = vld [vmem:[%s25286_s2 + $0xf0] sm:$0xff]  ;;  %v23357_v51 = vsub.f32 %v23016_v49, %v7088_v13 }
 0x33b   :  { %18081 = vmatpush3.bf16.msra.mxu1 %v23276_v44  ;;  %v25802_v39 = vand.u32 4294901760, %v23347_v58  ;;  %v25806_v57 = vand.u32 4294901760, %v23352_v14  ;;  %v25805_v49 = vand.u32 4294901760, %v23365_v1 }
 0x33c   :  { %26838 = vst [vmem:[#allocation30_spill] sm:$0xff] %v23282_v46  ;;  %18271 = vmatprep.subr.bf16.mxu0 %v23282_v46  ;;  %26841 = vst [vmem:[#allocation35_spill] sm:$0xff] %v23357_v51  ;;  %18083 = vmatprep.subr.bf16.mxu1 %v23316_v17  ;;  %v25809_v13 = vand.u32 4294901760, %v23326_v54  ;;  %v25812_v29 = vand.u32 4294901760, %v23331_v22 }
 0x33d   :  { %18273 = vmatpush3.bf16.msra.mxu0 %v23282_v46  ;;  %v23380_v35 = vpack.c.bf16 %v25802_v39, %v25803_v27  ;;  %v23389_v53 = vpack.c.bf16 %v25805_v49, %v25806_v57  ;;  %v26844_v39 = vand.u32 4294901760, %v23357_v51 }
 0x33e   :  { %18275 = vmatprep.subr.bf16.mxu0 %v23337_v28  ;;  %v6470_v4 = vsub.f32 %v23326_v54, %v25809_v13  ;;  %v7189_v5 = vsub.f32 %v23331_v22, %v25812_v29 }
 0x33f   :  { %18085 = vmatpush3.bf16.msra.mxu1 %v23316_v17  ;;  %26842 = vst [vmem:[#allocation36_spill] sm:$0xff] %v23380_v35  ;;  %26843 = vst [vmem:[#allocation137_spill] sm:$0xff] %v23389_v53  ;;  %v7196_v27 = vsub.f32 %v23357_v51, %v26844_v39  ;;  %v26845_v39 = vand.u32 4294901760, %v23211_v12 }
 0x340   :  { %18087 = vmatprep.subr.bf16.mxu1 %v23380_v35  ;;  %v6471_v49 = vand.u32 4294901760, %v6470_v4  ;;  %v7190_v57 = vand.u32 4294901760, %v7189_v5  ;;  %v26847_v4 = vand.u32 4294901760, %v23216_v50 }
 0x341   :  { %18277 = vmatpush3.bf16.msra.mxu0 %v23337_v28  ;;  %v7197_v28 = vand.u32 4294901760, %v7196_v27  ;;  %v23413_v21 = vsub.f32 %v23211_v12, %v26845_v39 }
 0x342   :  { %18279 = vmatprep.subr.bf16.mxu0 %v23389_v53  ;;  %v23404_v13 = vpack.c.bf16 %v6471_v49, %v6464_v18  ;;  %v23419_v5 = vsub.f32 %v23216_v50, %v26847_v4  ;;  %v26849_v18 = vand.u32 4294901760, %v23221_v38  ;;  %v26853_v50 = vand.u32 4294901760, %v23247_v23 }
 0x343   :  { %18089 = vmatpush3.bf16.msra.mxu1 %v23380_v35  ;;  %v23406_v17 = vpack.c.bf16 %v7197_v28, %v7190_v57  ;;  %26846 = vst [vmem:[#allocation138_spill] sm:$0xff] %v23413_v21  ;;  %v25813_v29 = vand.u32 4294901760, %v23413_v21  ;;  %v26851_v28 = vand.u32 4294901760, %v23228_v2 }
 0x344   :  { %18091 = vmatprep.subr.bf16.mxu1 %v23404_v13  ;;  %26848 = vst [vmem:[#allocation38_spill] sm:$0xff] %v23419_v5  ;;  %v23424_v57 = vsub.f32 %v23221_v38, %v26849_v18  ;;  %v25820_v49 = vand.u32 4294901760, %v23419_v5  ;;  %v23439_v4 = vsub.f32 %v23247_v23, %v26853_v50  ;;  %v26855_v18 = vand.u32 4294901760, %v23252_v8 }
 0x345   :  { %18281 = vmatpush3.bf16.msra.mxu0 %v23389_v53  ;;  %v23429_v27 = vsub.f32 %v23228_v2, %v26851_v28  ;;  %v6519_v12 = vsub.f32 %v23413_v21, %v25813_v29 }
 0x346   :  { %18283 = vmatprep.subr.bf16.mxu0 %v23406_v17  ;;  %26850 = vst [vmem:[#allocation40_spill] sm:$0xff] %v23424_v57  ;;  %v25821_v39 = vand.u32 4294901760, %v23424_v57  ;;  %26854 = vst [vmem:[#allocation43_spill] sm:$0xff] %v23439_v4  ;;  %v23445_v2 = vsub.f32 %v23252_v8, %v26855_v18  ;;  %v6526_v29 = vsub.f32 %v23419_v5, %v25820_v49  ;;  %v25829_v35 = vand.u32 4294901760, %v23439_v4 }
 0x347   :  { %26852 = vst [vmem:[#allocation41_spill] sm:$0xff] %v23429_v27  ;;  %v25826_v38 = vand.u32 4294901760, %v23429_v27  ;;  %v6520_v28 = vand.u32 4294901760, %v6519_v12  ;;  %v26857_v8 = vand.u32 4294901760, %v23257_v19 }
 0x348   :  { %26856 = vst [vmem:[#allocation45_spill] sm:$0xff] %v23445_v2  ;;  %v7245_v53 = vsub.f32 %v23424_v57, %v25821_v39  ;;  %v25830_v50 = vand.u32 4294901760, %v23445_v2  ;;  %v6527_v18 = vand.u32 4294901760, %v6526_v29  ;;  %v6533_v49 = vsub.f32 %v23439_v4, %v25829_v35 }
 0x349   :  { %v7252_v23 = vsub.f32 %v23429_v27, %v25826_v38  ;;  %v23461_v12 = vsub.f32 %v23257_v19, %v26857_v8  ;;  %v26859_v39 = vand.u32 4294901760, %v23265_v48  ;;  %v26861_v19 = vand.u32 4294901760, %v23287_v25 }
 0x34a   :  { %v7246_v46 = vand.u32 4294901760, %v7245_v53  ;;  %v6540_v38 = vsub.f32 %v23445_v2, %v25830_v50  ;;  %v23480_v29 = vpack.c.bf16 %v6527_v18, %v6520_v28  ;;  %v6534_v8 = vand.u32 4294901760, %v6533_v49 }
 0x34b   :  { %26858 = vst [vmem:[#allocation46_spill] sm:$0xff] %v23461_v12  ;;  %v23469_v44 = vsub.f32 %v23265_v48, %v26859_v39  ;;  %v7253_v40 = vand.u32 4294901760, %v7252_v23  ;;  %v25834_v24 = vand.u32 4294901760, %v23461_v12  ;;  %v23478_v53 = vsub.f32 %v23287_v25, %v26861_v19 }
 0x34c   :  { %v26863_v48 = vand.u32 4294901760, %v23292_v61  ;;  %v6541_v50 = vand.u32 4294901760, %v6540_v38  ;;  %v26865_v18 = vand.u32 4294901760, %v23297_v37 }
 0x34d   :  { %26860 = vst [vmem:[#allocation48_spill] sm:$0xff] %v23469_v44  ;;  %26862 = vst [vmem:[#allocation49_spill] sm:$0xff] %v23478_v53  ;;  %v25833_v35 = vand.u32 4294901760, %v23469_v44  ;;  %v23488_v23 = vpack.c.bf16 %v7253_v40, %v7246_v46  ;;  %v7259_v42 = vsub.f32 %v23461_v12, %v25834_v24  ;;  %v25835_v25 = vand.u32 4294901760, %v23478_v53 }
 0x34e   :  { %v23486_v39 = vsub.f32 %v23292_v61, %v26863_v48  ;;  %v23501_v61 = vsub.f32 %v23297_v37, %v26865_v18  ;;  %v26867_v46 = vand.u32 4294901760, %v23305_v32  ;;  %v23508_v38 = vpack.c.bf16 %v6541_v50, %v6534_v8 }
 0x34f   :  { %v7266_v49 = vsub.f32 %v23469_v44, %v25833_v35  ;;  %v7260_v19 = vand.u32 4294901760, %v7259_v42  ;;  %v6547_v48 = vsub.f32 %v23478_v53, %v25835_v25  ;;  %v26869_v35 = vand.u32 4294901760, %v23342_v11 }
 0x350   :  { %26864 = vst [vmem:[#allocation51_spill] sm:$0xff] %v23486_v39  ;;  %26866 = vst [vmem:[#allocation52_spill] sm:$0xff] %v23501_v61  ;;  %v23506_v40 = vsub.f32 %v23305_v32, %v26867_v46  ;;  %v26871_v37 = vand.u32 4294901760, %v23486_v39  ;;  %v25838_v32 = vand.u32 4294901760, %v23501_v61  ;;  %v26872_v46 = vand.u32 4294901760, %v23347_v58 }
 0x351   :  { %v23516_v24 = vsub.f32 %v23342_v11, %v26869_v35  ;;  %v7267_v28 = vand.u32 4294901760, %v7266_v49  ;;  %v6548_v8 = vand.u32 4294901760, %v6547_v48  ;;  %v26874_v35 = vand.u32 4294901760, %v23352_v14 }
 0x352   :  { %26868 = vst [vmem:[#allocation54_spill] sm:$0xff] %v23506_v40  ;;  %v6554_v18 = vsub.f32 %v23486_v39, %v26871_v37  ;;  %v23527_v25 = vsub.f32 %v23347_v58, %v26872_v46  ;;  %v7273_v50 = vsub.f32 %v23501_v61, %v25838_v32  ;;  %v26876_v48 = vand.u32 4294901760, %v23506_v40 }
 0x353   :  { %26870 = vst [vmem:[#allocation55_spill] sm:$0xff] %v23516_v24  ;;  %v23532_v11 = vsub.f32 %v23352_v14, %v26874_v35  ;;  %v23534_v49 = vpack.c.bf16 %v7267_v28, %v7260_v19  ;;  %v26877_v63 = vand.u32 4294901760, %v23516_v24  ;;  %v26878_v28 = vand.u32 4294901760, %v23365_v1 }
 0x354   :  { %26873 = vst [vmem:[#allocation57_spill] sm:$0xff] %v23527_v25  ;;  %v6555_v37 = vand.u32 4294901760, %v6554_v18  ;;  %v7280_v42 = vsub.f32 %v23506_v40, %v26876_v48  ;;  %v25849_v46 = vand.u32 4294901760, %v23527_v25  ;;  %v7274_v35 = vand.u32 4294901760, %v7273_v50 }
 0x355   :  { %26875 = vst [vmem:[#allocation58_spill] sm:$0xff] %v23532_v11  ;;  %v6561_v58 = vsub.f32 %v23516_v24, %v26877_v63  ;;  %v25848_v14 = vand.u32 4294901760, %v23532_v11  ;;  %v23550_v19 = vsub.f32 %v23365_v1, %v26878_v28 }
 0x356   :  { %v23552_v18 = vpack.c.bf16 %v6555_v37, %v6548_v8  ;;  %v7281_v32 = vand.u32 4294901760, %v7280_v42  ;;  %v6568_v48 = vsub.f32 %v23527_v25, %v25849_v46  ;;  %v23570_v37 = vpack.c.bf16 %v23326_v54, %v23321_v0 }
 0x357   :  { %26879 = vst [vmem:[#allocation60_spill] sm:$0xff] %v23550_v19  ;;  %v6562_v45 = vand.u32 4294901760, %v6561_v58  ;;  %v7287_v63 = vsub.f32 %v23532_v11, %v25848_v14  ;;  %v25847_v41 = vand.u32 4294901760, %v23550_v19  ;;  %v23574_v58 = vpack.c.bf16 %v23357_v51, %v23331_v22 }
 0x358   :  { %v23561_v43 = vpack.c.bf16 %v7281_v32, %v7274_v35  ;;  %v6569_v26 = vand.u32 4294901760, %v6568_v48  ;;  %v23580_v32 = vpack.c.bf16 %v23419_v5, %v23413_v21  ;;  %v23584_v35 = vpack.c.bf16 %v23429_v27, %v23424_v57 }
 0x359   :  { %v7288_v1 = vand.u32 4294901760, %v7287_v63  ;;  %v7294_v50 = vsub.f32 %v23550_v19, %v25847_v41  ;;  %v23596_v48 = vpack.c.bf16 %v23486_v39, %v23478_v53  ;;  %v23600_v63 = vpack.c.bf16 %v23506_v40, %v23501_v61 }
 0x35a   :  { %v23566_v8 = vpack.c.bf16 %v6569_v26, %v6562_v45  ;;  %v23588_v45 = vpack.c.bf16 %v23445_v2, %v23439_v4  ;;  %v23592_v26 = vpack.c.bf16 %v23469_v44, %v23461_v12  ;;  %v26881_v61 = vand.u32 4294901760, %v23100_v52 }
 0x35b   :  { %v7295_v42 = vand.u32 4294901760, %v7294_v50  ;;  %v23608_v50 = vpack.c.bf16 %v23550_v19, %v23532_v11  ;;  %v26882_v19 = vand.u32 4294901760, %v23027_v34 }
 0x35d   :  { %v23576_v28 = vpack.c.bf16 %v7295_v42, %v7288_v1  ;;  %v23604_v1 = vpack.c.bf16 %v23527_v25, %v23516_v24  ;;  %v26880_v42 = vand.u32 4294901760, %v23095_v7  ;;  %v23620_v25 = vsub.f32 %v23100_v52, %v26881_v61 }
 0x35e   :  { %v23626_v11 = vsub.f32 %v23027_v34, %v26882_v19  ;;  %v26885_v61 = vand.u32 4294901760, %v23133_v30  ;;  %v26886_v24 = vand.u32 4294901760, %v23049_v59 }
 0x35f   :  { %v23613_v41 = vsub.f32 %v23095_v7, %v26880_v42  ;;  %v26883_v7 = vand.u32 4294901760, %v23032_v60 }
 0x361   :  { %v23631_v42 = vsub.f32 %v23032_v60, %v26883_v7  ;;  %v23647_v60 = vsub.f32 %v23049_v59, %v26886_v24  ;;  %v26887_v7 = vand.u32 4294901760, %v23054_v36  ;;  %v26890_v59 = vand.u32 4294901760, %v23161_v20 }
 0x363   :  { %v23678_v24 = vsub.f32 %v23161_v20, %v26890_v59 }
 0x3cf   :  { %v4726_v14 = vpop.f32.mrb[12].mxu0 }
 0x3d0   :  { %v19416_v46 = vadd.f32 %v23195_v31, %v4726_v14  ;;  %v4728_v39 = vpop.f32.mrb[13].mxu0  ;;  %v26884_v31 = vand.u32 4294901760, %v23128_v47  ;;  %v23641_v14 = vsub.f32 %v23133_v30, %v26885_v61 }
 0x3d1   :  { %v19419_v40 = vadd.f32 %v23198_v9, %v4728_v39 }
 0x3d2   :  { %v23636_v9 = vsub.f32 %v23128_v47, %v26884_v31  ;;  %v23652_v47 = vsub.f32 %v23054_v36, %v26887_v7  ;;  %v26888_v31 = vand.u32 4294901760, %v23613_v41 }
 0x3d3   :  { %v6340_v39 = vmul.f32 %v19419_v40, %v19416_v46  ;;  %v4733_v52 = vpop.f32.mrb[14].mxu0 }
 0x3d4   :  { %v19422_v34 = vadd.f32 %v23203_v55, %v4733_v52  ;;  %v4735_v19 = vpop.f32.mrb[15].mxu0  ;;  %v6477_v55 = vsub.f32 %v23613_v41, %v26888_v31  ;;  %v26893_v52 = vand.u32 4294901760, %v23088_v10 }
 0x3d5   :  { %v23654_v40 = vand.u32 4294901760, %v6340_v39  ;;  %v19425_v46 = vadd.f32 %v23206_v33, %v4735_v19  ;;  %v26889_v33 = vand.u32 4294901760, %v23156_v62 }
 0x3d6   :  { %v23696_v7 = vsub.f32 %v23088_v10, %v26893_v52  ;;  %v6478_v27 = vand.u32 4294901760, %v6477_v55  ;;  %v26905_v55 = vand.u32 4294901760, %v23678_v24 }
 0x3d7   :  { %v23665_v61 = vsub.f32 %v6340_v39, %v23654_v40  ;;  %v6341_v36 = vmul.f32 %v19425_v46, %v19422_v34  ;;  %v23671_v19 = vsub.f32 %v23156_v62, %v26889_v33  ;;  %v26891_v39 = vand.u32 4294901760, %v23083_v3 }
 0x3d8   :  { %v15345_v30 = vpop.f32.mrb[36].mxu1 }
 0x3d9   :  { %v23683_v34 = vsub.f32 %v23083_v3, %v26891_v39  ;;  %v23685_v46 = vand.u32 4294901760, %v6341_v36  ;;  %v23688_v62 = vadd.f32 %v15345_v30, %v23190_v16  ;;  %v6330_v33 = vpop.f32.mrb[37].mxu1  ;;  %v23691_v31 = vand.u32 4294901760, %v23665_v61 }
 0x3da   :  { %v23699_v20 = vadd.f32 %v6330_v33, %v23188_v15  ;;  %v26895_v3 = vand.u32 4294901760, %v23620_v25  ;;  %v26896_v39 = vand.u32 4294901760, %v23626_v11  ;;  %v26897_v30 = vand.u32 4294901760, %v23631_v42 }
 0x3db   :  { %26892 = vst [vmem:[#allocation61_spill] sm:$0xff] %v23688_v62  ;;  %v23711_v53 = vsub.f32 %v6341_v36, %v23685_v46  ;;  %v6442_v10 = vsub.f32 %v23665_v61, %v23691_v31  ;;  %v26898_v15 = vand.u32 4294901760, %v23636_v9  ;;  %v26899_v33 = vand.u32 4294901760, %v23641_v14 }
 0x3dc   :  { %26894 = vst [vmem:[#allocation63_spill] sm:$0xff] %v23699_v20  ;;  %v6484_v59 = vsub.f32 %v23620_v25, %v26895_v3  ;;  %v7203_v16 = vsub.f32 %v23626_v11, %v26896_v39  ;;  %v7210_v62 = vsub.f32 %v23631_v42, %v26897_v30  ;;  %v26900_v39 = vand.u32 4294901760, %v23647_v60 }
 0x3dd   :  { %v6491_v52 = vsub.f32 %v23636_v9, %v26898_v15  ;;  %v6498_v3 = vsub.f32 %v23641_v14, %v26899_v33  ;;  %v26901_v30 = vand.u32 4294901760, %v23652_v47  ;;  %v23729_v2 = vand.u32 4294901760, %v6442_v10 }
 0x3de   :  { %v7217_v20 = vsub.f32 %v23647_v60, %v26900_v39  ;;  %v23732_v15 = vand.u32 4294901760, %v23711_v53  ;;  %v6485_v57 = vand.u32 4294901760, %v6484_v59  ;;  %v7204_v39 = vand.u32 4294901760, %v7203_v16 }
 0x3df   :  { %v7224_v36 = vsub.f32 %v23652_v47, %v26901_v30  ;;  %26902 = vst [vmem:[#allocation64_spill] sm:$0xff] %v23729_v2  ;;  %v7211_v5 = vand.u32 4294901760, %v7210_v62  ;;  %15378 = vmatprep.mubr.f32.mxu1 %v23729_v2  ;;  %15588 = vmatprep.mubr.f32.mxu0 %v23729_v2  ;;  %v6492_v10 = vand.u32 4294901760, %v6491_v52  ;;  %v6499_v12 = vand.u32 4294901760, %v6498_v3 }
 0x3e0   :  { %26903 = vst [vmem:[#allocation189_spill] sm:$0xff] %v23732_v15  ;;  %v6452_v30 = vsub.f32 %v23711_v53, %v23732_v15  ;;  %v7218_v44 = vand.u32 4294901760, %v7217_v20  ;;  %v26904_v51 = vand.u32 4294901760, %v23671_v19  ;;  %v6512_v62 = vsub.f32 %v23678_v24, %v26905_v55 }
 0x3e1   :  { %v7225_v21 = vand.u32 4294901760, %v7224_v36  ;;  %v26906_v59 = vand.u32 4294901760, %v23683_v34  ;;  %v26907_v2 = vand.u32 4294901760, %v23696_v7  ;;  %v18094_v20 = vpack.c.bf16 %v6485_v57, %v6478_v27 }
 0x3e2   :  { %v6505_v4 = vsub.f32 %v23671_v19, %v26904_v51  ;;  %v23743_v33 = vand.u32 4294901760, %v6452_v30  ;;  %v18286_v3 = vpack.c.bf16 %v7211_v5, %v7204_v39  ;;  %v18098_v51 = vpack.c.bf16 %v6499_v12, %v6492_v10  ;;  %v26909_v12 = vld [vmem:[#allocation22_spill] sm:$0xff] }
 0x3e3   :  { %v7231_v16 = vsub.f32 %v23683_v34, %v26906_v59  ;;  %v7238_v52 = vsub.f32 %v23696_v7, %v26907_v2  ;;  %v18290_v30 = vpack.c.bf16 %v7225_v21, %v7218_v44  ;;  %v6513_v55 = vand.u32 4294901760, %v6512_v62 }
 0x3e4   :  { %15379 = vmatmul.mubr.f32.vlgmr.msra.gmra.mrb[38].mxu1 %v23743_v33  ;;  %15589 = vmatmul.mubr.f32.vlgmr.msra.gmra.mrb[16].mxu0 %v23743_v33  ;;  %v6506_v36 = vand.u32 4294901760, %v6505_v4  ;;  %v18126_v44 = vpack.c.bf16 %v23620_v25, %v23613_v41  ;;  %v18322_v21 = vpack.c.bf16 %v23652_v47, %v23647_v60  ;;  %v18134_v57 = vpack.c.bf16 %v23678_v24, %v23671_v19  ;;  %v26908_v4 = vld [vmem:[#allocation131_spill] sm:$0xff] }
 0x3e5   :  { %18093 = vmatpush3.bf16.msra.mxu1 %v23404_v13  ;;  %18285 = vmatpush3.bf16.msra.mxu0 %v23406_v17  ;;  %v7232_v59 = vand.u32 4294901760, %v7231_v16  ;;  %v7239_v2 = vand.u32 4294901760, %v7238_v52  ;;  %v18318_v17 = vpack.c.bf16 %v23631_v42, %v23626_v11  ;;  %v18326_v27 = vpack.c.bf16 %v23696_v7, %v23683_v34 }
 0x3e6   :  { %15413 = vmatprep.mubr.f32.mxu1 %v23654_v40  ;;  %15623 = vmatprep.mubr.f32.mxu0 %v23654_v40  ;;  %v18102_v5 = vpack.c.bf16 %v6513_v55, %v6506_v36  ;;  %v26927_v62 = vand.u32 4294901760, %v23613_v41  ;;  %v26932_v41 = vand.u32 4294901760, %v23641_v14  ;;  %v26936_v36 = vand.u32 4294901760, %v23678_v24 }
 0x3e7   :  { %18095 = vmatprep.subr.bf16.mxu1 %v18094_v20  ;;  %18287 = vmatprep.subr.bf16.mxu0 %v18286_v3  ;;  %v18294_v13 = vpack.c.bf16 %v7239_v2, %v7232_v59  ;;  %v26941_v59 = vld [vmem:[#allocation38_spill] sm:$0xff] }
 0x3e8   :  { %v26942_v2 = vand.u32 4294901760, %v26941_v59  ;;  %v24012_v59 = vld [vmem:[%s25286_s2 + $0x128] sm:$0xff] }
 0x3e9   :  { %18097 = vmatpush3.bf16.msra.mxu1 %v18094_v20  ;;  %18289 = vmatpush3.bf16.msra.mxu0 %v18286_v3  ;;  %v26931_v20 = vand.u32 4294901760, %v23636_v9 }
 0x3ea   :  { %18099 = vmatprep.subr.bf16.mxu1 %v18098_v51  ;;  %18291 = vmatprep.subr.bf16.mxu0 %v18290_v30 }
 0x3eb   :  { %v18194_v3 = vpack.c.bf16 %v26932_v41, %v26931_v20  ;;  %v26963_v41 = vld [vmem:[#allocation55_spill] sm:$0xff] }
 0x3ed   :  { %18101 = vmatpush3.bf16.msra.mxu1 %v18098_v51  ;;  %18293 = vmatpush3.bf16.msra.mxu0 %v18290_v30  ;;  %v26935_v51 = vand.u32 4294901760, %v23671_v19  ;;  %v26938_v30 = vand.u32 4294901760, %v23696_v7 }
 0x3ee   :  { %18103 = vmatprep.subr.bf16.mxu1 %v18102_v5  ;;  %18295 = vmatprep.subr.bf16.mxu0 %v18294_v13 }
 0x3f1   :  { %18105 = vmatpush3.bf16.msra.mxu1 %v18102_v5  ;;  %18297 = vmatpush3.bf16.msra.mxu0 %v18294_v13  ;;  %v26943_v13 = vld [vmem:[#allocation40_spill] sm:$0xff] }
 0x3f2   :  { %18107 = vmatprep.subr.bf16.mxu1 %v23480_v29  ;;  %18299 = vmatprep.subr.bf16.mxu0 %v23488_v23  ;;  %v26944_v19 = vand.u32 4294901760, %v26943_v13 }
 0x3f5   :  { %18109 = vmatpush3.bf16.msra.mxu1 %v23480_v29  ;;  %18301 = vmatpush3.bf16.msra.mxu0 %v23488_v23  ;;  %v26910_v29 = vld [vmem:[#allocation27_spill] sm:$0xff] }
 0x3f6   :  { %18111 = vmatprep.subr.bf16.mxu1 %v23508_v38  ;;  %18303 = vmatprep.subr.bf16.mxu0 %v23534_v49  ;;  %v26911_v23 = vld [vmem:[#allocation23_spill] sm:$0xff] }
 0x3f9   :  { %18113 = vmatpush3.bf16.msra.mxu1 %v23508_v38  ;;  %18305 = vmatpush3.bf16.msra.mxu0 %v23534_v49  ;;  %v26912_v38 = vld [vmem:[#allocation29_spill] sm:$0xff] }
 0x3fa   :  { %18115 = vmatprep.subr.bf16.mxu1 %v23552_v18  ;;  %18307 = vmatprep.subr.bf16.mxu0 %v23561_v43  ;;  %v26913_v49 = vld [vmem:[#allocation157_spill] sm:$0xff] }
 0x3fd   :  { %18117 = vmatpush3.bf16.msra.mxu1 %v23552_v18  ;;  %18309 = vmatpush3.bf16.msra.mxu0 %v23561_v43  ;;  %v18130_v43 = vpack.c.bf16 %v23641_v14, %v23636_v9  ;;  %v26914_v18 = vld [vmem:[#allocation132_spill] sm:$0xff]  ;;  %v18198_v9 = vpack.c.bf16 %v26936_v36, %v26935_v51  ;;  %v26937_v14 = vand.u32 4294901760, %v23683_v34  ;;  %v26947_v34 = vld [vmem:[#allocation43_spill] sm:$0xff]  ;;  %v26967_v51 = vld [vmem:[#allocation58_spill] sm:$0xff] }
 0x3fe   :  { %18119 = vmatprep.subr.bf16.mxu1 %v23566_v8  ;;  %18311 = vmatprep.subr.bf16.mxu0 %v23576_v28  ;;  %v26948_v7 = vand.u32 4294901760, %v26947_v34  ;;  %v26968_v36 = vand.u32 4294901760, %v26967_v51 }
 0x3ff   :  { %v18390_v55 = vpack.c.bf16 %v26938_v30, %v26937_v14 }
 0x401   :  { %18121 = vmatpush3.bf16.msra.mxu1 %v23566_v8  ;;  %18313 = vmatpush3.bf16.msra.mxu0 %v23576_v28  ;;  %v26915_v8 = vld [vmem:[#allocation134_spill] sm:$0xff]  ;;  %v26918_v28 = vld [vmem:[#allocation31_spill] sm:$0xff] }
 0x402   :  { %18123 = vmatprep.subr.bf16.mxu1 %v23570_v37  ;;  %18315 = vmatprep.subr.bf16.mxu0 %v23574_v58 }
 0x404   :  { %15414 = vmatmul.mubr.f32.vlgmr.msra.gmra.mrb[38].mxu1 %v23685_v46  ;;  %15624 = vmatmul.mubr.f32.vlgmr.msra.gmra.mrb[16].mxu0 %v23685_v46 }
 0x405   :  { %18125 = vmatpush3.bf16.msra.mxu1 %v23570_v37  ;;  %15448 = vmatprep.mubr.f32.mxu1 %v23665_v61  ;;  %v26916_v37 = vld [vmem:[#allocation156_spill] sm:$0xff] }
 0x406   :  { %18317 = vmatpush3.bf16.msra.mxu0 %v23574_v58  ;;  %15658 = vmatprep.mubr.f32.mxu0 %v23665_v61  ;;  %v26917_v58 = vld [vmem:[#allocation30_spill] sm:$0xff] }
 0x407   :  { %18127 = vmatprep.subr.bf16.mxu1 %v18126_v44  ;;  %18319 = vmatprep.subr.bf16.mxu0 %v18318_v17 }
 0x409   :  { %18129 = vmatpush3.bf16.msra.mxu1 %v18126_v44  ;;  %v26945_v44 = vld [vmem:[#allocation41_spill] sm:$0xff] }
 0x40a   :  { %18321 = vmatpush3.bf16.msra.mxu0 %v18318_v17  ;;  %18131 = vmatprep.subr.bf16.mxu1 %v18130_v43  ;;  %v26946_v24 = vand.u32 4294901760, %v26945_v44 }
 0x40b   :  { %18323 = vmatprep.subr.bf16.mxu0 %v18322_v21 }
 0x40c   :  { %v18394_v17 = vpack.c.bf16 %v26946_v24, %v26944_v19  ;;  %v25883_v24 = vand.u32 4294901760, %v24012_v59 }
 0x40d   :  { %18133 = vmatpush3.bf16.msra.mxu1 %v18130_v43  ;;  %v26949_v43 = vld [vmem:[#allocation45_spill] sm:$0xff] }
 0x40e   :  { %18325 = vmatpush3.bf16.msra.mxu0 %v18322_v21  ;;  %18135 = vmatprep.subr.bf16.mxu1 %v18134_v57  ;;  %v26950_v21 = vand.u32 4294901760, %v26949_v43  ;;  %v24053_v43 = vld [vmem:[%s25286_s2 + $0x1b0] sm:$0xff] }
 0x40f   :  { %18327 = vmatprep.subr.bf16.mxu0 %v18326_v27 }
 0x411   :  { %18137 = vmatpush3.bf16.msra.mxu1 %v18134_v57  ;;  %v18206_v57 = vpack.c.bf16 %v26950_v21, %v26948_v7 }
 0x412   :  { %18329 = vmatpush3.bf16.msra.mxu0 %v18326_v27  ;;  %18139 = vmatprep.subr.bf16.mxu1 %v23580_v32  ;;  %v26951_v27 = vld [vmem:[#allocation46_spill] sm:$0xff] }
 0x413   :  { %18331 = vmatprep.subr.bf16.mxu0 %v23584_v35 }
 0x415   :  { %18141 = vmatpush3.bf16.msra.mxu1 %v23580_v32  ;;  %v26919_v32 = vld [vmem:[#allocation136_spill] sm:$0xff] }
 0x416   :  { %18333 = vmatpush3.bf16.msra.mxu0 %v23584_v35  ;;  %18143 = vmatprep.subr.bf16.mxu1 %v23588_v45  ;;  %v26920_v35 = vld [vmem:[#allocation36_spill] sm:$0xff] }
 0x417   :  { %18335 = vmatprep.subr.bf16.mxu0 %v23592_v26 }
 0x419   :  { %18145 = vmatpush3.bf16.msra.mxu1 %v23588_v45  ;;  %v26921_v45 = vand.u32 4294901760, %v23321_v0  ;;  %v26928_v0 = vand.u32 4294901760, %v23620_v25  ;;  %v26933_v25 = vand.u32 4294901760, %v23647_v60  ;;  %v26939_v60 = vld [vmem:[#allocation138_spill] sm:$0xff] }
 0x41a   :  { %18337 = vmatpush3.bf16.msra.mxu0 %v23592_v26  ;;  %18147 = vmatprep.subr.bf16.mxu1 %v23596_v48  ;;  %v26922_v26 = vand.u32 4294901760, %v23326_v54  ;;  %v26929_v54 = vand.u32 4294901760, %v23626_v11  ;;  %v26934_v11 = vand.u32 4294901760, %v23652_v47  ;;  %v26940_v47 = vand.u32 4294901760, %v26939_v60 }
 0x41b   :  { %18339 = vmatprep.subr.bf16.mxu0 %v23600_v63  ;;  %v18190_v16 = vpack.c.bf16 %v26928_v0, %v26927_v62 }
 0x41c   :  { %v18202_v5 = vpack.c.bf16 %v26942_v2, %v26940_v47  ;;  %v24017_v2 = vld [vmem:[%s25286_s2 + $0x1a0] sm:$0xff] }
 0x41d   :  { %18149 = vmatpush3.bf16.msra.mxu1 %v23596_v48  ;;  %v18186_v48 = vpack.c.bf16 %v26922_v26, %v26921_v45  ;;  %v26952_v45 = vand.u32 4294901760, %v26951_v27  ;;  %v26953_v26 = vld [vmem:[#allocation48_spill] sm:$0xff] }
 0x41e   :  { %18341 = vmatpush3.bf16.msra.mxu0 %v23600_v63  ;;  %18151 = vmatprep.subr.bf16.mxu1 %v23604_v1  ;;  %v26923_v63 = vld [vmem:[#allocation137_spill] sm:$0xff]  ;;  %v24070_v27 = vld [vmem:[%s25286_s2 + $0x140] sm:$0xff] }
 0x41f   :  { %18343 = vmatprep.subr.bf16.mxu0 %v23608_v50 }
 0x421   :  { %18153 = vmatpush3.bf16.msra.mxu1 %v23604_v1  ;;  %v26924_v1 = vand.u32 4294901760, %v23331_v22  ;;  %v26930_v22 = vand.u32 4294901760, %v23631_v42  ;;  %v18386_v42 = vpack.c.bf16 %v26934_v11, %v26933_v25  ;;  %v26965_v25 = vld [vmem:[#allocation57_spill] sm:$0xff] }
 0x422   :  { %18345 = vmatpush3.bf16.msra.mxu0 %v23608_v50  ;;  %18155 = vmatprep.subr.bf16.mxu1 %v23119_v6  ;;  %v26925_v50 = vld [vmem:[#allocation35_spill] sm:$0xff]  ;;  %v26966_v11 = vand.u32 4294901760, %v26965_v25 }
 0x423   :  { %18347 = vmatprep.subr.bf16.mxu0 %v23041_v56  ;;  %v26926_v39 = vand.u32 4294901760, %v26925_v50  ;;  %v18382_v52 = vpack.c.bf16 %v26930_v22, %v26929_v54  ;;  %v26955_v50 = vld [vmem:[#allocation49_spill] sm:$0xff]  ;;  %v26961_v22 = vld [vmem:[#allocation54_spill] sm:$0xff] }
 0x424   :  { %15449 = vmatmul.mubr.f32.vlgmr.msra.gmra.mrb[38].mxu1 %v23711_v53 }
 0x425   :  { %15659 = vmatmul.mubr.f32.vlgmr.msra.gmra.mrb[16].mxu0 %v23711_v53  ;;  %18157 = vmatpush3.bf16.msra.mxu1 %v23119_v6  ;;  %v18378_v10 = vpack.c.bf16 %v26926_v39, %v26924_v1  ;;  %v26956_v39 = vand.u32 4294901760, %v26955_v50 }
 0x426   :  { %15483 = vmatprep.mubr.f32.mxu1 %v23691_v31  ;;  %18349 = vmatpush3.bf16.msra.mxu0 %v23041_v56 }
 0x427   :  { %15693 = vmatprep.mubr.f32.mxu0 %v23691_v31  ;;  %18159 = vmatprep.subr.bf16.mxu1 %v26908_v4 }
 0x428   :  { %18351 = vmatprep.subr.bf16.mxu0 %v26909_v12 }
 0x429   :  { %18161 = vmatpush3.bf16.msra.mxu1 %v26908_v4 }
 0x42a   :  { %18353 = vmatpush3.bf16.msra.mxu0 %v26909_v12  ;;  %18163 = vmatprep.subr.bf16.mxu1 %v26910_v29 }
 0x42b   :  { %18355 = vmatprep.subr.bf16.mxu0 %v26911_v23 }
 0x42d   :  { %18165 = vmatpush3.bf16.msra.mxu1 %v26910_v29 }
 0x42e   :  { %18357 = vmatpush3.bf16.msra.mxu0 %v26911_v23  ;;  %18167 = vmatprep.subr.bf16.mxu1 %v26912_v38 }
 0x42f   :  { %18359 = vmatprep.subr.bf16.mxu0 %v26913_v49 }
 0x431   :  { %18169 = vmatpush3.bf16.msra.mxu1 %v26912_v38 }
 0x432   :  { %18361 = vmatpush3.bf16.msra.mxu0 %v26913_v49  ;;  %18171 = vmatprep.subr.bf16.mxu1 %v26914_v18 }
 0x433   :  { %18363 = vmatprep.subr.bf16.mxu0 %v26915_v8 }
 0x435   :  { %18173 = vmatpush3.bf16.msra.mxu1 %v26914_v18 }
 0x436   :  { %18365 = vmatpush3.bf16.msra.mxu0 %v26915_v8  ;;  %18175 = vmatprep.subr.bf16.mxu1 %v26916_v37 }
 0x437   :  { %18367 = vmatprep.subr.bf16.mxu0 %v26917_v58 }
 0x439   :  { %18177 = vmatpush3.bf16.msra.mxu1 %v26916_v37 }
 0x43a   :  { %18369 = vmatpush3.bf16.msra.mxu0 %v26917_v58  ;;  %18179 = vmatprep.subr.bf16.mxu1 %v26918_v28 }
 0x43b   :  { %18371 = vmatprep.subr.bf16.mxu0 %v26919_v32 }
 0x43d   :  { %18181 = vmatpush3.bf16.msra.mxu1 %v26918_v28 }
 0x43e   :  { %18373 = vmatpush3.bf16.msra.mxu0 %v26919_v32  ;;  %18183 = vmatprep.subr.bf16.mxu1 %v26920_v35 }
 0x43f   :  { %18375 = vmatprep.subr.bf16.mxu0 %v26923_v63 }
 0x441   :  { %18185 = vmatpush3.bf16.msra.mxu1 %v26920_v35 }
 0x442   :  { %18377 = vmatpush3.bf16.msra.mxu0 %v26923_v63  ;;  %18187 = vmatprep.subr.bf16.mxu1 %v18186_v48 }
 0x443   :  { %18379 = vmatprep.subr.bf16.mxu0 %v18378_v10 }
 0x444   :  { %15484 = vmatmul.mubr.f32.vlgmr.msra.gmra.mrb[38].mxu1 %v23732_v15 }
 0x445   :  { %15694 = vmatmul.mubr.f32.vlgmr.msra.gmra.mrb[16].mxu0 %v23732_v15  ;;  %18189 = vmatpush3.bf16.msra.mxu1 %v18186_v48  ;;  %v26954_v48 = vand.u32 4294901760, %v26953_v26  ;;  %v26973_v26 = vld [vmem:[#allocation64_spill] sm:$0xff] }
 0x446   :  { %15518 = vmatprep.mubr.f32.mxu1 %v23654_v40  ;;  %18381 = vmatpush3.bf16.msra.mxu0 %v18378_v10  ;;  %v26957_v10 = vld [vmem:[#allocation51_spill] sm:$0xff] }
 0x447   :  { %15728 = vmatprep.mubr.f32.mxu0 %v23654_v40  ;;  %18191 = vmatprep.subr.bf16.mxu1 %v18190_v16  ;;  %v18398_v1 = vpack.c.bf16 %v26954_v48, %v26952_v45  ;;  %v26958_v62 = vand.u32 4294901760, %v26957_v10  ;;  %v24075_v45 = vld [vmem:[%s25286_s2 + $0x148] sm:$0xff]  ;;  %v24098_v10 = vld [vmem:[%s25286_s2 + $0x1c0] sm:$0xff] }
 0x448   :  { %18383 = vmatprep.subr.bf16.mxu0 %v18382_v52  ;;  %v25880_v25 = vand.u32 4294901760, %v24098_v10 }
 0x449   :  { %18193 = vmatpush3.bf16.msra.mxu1 %v18190_v16  ;;  %v18210_v0 = vpack.c.bf16 %v26958_v62, %v26956_v39  ;;  %v26959_v16 = vld [vmem:[#allocation52_spill] sm:$0xff]  ;;  %v24103_v62 = vld [vmem:[%s25286_s2 + $0x1c8] sm:$0xff] }
 0x44a   :  { %18385 = vmatpush3.bf16.msra.mxu0 %v18382_v52  ;;  %18195 = vmatprep.subr.bf16.mxu1 %v18194_v3  ;;  %v26960_v54 = vand.u32 4294901760, %v26959_v16  ;;  %v26962_v52 = vand.u32 4294901760, %v26961_v22  ;;  %v25871_v22 = vand.u32 4294901760, %v24075_v45 }
 0x44b   :  { %18387 = vmatprep.subr.bf16.mxu0 %v18386_v42 }
 0x44c   :  { %v18402_v20 = vpack.c.bf16 %v26962_v52, %v26960_v54  ;;  %v25872_v54 = vand.u32 4294901760, %v24070_v27  ;;  %v24114_v52 = vld [vmem:[%s25286_s2 + $0x150] sm:$0xff] }
 0x44d   :  { %18197 = vmatpush3.bf16.msra.mxu1 %v18194_v3  ;;  %v26964_v3 = vand.u32 4294901760, %v26963_v41  ;;  %v25882_v51 = vand.u32 4294901760, %v24114_v52 }
 0x44e   :  { %18389 = vmatpush3.bf16.msra.mxu0 %v18386_v42  ;;  %18199 = vmatprep.subr.bf16.mxu1 %v18198_v9 }
 0x44f   :  { %18391 = vmatprep.subr.bf16.mxu0 %v18390_v55  ;;  %v18214_v42 = vpack.c.bf16 %v26966_v11, %v26964_v3  ;;  %v25879_v11 = vand.u32 4294901760, %v24103_v62 }
 0x451   :  { %18201 = vmatpush3.bf16.msra.mxu1 %v18198_v9  ;;  %v26969_v9 = vld [vmem:[#allocation60_spill] sm:$0xff] }
 0x452   :  { %18393 = vmatpush3.bf16.msra.mxu0 %v18390_v55  ;;  %18203 = vmatprep.subr.bf16.mxu1 %v18202_v5  ;;  %v26970_v14 = vand.u32 4294901760, %v26969_v9  ;;  %v24144_v9 = vld [vmem:[%s25286_s2 + $0x1d0] sm:$0xff] }
 0x453   :  { %18395 = vmatprep.subr.bf16.mxu0 %v18394_v17 }
 0x454   :  { %v18406_v30 = vpack.c.bf16 %v26970_v14, %v26968_v36  ;;  %v24149_v14 = vld [vmem:[%s25286_s2 + $0x1d8] sm:$0xff] }
 0x455   :  { %18205 = vmatpush3.bf16.msra.mxu1 %v18202_v5  ;;  %v24022_v5 = vld [vmem:[%s25286_s2 + $0x1a8] sm:$0xff] }
 0x456   :  { %18397 = vmatpush3.bf16.msra.mxu0 %v18394_v17  ;;  %18207 = vmatprep.subr.bf16.mxu1 %v18206_v57  ;;  %v25878_v17 = vand.u32 4294901760, %v24017_v2  ;;  %v25877_v34 = vand.u32 4294901760, %v24022_v5 }
 0x457   :  { %18399 = vmatprep.subr.bf16.mxu0 %v18398_v1 }
 0x459   :  { %18209 = vmatpush3.bf16.msra.mxu1 %v18206_v57  ;;  %v24065_v57 = vld [vmem:[%s25286_s2 + $0x1b8] sm:$0xff] }
 0x45a   :  { %18401 = vmatpush3.bf16.msra.mxu0 %v18398_v1  ;;  %18211 = vmatprep.subr.bf16.mxu1 %v18210_v0  ;;  %v24091_v1 = vpack.c.bf16 %v25877_v34, %v25878_v17  ;;  %v25873_v16 = vand.u32 4294901760, %v24065_v57  ;;  %v24211_v34 = vpack.c.bf16 %v25879_v11, %v25880_v25  ;;  %v25888_v17 = vand.u32 4294901760, %v24144_v9 }
 0x45b   :  { %18403 = vmatprep.subr.bf16.mxu0 %v18402_v20 }
 0x45c   :  { %26975 = vst [vmem:[#allocation69_spill] sm:$0xff] %v24091_v1  ;;  %26979 = vst [vmem:[#allocation75_spill] sm:$0xff] %v24211_v34 }
 0x45d   :  { %18213 = vmatpush3.bf16.msra.mxu1 %v18210_v0  ;;  %v25874_v0 = vand.u32 4294901760, %v24053_v43 }
 0x45e   :  { %18405 = vmatpush3.bf16.msra.mxu0 %v18402_v20  ;;  %18215 = vmatprep.subr.bf16.mxu1 %v18214_v42  ;;  %v24119_v20 = vld [vmem:[%s25286_s2 + $0x158] sm:$0xff] }
 0x45f   :  { %18407 = vmatprep.subr.bf16.mxu0 %v18406_v30  ;;  %v25881_v36 = vand.u32 4294901760, %v24119_v20 }
 0x461   :  { %18217 = vmatpush3.bf16.msra.mxu1 %v18214_v42 }
 0x462   :  { %18409 = vmatpush3.bf16.msra.mxu0 %v18406_v30  ;;  %18219 = vmatprep.subr.bf16.mxu1 %v23119_v6  ;;  %v24156_v30 = vpack.c.bf16 %v25873_v16, %v25874_v0 }
 0x463   :  { %18411 = vmatprep.subr.bf16.mxu0 %v23041_v56 }
 0x464   :  { %15519 = vmatmul.mubr.f32.vlgmr.msra.gmra.mrb[38].mxu1 %v23685_v46  ;;  %26977 = vst [vmem:[#allocation72_spill] sm:$0xff] %v24156_v30 }
 0x465   :  { %15729 = vmatmul.mubr.f32.vlgmr.msra.gmra.mrb[16].mxu0 %v23685_v46  ;;  %18221 = vmatpush3.bf16.msra.mxu1 %v23119_v6  ;;  %v23950_v6 = vld [vmem:[%s25286_s2 + $0x108] sm:$0xff] }
 0x466   :  { %15553 = vmatprep.mubr.f32.mxu1 %v23654_v40  ;;  %18413 = vmatpush3.bf16.msra.mxu0 %v23041_v56  ;;  %v23945_v56 = vld [vmem:[%s25286_s2 + $0x100] sm:$0xff] }
 0x467   :  { %15763 = vmatprep.mubr.f32.mxu0 %v23654_v40  ;;  %18223 = vmatprep.subr.bf16.mxu1 %v26908_v4 }
 0x468   :  { %18415 = vmatprep.subr.bf16.mxu0 %v26909_v12 }
 0x469   :  { %18225 = vmatpush3.bf16.msra.mxu1 %v26908_v4  ;;  %v23955_v4 = vld [vmem:[%s25286_s2 + $0x180] sm:$0xff] }
 0x46a   :  { %18417 = vmatpush3.bf16.msra.mxu0 %v26909_v12  ;;  %18227 = vmatprep.subr.bf16.mxu1 %v26910_v29  ;;  %v23960_v12 = vld [vmem:[%s25286_s2 + $0x188] sm:$0xff] }
 0x46b   :  { %18419 = vmatprep.subr.bf16.mxu0 %v26911_v23 }
 0x46d   :  { %18229 = vmatpush3.bf16.msra.mxu1 %v26910_v29  ;;  %v7811_v29 = vand.u32 4294901760, %v23945_v56 }
 0x46e   :  { %18421 = vmatpush3.bf16.msra.mxu0 %v26911_v23  ;;  %18231 = vmatprep.subr.bf16.mxu1 %v26912_v38  ;;  %v7814_v23 = vand.u32 4294901760, %v23950_v6 }
 0x46f   :  { %18423 = vmatprep.subr.bf16.mxu0 %v26913_v49  ;;  %v24123_v41 = vsub.f32 %v23945_v56, %v7811_v29  ;;  %v24162_v56 = vpack.c.bf16 %v25871_v22, %v25872_v54  ;;  %v24187_v22 = vld [vmem:[%s25286_s2 + $0x170] sm:$0xff]  ;;  %v24192_v54 = vld [vmem:[%s25286_s2 + $0x178] sm:$0xff] }
 0x470   :  { %v23993_v55 = vpack.c.bf16 %v7814_v23, %v7811_v29  ;;  %v24126_v3 = vsub.f32 %v23950_v6, %v7814_v23  ;;  %v24167_v6 = vld [vmem:[%s25286_s2 + $0x160] sm:$0xff]  ;;  %v24172_v29 = vld [vmem:[%s25286_s2 + $0x168] sm:$0xff] }
 0x471   :  { %18233 = vmatpush3.bf16.msra.mxu1 %v26912_v38  ;;  %v8537_v38 = vand.u32 4294901760, %v23955_v4  ;;  %26978 = vst [vmem:[#allocation73_spill] sm:$0xff] %v24162_v56  ;;  %v24177_v23 = vld [vmem:[%s25286_s2 + $0x1e0] sm:$0xff]  ;;  %v25885_v16 = vand.u32 4294901760, %v24123_v41 }
 0x472   :  { %18425 = vmatpush3.bf16.msra.mxu0 %v26913_v49  ;;  %18235 = vmatprep.subr.bf16.mxu1 %v26914_v18  ;;  %v8540_v49 = vand.u32 4294901760, %v23960_v12  ;;  %v25886_v0 = vand.u32 4294901760, %v24126_v3 }
 0x473   :  { %18427 = vmatprep.subr.bf16.mxu0 %v26915_v8 }
 0x474   :  { %v24005_v60 = vpack.c.bf16 %v8540_v49, %v8537_v38  ;;  %v7922_v11 = vsub.f32 %v24126_v3, %v25886_v0 }
 0x475   :  { %18237 = vmatpush3.bf16.msra.mxu1 %v26914_v18  ;;  %v23973_v18 = vld [vmem:[%s25286_s2 + $0x110] sm:$0xff] }
 0x476   :  { %18429 = vmatpush3.bf16.msra.mxu0 %v26915_v8  ;;  %18239 = vmatprep.subr.bf16.mxu1 %v26916_v37  ;;  %v23978_v8 = vld [vmem:[%s25286_s2 + $0x118] sm:$0xff]  ;;  %v7817_v47 = vand.u32 4294901760, %v23973_v18 }
 0x477   :  { %18431 = vmatprep.subr.bf16.mxu0 %v26917_v58 }
 0x479   :  { %18241 = vmatpush3.bf16.msra.mxu1 %v26916_v37  ;;  %v23984_v37 = vld [vmem:[%s25286_s2 + $0x190] sm:$0xff] }
 0x47a   :  { %18433 = vmatpush3.bf16.msra.mxu0 %v26917_v58  ;;  %18243 = vmatprep.subr.bf16.mxu1 %v26918_v28  ;;  %v23989_v58 = vld [vmem:[%s25286_s2 + $0x198] sm:$0xff]  ;;  %v8543_v13 = vand.u32 4294901760, %v23984_v37 }
 0x47b   :  { %18435 = vmatprep.subr.bf16.mxu0 %v26919_v32  ;;  %v8546_v19 = vand.u32 4294901760, %v23989_v58 }
 0x47d   :  { %18245 = vmatpush3.bf16.msra.mxu1 %v26918_v28  ;;  %v23998_v28 = vld [vmem:[%s25286_s2 + $0x120] sm:$0xff]  ;;  %v24060_v21 = vpack.c.bf16 %v8546_v19, %v8543_v13 }
 0x47e   :  { %18437 = vmatpush3.bf16.msra.mxu0 %v26919_v32  ;;  %18247 = vmatprep.subr.bf16.mxu1 %v26920_v35  ;;  %v7820_v32 = vand.u32 4294901760, %v23978_v8  ;;  %v25884_v44 = vand.u32 4294901760, %v23998_v28 }
 0x47f   :  { %18439 = vmatprep.subr.bf16.mxu0 %v26923_v63  ;;  %26972 = vst [vmem:[#allocation67_spill] sm:$0xff] %v24060_v21 }
 0x480   :  { %v24038_v7 = vpack.c.bf16 %v7820_v32, %v7817_v47  ;;  %v24085_v48 = vpack.c.bf16 %v25883_v24, %v25884_v44  ;;  %v7915_v24 = vsub.f32 %v24123_v41, %v25885_v16  ;;  %v24269_v16 = vsub.f32 %v23989_v58, %v8546_v19 }
 0x481   :  { %18249 = vmatpush3.bf16.msra.mxu1 %v26920_v35  ;;  %v24043_v35 = vld [vmem:[%s25286_s2 + $0x130] sm:$0xff]  ;;  %v26984_v44 = vand.u32 4294901760, %v23998_v28  ;;  %v26985_v19 = vand.u32 4294901760, %v24177_v23 }
 0x482   :  { %18441 = vmatpush3.bf16.msra.mxu0 %v26923_v63  ;;  %18443 = vmatprep.subr.bf16.mxu1 %v23993_v55  ;;  %26971 = vst [vmem:[#allocation66_spill] sm:$0xff] %v24038_v7  ;;  %v24048_v63 = vld [vmem:[%s25286_s2 + $0x138] sm:$0xff]  ;;  %26974 = vst [vmem:[#allocation191_spill] sm:$0xff] %v24085_v48  ;;  %v25876_v50 = vand.u32 4294901760, %v24043_v35 }
 0x483   :  { %18635 = vmatprep.subr.bf16.mxu0 %v24005_v60  ;;  %v25875_v39 = vand.u32 4294901760, %v24048_v63  ;;  %v24288_v58 = vsub.f32 %v23998_v28, %v26984_v44  ;;  %v7916_v28 = vand.u32 4294901760, %v7915_v24  ;;  %v7923_v44 = vand.u32 4294901760, %v7922_v11 }
 0x484   :  { %15554 = vmatmul.mubr.f32.vlgmr.msra.gmra.mrb[38].mxu1 %v23685_v46 }
 0x485   :  { %15764 = vmatmul.mubr.f32.vlgmr.msra.gmra.mrb[16].mxu0 %v23685_v46  ;;  %18445 = vmatpush3.bf16.msra.mxu1 %v23993_v55  ;;  %v24137_v42 = vpack.c.bf16 %v25875_v39, %v25876_v50  ;;  %v24199_v39 = vsub.f32 %v23955_v4, %v8537_v38  ;;  %v24204_v50 = vsub.f32 %v23960_v12, %v8540_v49  ;;  %v25887_v49 = vand.u32 4294901760, %v24149_v14 }
 0x486   :  { %15798 = vmatprep.mubr.f32.mxu1 %v26973_v26  ;;  %18637 = vmatpush3.bf16.msra.mxu0 %v24005_v60  ;;  %v24217_v4 = vsub.f32 %v23973_v18, %v7817_v47  ;;  %v24222_v12 = vsub.f32 %v23978_v8, %v7820_v32  ;;  %v24230_v38 = vpack.c.bf16 %v25881_v36, %v25882_v51  ;;  %v25889_v18 = vand.u32 4294901760, %v24167_v6  ;;  %v24243_v36 = vld [vmem:[%s25286_s2 + $0x1f0] sm:$0xff]  ;;  %v24248_v51 = vld [vmem:[%s25286_s2 + $0x1f8] sm:$0xff] }
 0x487   :  { %16008 = vmatprep.mubr.f32.mxu0 %v26973_v26  ;;  %18447 = vmatprep.subr.bf16.mxu1 %v24038_v7  ;;  %26976 = vst [vmem:[#allocation70_spill] sm:$0xff] %v24137_v42  ;;  %v24182_v26 = vld [vmem:[%s25286_s2 + $0x1e8] sm:$0xff]  ;;  %v24264_v47 = vsub.f32 %v23984_v37, %v8543_v13  ;;  %v24277_v0 = vpack.c.bf16 %v25887_v49, %v25888_v17  ;;  %v26982_v37 = vand.u32 4294901760, %v24172_v29  ;;  %v26988_v49 = vand.u32 4294901760, %v24187_v22 }
 0x488   :  { %18639 = vmatprep.subr.bf16.mxu0 %v24060_v21  ;;  %26980 = vst [vmem:[#allocation76_spill] sm:$0xff] %v24230_v38  ;;  %v26986_v8 = vand.u32 4294901760, %v24182_v26  ;;  %v26989_v17 = vand.u32 4294901760, %v24192_v54  ;;  %v26991_v15 = vand.u32 4294901760, %v24199_v39  ;;  %v26998_v24 = vand.u32 4294901760, %v24243_v36 }
 0x489   :  { %18449 = vmatpush3.bf16.msra.mxu1 %v24038_v7  ;;  %26981 = vst [vmem:[#allocation78_spill] sm:$0xff] %v24277_v0  ;;  %v24283_v13 = vpack.c.bf16 %v26982_v37, %v25889_v18 }
 0x48a   :  { %18641 = vmatpush3.bf16.msra.mxu0 %v24060_v21  ;;  %18451 = vmatprep.subr.bf16.mxu1 %v24085_v48  ;;  %v24295_v32 = vpack.c.bf16 %v26986_v8, %v26985_v19  ;;  %v24301_v25 = vpack.c.bf16 %v26989_v17, %v26988_v49  ;;  %v26993_v19 = vand.u32 4294901760, %v24217_v4  ;;  %v26994_v49 = vand.u32 4294901760, %v24222_v12 }
 0x48b   :  { %18643 = vmatprep.subr.bf16.mxu0 %v24091_v1  ;;  %26983 = vst [vmem:[#allocation79_spill] sm:$0xff] %v24283_v13 }
 0x48c   :  { %26987 = vst [vmem:[#allocation81_spill] sm:$0xff] %v24295_v32  ;;  %26990 = vst [vmem:[#allocation82_spill] sm:$0xff] %v24301_v25  ;;  %v7929_v17 = vsub.f32 %v24217_v4, %v26993_v19  ;;  %v7936_v18 = vsub.f32 %v24222_v12, %v26994_v49  ;;  %v26996_v19 = vand.u32 4294901760, %v24017_v2  ;;  %v26997_v49 = vand.u32 4294901760, %v24022_v5 }
 0x48d   :  { %18453 = vmatpush3.bf16.msra.mxu1 %v24085_v48 }
 0x48e   :  { %18645 = vmatpush3.bf16.msra.mxu0 %v24091_v1  ;;  %18455 = vmatprep.subr.bf16.mxu1 %v24137_v42  ;;  %v24336_v11 = vsub.f32 %v24022_v5, %v26997_v49  ;;  %v27002_v5 = vand.u32 4294901760, %v24053_v43  ;;  %v24360_v1 = vpack.c.bf16 %v7923_v44, %v7916_v28 }
 0x48f   :  { %18647 = vmatprep.subr.bf16.mxu0 %v24156_v30 }
 0x490   :  { %v24358_v49 = vsub.f32 %v24053_v43, %v27002_v5  ;;  %v27005_v43 = vand.u32 4294901760, %v24269_v16 }
 0x491   :  { %18457 = vmatpush3.bf16.msra.mxu1 %v24137_v42  ;;  %v26992_v42 = vand.u32 4294901760, %v24204_v50 }
 0x492   :  { %18649 = vmatpush3.bf16.msra.mxu0 %v24156_v30  ;;  %18459 = vmatprep.subr.bf16.mxu1 %v24162_v56  ;;  %v8641_v30 = vsub.f32 %v24199_v39, %v26991_v15  ;;  %v26999_v15 = vand.u32 4294901760, %v24248_v51  ;;  %v8662_v28 = vsub.f32 %v24269_v16, %v27005_v43 }
 0x493   :  { %18651 = vmatprep.subr.bf16.mxu0 %v24211_v34  ;;  %v8648_v8 = vsub.f32 %v24204_v50, %v26992_v42  ;;  %v26995_v42 = vand.u32 4294901760, %v24012_v59 }
 0x494   :  { %v8642_v48 = vand.u32 4294901760, %v8641_v30  ;;  %v27006_v30 = vand.u32 4294901760, %v24288_v58 }
 0x495   :  { %18461 = vmatpush3.bf16.msra.mxu1 %v24162_v56  ;;  %v24326_v37 = vsub.f32 %v24012_v59, %v26995_v42  ;;  %v24331_v56 = vsub.f32 %v24017_v2, %v26996_v19  ;;  %v27000_v59 = vand.u32 4294901760, %v24043_v35  ;;  %v27001_v2 = vand.u32 4294901760, %v24048_v63 }
 0x496   :  { %18653 = vmatpush3.bf16.msra.mxu0 %v24211_v34  ;;  %18463 = vmatprep.subr.bf16.mxu1 %v24230_v38  ;;  %v24343_v34 = vpack.c.bf16 %v26999_v15, %v26998_v24  ;;  %v8649_v24 = vand.u32 4294901760, %v8648_v8  ;;  %v27003_v15 = vand.u32 4294901760, %v24065_v57 }
 0x497   :  { %18655 = vmatprep.subr.bf16.mxu0 %v24277_v0  ;;  %v24348_v42 = vsub.f32 %v24043_v35, %v27000_v59  ;;  %v24353_v19 = vsub.f32 %v24048_v63, %v27001_v2  ;;  %v7930_v35 = vand.u32 4294901760, %v7929_v17  ;;  %v7937_v59 = vand.u32 4294901760, %v7936_v18 }
 0x498   :  { %v24365_v21 = vsub.f32 %v24065_v57, %v27003_v15  ;;  %v27004_v63 = vand.u32 4294901760, %v24264_v47  ;;  %v24379_v57 = vsub.f32 %v24288_v58, %v27006_v30  ;;  %v18666_v30 = vpack.c.bf16 %v8649_v24, %v8642_v48 }
 0x499   :  { %18465 = vmatpush3.bf16.msra.mxu1 %v24230_v38  ;;  %v27008_v18 = vand.u32 4294901760, %v24075_v45  ;;  %v24405_v15 = vpack.c.bf16 %v7937_v59, %v7930_v35  ;;  %v27010_v48 = vand.u32 4294901760, %v24103_v62  ;;  %v27012_v35 = vand.u32 4294901760, %v24331_v56 }
 0x49a   :  { %v8655_v2 = vsub.f32 %v24264_v47, %v27004_v63  ;;  %18657 = vmatpush3.bf16.msra.mxu0 %v24277_v0  ;;  %18467 = vmatprep.subr.bf16.mxu1 %v24283_v13  ;;  %v27007_v63 = vand.u32 4294901760, %v24070_v27  ;;  %v25916_v44 = vand.u32 4294901760, %v24365_v21  ;;  %v27009_v0 = vand.u32 4294901760, %v24098_v10 }
 0x49b   :  { %18659 = vmatprep.subr.bf16.mxu0 %v24295_v32  ;;  %v24397_v8 = vsub.f32 %v24075_v45, %v27008_v18  ;;  %v24410_v24 = vsub.f32 %v24103_v62, %v27010_v48  ;;  %v7944_v45 = vand.u32 4294901760, %v24379_v57  ;;  %v8669_v59 = vsub.f32 %v24331_v56, %v27012_v35 }
 0x49c   :  { %v24391_v43 = vsub.f32 %v24070_v27, %v27007_v63  ;;  %v24402_v17 = vsub.f32 %v24098_v10, %v27009_v0  ;;  %v8656_v5 = vand.u32 4294901760, %v8655_v2  ;;  %v8663_v27 = vand.u32 4294901760, %v8662_v28 }
 0x49d   :  { %18469 = vmatpush3.bf16.msra.mxu1 %v24283_v13  ;;  %v27011_v10 = vand.u32 4294901760, %v24326_v37  ;;  %v27013_v2 = vand.u32 4294901760, %v24336_v11  ;;  %v27014_v62 = vand.u32 4294901760, %v24348_v42  ;;  %v27015_v57 = vand.u32 4294901760, %v24353_v19 }
 0x49e   :  { %18661 = vmatpush3.bf16.msra.mxu0 %v24295_v32  ;;  %18471 = vmatprep.subr.bf16.mxu1 %v24301_v25  ;;  %v27016_v48 = vand.u32 4294901760, %v24358_v49  ;;  %v27018_v35 = vand.u32 4294901760, %v24119_v20 }
 0x49f   :  { %v7950_v0 = vsub.f32 %v24326_v37, %v27011_v10  ;;  %v8676_v28 = vsub.f32 %v24336_v11, %v27013_v2  ;;  %18663 = vmatprep.subr.bf16.mxu0 %v24343_v34  ;;  %v7957_v18 = vsub.f32 %v24348_v42, %v27014_v62  ;;  %v7964_v63 = vsub.f32 %v24353_v19, %v27015_v57 }
 0x4a0   :  { %v8683_v10 = vsub.f32 %v24358_v49, %v27016_v48  ;;  %v8690_v2 = vsub.f32 %v24365_v21, %v25916_v44  ;;  %v27017_v62 = vand.u32 4294901760, %v24114_v52  ;;  %v18670_v57 = vpack.c.bf16 %v8663_v27, %v8656_v5 }
 0x4a1   :  { %18473 = vmatpush3.bf16.msra.mxu1 %v24301_v25  ;;  %v24450_v7 = vsub.f32 %v24119_v20, %v27018_v35  ;;  %v27019_v44 = vand.u32 4294901760, %v24144_v9  ;;  %v8677_v13 = vand.u32 4294901760, %v8676_v28  ;;  %v27020_v5 = vand.u32 4294901760, %v24149_v14 }
 0x4a2   :  { %v24443_v38 = vsub.f32 %v24114_v52, %v27017_v62  ;;  %18665 = vmatpush3.bf16.msra.mxu0 %v24343_v34  ;;  %18475 = vmatprep.subr.bf16.mxu1 %v24360_v1  ;;  %v7951_v52 = vand.u32 4294901760, %v7950_v0  ;;  %v8670_v62 = vand.u32 4294901760, %v8669_v59  ;;  %v7958_v20 = vand.u32 4294901760, %v7957_v18 }
 0x4a3   :  { %v24455_v32 = vsub.f32 %v24144_v9, %v27019_v44  ;;  %v24462_v27 = vsub.f32 %v24149_v14, %v27020_v5  ;;  %18667 = vmatprep.subr.bf16.mxu0 %v18666_v30  ;;  %v7965_v35 = vand.u32 4294901760, %v7964_v63  ;;  %v8684_v48 = vand.u32 4294901760, %v8683_v10 }
 0x4a4   :  { %v27021_v25 = vand.u32 4294901760, %v24391_v43  ;;  %15799 = vmatmul.mubr.f32.vlgmr.msra.gmra.mrb[40].mxu1 %v23743_v33  ;;  %v8691_v44 = vand.u32 4294901760, %v8690_v2  ;;  %v27022_v0 = vand.u32 4294901760, %v24397_v8  ;;  %v27023_v28 = vand.u32 4294901760, %v24402_v17 }
 0x4a5   :  { %16009 = vmatmul.mubr.f32.vlgmr.msra.gmra.mrb[18].mxu0 %v23743_v33  ;;  %18477 = vmatpush3.bf16.msra.mxu1 %v24360_v1  ;;  %v27024_v18 = vand.u32 4294901760, %v24410_v24  ;;  %v27025_v2 = vand.u32 4294901760, %v24167_v6  ;;  %v18674_v33 = vpack.c.bf16 %v8677_v13, %v8670_v62  ;;  %v25919_v1 = vand.u32 4294901760, %v24462_v27 }
 0x4a6   :  { %v7971_v9 = vsub.f32 %v24391_v43, %v27021_v25  ;;  %v7978_v59 = vsub.f32 %v24397_v8, %v27022_v0  ;;  %v8697_v14 = vsub.f32 %v24402_v17, %v27023_v28  ;;  %15833 = vmatprep.mubr.f32.mxu1 %v23654_v40  ;;  %18669 = vmatpush3.bf16.msra.mxu0 %v18666_v30  ;;  %v27026_v5 = vand.u32 4294901760, %v24172_v29 }
 0x4a7   :  { %v8704_v25 = vsub.f32 %v24410_v24, %v27024_v18  ;;  %v24485_v0 = vsub.f32 %v24167_v6, %v27025_v2  ;;  %v18482_v28 = vpack.c.bf16 %v7951_v52, %v7944_v45  ;;  %16043 = vmatprep.mubr.f32.mxu0 %v23654_v40  ;;  %18479 = vmatprep.subr.bf16.mxu1 %v24405_v15  ;;  %v27027_v6 = vand.u32 4294901760, %v24177_v23 }
 0x4a8   :  { %v24492_v18 = vsub.f32 %v24172_v29, %v27026_v5  ;;  %v18486_v10 = vpack.c.bf16 %v7965_v35, %v7958_v20  ;;  %v7972_v63 = vand.u32 4294901760, %v7971_v9  ;;  %v27028_v13 = vand.u32 4294901760, %v24182_v26  ;;  %18671 = vmatprep.subr.bf16.mxu0 %v18670_v57 }
 0x4a9   :  { %v24499_v2 = vsub.f32 %v24177_v23, %v27027_v6  ;;  %v18678_v45 = vpack.c.bf16 %v8691_v44, %v8684_v48  ;;  %v7979_v29 = vand.u32 4294901760, %v7978_v59  ;;  %v8698_v52 = vand.u32 4294901760, %v8697_v14  ;;  %18481 = vmatpush3.bf16.msra.mxu1 %v24405_v15 }
 0x4aa   :  { %v24504_v30 = vsub.f32 %v24182_v26, %v27028_v13  ;;  %v27029_v62 = vand.u32 4294901760, %v24443_v38  ;;  %v8705_v20 = vand.u32 4294901760, %v8704_v25  ;;  %v27030_v35 = vand.u32 4294901760, %v24450_v7  ;;  %18673 = vmatpush3.bf16.msra.mxu0 %v18670_v57  ;;  %18483 = vmatprep.subr.bf16.mxu1 %v18482_v28 }
 0x4ab   :  { %v27031_v9 = vand.u32 4294901760, %v24455_v32  ;;  %v25920_v6 = vand.u32 4294901760, %v24485_v0  ;;  %v8718_v48 = vsub.f32 %v24462_v27, %v25919_v1  ;;  %v27032_v15 = vand.u32 4294901760, %v24187_v22  ;;  %18675 = vmatprep.subr.bf16.mxu0 %v18674_v33 }
 0x4ac   :  { %v7985_v5 = vsub.f32 %v24443_v38, %v27029_v62  ;;  %v7992_v23 = vsub.f32 %v24450_v7, %v27030_v35  ;;  %v27033_v14 = vand.u32 4294901760, %v24192_v54  ;;  %v27034_v62 = vand.u32 4294901760, %v24243_v36 }
 0x4ad   :  { %v8711_v26 = vsub.f32 %v24455_v32, %v27031_v9  ;;  %v24524_v59 = vsub.f32 %v24187_v22, %v27032_v15  ;;  %v27035_v9 = vand.u32 4294901760, %v24248_v51  ;;  %v18490_v15 = vpack.c.bf16 %v7979_v29, %v7972_v63  ;;  %18485 = vmatpush3.bf16.msra.mxu1 %v18482_v28 }
 0x4ae   :  { %v24529_v25 = vsub.f32 %v24192_v54, %v27033_v14  ;;  %v24536_v35 = vsub.f32 %v24243_v36, %v27034_v62  ;;  %v7986_v1 = vand.u32 4294901760, %v7985_v5  ;;  %v18682_v54 = vpack.c.bf16 %v8705_v20, %v8698_v52  ;;  %18677 = vmatpush3.bf16.msra.mxu0 %v18674_v33  ;;  %18487 = vmatprep.subr.bf16.mxu1 %v18486_v10 }
 0x4af   :  { %v24541_v22 = vsub.f32 %v24248_v51, %v27035_v9  ;;  %v7993_v14 = vand.u32 4294901760, %v7992_v23  ;;  %v8712_v44 = vand.u32 4294901760, %v8711_v26  ;;  %v7999_v13 = vsub.f32 %v24485_v0, %v25920_v6  ;;  %18679 = vmatprep.subr.bf16.mxu0 %v18678_v45 }
 0x4b0   :  { %v8719_v57 = vand.u32 4294901760, %v8718_v48  ;;  %v27036_v36 = vand.u32 4294901760, %v24492_v18  ;;  %v8012_v51 = vand.u32 4294901760, %v24524_v59  ;;  %v8019_v63 = vand.u32 4294901760, %v24529_v25 }
 0x4b1   :  { %v27037_v28 = vand.u32 4294901760, %v24499_v2  ;;  %v27038_v52 = vand.u32 4294901760, %v24504_v30  ;;  %v8738_v33 = vand.u32 4294901760, %v24536_v35  ;;  %v8745_v20 = vand.u32 4294901760, %v24541_v22  ;;  %18489 = vmatpush3.bf16.msra.mxu1 %v18486_v10 }
 0x4b2   :  { %v8006_v62 = vsub.f32 %v24492_v18, %v27036_v36  ;;  %v18494_v23 = vpack.c.bf16 %v7993_v14, %v7986_v1  ;;  %v8000_v26 = vand.u32 4294901760, %v7999_v13  ;;  %18681 = vmatpush3.bf16.msra.mxu0 %v18678_v45  ;;  %18491 = vmatprep.subr.bf16.mxu1 %v18490_v15  ;;  %v18686_v48 = vpack.c.bf16 %v8719_v57, %v8712_v44 }
 0x4b3   :  { %v8725_v29 = vsub.f32 %v24499_v2, %v27037_v28  ;;  %v8732_v5 = vsub.f32 %v24504_v30, %v27038_v52  ;;  %v8013_v36 = vsub.f32 %v24524_v59, %v8012_v51  ;;  %v8020_v28 = vsub.f32 %v24529_v25, %v8019_v63  ;;  %18683 = vmatprep.subr.bf16.mxu0 %v18682_v54 }
 0x4b4   :  { %v8007_v9 = vand.u32 4294901760, %v8006_v62  ;;  %v8739_v10 = vsub.f32 %v24536_v35, %v8738_v33  ;;  %v8746_v1 = vsub.f32 %v24541_v22, %v8745_v20 }
 0x4b5   :  { %v8726_v52 = vand.u32 4294901760, %v8725_v29  ;;  %v8733_v6 = vand.u32 4294901760, %v8732_v5  ;;  %18493 = vmatpush3.bf16.msra.mxu1 %v18490_v15  ;;  %v8014_v44 = vand.u32 4294901760, %v8013_v36  ;;  %v8021_v57 = vand.u32 4294901760, %v8020_v28 }
 0x4b6   :  { %18685 = vmatpush3.bf16.msra.mxu0 %v18682_v54  ;;  %18495 = vmatprep.subr.bf16.mxu1 %v18494_v23  ;;  %v18498_v45 = vpack.c.bf16 %v8007_v9, %v8000_v26  ;;  %v8740_v14 = vand.u32 4294901760, %v8739_v10  ;;  %v8747_v62 = vand.u32 4294901760, %v8746_v1  ;;  %v18506_v15 = vpack.c.bf16 %v24126_v3, %v24123_v41 }
 0x4b7   :  { %18687 = vmatprep.subr.bf16.mxu0 %v18686_v48  ;;  %v18690_v13 = vpack.c.bf16 %v8733_v6, %v8726_v52  ;;  %v18502_v29 = vpack.c.bf16 %v8021_v57, %v8014_v44  ;;  %v18698_v54 = vpack.c.bf16 %v24204_v50, %v24199_v39  ;;  %v18510_v6 = vpack.c.bf16 %v24222_v12, %v24217_v4 }
 0x4b8   :  { %v18694_v5 = vpack.c.bf16 %v8747_v62, %v8740_v14  ;;  %v18514_v26 = vpack.c.bf16 %v24326_v37, %v24288_v58  ;;  %v18518_v9 = vpack.c.bf16 %v24353_v19, %v24348_v42  ;;  %v18710_v36 = vpack.c.bf16 %v24365_v21, %v24358_v49  ;;  %v27040_v14 = vld [vmem:[#allocation67_spill] sm:$0xff] }
 0x4b9   :  { %18497 = vmatpush3.bf16.msra.mxu1 %v18494_v23  ;;  %v18702_v23 = vpack.c.bf16 %v24269_v16, %v24264_v47  ;;  %v18714_v28 = vpack.c.bf16 %v24410_v24, %v24402_v17  ;;  %v18526_v52 = vpack.c.bf16 %v24450_v7, %v24443_v38  ;;  %v18718_v10 = vpack.c.bf16 %v24462_v27, %v24455_v32  ;;  %v27041_v62 = vld [vmem:[#allocation191_spill] sm:$0xff] }
 0x4ba   :  { %18689 = vmatpush3.bf16.msra.mxu0 %v18686_v48  ;;  %18499 = vmatprep.subr.bf16.mxu1 %v18498_v45  ;;  %v18706_v48 = vpack.c.bf16 %v24336_v11, %v24331_v56  ;;  %v18530_v1 = vpack.c.bf16 %v24492_v18, %v24485_v0  ;;  %v18534_v44 = vpack.c.bf16 %v24529_v25, %v24524_v59 }
 0x4bb   :  { %18691 = vmatprep.subr.bf16.mxu0 %v18690_v13  ;;  %v18726_v57 = vpack.c.bf16 %v24541_v22, %v24536_v35 }
 0x4bd   :  { %18501 = vmatpush3.bf16.msra.mxu1 %v18498_v45  ;;  %v18722_v45 = vpack.c.bf16 %v24504_v30, %v24499_v2 }
 0x4be   :  { %18693 = vmatpush3.bf16.msra.mxu0 %v18690_v13  ;;  %18503 = vmatprep.subr.bf16.mxu1 %v18502_v29  ;;  %v27039_v13 = vld [vmem:[#allocation66_spill] sm:$0xff] }
 0x4bf   :  { %18695 = vmatprep.subr.bf16.mxu0 %v18694_v5 }
 0x4c1   :  { %18505 = vmatpush3.bf16.msra.mxu1 %v18502_v29  ;;  %v27042_v29 = vld [vmem:[#allocation69_spill] sm:$0xff] }
 0x4c2   :  { %18697 = vmatpush3.bf16.msra.mxu0 %v18694_v5  ;;  %18507 = vmatprep.subr.bf16.mxu1 %v18506_v15  ;;  %v27044_v5 = vld [vmem:[#allocation72_spill] sm:$0xff] }
 0x4c3   :  { %18699 = vmatprep.subr.bf16.mxu0 %v18698_v54 }
 0x4c4   :  { %15834 = vmatmul.mubr.f32.vlgmr.msra.gmra.mrb[40].mxu1 %v23685_v46 }
 0x4c5   :  { %16044 = vmatmul.mubr.f32.vlgmr.msra.gmra.mrb[18].mxu0 %v23685_v46  ;;  %18509 = vmatpush3.bf16.msra.mxu1 %v18506_v15  ;;  %v27046_v15 = vld [vmem:[#allocation75_spill] sm:$0xff] }
 0x4c6   :  { %15868 = vmatprep.mubr.f32.mxu1 %v23665_v61  ;;  %18701 = vmatpush3.bf16.msra.mxu0 %v18698_v54  ;;  %v27047_v54 = vld [vmem:[#allocation76_spill] sm:$0xff] }
 0x4c7   :  { %16078 = vmatprep.mubr.f32.mxu0 %v23665_v61  ;;  %18511 = vmatprep.subr.bf16.mxu1 %v18510_v6  ;;  %v18522_v61 = vpack.c.bf16 %v24397_v8, %v24391_v43 }
 0x4c8   :  { %18703 = vmatprep.subr.bf16.mxu0 %v18702_v23 }
 0x4c9   :  { %18513 = vmatpush3.bf16.msra.mxu1 %v18510_v6  ;;  %v27048_v6 = vld [vmem:[#allocation78_spill] sm:$0xff] }
 0x4ca   :  { %18705 = vmatpush3.bf16.msra.mxu0 %v18702_v23  ;;  %18515 = vmatprep.subr.bf16.mxu1 %v18514_v26  ;;  %v27049_v23 = vld [vmem:[#allocation79_spill] sm:$0xff] }
 0x4cb   :  { %18707 = vmatprep.subr.bf16.mxu0 %v18706_v48 }
 0x4cd   :  { %18517 = vmatpush3.bf16.msra.mxu1 %v18514_v26  ;;  %v27050_v26 = vld [vmem:[#allocation81_spill] sm:$0xff] }
 0x4ce   :  { %18709 = vmatpush3.bf16.msra.mxu0 %v18706_v48  ;;  %18519 = vmatprep.subr.bf16.mxu1 %v18518_v9  ;;  %v27051_v48 = vld [vmem:[#allocation82_spill] sm:$0xff] }
 0x4cf   :  { %18711 = vmatprep.subr.bf16.mxu0 %v18710_v36 }
 0x4d1   :  { %18521 = vmatpush3.bf16.msra.mxu1 %v18518_v9  ;;  %v27052_v9 = vand.u32 4294901760, %v24123_v41  ;;  %v27057_v41 = vand.u32 4294901760, %v24222_v12  ;;  %v27063_v12 = vand.u32 4294901760, %v24331_v56  ;;  %v27069_v56 = vand.u32 4294901760, %v24391_v43 }
 0x4d2   :  { %18713 = vmatpush3.bf16.msra.mxu0 %v18710_v36  ;;  %18523 = vmatprep.subr.bf16.mxu1 %v18522_v61  ;;  %v27053_v36 = vand.u32 4294901760, %v24126_v3  ;;  %v27058_v3 = vld [vmem:[#allocation189_spill] sm:$0xff]  ;;  %v27075_v43 = vand.u32 4294901760, %v24455_v32  ;;  %v18598_v32 = vpack.c.bf16 %v8019_v63, %v8012_v51 }
 0x4d3   :  { %18715 = vmatprep.subr.bf16.mxu0 %v18714_v28 }
 0x4d5   :  { %18525 = vmatpush3.bf16.msra.mxu1 %v18522_v61  ;;  %v18570_v61 = vpack.c.bf16 %v27053_v36, %v27052_v9  ;;  %v27065_v36 = vand.u32 4294901760, %v24348_v42  ;;  %v27071_v42 = vand.u32 4294901760, %v24402_v17  ;;  %v27077_v17 = vand.u32 4294901760, %v24485_v0 }
 0x4d6   :  { %18717 = vmatpush3.bf16.msra.mxu0 %v18714_v28  ;;  %18527 = vmatprep.subr.bf16.mxu1 %v18526_v52  ;;  %v27054_v28 = vand.u32 4294901760, %v24199_v39  ;;  %v27060_v39 = vand.u32 4294901760, %v24269_v16 }
 0x4d7   :  { %18719 = vmatprep.subr.bf16.mxu0 %v18718_v10 }
 0x4d9   :  { %18529 = vmatpush3.bf16.msra.mxu1 %v18526_v52  ;;  %v27055_v52 = vand.u32 4294901760, %v24204_v50  ;;  %v27061_v50 = vand.u32 4294901760, %v24288_v58 }
 0x4da   :  { %18721 = vmatpush3.bf16.msra.mxu0 %v18718_v10  ;;  %18531 = vmatprep.subr.bf16.mxu1 %v18530_v1 }
 0x4db   :  { %18723 = vmatprep.subr.bf16.mxu0 %v18722_v45  ;;  %v18762_v10 = vpack.c.bf16 %v27055_v52, %v27054_v28  ;;  %v27068_v28 = vand.u32 4294901760, %v24365_v21  ;;  %v27073_v21 = vand.u32 4294901760, %v24443_v38  ;;  %v27079_v38 = vand.u32 4294901760, %v24499_v2 }
 0x4dd   :  { %18533 = vmatpush3.bf16.msra.mxu1 %v18530_v1  ;;  %v27056_v1 = vand.u32 4294901760, %v24217_v4  ;;  %v27062_v4 = vand.u32 4294901760, %v24326_v37  ;;  %v27067_v37 = vand.u32 4294901760, %v24358_v49  ;;  %v27074_v49 = vand.u32 4294901760, %v24450_v7 }
 0x4de   :  { %18725 = vmatpush3.bf16.msra.mxu0 %v18722_v45  ;;  %18535 = vmatprep.subr.bf16.mxu1 %v18534_v44  ;;  %v27080_v7 = vand.u32 4294901760, %v24504_v30 }
 0x4df   :  { %18727 = vmatprep.subr.bf16.mxu0 %v18726_v57  ;;  %v18574_v45 = vpack.c.bf16 %v27057_v41, %v27056_v1  ;;  %v18578_v9 = vpack.c.bf16 %v27062_v4, %v27061_v50  ;;  %v18774_v52 = vpack.c.bf16 %v27068_v28, %v27067_v37  ;;  %v18590_v41 = vpack.c.bf16 %v27074_v49, %v27073_v21 }
 0x4e1   :  { %18537 = vmatpush3.bf16.msra.mxu1 %v18534_v44  ;;  %v27059_v44 = vand.u32 4294901760, %v24264_v47  ;;  %v27064_v47 = vand.u32 4294901760, %v24336_v11  ;;  %v27070_v11 = vand.u32 4294901760, %v24397_v8  ;;  %v27076_v8 = vand.u32 4294901760, %v24462_v27 }
 0x4e2   :  { %18729 = vmatpush3.bf16.msra.mxu0 %v18726_v57  ;;  %18539 = vmatprep.subr.bf16.mxu1 %v23993_v55  ;;  %v18790_v27 = vpack.c.bf16 %v8745_v20, %v8738_v33 }
 0x4e3   :  { %18731 = vmatprep.subr.bf16.mxu0 %v24005_v60  ;;  %v18766_v57 = vpack.c.bf16 %v27060_v39, %v27059_v44  ;;  %v18770_v16 = vpack.c.bf16 %v27064_v47, %v27063_v12  ;;  %v18786_v44 = vpack.c.bf16 %v27080_v7, %v27079_v38 }
 0x4e4   :  { %15869 = vmatmul.mubr.f32.vlgmr.msra.gmra.mrb[40].mxu1 %v23711_v53 }
 0x4e5   :  { %16079 = vmatmul.mubr.f32.vlgmr.msra.gmra.mrb[18].mxu0 %v23711_v53  ;;  %18541 = vmatpush3.bf16.msra.mxu1 %v23993_v55  ;;  %v27043_v53 = vld [vmem:[#allocation70_spill] sm:$0xff] }
 0x4e6   :  { %15903 = vmatprep.mubr.f32.mxu1 %v23691_v31  ;;  %18733 = vmatpush3.bf16.msra.mxu0 %v24005_v60 }
 0x4e7   :  { %16113 = vmatprep.mubr.f32.mxu0 %v23691_v31  ;;  %18543 = vmatprep.subr.bf16.mxu1 %v27039_v13  ;;  %v27045_v31 = vld [vmem:[#allocation73_spill] sm:$0xff] }
 0x4e8   :  { %18735 = vmatprep.subr.bf16.mxu0 %v27040_v14 }
 0x4e9   :  { %18545 = vmatpush3.bf16.msra.mxu1 %v27039_v13 }
 0x4ea   :  { %18737 = vmatpush3.bf16.msra.mxu0 %v27040_v14  ;;  %18547 = vmatprep.subr.bf16.mxu1 %v27041_v62 }
 0x4eb   :  { %18739 = vmatprep.subr.bf16.mxu0 %v27042_v29 }
 0x4ed   :  { %18549 = vmatpush3.bf16.msra.mxu1 %v27041_v62 }
 0x4ee   :  { %18741 = vmatpush3.bf16.msra.mxu0 %v27042_v29  ;;  %18551 = vmatprep.subr.bf16.mxu1 %v27043_v53 }
 0x4ef   :  { %18743 = vmatprep.subr.bf16.mxu0 %v27044_v5 }
 0x4f1   :  { %18553 = vmatpush3.bf16.msra.mxu1 %v27043_v53 }
 0x4f2   :  { %18745 = vmatpush3.bf16.msra.mxu0 %v27044_v5  ;;  %18555 = vmatprep.subr.bf16.mxu1 %v27045_v31 }
 0x4f3   :  { %18747 = vmatprep.subr.bf16.mxu0 %v27046_v15 }
 0x4f5   :  { %18557 = vmatpush3.bf16.msra.mxu1 %v27045_v31 }
 0x4f6   :  { %18749 = vmatpush3.bf16.msra.mxu0 %v27046_v15  ;;  %18559 = vmatprep.subr.bf16.mxu1 %v27047_v54 }
 0x4f7   :  { %18751 = vmatprep.subr.bf16.mxu0 %v27048_v6 }
 0x4f9   :  { %18561 = vmatpush3.bf16.msra.mxu1 %v27047_v54 }
 0x4fa   :  { %18753 = vmatpush3.bf16.msra.mxu0 %v27048_v6  ;;  %18563 = vmatprep.subr.bf16.mxu1 %v27049_v23 }
 0x4fb   :  { %18755 = vmatprep.subr.bf16.mxu0 %v27050_v26 }
 0x4fd   :  { %18565 = vmatpush3.bf16.msra.mxu1 %v27049_v23 }
 0x4fe   :  { %18757 = vmatpush3.bf16.msra.mxu0 %v27050_v26  ;;  %18567 = vmatprep.subr.bf16.mxu1 %v27051_v48 }
 0x4ff   :  { %18759 = vmatprep.subr.bf16.mxu0 %v24343_v34 }
 0x501   :  { %18569 = vmatpush3.bf16.msra.mxu1 %v27051_v48 }
 0x502   :  { %18761 = vmatpush3.bf16.msra.mxu0 %v24343_v34  ;;  %18571 = vmatprep.subr.bf16.mxu1 %v18570_v61 }
 0x503   :  { %18763 = vmatprep.subr.bf16.mxu0 %v18762_v10 }
 0x504   :  { %15904 = vmatmul.mubr.f32.vlgmr.msra.gmra.mrb[40].mxu1 %v27058_v3 }
 0x505   :  { %16114 = vmatmul.mubr.f32.vlgmr.msra.gmra.mrb[18].mxu0 %v27058_v3  ;;  %18573 = vmatpush3.bf16.msra.mxu1 %v18570_v61  ;;  %v27066_v61 = vand.u32 4294901760, %v24353_v19  ;;  %v27072_v19 = vand.u32 4294901760, %v24410_v24  ;;  %v27078_v24 = vand.u32 4294901760, %v24492_v18 }
 0x506   :  { %15938 = vmatprep.mubr.f32.mxu1 %v23654_v40  ;;  %18765 = vmatpush3.bf16.msra.mxu0 %v18762_v10  ;;  %v18586_v10 = vpack.c.bf16 %v27070_v11, %v27069_v56 }
 0x507   :  { %16148 = vmatprep.mubr.f32.mxu0 %v23654_v40  ;;  %18575 = vmatprep.subr.bf16.mxu1 %v18574_v45  ;;  %v18582_v58 = vpack.c.bf16 %v27066_v61, %v27065_v36  ;;  %v18778_v1 = vpack.c.bf16 %v27072_v19, %v27071_v42  ;;  %v18594_v3 = vpack.c.bf16 %v27078_v24, %v27077_v17 }
 0x508   :  { %18767 = vmatprep.subr.bf16.mxu0 %v18766_v57 }
 0x509   :  { %18577 = vmatpush3.bf16.msra.mxu1 %v18574_v45  ;;  %v18782_v45 = vpack.c.bf16 %v27076_v8, %v27075_v43 }
 0x50a   :  { %18769 = vmatpush3.bf16.msra.mxu0 %v18766_v57  ;;  %18579 = vmatprep.subr.bf16.mxu1 %v18578_v9 }
 0x50b   :  { %18771 = vmatprep.subr.bf16.mxu0 %v18770_v16 }
 0x50d   :  { %18581 = vmatpush3.bf16.msra.mxu1 %v18578_v9 }
 0x50e   :  { %18773 = vmatpush3.bf16.msra.mxu0 %v18770_v16  ;;  %18583 = vmatprep.subr.bf16.mxu1 %v18582_v58 }
 0x50f   :  { %18775 = vmatprep.subr.bf16.mxu0 %v18774_v52 }
 0x511   :  { %18585 = vmatpush3.bf16.msra.mxu1 %v18582_v58 }
 0x512   :  { %18777 = vmatpush3.bf16.msra.mxu0 %v18774_v52  ;;  %18587 = vmatprep.subr.bf16.mxu1 %v18586_v10 }
 0x513   :  { %18779 = vmatprep.subr.bf16.mxu0 %v18778_v1 }
 0x515   :  { %18589 = vmatpush3.bf16.msra.mxu1 %v18586_v10 }
 0x516   :  { %18781 = vmatpush3.bf16.msra.mxu0 %v18778_v1  ;;  %18591 = vmatprep.subr.bf16.mxu1 %v18590_v41 }
 0x517   :  { %18783 = vmatprep.subr.bf16.mxu0 %v18782_v45 }
 0x519   :  { %18593 = vmatpush3.bf16.msra.mxu1 %v18590_v41 }
 0x51a   :  { %18785 = vmatpush3.bf16.msra.mxu0 %v18782_v45  ;;  %18595 = vmatprep.subr.bf16.mxu1 %v18594_v3 }
 0x51b   :  { %18787 = vmatprep.subr.bf16.mxu0 %v18786_v44 }
 0x51d   :  { %18597 = vmatpush3.bf16.msra.mxu1 %v18594_v3 }
 0x51e   :  { %18789 = vmatpush3.bf16.msra.mxu0 %v18786_v44  ;;  %18599 = vmatprep.subr.bf16.mxu1 %v18598_v32 }
 0x51f   :  { %18791 = vmatprep.subr.bf16.mxu0 %v18790_v27 }
 0x521   :  { %18601 = vmatpush3.bf16.msra.mxu1 %v18598_v32 }
 0x522   :  { %18793 = vmatpush3.bf16.msra.mxu0 %v18790_v27  ;;  %18603 = vmatprep.subr.bf16.mxu1 %v23993_v55 }
 0x523   :  { %18795 = vmatprep.subr.bf16.mxu0 %v24005_v60 }
 0x524   :  { %15939 = vmatmul.mubr.f32.vlgmr.msra.gmra.mrb[40].mxu1 %v23685_v46 }
 0x525   :  { %16149 = vmatmul.mubr.f32.vlgmr.msra.gmra.mrb[18].mxu0 %v23685_v46  ;;  %18605 = vmatpush3.bf16.msra.mxu1 %v23993_v55 }
 0x526   :  { %15973 = vmatprep.mubr.f32.mxu1 %v23654_v40  ;;  %18797 = vmatpush3.bf16.msra.mxu0 %v24005_v60 }
 0x527   :  { %16183 = vmatprep.mubr.f32.mxu0 %v23654_v40  ;;  %18607 = vmatprep.subr.bf16.mxu1 %v27039_v13 }
 0x528   :  { %18799 = vmatprep.subr.bf16.mxu0 %v27040_v14 }
 0x529   :  { %18609 = vmatpush3.bf16.msra.mxu1 %v27039_v13 }
 0x52a   :  { %18801 = vmatpush3.bf16.msra.mxu0 %v27040_v14  ;;  %18611 = vmatprep.subr.bf16.mxu1 %v27041_v62 }
 0x52b   :  { %18803 = vmatprep.subr.bf16.mxu0 %v27042_v29 }
 0x52d   :  { %18613 = vmatpush3.bf16.msra.mxu1 %v27041_v62 }
 0x52e   :  { %18805 = vmatpush3.bf16.msra.mxu0 %v27042_v29  ;;  %18615 = vmatprep.subr.bf16.mxu1 %v27043_v53 }
 0x52f   :  { %18807 = vmatprep.subr.bf16.mxu0 %v27044_v5 }
 0x531   :  { %18617 = vmatpush3.bf16.msra.mxu1 %v27043_v53 }
 0x532   :  { %18809 = vmatpush3.bf16.msra.mxu0 %v27044_v5  ;;  %18619 = vmatprep.subr.bf16.mxu1 %v27045_v31 }
 0x533   :  { %18811 = vmatprep.subr.bf16.mxu0 %v27046_v15 }
 0x535   :  { %18621 = vmatpush3.bf16.msra.mxu1 %v27045_v31 }
 0x536   :  { %18813 = vmatpush3.bf16.msra.mxu0 %v27046_v15  ;;  %18623 = vmatprep.subr.bf16.mxu1 %v27047_v54 }
 0x537   :  { %18815 = vmatprep.subr.bf16.mxu0 %v27048_v6 }
 0x539   :  { %18625 = vmatpush3.bf16.msra.mxu1 %v27047_v54 }
 0x53a   :  { %18817 = vmatpush3.bf16.msra.mxu0 %v27048_v6  ;;  %18627 = vmatprep.subr.bf16.mxu1 %v27049_v23 }
 0x53b   :  { %18819 = vmatprep.subr.bf16.mxu0 %v27050_v26 }
 0x53d   :  { %18629 = vmatpush3.bf16.msra.mxu1 %v27049_v23 }
 0x53e   :  { %18821 = vmatpush3.bf16.msra.mxu0 %v27050_v26  ;;  %18631 = vmatprep.subr.bf16.mxu1 %v27051_v48 }
 0x53f   :  { %18823 = vmatprep.subr.bf16.mxu0 %v24343_v34 }
 0x541   :  { %18633 = vmatpush3.bf16.msra.mxu1 %v27051_v48 }
 0x542   :  { %18825 = vmatpush3.bf16.msra.mxu0 %v24343_v34 }
 0x544   :  { %15974 = vmatmul.mubr.f32.vlgmr.msra.gmra.mrb[40].mxu1 %v23685_v46 }
 0x545   :  { %16184 = vmatmul.mubr.f32.vlgmr.msra.gmra.mrb[18].mxu0 %v23685_v46 }
 0x557   :  { %v15555_v40 = vpop.f32.mrb[38].mxu1 }
 0x558   :  { %v15765_v55 = vpop.f32.mrb[16].mxu0  ;;  %v7032_v60 = vpop.f32.mrb[39].mxu1  ;;  %v7045_v59 = vsel %vm75_vm0, %v15555_v40, -inf }
 0x559   :  { %v7758_v0 = vpop.f32.mrb[17].mxu0  ;;  %v7771_v18 = vsel %vm75_vm0, %v15765_v55, -inf  ;;  %v7042_v2 = vsel %vm75_vm0, %v7032_v60, -inf }
 0x55a   :  { %7772 = vmax.xlane.f32.xlu1 %v7771_v18  ;;  %7043 = vmax.xlane.f32.xlu0 %v7042_v2  ;;  %v7768_v30 = vsel %vm75_vm0, %v7758_v0, -inf  ;;  %v27081_v18 = vld [vmem:[#allocation61_spill] sm:$0xff] }
 0x55e   :  { %7769 = vmax.xlane.f32.xlu1 %v7768_v30  ;;  %7046 = vmax.xlane.f32.xlu0 %v7045_v59  ;;  %v27082_v59 = vld [vmem:[#allocation63_spill] sm:$0xff] }
 0x5e7   :  { %v7044_v34 = vpop.xlane.xlu0 %7043  ;;  %v7773_v25 = vpop.xlane.xlu1 %7772 }
 0x5e8   :  { %v7048_v22 = vsub.f32 %v7032_v60, %v7044_v34  ;;  %v7775_v63 = vsub.f32 %v15765_v55, %v7773_v25 }
 0x5ea   :  { %v7050_v20 = vmul.f32 1.442695, %v7048_v22  ;;  %v7778_v14 = vmul.f32 1.442695, %v7775_v63 }
 0x5eb   :  { %v7047_v35 = vpop.xlane.xlu0 %7046  ;;  %v7770_v51 = vpop.xlane.xlu1 %7769 }
 0x5ec   :  { %v7049_v46 = vsub.f32 %v15555_v40, %v7047_v35  ;;  %v7774_v13 = vsub.f32 %v7758_v0, %v7770_v51 }
 0x5ee   :  { %v7052_v33 = vmul.f32 1.442695, %v7049_v46  ;;  %v7776_v62 = vmul.f32 1.442695, %v7774_v13 }
 0x5f0   :  { %19663 = vpow2.f32 %v7052_v33 }
 0x5f1   :  { %19665 = vpow2.f32 %v7050_v20 }
 0x5f2   :  { %19667 = vpow2.f32 %v7778_v14 }
 0x5f3   :  { %19669 = vpow2.f32 %v7776_v62 }
 0x5fa   :  { %v19664_v23 = vpop.eup %19663 }
 0x5fb   :  { %v19666_v48 = vpop.eup %19665  ;;  %v7057_v39 = vsel %vm75_vm0, %v19664_v23, 0.0 }
 0x5fc   :  { %v19668_v57 = vpop.eup %19667  ;;  %v7054_v50 = vsel %vm75_vm0, %v19666_v48, 0.0 }
 0x5fd   :  { %v19670_v4 = vpop.eup %19669  ;;  %v7783_v9 = vsel %vm75_vm0, %v19668_v57, 0.0 }
 0x5fe   :  { %v7780_v12 = vsel %vm75_vm0, %v19670_v4, 0.0 }
 0x617   :  { %v15975_v29 = vpop.f32.mrb[40].mxu1 }
 0x618   :  { %v16185_v53 = vpop.f32.mrb[18].mxu0  ;;  %v8484_v5 = vpop.f32.mrb[41].mxu1  ;;  %v8497_v31 = vsel %vm75_vm0, %v15975_v29, -inf }
 0x619   :  { %v9210_v15 = vpop.f32.mrb[19].mxu0  ;;  %8498 = vmax.xlane.f32.xlu1 %v8497_v31  ;;  %v8494_v54 = vsel %vm75_vm0, %v8484_v5, -inf  ;;  %v9223_v6 = vsel %vm75_vm0, %v16185_v53, -inf }
 0x61a   :  { %8495 = vmax.xlane.f32.xlu0 %v8494_v54  ;;  %v9220_v26 = vsel %vm75_vm0, %v9210_v15, -inf }
 0x61d   :  { %9224 = vmax.xlane.f32.xlu1 %v9223_v6 }
 0x61e   :  { %9221 = vmax.xlane.f32.xlu0 %v9220_v26 }
 0x621   :  { %7058 = vadd.xlane.f32.xlu1 %v7057_v39 }
 0x622   :  { %7055 = vadd.xlane.f32.xlu0 %v7054_v50 }
 0x625   :  { %7784 = vadd.xlane.f32.xlu1 %v7783_v9 }
 0x626   :  { %7781 = vadd.xlane.f32.xlu0 %v7780_v12 }
 0x6a6   :  { %v8499_v47 = vpop.xlane.xlu1 %8498 }
 0x6a7   :  { %v8501_v16 = vsub.f32 %v15975_v29, %v8499_v47  ;;  %v8496_v36 = vpop.xlane.xlu0 %8495 }
 0x6a8   :  { %v8500_v61 = vsub.f32 %v8484_v5, %v8496_v36 }
 0x6a9   :  { %v8504_v58 = vmul.f32 1.442695, %v8501_v16 }
 0x6aa   :  { %v8502_v37 = vmul.f32 1.442695, %v8500_v61  ;;  %v9225_v28 = vpop.xlane.xlu1 %9224 }
 0x6ab   :  { %19671 = vpow2.f32 %v8504_v58  ;;  %v9227_v52 = vsub.f32 %v16185_v53, %v9225_v28  ;;  %v9222_v56 = vpop.xlane.xlu0 %9221  ;;  %v9246_v28 = vld [vmem:[%s25286_s2 + $0x200] sm:$0xff] }
 0x6ac   :  { %19673 = vpow2.f32 %v8502_v37  ;;  %v9226_v11 = vsub.f32 %v9210_v15, %v9222_v56 }
 0x6ad   :  { %v9230_v10 = vmul.f32 1.442695, %v9227_v52  ;;  %v9254_v52 = vsel %vm9252_vm1, %v9246_v28, 0 }
 0x6ae   :  { %v9228_v42 = vmul.f32 1.442695, %v9226_v11  ;;  %v7059_v19 = vpop.xlane.xlu1 %7058  ;;  %v24805_v56 = vand.u32 4294901760, %v9254_v52 }
 0x6af   :  { %19675 = vpow2.f32 %v9230_v10  ;;  %v7061_v1 = vmul.f32 0.125, %v7059_v19  ;;  %v7056_v21 = vpop.xlane.xlu0 %7055 }
 0x6b0   :  { %19677 = vpow2.f32 %v9228_v42  ;;  %v7060_v49 = vmul.f32 0.125, %v7056_v21  ;;  %v24808_v11 = vsub.f32 %v9254_v52, %v24805_v56 }
 0x6b1   :  { %19679 = vrcp.f32 %v7061_v1 }
 0x6b2   :  { %19681 = vrcp.f32 %v7060_v49  ;;  %v7785_v41 = vpop.xlane.xlu1 %7784  ;;  %v9334_v10 = vand.u32 4294901760, %v24808_v11 }
 0x6b3   :  { %v7787_v43 = vmul.f32 0.125, %v7785_v41  ;;  %v7782_v8 = vpop.xlane.xlu0 %7781 }
 0x6b4   :  { %v7786_v45 = vmul.f32 0.125, %v7782_v8  ;;  %v9335_v42 = vsub.f32 %v24808_v11, %v9334_v10  ;;  %v9247_v8 = vld [vmem:[%s25286_s2 + $0x208] sm:$0xff] }
 0x6b5   :  { %v24761_v17 = vpop.eup %19671  ;;  %19683 = vrcp.f32 %v7787_v43 }
 0x6b6   :  { %v24763_v24 = vpop.eup %19673  ;;  %19685 = vrcp.f32 %v7786_v45  ;;  %v8509_v3 = vsel %vm75_vm0, %v24761_v17, 0.0  ;;  %v9336_v19 = vand.u32 4294901760, %v9335_v42 }
 0x6b7   :  { %8510 = vadd.xlane.f32.xlu1 %v8509_v3  ;;  %v8506_v38 = vsel %vm75_vm0, %v24763_v24, 0.0 }
 0x6b8   :  { %8507 = vadd.xlane.f32.xlu0 %v8506_v38  ;;  %16202 = vmatprep.mubr.f32.mxu1 %v9336_v19 }
 0x6b9   :  { %v24769_v7 = vpop.eup %19675 }
 0x6ba   :  { %v24771_v44 = vpop.eup %19677  ;;  %v9235_v32 = vsel %vm75_vm0, %v24769_v7, 0.0 }
 0x6bb   :  { %v19680_v27 = vpop.eup %19679  ;;  %9236 = vadd.xlane.f32.xlu1 %v9235_v32  ;;  %v9232_v40 = vsel %vm75_vm0, %v24771_v44, 0.0  ;;  %v9257_v32 = vsel %vm9252_vm1, %v9247_v8, 0  ;;  %v9840_v8 = vld [vmem:[%s25286_s2 + $0x218] sm:$0xff] }
 0x6bc   :  { %v19682_v55 = vpop.eup %19681  ;;  %v7065_v60 = vmul.f32 %v19680_v27, %v19664_v23  ;;  %9233 = vadd.xlane.f32.xlu0 %v9232_v40  ;;  %v24818_v27 = vand.u32 4294901760, %v9257_v32 }
 0x6bd   :  { %v7063_v0 = vmul.f32 %v19682_v55, %v19666_v48 }
 0x6be   :  { %v7067_v2 = vmul.f32 %v27081_v18, %v7065_v60 }
 0x6bf   :  { %v19684_v30 = vpop.eup %19683  ;;  %v7066_v34 = vmul.f32 %v27082_v59, %v7063_v0  ;;  %v24822_v0 = vsub.f32 %v9257_v32, %v24818_v27 }
 0x6c0   :  { %v19686_v25 = vpop.eup %19685  ;;  %v9263_v35 = vand.u32 4294901760, %v7067_v2  ;;  %v7791_v46 = vmul.f32 %v19684_v30, %v19668_v57 }
 0x6c1   :  { %v9260_v22 = vand.u32 4294901760, %v7066_v34  ;;  %v7789_v51 = vmul.f32 %v19686_v25, %v19670_v4 }
 0x6c2   :  { %v9361_v63 = vsub.f32 %v7067_v2, %v9263_v35  ;;  %v7793_v33 = vmul.f32 %v27081_v18, %v7791_v46 }
 0x6c3   :  { %v24780_v20 = vpack.c.bf16 %v9263_v35, %v9260_v22  ;;  %v9354_v13 = vsub.f32 %v7066_v34, %v9260_v22  ;;  %v7792_v14 = vmul.f32 %v27082_v59, %v7789_v51  ;;  %v9344_v51 = vand.u32 4294901760, %v24822_v0 }
 0x6c4   :  { %v9362_v62 = vand.u32 4294901760, %v9361_v63  ;;  %v9269_v29 = vand.u32 4294901760, %v7793_v33 }
 0x6c5   :  { %v9355_v53 = vand.u32 4294901760, %v9354_v13  ;;  %v24783_v5 = vpack.c.bf16 %v9361_v63, %v9354_v13  ;;  %v9266_v31 = vand.u32 4294901760, %v7792_v14  ;;  %18827 = vmatprep.subr.bf16.mxu1 %v24780_v20 }
 0x6c6   :  { %v9363_v15 = vsub.f32 %v9361_v63, %v9362_v62  ;;  %v9375_v54 = vsub.f32 %v7793_v33, %v9269_v29  ;;  %18829 = vmatpush3.bf16.msra.mxu1 %v24780_v20 }
 0x6c7   :  { %v9356_v6 = vsub.f32 %v9354_v13, %v9355_v53  ;;  %v24787_v23 = vpack.c.bf16 %v9362_v62, %v9355_v53  ;;  %v24789_v26 = vpack.c.bf16 %v9269_v29, %v9266_v31  ;;  %v9368_v48 = vsub.f32 %v7792_v14, %v9266_v31 }
 0x6c8   :  { %v9364_v39 = vand.u32 4294901760, %v9363_v15  ;;  %v9376_v57 = vand.u32 4294901760, %v9375_v54 }
 0x6c9   :  { %v9357_v50 = vand.u32 4294901760, %v9356_v6  ;;  %v9369_v4 = vand.u32 4294901760, %v9368_v48  ;;  %v24791_v9 = vpack.c.bf16 %v9375_v54, %v9368_v48  ;;  %18831 = vmatprep.subr.bf16.mxu1 %v24789_v26 }
 0x6ca   :  { %v9377_v12 = vsub.f32 %v9375_v54, %v9376_v57  ;;  %18833 = vmatpush3.bf16.msra.mxu1 %v24789_v26 }
 0x6cb   :  { %v24795_v47 = vpack.c.bf16 %v9364_v39, %v9357_v50  ;;  %v9370_v16 = vsub.f32 %v9368_v48, %v9369_v4  ;;  %v24797_v36 = vpack.c.bf16 %v9376_v57, %v9369_v4 }
 0x6cc   :  { %v9378_v61 = vand.u32 4294901760, %v9377_v12 }
 0x6cd   :  { %v9371_v58 = vand.u32 4294901760, %v9370_v16 }
 0x6cf   :  { %v24799_v37 = vpack.c.bf16 %v9378_v61, %v9371_v58 }
 0x744   :  { %v8511_v1 = vpop.xlane.xlu1 %8510 }
 0x745   :  { %v8513_v21 = vmul.f32 0.125, %v8511_v1  ;;  %v8508_v49 = vpop.xlane.xlu0 %8507 }
 0x746   :  { %v8512_v41 = vmul.f32 0.125, %v8508_v49 }
 0x747   :  { %19687 = vrcp.f32 %v8513_v21 }
 0x748   :  { %19689 = vrcp.f32 %v8512_v41  ;;  %v9237_v43 = vpop.xlane.xlu1 %9236 }
 0x749   :  { %v9239_v45 = vmul.f32 0.125, %v9237_v43  ;;  %v9234_v3 = vpop.xlane.xlu0 %9233 }
 0x74a   :  { %v9238_v38 = vmul.f32 0.125, %v9234_v3  ;;  %v9849_v3 = vsel %vm9252_vm1, %v9840_v8, 0 }
 0x74b   :  { %19691 = vrcp.f32 %v9239_v45 }
 0x74c   :  { %19693 = vrcp.f32 %v9238_v38 }
 0x751   :  { %v19688_v40 = vpop.eup %19687 }
 0x752   :  { %v19690_v55 = vpop.eup %19689  ;;  %v8517_v60 = vmul.f32 %v19688_v40, %v24761_v17 }
 0x753   :  { %v8515_v2 = vmul.f32 %v19690_v55, %v24763_v24 }
 0x754   :  { %v8519_v30 = vmul.f32 %v27081_v18, %v8517_v60 }
 0x755   :  { %v19692_v34 = vpop.eup %19691  ;;  %v8518_v25 = vmul.f32 %v27082_v59, %v8515_v2 }
 0x756   :  { %v19694_v35 = vpop.eup %19693  ;;  %v9275_v46 = vand.u32 4294901760, %v8519_v30  ;;  %v9243_v22 = vmul.f32 %v19692_v34, %v24769_v7  ;;  %v9345_v7 = vsub.f32 %v24822_v0, %v9344_v51 }
 0x757   :  { %v9272_v63 = vand.u32 4294901760, %v8518_v25  ;;  %v9241_v33 = vmul.f32 %v19694_v35, %v24771_v44 }
 0x758   :  { %v24830_v17 = vsub.f32 %v8519_v30, %v9275_v46  ;;  %v9245_v13 = vmul.f32 %v27081_v18, %v9243_v22  ;;  %v9346_v6 = vand.u32 4294901760, %v9345_v7 }
 0x759   :  { %v24833_v14 = vpack.c.bf16 %v9275_v46, %v9272_v63  ;;  %v24835_v24 = vsub.f32 %v8518_v25, %v9272_v63  ;;  %v9244_v62 = vmul.f32 %v27082_v59, %v9241_v33  ;;  %v10966_v25 = vld [vmem:[%s25286_s2 + $0x228] sm:$0xff] }
 0x75a   :  { %v9281_v29 = vand.u32 4294901760, %v9245_v13  ;;  %v9390_v53 = vand.u32 4294901760, %v24830_v17  ;;  %v10975_v46 = vsel %vm9252_vm1, %v10966_v25, 0 }
 0x75b   :  { %v9383_v31 = vand.u32 4294901760, %v24835_v24  ;;  %v9278_v44 = vand.u32 4294901760, %v9244_v62  ;;  %18835 = vmatprep.subr.bf16.mxu1 %v24833_v14  ;;  %v24871_v42 = vpack.c.bf16 %v24830_v17, %v24835_v24  ;;  %v24994_v22 = vand.u32 4294901760, %v10975_v46 }
 0x75c   :  { %v9403_v15 = vsub.f32 %v9245_v13, %v9281_v29  ;;  %18837 = vmatpush3.bf16.msra.mxu1 %v24833_v14  ;;  %v9391_v59 = vsub.f32 %v24830_v17, %v9390_v53 }
 0x75d   :  { %v24845_v18 = vpack.c.bf16 %v9281_v29, %v9278_v44  ;;  %v9396_v54 = vsub.f32 %v9244_v62, %v9278_v44  ;;  %v9384_v48 = vsub.f32 %v24835_v24, %v9383_v31  ;;  %v11061_v63 = vsub.f32 %v10975_v46, %v24994_v22  ;;  %v9841_v24 = vld [vmem:[%s25286_s2 + $0x260] sm:$0xff]  ;;  %v9842_v62 = vld [vmem:[%s25286_s2 + $0x268] sm:$0xff] }
 0x75e   :  { %v9404_v39 = vand.u32 4294901760, %v9403_v15  ;;  %v9392_v50 = vand.u32 4294901760, %v9391_v59  ;;  %v10438_v29 = vand.u32 4294901760, %v9841_v24  ;;  %v10441_v7 = vand.u32 4294901760, %v9842_v62 }
 0x75f   :  { %v9397_v57 = vand.u32 4294901760, %v9396_v54  ;;  %18839 = vmatprep.subr.bf16.mxu1 %v24845_v18  ;;  %v9385_v4 = vand.u32 4294901760, %v9384_v48  ;;  %v24875_v19 = vpack.c.bf16 %v9403_v15, %v9396_v54  ;;  %v11062_v33 = vand.u32 4294901760, %v11061_v63 }
 0x760   :  { %18841 = vmatpush3.bf16.msra.mxu1 %v24845_v18  ;;  %v9405_v12 = vsub.f32 %v9403_v15, %v9404_v39  ;;  %v10535_v44 = vsub.f32 %v9842_v62, %v10441_v7  ;;  %v9843_v15 = vld [vmem:[%s25286_s2 + $0x270] sm:$0xff] }
 0x761   :  { %18843 = vmatprep.subr.bf16.mxu1 %v24795_v47  ;;  %v9398_v16 = vsub.f32 %v9396_v54, %v9397_v57  ;;  %v24855_v61 = vpack.c.bf16 %v9392_v50, %v9385_v4  ;;  %v24904_v1 = vpack.c.bf16 %v9404_v39, %v9397_v57  ;;  %v11063_v17 = vsub.f32 %v11061_v63, %v11062_v33  ;;  %v9844_v54 = vld [vmem:[%s25286_s2 + $0x278] sm:$0xff] }
 0x762   :  { %v9406_v58 = vand.u32 4294901760, %v9405_v12  ;;  %v10447_v59 = vand.u32 4294901760, %v9844_v54  ;;  %v10536_v39 = vand.u32 4294901760, %v10535_v44 }
 0x763   :  { %16203 = vmatmul.mubr.f32.vlgmr.msra.gmra.mrb[42].mxu1 %v9346_v6  ;;  %v9399_v28 = vand.u32 4294901760, %v9398_v16  ;;  %v11064_v13 = vand.u32 4294901760, %v11063_v17  ;;  %v10444_v6 = vand.u32 4294901760, %v9843_v15 }
 0x764   :  { %18845 = vmatpush3.bf16.msra.mxu1 %v24795_v47  ;;  %16221 = vmatprep.mubr.f32.mxu1 %v24805_v56  ;;  %v10537_v4 = vsub.f32 %v10535_v44, %v10536_v39  ;;  %v10549_v16 = vsub.f32 %v9844_v54, %v10447_v59 }
 0x765   :  { %18847 = vmatprep.subr.bf16.mxu1 %v24799_v37  ;;  %v24859_v52 = vpack.c.bf16 %v9406_v58, %v9399_v28  ;;  %v25067_v57 = vpack.c.bf16 %v10447_v59, %v10444_v6  ;;  %v10542_v12 = vsub.f32 %v9843_v15, %v10444_v6 }
 0x766   :  { %v10538_v28 = vand.u32 4294901760, %v10537_v4 }
 0x768   :  { %18849 = vmatpush3.bf16.msra.mxu1 %v24799_v37 }
 0x769   :  { %18851 = vmatprep.subr.bf16.mxu1 %v24855_v61 }
 0x76c   :  { %18853 = vmatpush3.bf16.msra.mxu1 %v24855_v61 }
 0x76d   :  { %18855 = vmatprep.subr.bf16.mxu1 %v24859_v52 }
 0x770   :  { %18857 = vmatpush3.bf16.msra.mxu1 %v24859_v52 }
 0x771   :  { %18859 = vmatprep.subr.bf16.mxu1 %v24783_v5 }
 0x773   :  { %16222 = vmatmul.mubr.f32.vlgmr.msra.gmra.mrb[42].mxu1 %v24818_v27 }
 0x774   :  { %18861 = vmatpush3.bf16.msra.mxu1 %v24783_v5  ;;  %16240 = vmatprep.mubr.f32.mxu1 %v24808_v11  ;;  %v24897_v11 = vpack.c.bf16 %v9390_v53, %v9383_v31  ;;  %v25055_v53 = vpack.c.bf16 %v10441_v7, %v10438_v29  ;;  %v10528_v31 = vsub.f32 %v9841_v24, %v10438_v29  ;;  %v11557_v24 = vld [vmem:[%s25286_s2 + $0x230] sm:$0xff] }
 0x775   :  { %18863 = vmatprep.subr.bf16.mxu1 %v24791_v9  ;;  %v11564_v62 = vsel %vm9252_vm1, %v11557_v24, 0  ;;  %v9248_v24 = vld [vmem:[%s25286_s2 + $0x240] sm:$0xff] }
 0x776   :  { %19019 = vmatprep.subr.bf16.mxu0 %v25055_v53  ;;  %v10529_v48 = vand.u32 4294901760, %v10528_v31  ;;  %v25087_v29 = vand.u32 4294901760, %v11564_v62 }
 0x777   :  { %19021 = vmatpush3.bf16.msra.mxu0 %v25055_v53 }
 0x778   :  { %18865 = vmatpush3.bf16.msra.mxu1 %v24791_v9  ;;  %v10530_v50 = vsub.f32 %v10528_v31, %v10529_v48  ;;  %19023 = vmatprep.subr.bf16.mxu0 %v25067_v57  ;;  %v11643_v7 = vsub.f32 %v11564_v62, %v25087_v29  ;;  %v9249_v62 = vld [vmem:[%s25286_s2 + $0x248] sm:$0xff] }
 0x779   :  { %18867 = vmatprep.subr.bf16.mxu1 %v24871_v42 }
 0x77a   :  { %v10531_v58 = vand.u32 4294901760, %v10530_v50 }
 0x77b   :  { %19025 = vmatpush3.bf16.msra.mxu0 %v25067_v57 }
 0x77c   :  { %18869 = vmatpush3.bf16.msra.mxu1 %v24871_v42 }
 0x77d   :  { %18871 = vmatprep.subr.bf16.mxu1 %v24875_v19 }
 0x780   :  { %18873 = vmatpush3.bf16.msra.mxu1 %v24875_v19 }
 0x781   :  { %18875 = vmatprep.subr.bf16.mxu1 %v24780_v20 }
 0x783   :  { %16241 = vmatmul.mubr.f32.vlgmr.msra.gmra.mrb[42].mxu1 %v24822_v0 }
 0x784   :  { %18877 = vmatpush3.bf16.msra.mxu1 %v24780_v20  ;;  %16259 = vmatprep.mubr.f32.mxu1 %v9334_v10  ;;  %v9839_v10 = vld [vmem:[%s25286_s2 + $0x210] sm:$0xff] }
 0x785   :  { %18879 = vmatprep.subr.bf16.mxu1 %v24789_v26  ;;  %v9846_v21 = vsel %vm9252_vm1, %v9839_v10, 0  ;;  %v10543_v10 = vand.u32 4294901760, %v10542_v12 }
 0x786   :  { %v24910_v49 = vand.u32 4294901760, %v9846_v21 }
 0x788   :  { %18881 = vmatpush3.bf16.msra.mxu1 %v24789_v26  ;;  %v9925_v41 = vsub.f32 %v9846_v21, %v24910_v49  ;;  %v10550_v21 = vand.u32 4294901760, %v10549_v16 }
 0x789   :  { %18883 = vmatprep.subr.bf16.mxu1 %v24833_v14 }
 0x78a   :  { %v9926_v43 = vand.u32 4294901760, %v9925_v41 }
 0x78c   :  { %18885 = vmatpush3.bf16.msra.mxu1 %v24833_v14  ;;  %v9927_v45 = vsub.f32 %v9925_v41, %v9926_v43 }
 0x78d   :  { %18887 = vmatprep.subr.bf16.mxu1 %v24845_v18 }
 0x78e   :  { %v9928_v38 = vand.u32 4294901760, %v9927_v45 }
 0x790   :  { %18889 = vmatpush3.bf16.msra.mxu1 %v24845_v18 }
 0x791   :  { %18891 = vmatprep.subr.bf16.mxu1 %v24787_v23 }
 0x793   :  { %16260 = vmatmul.mubr.f32.vlgmr.msra.gmra.mrb[42].mxu1 %v9344_v51 }
 0x794   :  { %18893 = vmatpush3.bf16.msra.mxu1 %v24787_v23  ;;  %16278 = vmatprep.mubr.f32.mxu1 %v24805_v56 }
 0x795   :  { %18895 = vmatprep.subr.bf16.mxu1 %v24797_v36 }
 0x798   :  { %18897 = vmatpush3.bf16.msra.mxu1 %v24797_v36 }
 0x799   :  { %18899 = vmatprep.subr.bf16.mxu1 %v24897_v11 }
 0x79c   :  { %18901 = vmatpush3.bf16.msra.mxu1 %v24897_v11 }
 0x79d   :  { %18903 = vmatprep.subr.bf16.mxu1 %v24904_v1 }
 0x7a0   :  { %18905 = vmatpush3.bf16.msra.mxu1 %v24904_v1 }
 0x7a1   :  { %18907 = vmatprep.subr.bf16.mxu1 %v24780_v20 }
 0x7a3   :  { %16279 = vmatmul.mubr.f32.vlgmr.msra.gmra.mrb[42].mxu1 %v24818_v27 }
 0x7a4   :  { %18909 = vmatpush3.bf16.msra.mxu1 %v24780_v20  ;;  %16297 = vmatprep.mubr.f32.mxu1 %v24805_v56  ;;  %v24926_v56 = vand.u32 4294901760, %v9849_v3 }
 0x7a5   :  { %18911 = vmatprep.subr.bf16.mxu1 %v24789_v26 }
 0x7a6   :  { %v9935_v32 = vsub.f32 %v9849_v3, %v24926_v56 }
 0x7a8   :  { %18913 = vmatpush3.bf16.msra.mxu1 %v24789_v26  ;;  %v9936_v40 = vand.u32 4294901760, %v9935_v32 }
 0x7a9   :  { %18915 = vmatprep.subr.bf16.mxu1 %v24833_v14 }
 0x7aa   :  { %v9937_v55 = vsub.f32 %v9935_v32, %v9936_v40 }
 0x7ac   :  { %18917 = vmatpush3.bf16.msra.mxu1 %v24833_v14  ;;  %v9938_v60 = vand.u32 4294901760, %v9937_v55  ;;  %v19050_v55 = vpack.c.bf16 %v10536_v39, %v10529_v48 }
 0x7ad   :  { %18919 = vmatprep.subr.bf16.mxu1 %v24845_v18 }
 0x7b0   :  { %18921 = vmatpush3.bf16.msra.mxu1 %v24845_v18 }
 0x7b1   :  { %18923 = vmatprep.subr.bf16.mxu1 %v24780_v20 }
 0x7b3   :  { %16298 = vmatmul.mubr.f32.vlgmr.msra.gmra.mrb[42].mxu1 %v24818_v27  ;;  %v10965_v27 = vld [vmem:[%s25286_s2 + $0x220] sm:$0xff] }
 0x7b4   :  { %18925 = vmatpush3.bf16.msra.mxu1 %v24780_v20  ;;  %16316 = vmatprep.mubr.f32.mxu1 %v9928_v38  ;;  %v10972_v0 = vsel %vm9252_vm1, %v10965_v27, 0  ;;  %v19038_v38 = vpack.c.bf16 %v10549_v16, %v10542_v12 }
 0x7b5   :  { %18927 = vmatprep.subr.bf16.mxu1 %v24789_v26  ;;  %v24978_v2 = vand.u32 4294901760, %v10972_v0 }
 0x7b7   :  { %v11051_v30 = vsub.f32 %v10972_v0, %v24978_v2 }
 0x7b8   :  { %18929 = vmatpush3.bf16.msra.mxu1 %v24789_v26 }
 0x7b9   :  { %18931 = vmatprep.subr.bf16.mxu1 %v24833_v14  ;;  %v11052_v34 = vand.u32 4294901760, %v11051_v30 }
 0x7bb   :  { %v11053_v35 = vsub.f32 %v11051_v30, %v11052_v34 }
 0x7bc   :  { %18933 = vmatpush3.bf16.msra.mxu1 %v24833_v14 }
 0x7bd   :  { %18935 = vmatprep.subr.bf16.mxu1 %v24845_v18  ;;  %v11054_v51 = vand.u32 4294901760, %v11053_v35 }
 0x7c0   :  { %18937 = vmatpush3.bf16.msra.mxu1 %v24845_v18 }
 0x7c1   :  { %18939 = vmatprep.subr.bf16.mxu1 %v24795_v47 }
 0x7c3   :  { %16317 = vmatmul.mubr.f32.vlgmr.msra.gmra.mrb[44].mxu1 %v9938_v60  ;;  %v19054_v60 = vpack.c.bf16 %v10550_v21, %v10543_v10 }
 0x7c4   :  { %18941 = vmatpush3.bf16.msra.mxu1 %v24795_v47  ;;  %16335 = vmatprep.mubr.f32.mxu1 %v24910_v49 }
 0x7c5   :  { %18943 = vmatprep.subr.bf16.mxu1 %v24799_v37 }
 0x7c8   :  { %18945 = vmatpush3.bf16.msra.mxu1 %v24799_v37 }
 0x7c9   :  { %18947 = vmatprep.subr.bf16.mxu1 %v24855_v61 }
 0x7cc   :  { %18949 = vmatpush3.bf16.msra.mxu1 %v24855_v61 }
 0x7cd   :  { %18951 = vmatprep.subr.bf16.mxu1 %v24859_v52 }
 0x7d0   :  { %18953 = vmatpush3.bf16.msra.mxu1 %v24859_v52 }
 0x7d1   :  { %18955 = vmatprep.subr.bf16.mxu1 %v24783_v5 }
 0x7d3   :  { %16336 = vmatmul.mubr.f32.vlgmr.msra.gmra.mrb[44].mxu1 %v24926_v56 }
 0x7d4   :  { %18957 = vmatpush3.bf16.msra.mxu1 %v24783_v5  ;;  %16354 = vmatprep.mubr.f32.mxu1 %v9925_v41  ;;  %v10544_v41 = vsub.f32 %v10542_v12, %v10543_v10 }
 0x7d5   :  { %18959 = vmatprep.subr.bf16.mxu1 %v24791_v9 }
 0x7d6   :  { %v10545_v8 = vand.u32 4294901760, %v10544_v41 }
 0x7d8   :  { %18961 = vmatpush3.bf16.msra.mxu1 %v24791_v9 }
 0x7d9   :  { %18963 = vmatprep.subr.bf16.mxu1 %v24871_v42 }
 0x7dc   :  { %18965 = vmatpush3.bf16.msra.mxu1 %v24871_v42 }
 0x7dd   :  { %18967 = vmatprep.subr.bf16.mxu1 %v24875_v19 }
 0x7e0   :  { %18969 = vmatpush3.bf16.msra.mxu1 %v24875_v19 }
 0x7e1   :  { %18971 = vmatprep.subr.bf16.mxu1 %v24780_v20 }
 0x7e3   :  { %16355 = vmatmul.mubr.f32.vlgmr.msra.gmra.mrb[44].mxu1 %v9935_v32 }
 0x7e4   :  { %18973 = vmatpush3.bf16.msra.mxu1 %v24780_v20  ;;  %16373 = vmatprep.mubr.f32.mxu1 %v9926_v43  ;;  %v10551_v43 = vsub.f32 %v10549_v16, %v10550_v21 }
 0x7e5   :  { %18975 = vmatprep.subr.bf16.mxu1 %v24789_v26 }
 0x7e6   :  { %v10552_v45 = vand.u32 4294901760, %v10551_v43 }
 0x7e8   :  { %18977 = vmatpush3.bf16.msra.mxu1 %v24789_v26  ;;  %v19030_v3 = vpack.c.bf16 %v10552_v45, %v10545_v8 }
 0x7e9   :  { %18979 = vmatprep.subr.bf16.mxu1 %v24833_v14 }
 0x7ec   :  { %18981 = vmatpush3.bf16.msra.mxu1 %v24833_v14 }
 0x7ed   :  { %18983 = vmatprep.subr.bf16.mxu1 %v24845_v18 }
 0x7f0   :  { %18985 = vmatpush3.bf16.msra.mxu1 %v24845_v18 }
 0x7f1   :  { %18987 = vmatprep.subr.bf16.mxu1 %v24787_v23 }
 0x7f3   :  { %16374 = vmatmul.mubr.f32.vlgmr.msra.gmra.mrb[44].mxu1 %v9936_v40 }
 0x7f4   :  { %18989 = vmatpush3.bf16.msra.mxu1 %v24787_v23  ;;  %16392 = vmatprep.mubr.f32.mxu1 %v24910_v49 }
 0x7f5   :  { %18991 = vmatprep.subr.bf16.mxu1 %v24797_v36 }
 0x7f8   :  { %18993 = vmatpush3.bf16.msra.mxu1 %v24797_v36 }
 0x7f9   :  { %18995 = vmatprep.subr.bf16.mxu1 %v24897_v11 }
 0x7fc   :  { %18997 = vmatpush3.bf16.msra.mxu1 %v24897_v11 }
 0x7fd   :  { %18999 = vmatprep.subr.bf16.mxu1 %v24904_v1 }
 0x800   :  { %19001 = vmatpush3.bf16.msra.mxu1 %v24904_v1 }
 0x801   :  { %19003 = vmatprep.subr.bf16.mxu1 %v24780_v20 }
 0x803   :  { %16393 = vmatmul.mubr.f32.vlgmr.msra.gmra.mrb[44].mxu1 %v24926_v56 }
 0x804   :  { %19005 = vmatpush3.bf16.msra.mxu1 %v24780_v20  ;;  %16411 = vmatprep.mubr.f32.mxu1 %v24910_v49  ;;  %v19026_v49 = vpack.c.bf16 %v10538_v28, %v10531_v58 }
 0x805   :  { %19007 = vmatprep.subr.bf16.mxu1 %v24789_v26 }
 0x806   :  { %19027 = vmatprep.subr.bf16.mxu0 %v19026_v49 }
 0x808   :  { %19009 = vmatpush3.bf16.msra.mxu1 %v24789_v26 }
 0x809   :  { %19011 = vmatprep.subr.bf16.mxu1 %v24833_v14 }
 0x80c   :  { %19013 = vmatpush3.bf16.msra.mxu1 %v24833_v14 }
 0x80d   :  { %19015 = vmatprep.subr.bf16.mxu1 %v24845_v18 }
 0x810   :  { %19017 = vmatpush3.bf16.msra.mxu1 %v24845_v18 }
 0x811   :  { %19067 = vmatprep.subr.bf16.mxu1 %v24780_v20 }
 0x813   :  { %16412 = vmatmul.mubr.f32.vlgmr.msra.gmra.mrb[44].mxu1 %v24926_v56  ;;  %v19034_v56 = vpack.c.bf16 %v10535_v44, %v10528_v31  ;;  %v11644_v31 = vand.u32 4294901760, %v11643_v7  ;;  %v11558_v44 = vld [vmem:[%s25286_s2 + $0x238] sm:$0xff] }
 0x814   :  { %19069 = vmatpush3.bf16.msra.mxu1 %v24780_v20  ;;  %16496 = vmatprep.mubr.f32.mxu1 %v11054_v51  ;;  %v11567_v54 = vsel %vm9252_vm1, %v11558_v44, 0 }
 0x815   :  { %19071 = vmatprep.subr.bf16.mxu1 %v24789_v26  ;;  %v11645_v15 = vsub.f32 %v11643_v7, %v11644_v31  ;;  %v25097_v6 = vand.u32 4294901760, %v11567_v54 }
 0x817   :  { %v11646_v59 = vand.u32 4294901760, %v11645_v15  ;;  %v11653_v48 = vsub.f32 %v11567_v54, %v25097_v6  ;;  %v9250_v15 = vld [vmem:[%s25286_s2 + $0x250] sm:$0xff]  ;;  %v9251_v54 = vld [vmem:[%s25286_s2 + $0x258] sm:$0xff] }
 0x818   :  { %19073 = vmatpush3.bf16.msra.mxu1 %v24789_v26 }
 0x819   :  { %19075 = vmatprep.subr.bf16.mxu1 %v24833_v14 }
 0x81c   :  { %19077 = vmatpush3.bf16.msra.mxu1 %v24833_v14 }
 0x81d   :  { %19079 = vmatprep.subr.bf16.mxu1 %v24845_v18 }
 0x820   :  { %19081 = vmatpush3.bf16.msra.mxu1 %v24845_v18 }
 0x821   :  { %19083 = vmatprep.subr.bf16.mxu1 %v24795_v47 }
 0x823   :  { %16497 = vmatmul.mubr.f32.vlgmr.msra.gmra.mrb[46].mxu1 %v11064_v13 }
 0x824   :  { %19085 = vmatpush3.bf16.msra.mxu1 %v24795_v47  ;;  %16515 = vmatprep.mubr.f32.mxu1 %v24978_v2 }
 0x825   :  { %19087 = vmatprep.subr.bf16.mxu1 %v24799_v37 }
 0x828   :  { %19089 = vmatpush3.bf16.msra.mxu1 %v24799_v37 }
 0x829   :  { %19091 = vmatprep.subr.bf16.mxu1 %v24855_v61 }
 0x82c   :  { %19093 = vmatpush3.bf16.msra.mxu1 %v24855_v61 }
 0x82d   :  { %19095 = vmatprep.subr.bf16.mxu1 %v24859_v52 }
 0x830   :  { %19097 = vmatpush3.bf16.msra.mxu1 %v24859_v52 }
 0x831   :  { %19099 = vmatprep.subr.bf16.mxu1 %v24783_v5 }
 0x833   :  { %16516 = vmatmul.mubr.f32.vlgmr.msra.gmra.mrb[46].mxu1 %v24994_v22 }
 0x834   :  { %19101 = vmatpush3.bf16.msra.mxu1 %v24783_v5  ;;  %16534 = vmatprep.mubr.f32.mxu1 %v11051_v30 }
 0x835   :  { %19103 = vmatprep.subr.bf16.mxu1 %v24791_v9 }
 0x838   :  { %19105 = vmatpush3.bf16.msra.mxu1 %v24791_v9 }
 0x839   :  { %19107 = vmatprep.subr.bf16.mxu1 %v24871_v42 }
 0x83c   :  { %19109 = vmatpush3.bf16.msra.mxu1 %v24871_v42 }
 0x83d   :  { %19111 = vmatprep.subr.bf16.mxu1 %v24875_v19 }
 0x840   :  { %19113 = vmatpush3.bf16.msra.mxu1 %v24875_v19 }
 0x841   :  { %19115 = vmatprep.subr.bf16.mxu1 %v24780_v20 }
 0x843   :  { %16535 = vmatmul.mubr.f32.vlgmr.msra.gmra.mrb[46].mxu1 %v11061_v63 }
 0x844   :  { %19117 = vmatpush3.bf16.msra.mxu1 %v24780_v20  ;;  %16553 = vmatprep.mubr.f32.mxu1 %v11052_v34 }
 0x845   :  { %19119 = vmatprep.subr.bf16.mxu1 %v24789_v26 }
 0x848   :  { %19121 = vmatpush3.bf16.msra.mxu1 %v24789_v26 }
 0x849   :  { %19123 = vmatprep.subr.bf16.mxu1 %v24833_v14 }
 0x84c   :  { %19125 = vmatpush3.bf16.msra.mxu1 %v24833_v14 }
 0x84d   :  { %19127 = vmatprep.subr.bf16.mxu1 %v24845_v18 }
 0x850   :  { %19129 = vmatpush3.bf16.msra.mxu1 %v24845_v18 }
 0x851   :  { %19131 = vmatprep.subr.bf16.mxu1 %v24787_v23 }
 0x853   :  { %16554 = vmatmul.mubr.f32.vlgmr.msra.gmra.mrb[46].mxu1 %v11062_v33 }
 0x854   :  { %19133 = vmatpush3.bf16.msra.mxu1 %v24787_v23  ;;  %16572 = vmatprep.mubr.f32.mxu1 %v24978_v2 }
 0x855   :  { %19135 = vmatprep.subr.bf16.mxu1 %v24797_v36 }
 0x858   :  { %19137 = vmatpush3.bf16.msra.mxu1 %v24797_v36 }
 0x859   :  { %19139 = vmatprep.subr.bf16.mxu1 %v24897_v11 }
 0x85c   :  { %19141 = vmatpush3.bf16.msra.mxu1 %v24897_v11 }
 0x85d   :  { %19143 = vmatprep.subr.bf16.mxu1 %v24904_v1 }
 0x860   :  { %19145 = vmatpush3.bf16.msra.mxu1 %v24904_v1 }
 0x861   :  { %19147 = vmatprep.subr.bf16.mxu1 %v24780_v20 }
 0x863   :  { %16573 = vmatmul.mubr.f32.vlgmr.msra.gmra.mrb[46].mxu1 %v24994_v22 }
 0x864   :  { %19149 = vmatpush3.bf16.msra.mxu1 %v24780_v20  ;;  %16591 = vmatprep.mubr.f32.mxu1 %v24978_v2 }
 0x865   :  { %19151 = vmatprep.subr.bf16.mxu1 %v24789_v26 }
 0x868   :  { %19153 = vmatpush3.bf16.msra.mxu1 %v24789_v26 }
 0x869   :  { %19155 = vmatprep.subr.bf16.mxu1 %v24833_v14 }
 0x86c   :  { %19157 = vmatpush3.bf16.msra.mxu1 %v24833_v14 }
 0x86d   :  { %19159 = vmatprep.subr.bf16.mxu1 %v24845_v18 }
 0x870   :  { %19161 = vmatpush3.bf16.msra.mxu1 %v24845_v18 }
 0x873   :  { %16592 = vmatmul.mubr.f32.vlgmr.msra.gmra.mrb[46].mxu1 %v24994_v22 }
 0x886   :  { %v25073_v32 = vpop.f32.mrb[42].mxu1 }
 0x887   :  { %v25075_v40 = vpop.f32.mrb[43].mxu1 }
 0x8e6   :  { %v16413_v27 = vpop.f32.mrb[44].mxu1 }
 0x8e7   :  { %v10435_v0 = vsel %vm75_vm0, %v16413_v27, 0  ;;  %v10421_v2 = vpop.f32.mrb[45].mxu1 }
 0x8e8   :  { %v10516_v30 = vand.u32 4294901760, %v10435_v0  ;;  %v10432_v34 = vsel %vm75_vm0, %v10421_v2, 0 }
 0x8e9   :  { %v10506_v25 = vand.u32 4294901760, %v10432_v34 }
 0x8ea   :  { %v10517_v35 = vsub.f32 %v10435_v0, %v10516_v30 }
 0x8eb   :  { %v10507_v46 = vsub.f32 %v10432_v34, %v10506_v25 }
 0x8ec   :  { %v10518_v22 = vand.u32 4294901760, %v10517_v35 }
 0x8ed   :  { %v10508_v51 = vand.u32 4294901760, %v10507_v46 }
 0x8ee   :  { %v10519_v63 = vsub.f32 %v10517_v35, %v10518_v22 }
 0x8ef   :  { %v10509_v33 = vsub.f32 %v10507_v46, %v10508_v51 }
 0x8f0   :  { %v10520_v13 = vand.u32 4294901760, %v10519_v63 }
 0x8f1   :  { %v10510_v17 = vand.u32 4294901760, %v10509_v33 }
 0x8f3   :  { %16422 = vmatprep.mubr.f32.mxu0 %v10510_v17 }
 0x8f4   :  { %16423 = vmatmul.mubr.f32.vlgmr.msra.gmra.mrb[20].mxu0 %v10520_v13 }
 0x8f5   :  { %19029 = vmatpush3.bf16.msra.mxu0 %v19026_v49  ;;  %16433 = vmatprep.mubr.f32.mxu0 %v10506_v25 }
 0x8f6   :  { %19031 = vmatprep.subr.bf16.mxu0 %v19030_v3 }
 0x8f9   :  { %19033 = vmatpush3.bf16.msra.mxu0 %v19030_v3 }
 0x8fa   :  { %19035 = vmatprep.subr.bf16.mxu0 %v19034_v56 }
 0x8fc   :  { %16434 = vmatmul.mubr.f32.vlgmr.msra.gmra.mrb[20].mxu0 %v10516_v30 }
 0x8fd   :  { %19037 = vmatpush3.bf16.msra.mxu0 %v19034_v56  ;;  %16444 = vmatprep.mubr.f32.mxu0 %v10507_v46 }
 0x8fe   :  { %19039 = vmatprep.subr.bf16.mxu0 %v19038_v38 }
 0x901   :  { %19041 = vmatpush3.bf16.msra.mxu0 %v19038_v38 }
 0x902   :  { %19043 = vmatprep.subr.bf16.mxu0 %v25055_v53 }
 0x904   :  { %16445 = vmatmul.mubr.f32.vlgmr.msra.gmra.mrb[20].mxu0 %v10517_v35 }
 0x905   :  { %19045 = vmatpush3.bf16.msra.mxu0 %v25055_v53  ;;  %16455 = vmatprep.mubr.f32.mxu0 %v10508_v51 }
 0x906   :  { %19047 = vmatprep.subr.bf16.mxu0 %v25067_v57 }
 0x909   :  { %19049 = vmatpush3.bf16.msra.mxu0 %v25067_v57 }
 0x90a   :  { %19051 = vmatprep.subr.bf16.mxu0 %v19050_v55 }
 0x90c   :  { %16456 = vmatmul.mubr.f32.vlgmr.msra.gmra.mrb[20].mxu0 %v10518_v22 }
 0x90d   :  { %19053 = vmatpush3.bf16.msra.mxu0 %v19050_v55  ;;  %16466 = vmatprep.mubr.f32.mxu0 %v10506_v25 }
 0x90e   :  { %19055 = vmatprep.subr.bf16.mxu0 %v19054_v60 }
 0x911   :  { %19057 = vmatpush3.bf16.msra.mxu0 %v19054_v60 }
 0x912   :  { %19059 = vmatprep.subr.bf16.mxu0 %v25055_v53 }
 0x914   :  { %16467 = vmatmul.mubr.f32.vlgmr.msra.gmra.mrb[20].mxu0 %v10516_v30 }
 0x915   :  { %19061 = vmatpush3.bf16.msra.mxu0 %v25055_v53  ;;  %16477 = vmatprep.mubr.f32.mxu0 %v10506_v25  ;;  %v11654_v53 = vand.u32 4294901760, %v11653_v48 }
 0x916   :  { %19063 = vmatprep.subr.bf16.mxu0 %v25067_v57 }
 0x917   :  { %v11655_v39 = vsub.f32 %v11653_v48, %v11654_v53 }
 0x919   :  { %19065 = vmatpush3.bf16.msra.mxu0 %v25067_v57  ;;  %v11656_v57 = vand.u32 4294901760, %v11655_v39 }
 0x91a   :  { %19163 = vmatprep.subr.bf16.mxu0 %v24780_v20 }
 0x91c   :  { %16478 = vmatmul.mubr.f32.vlgmr.msra.gmra.mrb[20].mxu0 %v10516_v30 }
 0x91d   :  { %19165 = vmatpush3.bf16.msra.mxu0 %v24780_v20  ;;  %16610 = vmatprep.mubr.f32.mxu0 %v11646_v59  ;;  %v12700_v59 = vand.u32 4294901760, %v9251_v54 }
 0x91e   :  { %19167 = vmatprep.subr.bf16.mxu0 %v24789_v26 }
 0x921   :  { %19169 = vmatpush3.bf16.msra.mxu0 %v24789_v26 }
 0x922   :  { %19171 = vmatprep.subr.bf16.mxu0 %v24833_v14 }
 0x925   :  { %19173 = vmatpush3.bf16.msra.mxu0 %v24833_v14 }
 0x926   :  { %19175 = vmatprep.subr.bf16.mxu0 %v24845_v18 }
 0x929   :  { %19177 = vmatpush3.bf16.msra.mxu0 %v24845_v18 }
 0x92a   :  { %19179 = vmatprep.subr.bf16.mxu0 %v24795_v47 }
 0x92c   :  { %16611 = vmatmul.mubr.f32.vlgmr.msra.gmra.mrb[22].mxu0 %v11656_v57 }
 0x92d   :  { %19181 = vmatpush3.bf16.msra.mxu0 %v24795_v47  ;;  %16629 = vmatprep.mubr.f32.mxu0 %v25087_v29 }
 0x92e   :  { %19183 = vmatprep.subr.bf16.mxu0 %v24799_v37 }
 0x931   :  { %19185 = vmatpush3.bf16.msra.mxu0 %v24799_v37  ;;  %v11561_v37 = vld [vmem:[%s25286_s2 + $0x2b0] sm:$0xff] }
 0x932   :  { %19187 = vmatprep.subr.bf16.mxu0 %v24855_v61 }
 0x935   :  { %19189 = vmatpush3.bf16.msra.mxu0 %v24855_v61 }
 0x936   :  { %19191 = vmatprep.subr.bf16.mxu0 %v24859_v52 }
 0x939   :  { %19193 = vmatpush3.bf16.msra.mxu0 %v24859_v52 }
 0x93a   :  { %19195 = vmatprep.subr.bf16.mxu0 %v24783_v5 }
 0x93c   :  { %16630 = vmatmul.mubr.f32.vlgmr.msra.gmra.mrb[22].mxu0 %v25097_v6 }
 0x93d   :  { %19197 = vmatpush3.bf16.msra.mxu0 %v24783_v5  ;;  %16648 = vmatprep.mubr.f32.mxu0 %v11643_v7  ;;  %v11560_v5 = vld [vmem:[%s25286_s2 + $0x2a8] sm:$0xff]  ;;  %v12691_v7 = vand.u32 4294901760, %v9248_v24 }
 0x93e   :  { %19199 = vmatprep.subr.bf16.mxu0 %v24791_v9 }
 0x941   :  { %19201 = vmatpush3.bf16.msra.mxu0 %v24791_v9 }
 0x942   :  { %19203 = vmatprep.subr.bf16.mxu0 %v24871_v42 }
 0x945   :  { %19205 = vmatpush3.bf16.msra.mxu0 %v24871_v42 }
 0x946   :  { %19207 = vmatprep.subr.bf16.mxu0 %v24875_v19  ;;  %v25173_v4 = vpop.f32.mrb[46].mxu1 }
 0x947   :  { %v25177_v21 = vpop.f32.mrb[47].mxu1 }
 0x949   :  { %19209 = vmatpush3.bf16.msra.mxu0 %v24875_v19 }
 0x94a   :  { %19211 = vmatprep.subr.bf16.mxu0 %v24780_v20 }
 0x94c   :  { %16649 = vmatmul.mubr.f32.vlgmr.msra.gmra.mrb[22].mxu0 %v11653_v48  ;;  %v12781_v48 = vsub.f32 %v9248_v24, %v12691_v7 }
 0x94d   :  { %19213 = vmatpush3.bf16.msra.mxu0 %v24780_v20  ;;  %16667 = vmatprep.mubr.f32.mxu0 %v11644_v31  ;;  %v12694_v31 = vand.u32 4294901760, %v9249_v62 }
 0x94e   :  { %19215 = vmatprep.subr.bf16.mxu0 %v24789_v26 }
 0x951   :  { %19217 = vmatpush3.bf16.msra.mxu0 %v24789_v26 }
 0x952   :  { %19219 = vmatprep.subr.bf16.mxu0 %v24833_v14 }
 0x955   :  { %19221 = vmatpush3.bf16.msra.mxu0 %v24833_v14 }
 0x956   :  { %19223 = vmatprep.subr.bf16.mxu0 %v24845_v18 }
 0x959   :  { %19225 = vmatpush3.bf16.msra.mxu0 %v24845_v18 }
 0x95a   :  { %19227 = vmatprep.subr.bf16.mxu0 %v24787_v23 }
 0x95c   :  { %16668 = vmatmul.mubr.f32.vlgmr.msra.gmra.mrb[22].mxu0 %v11654_v53  ;;  %v12788_v53 = vsub.f32 %v9249_v62, %v12694_v31 }
 0x95d   :  { %19229 = vmatpush3.bf16.msra.mxu0 %v24787_v23  ;;  %16686 = vmatprep.mubr.f32.mxu0 %v25087_v29 }
 0x95e   :  { %19231 = vmatprep.subr.bf16.mxu0 %v24797_v36 }
 0x961   :  { %19233 = vmatpush3.bf16.msra.mxu0 %v24797_v36 }
 0x962   :  { %19235 = vmatprep.subr.bf16.mxu0 %v24897_v11 }
 0x965   :  { %19237 = vmatpush3.bf16.msra.mxu0 %v24897_v11 }
 0x966   :  { %19239 = vmatprep.subr.bf16.mxu0 %v24904_v1 }
 0x969   :  { %19241 = vmatpush3.bf16.msra.mxu0 %v24904_v1 }
 0x96a   :  { %19243 = vmatprep.subr.bf16.mxu0 %v24780_v20 }
 0x96c   :  { %16687 = vmatmul.mubr.f32.vlgmr.msra.gmra.mrb[22].mxu0 %v25097_v6 }
 0x96d   :  { %19245 = vmatpush3.bf16.msra.mxu0 %v24780_v20  ;;  %16705 = vmatprep.mubr.f32.mxu0 %v25087_v29  ;;  %v11559_v20 = vld [vmem:[%s25286_s2 + $0x2a0] sm:$0xff]  ;;  %v12685_v29 = vsel %vm75_vm0, %v25075_v40, 0  ;;  %v12697_v40 = vand.u32 4294901760, %v9250_v15 }
 0x96e   :  { %19247 = vmatprep.subr.bf16.mxu0 %v24789_v26  ;;  %v12156_v23 = vand.u32 4294901760, %v11559_v20  ;;  %v25197_v44 = vand.u32 4294901760, %v12685_v29 }
 0x970   :  { %v12246_v47 = vsub.f32 %v11559_v20, %v12156_v23  ;;  %v12760_v39 = vsub.f32 %v12685_v29, %v25197_v44  ;;  %v12782_v20 = vand.u32 4294901760, %v12781_v48 }
 0x971   :  { %19249 = vmatpush3.bf16.msra.mxu0 %v24789_v26  ;;  %v12159_v26 = vand.u32 4294901760, %v11560_v5 }
 0x972   :  { %19251 = vmatprep.subr.bf16.mxu0 %v24833_v14  ;;  %v12247_v52 = vand.u32 4294901760, %v12246_v47 }
 0x973   :  { %v25161_v9 = vpack.c.bf16 %v12159_v26, %v12156_v23  ;;  %v12253_v36 = vsub.f32 %v11560_v5, %v12159_v26  ;;  %v12789_v5 = vand.u32 4294901760, %v12788_v53  ;;  %v12795_v23 = vsub.f32 %v9250_v15, %v12697_v40 }
 0x974   :  { %v12248_v11 = vsub.f32 %v12246_v47, %v12247_v52  ;;  %v12802_v26 = vsub.f32 %v9251_v54, %v12700_v59 }
 0x975   :  { %19253 = vmatpush3.bf16.msra.mxu0 %v24833_v14  ;;  %v11562_v14 = vld [vmem:[%s25286_s2 + $0x2b8] sm:$0xff]  ;;  %v12254_v42 = vand.u32 4294901760, %v12253_v36  ;;  %v19274_v56 = vpack.c.bf16 %v12253_v36, %v12246_v47  ;;  %v12761_v47 = vand.u32 4294901760, %v12760_v39 }
 0x976   :  { %19255 = vmatprep.subr.bf16.mxu0 %v24845_v18  ;;  %v12165_v61 = vand.u32 4294901760, %v11562_v14  ;;  %v12249_v16 = vand.u32 4294901760, %v12248_v11  ;;  %v25218_v11 = vpack.c.bf16 %v12700_v59, %v12697_v40 }
 0x977   :  { %v12255_v1 = vsub.f32 %v12253_v36, %v12254_v42  ;;  %v19290_v55 = vpack.c.bf16 %v12254_v42, %v12247_v52  ;;  %v25214_v36 = vpack.c.bf16 %v12694_v31, %v12691_v7  ;;  %v12762_v52 = vsub.f32 %v12760_v39, %v12761_v47 }
 0x978   :  { %v12267_v12 = vsub.f32 %v11562_v14, %v12165_v61  ;;  %v12790_v14 = vsub.f32 %v12788_v53, %v12789_v5 }
 0x979   :  { %19257 = vmatpush3.bf16.msra.mxu0 %v24845_v18  ;;  %v12162_v18 = vand.u32 4294901760, %v11561_v37  ;;  %v12256_v58 = vand.u32 4294901760, %v12255_v1 }
 0x97a   :  { %19259 = vmatprep.subr.bf16.mxu0 %v25161_v9  ;;  %v12268_v10 = vand.u32 4294901760, %v12267_v12 }
 0x97b   :  { %v25171_v19 = vpack.c.bf16 %v12165_v61, %v12162_v18  ;;  %v12260_v50 = vsub.f32 %v11561_v37, %v12162_v18  ;;  %v19266_v49 = vpack.c.bf16 %v12256_v58, %v12249_v16  ;;  %v12783_v37 = vsub.f32 %v12781_v48, %v12782_v20 }
 0x97c   :  { %16706 = vmatmul.mubr.f32.vlgmr.msra.gmra.mrb[22].mxu0 %v25097_v6  ;;  %v12269_v43 = vsub.f32 %v12267_v12, %v12268_v10  ;;  %v12688_v6 = vsel %vm75_vm0, %v25073_v32, 0  ;;  %v12796_v18 = vand.u32 4294901760, %v12795_v23  ;;  %v12803_v61 = vand.u32 4294901760, %v12802_v26 }
 0x97d   :  { %19261 = vmatpush3.bf16.msra.mxu0 %v25161_v9  ;;  %v12261_v28 = vand.u32 4294901760, %v12260_v50  ;;  %v19278_v38 = vpack.c.bf16 %v12267_v12, %v12260_v50  ;;  %v25208_v57 = vand.u32 4294901760, %v12688_v6  ;;  %v12784_v1 = vand.u32 4294901760, %v12783_v37 }
 0x97e   :  { %19263 = vmatprep.subr.bf16.mxu0 %v25171_v19  ;;  %v12270_v45 = vand.u32 4294901760, %v12269_v43  ;;  %v12804_v12 = vsub.f32 %v12802_v26, %v12803_v61  ;;  %v12763_v16 = vand.u32 4294901760, %v12762_v52  ;;  %v19322_v43 = vpack.c.bf16 %v12788_v53, %v12781_v48 }
 0x97f   :  { %v12262_v41 = vsub.f32 %v12260_v50, %v12261_v28  ;;  %v19294_v60 = vpack.c.bf16 %v12268_v10, %v12261_v28  ;;  %v12770_v32 = vsub.f32 %v12688_v6, %v25208_v57  ;;  %v12791_v50 = vand.u32 4294901760, %v12790_v14 }
 0x981   :  { %19265 = vmatpush3.bf16.msra.mxu0 %v25171_v19  ;;  %v12263_v8 = vand.u32 4294901760, %v12262_v41  ;;  %v12771_v42 = vand.u32 4294901760, %v12770_v32  ;;  %v19314_v28 = vpack.c.bf16 %v12791_v50, %v12784_v1 }
 0x982   :  { %19267 = vmatprep.subr.bf16.mxu0 %v19266_v49 }
 0x983   :  { %v19270_v3 = vpack.c.bf16 %v12270_v45, %v12263_v8  ;;  %v12772_v58 = vsub.f32 %v12770_v32, %v12771_v42  ;;  %v19326_v8 = vpack.c.bf16 %v12802_v26, %v12795_v23  ;;  %v19338_v45 = vpack.c.bf16 %v12789_v5, %v12782_v20 }
 0xa4f   :  { %v16707_v27 = vpop.f32.mrb[22].mxu0 }
 0xa50   :  { %v12153_v0 = vsel %vm75_vm0, %v16707_v27, 0  ;;  %v12139_v2 = vpop.f32.mrb[23].mxu0 }
 0xa51   :  { %v25180_v30 = vand.u32 4294901760, %v12153_v0  ;;  %v12150_v34 = vsel %vm75_vm0, %v12139_v2, 0  ;;  %v10969_v2 = vld [vmem:[%s25286_s2 + $0x290] sm:$0xff] }
 0xa52   :  { %v12224_v25 = vand.u32 4294901760, %v12150_v34 }
 0xa53   :  { %v12235_v35 = vsub.f32 %v12153_v0, %v25180_v30 }
 0xa54   :  { %v12225_v46 = vsub.f32 %v12150_v34, %v12224_v25  ;;  %v13231_v34 = vand.u32 4294901760, %v10969_v2 }
 0xa55   :  { %v12236_v22 = vand.u32 4294901760, %v12235_v35 }
 0xa56   :  { %v12226_v51 = vand.u32 4294901760, %v12225_v46 }
 0xa57   :  { %v12237_v63 = vsub.f32 %v12235_v35, %v12236_v22 }
 0xa58   :  { %v12227_v33 = vsub.f32 %v12225_v46, %v12226_v51 }
 0xa59   :  { %v12238_v13 = vand.u32 4294901760, %v12237_v63 }
 0xa5a   :  { %v12228_v17 = vand.u32 4294901760, %v12227_v33 }
 0xa5c   :  { %16716 = vmatprep.mubr.f32.mxu0 %v12228_v17  ;;  %v13329_v17 = vsub.f32 %v10969_v2, %v13231_v34 }
 0xa5d   :  { %16717 = vmatmul.mubr.f32.vlgmr.msra.gmra.mrb[20].mxu0 %v12238_v13 }
 0xa5e   :  { %19269 = vmatpush3.bf16.msra.mxu0 %v19266_v49  ;;  %16727 = vmatprep.mubr.f32.mxu0 %v12224_v25  ;;  %v12773_v49 = vand.u32 4294901760, %v12772_v58  ;;  %v13330_v31 = vand.u32 4294901760, %v13329_v17 }
 0xa5f   :  { %19271 = vmatprep.subr.bf16.mxu0 %v19270_v3 }
 0xa60   :  { %v13331_v53 = vsub.f32 %v13329_v17, %v13330_v31 }
 0xa62   :  { %19273 = vmatpush3.bf16.msra.mxu0 %v19270_v3  ;;  %v10967_v3 = vld [vmem:[%s25286_s2 + $0x280] sm:$0xff] }
 0xa63   :  { %19275 = vmatprep.subr.bf16.mxu0 %v19274_v56 }
 0xa65   :  { %16728 = vmatmul.mubr.f32.vlgmr.msra.gmra.mrb[20].mxu0 %v25180_v30 }
 0xa66   :  { %19277 = vmatpush3.bf16.msra.mxu0 %v19274_v56  ;;  %16738 = vmatprep.mubr.f32.mxu0 %v12225_v46  ;;  %v10968_v56 = vld [vmem:[%s25286_s2 + $0x288] sm:$0xff] }
 0xa67   :  { %19279 = vmatprep.subr.bf16.mxu0 %v19278_v38  ;;  %v13228_v27 = vand.u32 4294901760, %v10968_v56 }
 0xa69   :  { %v13322_v46 = vsub.f32 %v10968_v56, %v13228_v27 }
 0xa6a   :  { %19281 = vmatpush3.bf16.msra.mxu0 %v19278_v38  ;;  %v13219_v38 = vsel %vm75_vm0, %v25177_v21, 0  ;;  %v13222_v21 = vsel %vm75_vm0, %v25173_v4, 0 }
 0xa6b   :  { %19283 = vmatprep.subr.bf16.mxu0 %v25161_v9  ;;  %v25239_v0 = vand.u32 4294901760, %v13219_v38  ;;  %v13323_v33 = vand.u32 4294901760, %v13322_v46 }
 0xa6d   :  { %16739 = vmatmul.mubr.f32.vlgmr.msra.gmra.mrb[20].mxu0 %v12235_v35  ;;  %v13324_v7 = vsub.f32 %v13322_v46, %v13323_v33 }
 0xa6e   :  { %19285 = vmatpush3.bf16.msra.mxu0 %v25161_v9  ;;  %16749 = vmatprep.mubr.f32.mxu0 %v12226_v51  ;;  %v25251_v51 = vand.u32 4294901760, %v13222_v21 }
 0xa6f   :  { %19287 = vmatprep.subr.bf16.mxu0 %v25171_v19  ;;  %v13325_v48 = vand.u32 4294901760, %v13324_v7 }
 0xa70   :  { %v13304_v24 = vsub.f32 %v13222_v21, %v25251_v51 }
 0xa72   :  { %19289 = vmatpush3.bf16.msra.mxu0 %v25171_v19  ;;  %v13305_v6 = vand.u32 4294901760, %v13304_v24 }
 0xa73   :  { %19291 = vmatprep.subr.bf16.mxu0 %v19290_v55 }
 0xa75   :  { %16750 = vmatmul.mubr.f32.vlgmr.msra.gmra.mrb[20].mxu0 %v12236_v22  ;;  %v13294_v22 = vsub.f32 %v13219_v38, %v25239_v0 }
 0xa76   :  { %19293 = vmatpush3.bf16.msra.mxu0 %v19290_v55  ;;  %16760 = vmatprep.mubr.f32.mxu0 %v12224_v25  ;;  %v19342_v55 = vpack.c.bf16 %v12803_v61, %v12796_v18 }
 0xa77   :  { %19295 = vmatprep.subr.bf16.mxu0 %v19294_v60  ;;  %v13295_v4 = vand.u32 4294901760, %v13294_v22 }
 0xa79   :  { %v13296_v54 = vsub.f32 %v13294_v22, %v13295_v4 }
 0xa7a   :  { %19297 = vmatpush3.bf16.msra.mxu0 %v19294_v60  ;;  %v13225_v60 = vand.u32 4294901760, %v10967_v3 }
 0xa7b   :  { %19299 = vmatprep.subr.bf16.mxu0 %v25161_v9  ;;  %v13297_v20 = vand.u32 4294901760, %v13296_v54 }
 0xa7c   :  { %v13315_v35 = vsub.f32 %v10967_v3, %v13225_v60  ;;  %v19354_v62 = vpack.c.bf16 %v13228_v27, %v13225_v60 }
 0xa7d   :  { %16761 = vmatmul.mubr.f32.vlgmr.msra.gmra.mrb[20].mxu0 %v25180_v30 }
 0xa7e   :  { %19301 = vmatpush3.bf16.msra.mxu0 %v25161_v9  ;;  %16771 = vmatprep.mubr.f32.mxu0 %v12224_v25  ;;  %v12797_v9 = vsub.f32 %v12795_v23, %v12796_v18  ;;  %v13316_v63 = vand.u32 4294901760, %v13315_v35  ;;  %v13332_v23 = vand.u32 4294901760, %v13331_v53  ;;  %v13779_v18 = vld [vmem:[%s25286_s2 + $0x2c0] ss:$0 sm:$0xff] }
 0xa7f   :  { %19303 = vmatprep.subr.bf16.mxu0 %v25171_v19 }
 0xa80   :  { %v12798_v10 = vand.u32 4294901760, %v12797_v9  ;;  %v13317_v29 = vsub.f32 %v13315_v35, %v13316_v63  ;;  %v19386_v37 = vpack.c.bf16 %v13323_v33, %v13316_v63 }
 0xa82   :  { %19305 = vmatpush3.bf16.msra.mxu0 %v25171_v19  ;;  %v12805_v19 = vand.u32 4294901760, %v12804_v12  ;;  %v13318_v59 = vand.u32 4294901760, %v13317_v29 }
 0xa83   :  { %19307 = vmatprep.subr.bf16.mxu0 %v25214_v36 }
 0xa84   :  { %v19318_v41 = vpack.c.bf16 %v12805_v19, %v12798_v10  ;;  %v19362_v5 = vpack.c.bf16 %v13325_v48, %v13318_v59 }
 0xa85   :  { %16772 = vmatmul.mubr.f32.vlgmr.msra.gmra.mrb[20].mxu0 %v25180_v30  ;;  %v10970_v30 = vld [vmem:[%s25286_s2 + $0x298] sm:$0xff] }
 0xa86   :  { %19309 = vmatpush3.bf16.msra.mxu0 %v25214_v36  ;;  %16782 = vmatprep.mubr.f32.mxu0 %v12763_v16  ;;  %v13234_v25 = vand.u32 4294901760, %v10970_v30 }
 0xa87   :  { %19311 = vmatprep.subr.bf16.mxu0 %v25218_v11 }
 0xa88   :  { %v13336_v13 = vsub.f32 %v10970_v30, %v13234_v25  ;;  %v19358_v40 = vpack.c.bf16 %v13234_v25, %v13231_v34 }
 0xa8a   :  { %19313 = vmatpush3.bf16.msra.mxu0 %v25218_v11  ;;  %v13337_v15 = vand.u32 4294901760, %v13336_v13 }
 0xa8b   :  { %19315 = vmatprep.subr.bf16.mxu0 %v19314_v28 }
 0xa8c   :  { %v19390_v14 = vpack.c.bf16 %v13337_v15, %v13330_v31 }
 0xa8d   :  { %16783 = vmatmul.mubr.f32.vlgmr.msra.gmra.mrb[20].mxu0 %v12773_v49 }
 0xa8e   :  { %19317 = vmatpush3.bf16.msra.mxu0 %v19314_v28  ;;  %16793 = vmatprep.mubr.f32.mxu0 %v25197_v44 }
 0xa8f   :  { %19319 = vmatprep.subr.bf16.mxu0 %v19318_v41 }
 0xa92   :  { %19321 = vmatpush3.bf16.msra.mxu0 %v19318_v41 }
 0xa93   :  { %19323 = vmatprep.subr.bf16.mxu0 %v19322_v43 }
 0xa95   :  { %16794 = vmatmul.mubr.f32.vlgmr.msra.gmra.mrb[20].mxu0 %v25208_v57 }
 0xa96   :  { %19325 = vmatpush3.bf16.msra.mxu0 %v19322_v43  ;;  %16804 = vmatprep.mubr.f32.mxu0 %v12760_v39  ;;  %v13338_v39 = vsub.f32 %v13336_v13, %v13337_v15 }
 0xa97   :  { %19327 = vmatprep.subr.bf16.mxu0 %v19326_v8 }
 0xa98   :  { %v13339_v26 = vand.u32 4294901760, %v13338_v39 }
 0xa9a   :  { %19329 = vmatpush3.bf16.msra.mxu0 %v19326_v8 }
 0xa9b   :  { %19331 = vmatprep.subr.bf16.mxu0 %v25214_v36 }
 0xa9d   :  { %16805 = vmatmul.mubr.f32.vlgmr.msra.gmra.mrb[20].mxu0 %v12770_v32  ;;  %v19366_v32 = vpack.c.bf16 %v13339_v26, %v13332_v23 }
 0xa9e   :  { %19333 = vmatpush3.bf16.msra.mxu0 %v25214_v36  ;;  %16815 = vmatprep.mubr.f32.mxu0 %v12761_v47 }
 0xa9f   :  { %19335 = vmatprep.subr.bf16.mxu0 %v25218_v11 }
 0xaa2   :  { %19337 = vmatpush3.bf16.msra.mxu0 %v25218_v11 }
 0xaa3   :  { %19339 = vmatprep.subr.bf16.mxu0 %v19338_v45 }
 0xaa5   :  { %16816 = vmatmul.mubr.f32.vlgmr.msra.gmra.mrb[20].mxu0 %v12771_v42 }
 0xaa6   :  { %19341 = vmatpush3.bf16.msra.mxu0 %v19338_v45  ;;  %16826 = vmatprep.mubr.f32.mxu0 %v25197_v44 }
 0xaa7   :  { %19343 = vmatprep.subr.bf16.mxu0 %v19342_v55 }
 0xaaa   :  { %19345 = vmatpush3.bf16.msra.mxu0 %v19342_v55 }
 0xaab   :  { %19347 = vmatprep.subr.bf16.mxu0 %v25214_v36 }
 0xaad   :  { %16827 = vmatmul.mubr.f32.vlgmr.msra.gmra.mrb[20].mxu0 %v25208_v57 }
 0xaae   :  { %19349 = vmatpush3.bf16.msra.mxu0 %v25214_v36  ;;  %16837 = vmatprep.mubr.f32.mxu0 %v25197_v44  ;;  %v13306_v44 = vsub.f32 %v13304_v24, %v13305_v6  ;;  %v19370_v36 = vpack.c.bf16 %v13322_v46, %v13315_v35 }
 0xaaf   :  { %19351 = vmatprep.subr.bf16.mxu0 %v25218_v11 }
 0xab0   :  { %v13307_v47 = vand.u32 4294901760, %v13306_v44 }
 0xab2   :  { %19353 = vmatpush3.bf16.msra.mxu0 %v25218_v11 }
 0xab3   :  { %19355 = vmatprep.subr.bf16.mxu0 %v19354_v62 }
 0xab5   :  { %16838 = vmatmul.mubr.f32.vlgmr.msra.gmra.mrb[20].mxu0 %v25208_v57  ;;  %v19374_v57 = vpack.c.bf16 %v13336_v13, %v13329_v17 }
 0xab6   :  { %19357 = vmatpush3.bf16.msra.mxu0 %v19354_v62  ;;  %16848 = vmatprep.mubr.f32.mxu0 %v13297_v20 }
 0xab7   :  { %19359 = vmatprep.subr.bf16.mxu0 %v19358_v40 }
 0xaba   :  { %19361 = vmatpush3.bf16.msra.mxu0 %v19358_v40 }
 0xabb   :  { %19363 = vmatprep.subr.bf16.mxu0 %v19362_v5 }
 0xabd   :  { %16849 = vmatmul.mubr.f32.vlgmr.msra.gmra.mrb[20].mxu0 %v13307_v47 }
 0xabe   :  { %19365 = vmatpush3.bf16.msra.mxu0 %v19362_v5  ;;  %16859 = vmatprep.mubr.f32.mxu0 %v25239_v0 }
 0xabf   :  { %19367 = vmatprep.subr.bf16.mxu0 %v19366_v32 }
 0xac2   :  { %19369 = vmatpush3.bf16.msra.mxu0 %v19366_v32 }
 0xac3   :  { %19371 = vmatprep.subr.bf16.mxu0 %v19370_v36 }
 0xac5   :  { %16860 = vmatmul.mubr.f32.vlgmr.msra.gmra.mrb[20].mxu0 %v25251_v51 }
 0xac6   :  { %19373 = vmatpush3.bf16.msra.mxu0 %v19370_v36  ;;  %16870 = vmatprep.mubr.f32.mxu0 %v13294_v22 }
 0xac7   :  { %19375 = vmatprep.subr.bf16.mxu0 %v19374_v57 }
 0xaca   :  { %19377 = vmatpush3.bf16.msra.mxu0 %v19374_v57 }
 0xacb   :  { %19379 = vmatprep.subr.bf16.mxu0 %v19354_v62 }
 0xacd   :  { %16871 = vmatmul.mubr.f32.vlgmr.msra.gmra.mrb[20].mxu0 %v13304_v24 }
 0xace   :  { %19381 = vmatpush3.bf16.msra.mxu0 %v19354_v62  ;;  %16881 = vmatprep.mubr.f32.mxu0 %v13295_v4 }
 0xacf   :  { %19383 = vmatprep.subr.bf16.mxu0 %v19358_v40 }
 0xad2   :  { %19385 = vmatpush3.bf16.msra.mxu0 %v19358_v40 }
 0xad3   :  { %19387 = vmatprep.subr.bf16.mxu0 %v19386_v37 }
 0xad5   :  { %16882 = vmatmul.mubr.f32.vlgmr.msra.gmra.mrb[20].mxu0 %v13305_v6 }
 0xad6   :  { %19389 = vmatpush3.bf16.msra.mxu0 %v19386_v37  ;;  %16892 = vmatprep.mubr.f32.mxu0 %v25239_v0 }
 0xad7   :  { %19391 = vmatprep.subr.bf16.mxu0 %v19390_v14 }
 0xada   :  { %19393 = vmatpush3.bf16.msra.mxu0 %v19390_v14 }
 0xadb   :  { %19395 = vmatprep.subr.bf16.mxu0 %v19354_v62 }
 0xadd   :  { %16893 = vmatmul.mubr.f32.vlgmr.msra.gmra.mrb[20].mxu0 %v25251_v51 }
 0xade   :  { %19397 = vmatpush3.bf16.msra.mxu0 %v19354_v62  ;;  %16903 = vmatprep.mubr.f32.mxu0 %v25239_v0 }
 0xadf   :  { %19399 = vmatprep.subr.bf16.mxu0 %v19358_v40 }
 0xae2   :  { %19401 = vmatpush3.bf16.msra.mxu0 %v19358_v40 }
 0xae5   :  { %16904 = vmatmul.mubr.f32.vlgmr.msra.gmra.mrb[20].mxu0 %v25251_v51 }
 0xbb8   :  { %v16905_v61 = vpop.f32.mrb[20].mxu0 }
 0xbb9   :  { %v13759_v52 = vadd.f32 %v16905_v61, %v13779_v18  ;;  %v13742_v42 = vpop.f32.mrb[21].mxu0 }
 0xbba   :  { %v13758_v11 = vadd.f32 %v13779_v18, %v13742_v42 }
 0xbbb   :  { %13761 = vst.msk [vmem:[#allocation5 + $0x8] sm:$0xff] %vm75_vm0, %v13759_v52 }
 0xbbc   :  { %13760 = vst.msk [vmem:[#allocation5] sm:$0xff] %vm75_vm0, %v13758_v11 }
 0xbbd   :  { %19728 = shalt.err (!%p19725_p12)
}
 0xbbe   :  { %s19729_s9 = scalar_lea.hbm %s25287_s3, 256 }
 0xbbf   :  { %p19730_p13 = scmp.ne.s32.totalorder %s25287_s3, %s19729_s9  ;;  %p19733_p0 = scmp.lt.u32.totalorder %s19729_s9, %s25287_s3 }
 0xbc1   :  { %p19735_p1 = pnand %p19733_p0, %p19730_p13 }
 0xbc3   :  { %19738 = shalt.err (!%p19735_p1)
}
 0xbc4   :  { %s19748_s14 = smov 128   ;;  %s19749_s15 = smov 8  }
 0xbc5   :  { %13773 = dma.vmem_to_hbm [thread:$0]  %s13768_s6, 256, %s25287_s3, [#allocation4], %s19748_s14, %s19748_s14, %s19749_s15  }
 0xbc6   :  { %19741 = dma.done.wait [#allocation4], 256  }
 0xbc7   :  { %19742 = vsyncadd [#allocation4], 4294967040 }
 0xbc8   :  { %13777 = vsyncpa [#allocation3], 1 }
 0xbc9   :  { %13778 = vsyncpa [#allocation4], 1 }

</bundles_post_ra>
